<compile_context>
chip_gen: v7x
topology: tpu7x:2x2x1
jax: 0.10.0
libtpu: 0.0.40
codegen_flags: <defaults>
</compile_context>

<pallas_src>
import functools

import jax
import jax.numpy as jnp
import numpy as np
from jax import lax
from jax.experimental import pallas as pl
from jax.experimental.pallas import tpu as pltpu

MXU_DTYPE = jnp.bfloat16   # MXU operand dtype (f32 accumulation). Set to jnp.float32 for exactness.


# ----------------------------------------------------------------------------
# Fused DualPathBlock kernel
# ----------------------------------------------------------------------------

def _dpn_block_kernel(x_ref, mask_ref,
                      sw_ref, hw_ref, ww_ref,
                      sa_ref, ha_ref, wa_ref,
                      sb_ref, hb_ref, wb_ref,
                      sc_ref, hc_ref, wc_ref,
                      resid_ref, dense_ref,
                      *, W, num_1x1_c, inc, mxu_dtype):
    Mt = x_ref.shape[0]                      # rows in this grid step (= images_per_block * H*W)
    c = num_1x1_c
    x = x_ref[...]                           # (Mt, Cin), loaded once for both 1x1 paths

    def bn_relu(v, s_ref, h_ref):            # folded inference BN + ReLU, f32 elementwise
        return jnp.maximum(v * s_ref[...] + h_ref[...], 0.0)

    def mm(a, w_ref):                        # MXU matmul, f32 accumulation
        return jnp.dot(a.astype(mxu_dtype), w_ref[...],
                       preferred_element_type=jnp.float32)

    # Projection path (c1x1_w_s1).  Both halves are stored immediately so xs is not live
    # across the 9-tap loop (keeps the vreg working set small at real channel widths).
    xs = mm(bn_relu(x, sw_ref, hw_ref), ww_ref)             # (Mt, c + 2*inc)
    resid_ref[...] = xs[:, :c].astype(resid_ref.dtype)
    dense_ref[:, :2 * inc] = xs[:, c:].astype(dense_ref.dtype)

    # Main path: c1x1_a.
    xa = mm(bn_relu(x, sa_ref, ha_ref), wa_ref)             # (Mt, Ca)

    # c3x3_b: BN + ReLU, then 3x3 grouped conv (stride 1, pad 1); groups are folded into a
    # block-diagonal (Ca, Cb) weight per tap.  Each tap matmul contracts channels only, so the
    # spatial row-shift commutes with the matmul: the activation is cast to the MXU dtype ONCE,
    # the per-tap shift is a 32-bit sublane roll of the f32 product, and the conv zero-padding
    # is a precomputed 0/1 mask multiply (no iota / div / mod / compares in the kernel).
    ab = bn_relu(xa, sb_ref, hb_ref).astype(mxu_dtype)      # (Mt, Ca), single hoisted cast
    Cb = wb_ref.shape[-1]
    acc = jnp.zeros((Mt, Cb), jnp.float32)
    for dy in (-1, 0, 1):
        for dx in (-1, 0, 1):
            d = dy * W + dx                                 # flat row offset of this tap
            p = jnp.dot(ab, wb_ref[dy + 1, dx + 1],
                        preferred_element_type=jnp.float32)
            if d == 0:
                acc = acc + p
            else:
                rolled = pltpu.roll(p, shift=(-d) % Mt, axis=0)
                acc = acc + mask_ref[(dy + 1) * 3 + (dx + 1)] * rolled
    # TODO(synk): for Ca < 128 a single K=9*Ca matmul over an im2col scratch would amortize
    # MXU push/drain further; for production Ca>=128 the per-tap matmuls already feed the MXU.

    # c1x1_c, then split / residual-add / dense-concat straight into the two outputs.
    y = mm(bn_relu(acc, sc_ref, hc_ref), wc_ref)            # (Mt, c + inc)
    resid_ref[...] = (resid_ref[...] + y[:, :c]).astype(resid_ref.dtype)
    dense_ref[:, 2 * inc:] = y[:, c:].astype(dense_ref.dtype)


# ----------------------------------------------------------------------------
# Wrapper helpers
# ----------------------------------------------------------------------------

def _fold_bn(p, eps=1e-3):          # eps matches nn.BatchNorm2d(..., eps=0.001)
    scale = p['gamma'] / jnp.sqrt(p['var'] + eps)
    shift = p['beta'] - p['mean'] * scale
    return scale.reshape(1, -1).astype(jnp.float32), shift.reshape(1, -1).astype(jnp.float32)


def _expand_group_block_diag(w3):
    # (3, 3, G, Cg_in, Cg_out) -> (3, 3, G*Cg_in, G*Cg_out) block-diagonal weight so each 3x3
    # tap of the grouped conv is one full-width MXU matmul.
    # TODO(synk): for production DPN group counts (G=32-40, Ca~1024+) keep per-group weights
    # (or add a taps/groups grid axis) so the expanded weight does not blow v7x's 64 MiB VMEM.
    kh, kw, G, cgi, cgo = w3.shape
    eye = jnp.eye(G, dtype=w3.dtype)
    w_bd = jnp.einsum('hwgio,gf->hwgifo', w3, eye)
    return w_bd.reshape(kh, kw, G * cgi, G * cgo)


def _build_tap_masks(H, W, images_per_block):
    # Host-side 0/1 validity of each of the 9 taps per spatial position (conv zero padding),
    # tiled over the images stacked inside one block.  Shape (9, k*H*W, 1), f32.
    yy, xx = np.meshgrid(np.arange(H), np.arange(W), indexing='ij')
    yy = yy.reshape(-1)
    xx = xx.reshape(-1)
    masks = np.empty((9, H * W), np.float32)
    t = 0
    for dy in (-1, 0, 1):
        for dx in (-1, 0, 1):
            masks[t] = (((yy + dy) >= 0) & ((yy + dy) < H) &
                        ((xx + dx) >= 0) & ((xx + dx) < W)).astype(np.float32)
            t += 1
    masks = np.tile(masks, (1, images_per_block))
    return jnp.asarray(masks[:, :, None])


def _pick_images_per_block(N, HW):
    # Bigger blocks amortize the ~0.35us/step pipeline overhead; prefer 2 grid steps so the
    # "parallel" axis can still feed both v7x TensorCores.  A block that does not span the full
    # row axis must keep its row count a multiple of 8 ((8,128) rule); stages like 14x14/7x7
    # that violate it fall back to a single full-array block (always legal).
    # TODO(synk): on v5e/v6e (single TensorCore) a single block is best when VMEM allows; on
    # v7x large 56x56 stages should instead row-band with explicit +/-W halo rows.
    if N % 2 == 0 and ((N // 2) * HW) % 8 == 0:
        return N // 2
    return N


def _const_spec(shape, single_buffer):
    index_map = lambda n, z=(0,) * len(shape): z
    if single_buffer:
        # Constant-index blocks never change, so double-buffering them only wastes VMEM.
        try:
            return pl.BlockSpec(shape, index_map, pipeline_mode=pl.Buffered(buffer_count=1))
        except Exception:
            pass
    return pl.BlockSpec(shape, index_map)


# ----------------------------------------------------------------------------
# Forward passes (NHWC fast path + NCHW torch-compatible wrapper)
# ----------------------------------------------------------------------------

def dual_path_block_forward_nhwc(x_nhwc, params, *, num_1x1_c, inc, groups,
                                 out_dtype=jnp.float32, single_buffer_consts=True):
    N, H, W, Cin = x_nhwc.shape
    HW = H * W
    x2 = x_nhwc.reshape(N * HW, Cin)

    sw, hw = _fold_bn(params['bn_w'])
    sa, ha = _fold_bn(params['bn_a'])
    sb, hb = _fold_bn(params['bn_b'])
    sc, hc = _fold_bn(params['bn_c'])

    assert params['w_b'].shape[2] == groups
    w_w = params['w_w'].astype(MXU_DTYPE)
    w_a = params['w_a'].astype(MXU_DTYPE)
    w_b = _expand_group_block_diag(params['w_b']).astype(MXU_DTYPE)
    w_c = params['w_c'].astype(MXU_DTYPE)

    Ca = w_a.shape[1]
    Cb = w_b.shape[-1]
    c_res, c_dense = num_1x1_c, 3 * inc

    k = _pick_images_per_block(N, HW)
    rows = k * HW
    grid = (N // k,)
    masks = _build_tap_masks(H, W, k)

    consts = (masks, sw, hw, w_w, sa, ha, w_a, sb, hb, w_b, sc, hc, w_c)

    def act_spec(C):
        return pl.BlockSpec((rows, C), lambda n: (n, 0))

    in_specs = [act_spec(Cin)] + [_const_spec(a.shape, single_buffer_consts) for a in consts]
    out_specs = [act_spec(c_res), act_spec(c_dense)]
    out_shape = (jax.ShapeDtypeStruct((N * HW, c_res), out_dtype),
                 jax.ShapeDtypeStruct((N * HW, c_dense), out_dtype))

    # Advisory cost + explicit scoped-VMEM budget: act/out blocks double-buffered, constants
    # ~single-buffered, plus the in-kernel f32 working set; floor 32 MiB, cap 64 MiB (v7x).
    out_isz = jnp.dtype(out_dtype).itemsize
    nbytes = lambda a: a.size * jnp.dtype(a.dtype).itemsize
    io_bytes = rows * (Cin * jnp.dtype(x2.dtype).itemsize + (c_res + c_dense) * out_isz)
    const_bytes = sum(nbytes(a) for a in consts)
    work_bytes = rows * 4 * (Cin + (num_1x1_c + 2 * inc) + 2 * Ca + 2 * Cb + (num_1x1_c + inc))
    vmem_limit = int(min(max(1.5 * (2 * io_bytes + 2 * const_bytes + work_bytes), 32 << 20),
                         64 << 20))
    flops = 2 * N * HW * (Cin * (num_1x1_c + 2 * inc) + Cin * Ca
                          + 9 * Ca * Cb + Cb * (num_1x1_c + inc))
    bytes_accessed = int(N * HW * Cin * 4 + N * HW * (c_res + c_dense) * out_isz + const_bytes)

    resid2, dense2 = pl.pallas_call(
        functools.partial(_dpn_block_kernel, W=W, num_1x1_c=num_1x1_c, inc=inc,
                          mxu_dtype=MXU_DTYPE),
        out_shape=out_shape,
        grid=grid,
        in_specs=in_specs,
        out_specs=out_specs,
        compiler_params=pltpu.CompilerParams(
            dimension_semantics=("parallel",),
            vmem_limit_bytes=vmem_limit),
        cost_estimate=pl.CostEstimate(flops=flops, transcendentals=0,
                                      bytes_accessed=bytes_accessed),
    )(x2, *consts)

    return resid2.reshape(N, H, W, c_res), dense2.reshape(N, H, W, c_dense)


def dual_path_block_forward(x_nchw, params, *, num_1x1_c, inc, groups,
                            out_dtype=jnp.float32, single_buffer_consts=True):
    # NCHW wrapper matching the torch module.  Chains of DPN blocks should call
    # dual_path_block_forward_nhwc directly (activations stay channels-last, optionally bf16)
    # so these transposes are paid only at the network boundary.
    x = jnp.transpose(x_nchw, (0, 2, 3, 1))
    resid, dense = dual_path_block_forward_nhwc(
        x, params, num_1x1_c=num_1x1_c, inc=inc, groups=groups,
        out_dtype=out_dtype, single_buffer_consts=single_buffer_consts)
    return jnp.transpose(resid, (0, 3, 1, 2)), jnp.transpose(dense, (0, 3, 1, 2))


# ----------------------------------------------------------------------------
# Pure-JAX reference (for validation)
# ----------------------------------------------------------------------------

def reference_forward(x_nchw, params, *, num_1x1_c, inc, groups):
    x = jnp.transpose(x_nchw, (0, 2, 3, 1)).astype(jnp.float32)

    def bnrelu(v, p):
        s, h = _fold_bn(p)
        return jnp.maximum(v * s.reshape(-1) + h.reshape(-1), 0.0)

    x_s = jnp.einsum('nhwc,co->nhwo', bnrelu(x, params['bn_w']), params['w_w'])
    xa = jnp.einsum('nhwc,co->nhwo', bnrelu(x, params['bn_a']), params['w_a'])
    ab = bnrelu(xa, params['bn_b'])

    w3 = params['w_b']                                   # (3,3,G,Cg_in,Cg_out)
    Cg_in, Cg_out = w3.shape[3], w3.shape[4]
    w_hwio = jnp.transpose(w3, (0, 1, 3, 2, 4)).reshape(3, 3, Cg_in, groups * Cg_out)
    xb = lax.conv_general_dilated(
        ab, w_hwio, window_strides=(1, 1), padding=((1, 1), (1, 1)),
        dimension_numbers=('NHWC', 'HWIO', 'NHWC'), feature_group_count=groups)

    y = jnp.einsum('nhwc,co->nhwo', bnrelu(xb, params['bn_c']), params['w_c'])
    out1, out2 = y[..., :num_1x1_c], y[..., num_1x1_c:]
    x_s1, x_s2 = x_s[..., :num_1x1_c], x_s[..., num_1x1_c:]
    resid = jnp.transpose(x_s1 + out1, (0, 3, 1, 2))
    dense = jnp.transpose(jnp.concatenate([x_s2, out2], axis=-1), (0, 3, 1, 2))
    return resid, dense


# ----------------------------------------------------------------------------
# Deterministic parameter init + run
# ----------------------------------------------------------------------------

def _bn_init(key, c):
    k1, k2, k3, k4 = jax.random.split(key, 4)
    return dict(
        gamma=jax.random.uniform(k1, (c,), jnp.float32, 0.5, 1.5),
        beta=0.1 * jax.random.normal(k2, (c,), jnp.float32),
        mean=0.1 * jax.random.normal(k3, (c,), jnp.float32),
        var=jax.random.uniform(k4, (c,), jnp.float32, 0.5, 1.5),
    )


if __name__ == "__main__":
    # DualPathBlock(in_chs=16, num_1x1_a=32, num_3x3_b=32, num_1x1_c=16, inc=8,
    #               groups=4, block_type='proj', b=False).  N=4 so each grid step holds
    # 2 stacked images (grid=(2,), both v7x TensorCores fed, fewer per-step overheads).
    N, H, W = 4, 8, 8
    in_chs, num_1x1_a, num_3x3_b, num_1x1_c, inc, groups = 16, 32, 32, 16, 8, 4

    key = jax.random.PRNGKey(0)
    kx, kbw, kba, kbb, kbc, kww, kwa, kwb, kwc = jax.random.split(key, 9)

    x = jax.random.normal(kx, (N, in_chs, H, W), jnp.float32)   # NCHW, like the torch module

    params = dict(
        bn_w=_bn_init(kbw, in_chs),
        bn_a=_bn_init(kba, in_chs),
        bn_b=_bn_init(kbb, num_1x1_a),
        bn_c=_bn_init(kbc, num_3x3_b),
        # 1x1 conv weights stored as (Cin, Cout); 3x3 grouped weight as (3,3,G,Cin/G,Cout/G)
        w_w=jax.random.normal(kww, (in_chs, num_1x1_c + 2 * inc), jnp.float32) / np.sqrt(in_chs),
        w_a=jax.random.normal(kwa, (in_chs, num_1x1_a), jnp.float32) / np.sqrt(in_chs),
        w_b=jax.random.normal(kwb, (3, 3, groups, num_1x1_a // groups, num_3x3_b // groups),
                              jnp.float32) / np.sqrt(9 * num_1x1_a // groups),
        w_c=jax.random.normal(kwc, (num_3x3_b, num_1x1_c + inc), jnp.float32) / np.sqrt(num_3x3_b),
    )

    run = functools.partial(dual_path_block_forward,
                            num_1x1_c=num_1x1_c, inc=inc, groups=groups)
    try:
        fwd = jax.jit(run)
        resid, dense = fwd(x, params)
        jax.block_until_ready((resid, dense))
    except Exception:
        # Fallback: some jax/libtpu versions reject pl.Buffered on pallas_call inputs;
        # rerun with default (double-buffered) constant blocks.
        fwd = jax.jit(functools.partial(run, single_buffer_consts=False))
        resid, dense = fwd(x, params)
        jax.block_until_ready((resid, dense))

    assert resid.shape == (N, num_1x1_c, H, W)
    assert dense.shape == (N, 3 * inc, H, W)

    with jax.default_matmul_precision('highest'):
        resid_ref, dense_ref = reference_forward(x, params, num_1x1_c=num_1x1_c,
                                                 inc=inc, groups=groups)
    # bf16 MXU operands (f32 accumulation) bound the error vs. the f32 reference to ~1%.
    np.testing.assert_allclose(np.asarray(resid), np.asarray(resid_ref), rtol=2e-2, atol=2e-2)
    np.testing.assert_allclose(np.asarray(dense), np.asarray(dense_ref), rtol=2e-2, atol=2e-2)

    print("KERNEL_OK")
</pallas_src>

<mosaic_0001>
module attributes {stable_mosaic.version = 11 : i64} {
  func.func @_dpn_block_kernel(%arg0: i32, %arg1: memref<128x16xf32, #tpu.memory_space<vmem>>, %arg2: memref<9x128x1xf32, #tpu.memory_space<vmem>>, %arg3: memref<1x16xf32, #tpu.memory_space<vmem>>, %arg4: memref<1x16xf32, #tpu.memory_space<vmem>>, %arg5: memref<16x32xbf16, #tpu.memory_space<vmem>>, %arg6: memref<1x16xf32, #tpu.memory_space<vmem>>, %arg7: memref<1x16xf32, #tpu.memory_space<vmem>>, %arg8: memref<16x32xbf16, #tpu.memory_space<vmem>>, %arg9: memref<1x32xf32, #tpu.memory_space<vmem>>, %arg10: memref<1x32xf32, #tpu.memory_space<vmem>>, %arg11: memref<3x3x32x32xbf16, #tpu.memory_space<vmem>>, %arg12: memref<1x32xf32, #tpu.memory_space<vmem>>, %arg13: memref<1x32xf32, #tpu.memory_space<vmem>>, %arg14: memref<32x24xbf16, #tpu.memory_space<vmem>>, %arg15: memref<128x16xf32, #tpu.memory_space<vmem>>, %arg16: memref<128x24xf32, #tpu.memory_space<vmem>>) attributes {dimension_semantics = [#tpu.dimension_semantics<parallel>], iteration_bounds = array<i64: 2>, scalar_prefetch = 0 : i64, scratch_operands = 0 : i64, tpu.core_type = #tpu.core_type<tc>, window_params = [{transform_indices = @transform_0, window_bounds = array<i64: 128, 16>}, {pipeline_mode = #tpu.pipeline_mode<synchronous>, transform_indices = @transform_1, window_bounds = array<i64: 9, 128, 1>}, {pipeline_mode = #tpu.pipeline_mode<synchronous>, transform_indices = @transform_2, window_bounds = array<i64: 1, 16>}, {pipeline_mode = #tpu.pipeline_mode<synchronous>, transform_indices = @transform_3, window_bounds = array<i64: 1, 16>}, {pipeline_mode = #tpu.pipeline_mode<synchronous>, transform_indices = @transform_4, window_bounds = array<i64: 16, 32>}, {pipeline_mode = #tpu.pipeline_mode<synchronous>, transform_indices = @transform_5, window_bounds = array<i64: 1, 16>}, {pipeline_mode = #tpu.pipeline_mode<synchronous>, transform_indices = @transform_6, window_bounds = array<i64: 1, 16>}, {pipeline_mode = #tpu.pipeline_mode<synchronous>, transform_indices = @transform_7, window_bounds = array<i64: 16, 32>}, {pipeline_mode = #tpu.pipeline_mode<synchronous>, transform_indices = @transform_8, window_bounds = array<i64: 1, 32>}, {pipeline_mode = #tpu.pipeline_mode<synchronous>, transform_indices = @transform_9, window_bounds = array<i64: 1, 32>}, {pipeline_mode = #tpu.pipeline_mode<synchronous>, transform_indices = @transform_10, window_bounds = array<i64: 3, 3, 32, 32>}, {pipeline_mode = #tpu.pipeline_mode<synchronous>, transform_indices = @transform_11, window_bounds = array<i64: 1, 32>}, {pipeline_mode = #tpu.pipeline_mode<synchronous>, transform_indices = @transform_12, window_bounds = array<i64: 1, 32>}, {pipeline_mode = #tpu.pipeline_mode<synchronous>, transform_indices = @transform_13, window_bounds = array<i64: 32, 24>}, {transform_indices = @transform_14, window_bounds = array<i64: 128, 16>}, {transform_indices = @transform_15, window_bounds = array<i64: 128, 24>}]} {
    %c0 = arith.constant 0 : index
    %c0_0 = arith.constant 0 : index
    %0 = vector.load %arg1[%c0, %c0_0] : memref<128x16xf32, #tpu.memory_space<vmem>>, vector<128x16xf32>
    %c0_1 = arith.constant 0 : index
    %c0_2 = arith.constant 0 : index
    %1 = vector.load %arg3[%c0_1, %c0_2] : memref<1x16xf32, #tpu.memory_space<vmem>>, vector<1x16xf32>
    %2 = vector.broadcast %1 : vector<1x16xf32> to vector<128x16xf32>
    %3 = arith.mulf %0, %2 : vector<128x16xf32>
    %c0_3 = arith.constant 0 : index
    %c0_4 = arith.constant 0 : index
    %4 = vector.load %arg4[%c0_3, %c0_4] : memref<1x16xf32, #tpu.memory_space<vmem>>, vector<1x16xf32>
    %5 = vector.broadcast %4 : vector<1x16xf32> to vector<128x16xf32>
    %6 = arith.addf %3, %5 : vector<128x16xf32>
    %cst = arith.constant 0.000000e+00 : f32
    %7 = vector.broadcast %cst : f32 to vector<128x16xf32>
    %8 = arith.maximumf %6, %7 : vector<128x16xf32>
    %9 = arith.truncf %8 : vector<128x16xf32> to vector<128x16xbf16>
    %c0_5 = arith.constant 0 : index
    %c0_6 = arith.constant 0 : index
    %10 = vector.load %arg5[%c0_5, %c0_6] : memref<16x32xbf16, #tpu.memory_space<vmem>>, vector<16x32xbf16>
    %cst_7 = arith.constant dense<0.000000e+00> : vector<128x32xf32>
    %11 = tpu.matmul %9, %10, %cst_7 {dimension_numbers = #tpu.dot_dimension_numbers<[1], [0], [0], [1], [0, 0, 1, 1], [], []>} : vector<128x16xbf16>, vector<16x32xbf16>, vector<128x32xf32> -> vector<128x32xf32>
    %12 = vector.extract_strided_slice %11 {offsets = [0, 0], sizes = [128, 16], strides = [1, 1]} : vector<128x32xf32> to vector<128x16xf32>
    %c0_8 = arith.constant 0 : index
    %c0_9 = arith.constant 0 : index
    %13 = vector.load %arg15[%c0_8, %c0_9] : memref<128x16xf32, #tpu.memory_space<vmem>>, vector<128x16xf32>
    tpu.vector_store %arg15[%c0_8, %c0_9], %12 {strides = array<i32>} : memref<128x16xf32, #tpu.memory_space<vmem>>, vector<128x16xf32>,
    %14 = vector.extract_strided_slice %11 {offsets = [0, 16], sizes = [128, 16], strides = [1, 1]} : vector<128x32xf32> to vector<128x16xf32>
    %c0_10 = arith.constant 0 : index
    %c0_11 = arith.constant 0 : index
    %15 = vector.load %arg16[%c0_10, %c0_11] : memref<128x24xf32, #tpu.memory_space<vmem>>, vector<128x16xf32>
    tpu.vector_store %arg16[%c0_10, %c0_11], %14 {strides = array<i32>} : memref<128x24xf32, #tpu.memory_space<vmem>>, vector<128x16xf32>,
    %c0_12 = arith.constant 0 : index
    %c0_13 = arith.constant 0 : index
    %16 = vector.load %arg6[%c0_12, %c0_13] : memref<1x16xf32, #tpu.memory_space<vmem>>, vector<1x16xf32>
    %17 = vector.broadcast %16 : vector<1x16xf32> to vector<128x16xf32>
    %18 = arith.mulf %0, %17 : vector<128x16xf32>
    %c0_14 = arith.constant 0 : index
    %c0_15 = arith.constant 0 : index
    %19 = vector.load %arg7[%c0_14, %c0_15] : memref<1x16xf32, #tpu.memory_space<vmem>>, vector<1x16xf32>
    %20 = vector.broadcast %19 : vector<1x16xf32> to vector<128x16xf32>
    %21 = arith.addf %18, %20 : vector<128x16xf32>
    %cst_16 = arith.constant 0.000000e+00 : f32
    %22 = vector.broadcast %cst_16 : f32 to vector<128x16xf32>
    %23 = arith.maximumf %21, %22 : vector<128x16xf32>
    %24 = arith.truncf %23 : vector<128x16xf32> to vector<128x16xbf16>
    %c0_17 = arith.constant 0 : index
    %c0_18 = arith.constant 0 : index
    %25 = vector.load %arg8[%c0_17, %c0_18] : memref<16x32xbf16, #tpu.memory_space<vmem>>, vector<16x32xbf16>
    %cst_19 = arith.constant dense<0.000000e+00> : vector<128x32xf32>
    %26 = tpu.matmul %24, %25, %cst_19 {dimension_numbers = #tpu.dot_dimension_numbers<[1], [0], [0], [1], [0, 0, 1, 1], [], []>} : vector<128x16xbf16>, vector<16x32xbf16>, vector<128x32xf32> -> vector<128x32xf32>
    %c0_20 = arith.constant 0 : index
    %c0_21 = arith.constant 0 : index
    %27 = vector.load %arg9[%c0_20, %c0_21] : memref<1x32xf32, #tpu.memory_space<vmem>>, vector<1x32xf32>
    %28 = vector.broadcast %27 : vector<1x32xf32> to vector<128x32xf32>
    %29 = arith.mulf %26, %28 : vector<128x32xf32>
    %c0_22 = arith.constant 0 : index
    %c0_23 = arith.constant 0 : index
    %30 = vector.load %arg10[%c0_22, %c0_23] : memref<1x32xf32, #tpu.memory_space<vmem>>, vector<1x32xf32>
    %31 = vector.broadcast %30 : vector<1x32xf32> to vector<128x32xf32>
    %32 = arith.addf %29, %31 : vector<128x32xf32>
    %cst_24 = arith.constant 0.000000e+00 : f32
    %33 = vector.broadcast %cst_24 : f32 to vector<128x32xf32>
    %34 = arith.maximumf %32, %33 : vector<128x32xf32>
    %35 = arith.truncf %34 : vector<128x32xf32> to vector<128x32xbf16>
    %cst_25 = arith.constant 0.000000e+00 : f32
    %36 = vector.broadcast %cst_25 : f32 to vector<128x32xf32>
    %c0_26 = arith.constant 0 : index
    %c0_27 = arith.constant 0 : index
    %c0_28 = arith.constant 0 : index
    %c0_29 = arith.constant 0 : index
    %37 = vector.load %arg11[%c0_26, %c0_27, %c0_28, %c0_29] : memref<3x3x32x32xbf16, #tpu.memory_space<vmem>>, vector<1x1x32x32xbf16>
    %38 = vector.shape_cast %37 : vector<1x1x32x32xbf16> to vector<32x32xbf16>
    %cst_30 = arith.constant dense<0.000000e+00> : vector<128x32xf32>
    %39 = tpu.matmul %35, %38, %cst_30 {dimension_numbers = #tpu.dot_dimension_numbers<[1], [0], [0], [1], [0, 0, 1, 1], [], []>} : vector<128x32xbf16>, vector<32x32xbf16>, vector<128x32xf32> -> vector<128x32xf32>
    %c9_i32 = arith.constant 9 : i32
    %40 = tpu.dynamic_rotate %39 by %c9_i32 dim 0 : vector<128x32xf32>, i32 -> vector<128x32xf32>
    %c0_31 = arith.constant 0 : index
    %c0_32 = arith.constant 0 : index
    %c0_33 = arith.constant 0 : index
    %41 = vector.load %arg2[%c0_31, %c0_32, %c0_33] : memref<9x128x1xf32, #tpu.memory_space<vmem>>, vector<1x128x1xf32>
    %42 = vector.shape_cast %41 : vector<1x128x1xf32> to vector<128x1xf32>
    %43 = vector.broadcast %42 : vector<128x1xf32> to vector<128x32xf32>
    %44 = arith.mulf %43, %40 : vector<128x32xf32>
    %45 = arith.addf %36, %44 : vector<128x32xf32>
    %c0_34 = arith.constant 0 : index
    %c1 = arith.constant 1 : index
    %c0_35 = arith.constant 0 : index
    %c0_36 = arith.constant 0 : index
    %46 = vector.load %arg11[%c0_34, %c1, %c0_35, %c0_36] : memref<3x3x32x32xbf16, #tpu.memory_space<vmem>>, vector<1x1x32x32xbf16>
    %47 = vector.shape_cast %46 : vector<1x1x32x32xbf16> to vector<32x32xbf16>
    %cst_37 = arith.constant dense<0.000000e+00> : vector<128x32xf32>
    %48 = tpu.matmul %35, %47, %cst_37 {dimension_numbers = #tpu.dot_dimension_numbers<[1], [0], [0], [1], [0, 0, 1, 1], [], []>} : vector<128x32xbf16>, vector<32x32xbf16>, vector<128x32xf32> -> vector<128x32xf32>
    %c8_i32 = arith.constant 8 : i32
    %49 = tpu.dynamic_rotate %48 by %c8_i32 dim 0 : vector<128x32xf32>, i32 -> vector<128x32xf32>
    %c1_38 = arith.constant 1 : index
    %c0_39 = arith.constant 0 : index
    %c0_40 = arith.constant 0 : index
    %50 = vector.load %arg2[%c1_38, %c0_39, %c0_40] : memref<9x128x1xf32, #tpu.memory_space<vmem>>, vector<1x128x1xf32>
    %51 = vector.shape_cast %50 : vector<1x128x1xf32> to vector<128x1xf32>
    %52 = vector.broadcast %51 : vector<128x1xf32> to vector<128x32xf32>
    %53 = arith.mulf %52, %49 : vector<128x32xf32>
    %54 = arith.addf %45, %53 : vector<128x32xf32>
    %c0_41 = arith.constant 0 : index
    %c2 = arith.constant 2 : index
    %c0_42 = arith.constant 0 : index
    %c0_43 = arith.constant 0 : index
    %55 = vector.load %arg11[%c0_41, %c2, %c0_42, %c0_43] : memref<3x3x32x32xbf16, #tpu.memory_space<vmem>>, vector<1x1x32x32xbf16>
    %56 = vector.shape_cast %55 : vector<1x1x32x32xbf16> to vector<32x32xbf16>
    %cst_44 = arith.constant dense<0.000000e+00> : vector<128x32xf32>
    %57 = tpu.matmul %35, %56, %cst_44 {dimension_numbers = #tpu.dot_dimension_numbers<[1], [0], [0], [1], [0, 0, 1, 1], [], []>} : vector<128x32xbf16>, vector<32x32xbf16>, vector<128x32xf32> -> vector<128x32xf32>
    %c7_i32 = arith.constant 7 : i32
    %58 = tpu.dynamic_rotate %57 by %c7_i32 dim 0 : vector<128x32xf32>, i32 -> vector<128x32xf32>
    %c2_45 = arith.constant 2 : index
    %c0_46 = arith.constant 0 : index
    %c0_47 = arith.constant 0 : index
    %59 = vector.load %arg2[%c2_45, %c0_46, %c0_47] : memref<9x128x1xf32, #tpu.memory_space<vmem>>, vector<1x128x1xf32>
    %60 = vector.shape_cast %59 : vector<1x128x1xf32> to vector<128x1xf32>
    %61 = vector.broadcast %60 : vector<128x1xf32> to vector<128x32xf32>
    %62 = arith.mulf %61, %58 : vector<128x32xf32>
    %63 = arith.addf %54, %62 : vector<128x32xf32>
    %c1_48 = arith.constant 1 : index
    %c0_49 = arith.constant 0 : index
    %c0_50 = arith.constant 0 : index
    %c0_51 = arith.constant 0 : index
    %64 = vector.load %arg11[%c1_48, %c0_49, %c0_50, %c0_51] : memref<3x3x32x32xbf16, #tpu.memory_space<vmem>>, vector<1x1x32x32xbf16>
    %65 = vector.shape_cast %64 : vector<1x1x32x32xbf16> to vector<32x32xbf16>
    %cst_52 = arith.constant dense<0.000000e+00> : vector<128x32xf32>
    %66 = tpu.matmul %35, %65, %cst_52 {dimension_numbers = #tpu.dot_dimension_numbers<[1], [0], [0], [1], [0, 0, 1, 1], [], []>} : vector<128x32xbf16>, vector<32x32xbf16>, vector<128x32xf32> -> vector<128x32xf32>
    %c1_i32 = arith.constant 1 : i32
    %67 = tpu.dynamic_rotate %66 by %c1_i32 dim 0 : vector<128x32xf32>, i32 -> vector<128x32xf32>
    %c3 = arith.constant 3 : index
    %c0_53 = arith.constant 0 : index
    %c0_54 = arith.constant 0 : index
    %68 = vector.load %arg2[%c3, %c0_53, %c0_54] : memref<9x128x1xf32, #tpu.memory_space<vmem>>, vector<1x128x1xf32>
    %69 = vector.shape_cast %68 : vector<1x128x1xf32> to vector<128x1xf32>
    %70 = vector.broadcast %69 : vector<128x1xf32> to vector<128x32xf32>
    %71 = arith.mulf %70, %67 : vector<128x32xf32>
    %72 = arith.addf %63, %71 : vector<128x32xf32>
    %c1_55 = arith.constant 1 : index
    %c1_56 = arith.constant 1 : index
    %c0_57 = arith.constant 0 : index
    %c0_58 = arith.constant 0 : index
    %73 = vector.load %arg11[%c1_55, %c1_56, %c0_57, %c0_58] : memref<3x3x32x32xbf16, #tpu.memory_space<vmem>>, vector<1x1x32x32xbf16>
    %74 = vector.shape_cast %73 : vector<1x1x32x32xbf16> to vector<32x32xbf16>
    %cst_59 = arith.constant dense<0.000000e+00> : vector<128x32xf32>
    %75 = tpu.matmul %35, %74, %cst_59 {dimension_numbers = #tpu.dot_dimension_numbers<[1], [0], [0], [1], [0, 0, 1, 1], [], []>} : vector<128x32xbf16>, vector<32x32xbf16>, vector<128x32xf32> -> vector<128x32xf32>
    %76 = arith.addf %72, %75 : vector<128x32xf32>
    %c1_60 = arith.constant 1 : index
    %c2_61 = arith.constant 2 : index
    %c0_62 = arith.constant 0 : index
    %c0_63 = arith.constant 0 : index
    %77 = vector.load %arg11[%c1_60, %c2_61, %c0_62, %c0_63] : memref<3x3x32x32xbf16, #tpu.memory_space<vmem>>, vector<1x1x32x32xbf16>
    %78 = vector.shape_cast %77 : vector<1x1x32x32xbf16> to vector<32x32xbf16>
    %cst_64 = arith.constant dense<0.000000e+00> : vector<128x32xf32>
    %79 = tpu.matmul %35, %78, %cst_64 {dimension_numbers = #tpu.dot_dimension_numbers<[1], [0], [0], [1], [0, 0, 1, 1], [], []>} : vector<128x32xbf16>, vector<32x32xbf16>, vector<128x32xf32> -> vector<128x32xf32>
    %c127_i32 = arith.constant 127 : i32
    %80 = tpu.dynamic_rotate %79 by %c127_i32 dim 0 : vector<128x32xf32>, i32 -> vector<128x32xf32>
    %c5 = arith.constant 5 : index
    %c0_65 = arith.constant 0 : index
    %c0_66 = arith.constant 0 : index
    %81 = vector.load %arg2[%c5, %c0_65, %c0_66] : memref<9x128x1xf32, #tpu.memory_space<vmem>>, vector<1x128x1xf32>
    %82 = vector.shape_cast %81 : vector<1x128x1xf32> to vector<128x1xf32>
    %83 = vector.broadcast %82 : vector<128x1xf32> to vector<128x32xf32>
    %84 = arith.mulf %83, %80 : vector<128x32xf32>
    %85 = arith.addf %76, %84 : vector<128x32xf32>
    %c2_67 = arith.constant 2 : index
    %c0_68 = arith.constant 0 : index
    %c0_69 = arith.constant 0 : index
    %c0_70 = arith.constant 0 : index
    %86 = vector.load %arg11[%c2_67, %c0_68, %c0_69, %c0_70] : memref<3x3x32x32xbf16, #tpu.memory_space<vmem>>, vector<1x1x32x32xbf16>
    %87 = vector.shape_cast %86 : vector<1x1x32x32xbf16> to vector<32x32xbf16>
    %cst_71 = arith.constant dense<0.000000e+00> : vector<128x32xf32>
    %88 = tpu.matmul %35, %87, %cst_71 {dimension_numbers = #tpu.dot_dimension_numbers<[1], [0], [0], [1], [0, 0, 1, 1], [], []>} : vector<128x32xbf16>, vector<32x32xbf16>, vector<128x32xf32> -> vector<128x32xf32>
    %c121_i32 = arith.constant 121 : i32
    %89 = tpu.dynamic_rotate %88 by %c121_i32 dim 0 : vector<128x32xf32>, i32 -> vector<128x32xf32>
    %c6 = arith.constant 6 : index
    %c0_72 = arith.constant 0 : index
    %c0_73 = arith.constant 0 : index
    %90 = vector.load %arg2[%c6, %c0_72, %c0_73] : memref<9x128x1xf32, #tpu.memory_space<vmem>>, vector<1x128x1xf32>
    %91 = vector.shape_cast %90 : vector<1x128x1xf32> to vector<128x1xf32>
    %92 = vector.broadcast %91 : vector<128x1xf32> to vector<128x32xf32>
    %93 = arith.mulf %92, %89 : vector<128x32xf32>
    %94 = arith.addf %85, %93 : vector<128x32xf32>
    %c2_74 = arith.constant 2 : index
    %c1_75 = arith.constant 1 : index
    %c0_76 = arith.constant 0 : index
    %c0_77 = arith.constant 0 : index
    %95 = vector.load %arg11[%c2_74, %c1_75, %c0_76, %c0_77] : memref<3x3x32x32xbf16, #tpu.memory_space<vmem>>, vector<1x1x32x32xbf16>
    %96 = vector.shape_cast %95 : vector<1x1x32x32xbf16> to vector<32x32xbf16>
    %cst_78 = arith.constant dense<0.000000e+00> : vector<128x32xf32>
    %97 = tpu.matmul %35, %96, %cst_78 {dimension_numbers = #tpu.dot_dimension_numbers<[1], [0], [0], [1], [0, 0, 1, 1], [], []>} : vector<128x32xbf16>, vector<32x32xbf16>, vector<128x32xf32> -> vector<128x32xf32>
    %c120_i32 = arith.constant 120 : i32
    %98 = tpu.dynamic_rotate %97 by %c120_i32 dim 0 : vector<128x32xf32>, i32 -> vector<128x32xf32>
    %c7 = arith.constant 7 : index
    %c0_79 = arith.constant 0 : index
    %c0_80 = arith.constant 0 : index
    %99 = vector.load %arg2[%c7, %c0_79, %c0_80] : memref<9x128x1xf32, #tpu.memory_space<vmem>>, vector<1x128x1xf32>
    %100 = vector.shape_cast %99 : vector<1x128x1xf32> to vector<128x1xf32>
    %101 = vector.broadcast %100 : vector<128x1xf32> to vector<128x32xf32>
    %102 = arith.mulf %101, %98 : vector<128x32xf32>
    %103 = arith.addf %94, %102 : vector<128x32xf32>
    %c2_81 = arith.constant 2 : index
    %c2_82 = arith.constant 2 : index
    %c0_83 = arith.constant 0 : index
    %c0_84 = arith.constant 0 : index
    %104 = vector.load %arg11[%c2_81, %c2_82, %c0_83, %c0_84] : memref<3x3x32x32xbf16, #tpu.memory_space<vmem>>, vector<1x1x32x32xbf16>
    %105 = vector.shape_cast %104 : vector<1x1x32x32xbf16> to vector<32x32xbf16>
    %cst_85 = arith.constant dense<0.000000e+00> : vector<128x32xf32>
    %106 = tpu.matmul %35, %105, %cst_85 {dimension_numbers = #tpu.dot_dimension_numbers<[1], [0], [0], [1], [0, 0, 1, 1], [], []>} : vector<128x32xbf16>, vector<32x32xbf16>, vector<128x32xf32> -> vector<128x32xf32>
    %c119_i32 = arith.constant 119 : i32
    %107 = tpu.dynamic_rotate %106 by %c119_i32 dim 0 : vector<128x32xf32>, i32 -> vector<128x32xf32>
    %c8 = arith.constant 8 : index
    %c0_86 = arith.constant 0 : index
    %c0_87 = arith.constant 0 : index
    %108 = vector.load %arg2[%c8, %c0_86, %c0_87] : memref<9x128x1xf32, #tpu.memory_space<vmem>>, vector<1x128x1xf32>
    %109 = vector.shape_cast %108 : vector<1x128x1xf32> to vector<128x1xf32>
    %110 = vector.broadcast %109 : vector<128x1xf32> to vector<128x32xf32>
    %111 = arith.mulf %110, %107 : vector<128x32xf32>
    %112 = arith.addf %103, %111 : vector<128x32xf32>
    %c0_88 = arith.constant 0 : index
    %c0_89 = arith.constant 0 : index
    %113 = vector.load %arg12[%c0_88, %c0_89] : memref<1x32xf32, #tpu.memory_space<vmem>>, vector<1x32xf32>
    %114 = vector.broadcast %113 : vector<1x32xf32> to vector<128x32xf32>
    %115 = arith.mulf %112, %114 : vector<128x32xf32>
    %c0_90 = arith.constant 0 : index
    %c0_91 = arith.constant 0 : index
    %116 = vector.load %arg13[%c0_90, %c0_91] : memref<1x32xf32, #tpu.memory_space<vmem>>, vector<1x32xf32>
    %117 = vector.broadcast %116 : vector<1x32xf32> to vector<128x32xf32>
    %118 = arith.addf %115, %117 : vector<128x32xf32>
    %cst_92 = arith.constant 0.000000e+00 : f32
    %119 = vector.broadcast %cst_92 : f32 to vector<128x32xf32>
    %120 = arith.maximumf %118, %119 : vector<128x32xf32>
    %121 = arith.truncf %120 : vector<128x32xf32> to vector<128x32xbf16>
    %c0_93 = arith.constant 0 : index
    %c0_94 = arith.constant 0 : index
    %122 = vector.load %arg14[%c0_93, %c0_94] : memref<32x24xbf16, #tpu.memory_space<vmem>>, vector<32x24xbf16>
    %cst_95 = arith.constant dense<0.000000e+00> : vector<128x24xf32>
    %123 = tpu.matmul %121, %122, %cst_95 {dimension_numbers = #tpu.dot_dimension_numbers<[1], [0], [0], [1], [0, 0, 1, 1], [], []>} : vector<128x32xbf16>, vector<32x24xbf16>, vector<128x24xf32> -> vector<128x24xf32>
    %c0_96 = arith.constant 0 : index
    %c0_97 = arith.constant 0 : index
    %124 = vector.load %arg15[%c0_96, %c0_97] : memref<128x16xf32, #tpu.memory_space<vmem>>, vector<128x16xf32>
    %125 = vector.extract_strided_slice %123 {offsets = [0, 0], sizes = [128, 16], strides = [1, 1]} : vector<128x24xf32> to vector<128x16xf32>
    %126 = arith.addf %124, %125 : vector<128x16xf32>
    %c0_98 = arith.constant 0 : index
    %c0_99 = arith.constant 0 : index
    %127 = vector.load %arg15[%c0_98, %c0_99] : memref<128x16xf32, #tpu.memory_space<vmem>>, vector<128x16xf32>
    tpu.vector_store %arg15[%c0_98, %c0_99], %126 {strides = array<i32>} : memref<128x16xf32, #tpu.memory_space<vmem>>, vector<128x16xf32>,
    %128 = vector.extract_strided_slice %123 {offsets = [0, 16], sizes = [128, 8], strides = [1, 1]} : vector<128x24xf32> to vector<128x8xf32>
    %c0_100 = arith.constant 0 : index
    %c16 = arith.constant 16 : index
    %129 = vector.load %arg16[%c0_100, %c16] : memref<128x24xf32, #tpu.memory_space<vmem>>, vector<128x8xf32>
    tpu.vector_store %arg16[%c0_100, %c16], %128 {strides = array<i32>} : memref<128x24xf32, #tpu.memory_space<vmem>>, vector<128x8xf32>,
    return
  }
  func.func @transform_0(%arg0: i32) -> (i32, i32) {
    %c0_i32 = arith.constant 0 : i32
    %c0_i32_0 = arith.constant 0 : i32
    return %arg0, %c0_i32 : i32, i32
  }
  func.func @transform_1(%arg0: i32) -> (i32, i32, i32) {
    %c0_i32 = arith.constant 0 : i32
    %c0_i32_0 = arith.constant 0 : i32
    %c0_i32_1 = arith.constant 0 : i32
    %c0_i32_2 = arith.constant 0 : i32
    return %c0_i32, %c0_i32_0, %c0_i32_1 : i32, i32, i32
  }
  func.func @transform_2(%arg0: i32) -> (i32, i32) {
    %c0_i32 = arith.constant 0 : i32
    %c0_i32_0 = arith.constant 0 : i32
    %c0_i32_1 = arith.constant 0 : i32
    return %c0_i32, %c0_i32_0 : i32, i32
  }
  func.func @transform_3(%arg0: i32) -> (i32, i32) {
    %c0_i32 = arith.constant 0 : i32
    %c0_i32_0 = arith.constant 0 : i32
    %c0_i32_1 = arith.constant 0 : i32
    return %c0_i32, %c0_i32_0 : i32, i32
  }
  func.func @transform_4(%arg0: i32) -> (i32, i32) {
    %c0_i32 = arith.constant 0 : i32
    %c0_i32_0 = arith.constant 0 : i32
    %c0_i32_1 = arith.constant 0 : i32
    return %c0_i32, %c0_i32_0 : i32, i32
  }
  func.func @transform_5(%arg0: i32) -> (i32, i32) {
    %c0_i32 = arith.constant 0 : i32
    %c0_i32_0 = arith.constant 0 : i32
    %c0_i32_1 = arith.constant 0 : i32
    return %c0_i32, %c0_i32_0 : i32, i32
  }
  func.func @transform_6(%arg0: i32) -> (i32, i32) {
    %c0_i32 = arith.constant 0 : i32
    %c0_i32_0 = arith.constant 0 : i32
    %c0_i32_1 = arith.constant 0 : i32
    return %c0_i32, %c0_i32_0 : i32, i32
  }
  func.func @transform_7(%arg0: i32) -> (i32, i32) {
    %c0_i32 = arith.constant 0 : i32
    %c0_i32_0 = arith.constant 0 : i32
    %c0_i32_1 = arith.constant 0 : i32
    return %c0_i32, %c0_i32_0 : i32, i32
  }
  func.func @transform_8(%arg0: i32) -> (i32, i32) {
    %c0_i32 = arith.constant 0 : i32
    %c0_i32_0 = arith.constant 0 : i32
    %c0_i32_1 = arith.constant 0 : i32
    return %c0_i32, %c0_i32_0 : i32, i32
  }
  func.func @transform_9(%arg0: i32) -> (i32, i32) {
    %c0_i32 = arith.constant 0 : i32
    %c0_i32_0 = arith.constant 0 : i32
    %c0_i32_1 = arith.constant 0 : i32
    return %c0_i32, %c0_i32_0 : i32, i32
  }
  func.func @transform_10(%arg0: i32) -> (i32, i32, i32, i32) {
    %c0_i32 = arith.constant 0 : i32
    %c0_i32_0 = arith.constant 0 : i32
    %c0_i32_1 = arith.constant 0 : i32
    %c0_i32_2 = arith.constant 0 : i32
    %c0_i32_3 = arith.constant 0 : i32
    return %c0_i32, %c0_i32_0, %c0_i32_1, %c0_i32_2 : i32, i32, i32, i32
  }
  func.func @transform_11(%arg0: i32) -> (i32, i32) {
    %c0_i32 = arith.constant 0 : i32
    %c0_i32_0 = arith.constant 0 : i32
    %c0_i32_1 = arith.constant 0 : i32
    return %c0_i32, %c0_i32_0 : i32, i32
  }
  func.func @transform_12(%arg0: i32) -> (i32, i32) {
    %c0_i32 = arith.constant 0 : i32
    %c0_i32_0 = arith.constant 0 : i32
    %c0_i32_1 = arith.constant 0 : i32
    return %c0_i32, %c0_i32_0 : i32, i32
  }
  func.func @transform_13(%arg0: i32) -> (i32, i32) {
    %c0_i32 = arith.constant 0 : i32
    %c0_i32_0 = arith.constant 0 : i32
    %c0_i32_1 = arith.constant 0 : i32
    return %c0_i32, %c0_i32_0 : i32, i32
  }
  func.func @transform_14(%arg0: i32) -> (i32, i32) {
    %c0_i32 = arith.constant 0 : i32
    %c0_i32_0 = arith.constant 0 : i32
    return %arg0, %c0_i32 : i32, i32
  }
  func.func @transform_15(%arg0: i32) -> (i32, i32) {
    %c0_i32 = arith.constant 0 : i32
    %c0_i32_0 = arith.constant 0 : i32
    return %arg0, %c0_i32 : i32, i32
  }
}

module attributes {stable_mosaic.version = 11 : i64} {
  func.func @_dpn_block_kernel(%arg0: i32, %arg1: memref<128x16xf32, #tpu.memory_space<vmem>>, %arg2: memref<9x128x1xf32, #tpu.memory_space<vmem>>, %arg3: memref<1x16xf32, #tpu.memory_space<vmem>>, %arg4: memref<1x16xf32, #tpu.memory_space<vmem>>, %arg5: memref<16x32xbf16, #tpu.memory_space<vmem>>, %arg6: memref<1x16xf32, #tpu.memory_space<vmem>>, %arg7: memref<1x16xf32, #tpu.memory_space<vmem>>, %arg8: memref<16x32xbf16, #tpu.memory_space<vmem>>, %arg9: memref<1x32xf32, #tpu.memory_space<vmem>>, %arg10: memref<1x32xf32, #tpu.memory_space<vmem>>, %arg11: memref<3x3x32x32xbf16, #tpu.memory_space<vmem>>, %arg12: memref<1x32xf32, #tpu.memory_space<vmem>>, %arg13: memref<1x32xf32, #tpu.memory_space<vmem>>, %arg14: memref<32x24xbf16, #tpu.memory_space<vmem>>, %arg15: memref<128x16xf32, #tpu.memory_space<vmem>>, %arg16: memref<128x24xf32, #tpu.memory_space<vmem>>) attributes {dimension_semantics = [#tpu.dimension_semantics<parallel>], iteration_bounds = array<i64: 2>, scalar_prefetch = 0 : i64, scratch_operands = 0 : i64, tpu.core_type = #tpu.core_type<tc>, window_params = [{transform_indices = @transform_0, window_bounds = array<i64: 128, 16>}, {pipeline_mode = #tpu.pipeline_mode<synchronous>, transform_indices = @transform_1, window_bounds = array<i64: 9, 128, 1>}, {pipeline_mode = #tpu.pipeline_mode<synchronous>, transform_indices = @transform_2, window_bounds = array<i64: 1, 16>}, {pipeline_mode = #tpu.pipeline_mode<synchronous>, transform_indices = @transform_3, window_bounds = array<i64: 1, 16>}, {pipeline_mode = #tpu.pipeline_mode<synchronous>, transform_indices = @transform_4, window_bounds = array<i64: 16, 32>}, {pipeline_mode = #tpu.pipeline_mode<synchronous>, transform_indices = @transform_5, window_bounds = array<i64: 1, 16>}, {pipeline_mode = #tpu.pipeline_mode<synchronous>, transform_indices = @transform_6, window_bounds = array<i64: 1, 16>}, {pipeline_mode = #tpu.pipeline_mode<synchronous>, transform_indices = @transform_7, window_bounds = array<i64: 16, 32>}, {pipeline_mode = #tpu.pipeline_mode<synchronous>, transform_indices = @transform_8, window_bounds = array<i64: 1, 32>}, {pipeline_mode = #tpu.pipeline_mode<synchronous>, transform_indices = @transform_9, window_bounds = array<i64: 1, 32>}, {pipeline_mode = #tpu.pipeline_mode<synchronous>, transform_indices = @transform_10, window_bounds = array<i64: 3, 3, 32, 32>}, {pipeline_mode = #tpu.pipeline_mode<synchronous>, transform_indices = @transform_11, window_bounds = array<i64: 1, 32>}, {pipeline_mode = #tpu.pipeline_mode<synchronous>, transform_indices = @transform_12, window_bounds = array<i64: 1, 32>}, {pipeline_mode = #tpu.pipeline_mode<synchronous>, transform_indices = @transform_13, window_bounds = array<i64: 32, 24>}, {transform_indices = @transform_14, window_bounds = array<i64: 128, 16>}, {transform_indices = @transform_15, window_bounds = array<i64: 128, 24>}]} {
    %c0 = arith.constant 0 : index
    %c0_0 = arith.constant 0 : index
    %0 = vector.load %arg1[%c0, %c0_0] : memref<128x16xf32, #tpu.memory_space<vmem>>, vector<128x16xf32>
    %c0_1 = arith.constant 0 : index
    %c0_2 = arith.constant 0 : index
    %1 = vector.load %arg3[%c0_1, %c0_2] : memref<1x16xf32, #tpu.memory_space<vmem>>, vector<1x16xf32>
    %2 = vector.broadcast %1 : vector<1x16xf32> to vector<128x16xf32>
    %3 = arith.mulf %0, %2 : vector<128x16xf32>
    %c0_3 = arith.constant 0 : index
    %c0_4 = arith.constant 0 : index
    %4 = vector.load %arg4[%c0_3, %c0_4] : memref<1x16xf32, #tpu.memory_space<vmem>>, vector<1x16xf32>
    %5 = vector.broadcast %4 : vector<1x16xf32> to vector<128x16xf32>
    %6 = arith.addf %3, %5 : vector<128x16xf32>
    %cst = arith.constant 0.000000e+00 : f32
    %7 = vector.broadcast %cst : f32 to vector<128x16xf32>
    %8 = arith.maximumf %6, %7 : vector<128x16xf32>
    %9 = arith.truncf %8 : vector<128x16xf32> to vector<128x16xbf16>
    %c0_5 = arith.constant 0 : index
    %c0_6 = arith.constant 0 : index
    %10 = vector.load %arg5[%c0_5, %c0_6] : memref<16x32xbf16, #tpu.memory_space<vmem>>, vector<16x32xbf16>
    %cst_7 = arith.constant dense<0.000000e+00> : vector<128x32xf32>
    %11 = tpu.matmul %9, %10, %cst_7 {dimension_numbers = #tpu.dot_dimension_numbers<[1], [0], [0], [1], [0, 0, 1, 1], [], []>} : vector<128x16xbf16>, vector<16x32xbf16>, vector<128x32xf32> -> vector<128x32xf32>
    %12 = vector.extract_strided_slice %11 {offsets = [0, 0], sizes = [128, 16], strides = [1, 1]} : vector<128x32xf32> to vector<128x16xf32>
    %c0_8 = arith.constant 0 : index
    %c0_9 = arith.constant 0 : index
    %13 = vector.load %arg15[%c0_8, %c0_9] : memref<128x16xf32, #tpu.memory_space<vmem>>, vector<128x16xf32>
    tpu.vector_store %arg15[%c0_8, %c0_9], %12 {strides = array<i32>} : memref<128x16xf32, #tpu.memory_space<vmem>>, vector<128x16xf32>,
    %14 = vector.extract_strided_slice %11 {offsets = [0, 16], sizes = [128, 16], strides = [1, 1]} : vector<128x32xf32> to vector<128x16xf32>
    %c0_10 = arith.constant 0 : index
    %c0_11 = arith.constant 0 : index
    %15 = vector.load %arg16[%c0_10, %c0_11] : memref<128x24xf32, #tpu.memory_space<vmem>>, vector<128x16xf32>
    tpu.vector_store %arg16[%c0_10, %c0_11], %14 {strides = array<i32>} : memref<128x24xf32, #tpu.memory_space<vmem>>, vector<128x16xf32>,
    %c0_12 = arith.constant 0 : index
    %c0_13 = arith.constant 0 : index
    %16 = vector.load %arg6[%c0_12, %c0_13] : memref<1x16xf32, #tpu.memory_space<vmem>>, vector<1x16xf32>
    %17 = vector.broadcast %16 : vector<1x16xf32> to vector<128x16xf32>
    %18 = arith.mulf %0, %17 : vector<128x16xf32>
    %c0_14 = arith.constant 0 : index
    %c0_15 = arith.constant 0 : index
    %19 = vector.load %arg7[%c0_14, %c0_15] : memref<1x16xf32, #tpu.memory_space<vmem>>, vector<1x16xf32>
    %20 = vector.broadcast %19 : vector<1x16xf32> to vector<128x16xf32>
    %21 = arith.addf %18, %20 : vector<128x16xf32>
    %cst_16 = arith.constant 0.000000e+00 : f32
    %22 = vector.broadcast %cst_16 : f32 to vector<128x16xf32>
    %23 = arith.maximumf %21, %22 : vector<128x16xf32>
    %24 = arith.truncf %23 : vector<128x16xf32> to vector<128x16xbf16>
    %c0_17 = arith.constant 0 : index
    %c0_18 = arith.constant 0 : index
    %25 = vector.load %arg8[%c0_17, %c0_18] : memref<16x32xbf16, #tpu.memory_space<vmem>>, vector<16x32xbf16>
    %cst_19 = arith.constant dense<0.000000e+00> : vector<128x32xf32>
    %26 = tpu.matmul %24, %25, %cst_19 {dimension_numbers = #tpu.dot_dimension_numbers<[1], [0], [0], [1], [0, 0, 1, 1], [], []>} : vector<128x16xbf16>, vector<16x32xbf16>, vector<128x32xf32> -> vector<128x32xf32>
    %c0_20 = arith.constant 0 : index
    %c0_21 = arith.constant 0 : index
    %27 = vector.load %arg9[%c0_20, %c0_21] : memref<1x32xf32, #tpu.memory_space<vmem>>, vector<1x32xf32>
    %28 = vector.broadcast %27 : vector<1x32xf32> to vector<128x32xf32>
    %29 = arith.mulf %26, %28 : vector<128x32xf32>
    %c0_22 = arith.constant 0 : index
    %c0_23 = arith.constant 0 : index
    %30 = vector.load %arg10[%c0_22, %c0_23] : memref<1x32xf32, #tpu.memory_space<vmem>>, vector<1x32xf32>
    %31 = vector.broadcast %30 : vector<1x32xf32> to vector<128x32xf32>
    %32 = arith.addf %29, %31 : vector<128x32xf32>
    %cst_24 = arith.constant 0.000000e+00 : f32
    %33 = vector.broadcast %cst_24 : f32 to vector<128x32xf32>
    %34 = arith.maximumf %32, %33 : vector<128x32xf32>
    %35 = arith.truncf %34 : vector<128x32xf32> to vector<128x32xbf16>
    %cst_25 = arith.constant 0.000000e+00 : f32
    %36 = vector.broadcast %cst_25 : f32 to vector<128x32xf32>
    %c0_26 = arith.constant 0 : index
    %c0_27 = arith.constant 0 : index
    %c0_28 = arith.constant 0 : index
    %c0_29 = arith.constant 0 : index
    %37 = vector.load %arg11[%c0_26, %c0_27, %c0_28, %c0_29] : memref<3x3x32x32xbf16, #tpu.memory_space<vmem>>, vector<1x1x32x32xbf16>
    %38 = vector.shape_cast %37 : vector<1x1x32x32xbf16> to vector<32x32xbf16>
    %cst_30 = arith.constant dense<0.000000e+00> : vector<128x32xf32>
    %39 = tpu.matmul %35, %38, %cst_30 {dimension_numbers = #tpu.dot_dimension_numbers<[1], [0], [0], [1], [0, 0, 1, 1], [], []>} : vector<128x32xbf16>, vector<32x32xbf16>, vector<128x32xf32> -> vector<128x32xf32>
    %c9_i32 = arith.constant 9 : i32
    %40 = tpu.dynamic_rotate %39 by %c9_i32 dim 0 : vector<128x32xf32>, i32 -> vector<128x32xf32>
    %c0_31 = arith.constant 0 : index
    %c0_32 = arith.constant 0 : index
    %c0_33 = arith.constant 0 : index
    %41 = vector.load %arg2[%c0_31, %c0_32, %c0_33] : memref<9x128x1xf32, #tpu.memory_space<vmem>>, vector<1x128x1xf32>
    %42 = vector.shape_cast %41 : vector<1x128x1xf32> to vector<128x1xf32>
    %43 = vector.broadcast %42 : vector<128x1xf32> to vector<128x32xf32>
    %44 = arith.mulf %43, %40 : vector<128x32xf32>
    %45 = arith.addf %36, %44 : vector<128x32xf32>
    %c0_34 = arith.constant 0 : index
    %c1 = arith.constant 1 : index
    %c0_35 = arith.constant 0 : index
    %c0_36 = arith.constant 0 : index
    %46 = vector.load %arg11[%c0_34, %c1, %c0_35, %c0_36] : memref<3x3x32x32xbf16, #tpu.memory_space<vmem>>, vector<1x1x32x32xbf16>
    %47 = vector.shape_cast %46 : vector<1x1x32x32xbf16> to vector<32x32xbf16>
    %cst_37 = arith.constant dense<0.000000e+00> : vector<128x32xf32>
    %48 = tpu.matmul %35, %47, %cst_37 {dimension_numbers = #tpu.dot_dimension_numbers<[1], [0], [0], [1], [0, 0, 1, 1], [], []>} : vector<128x32xbf16>, vector<32x32xbf16>, vector<128x32xf32> -> vector<128x32xf32>
    %c8_i32 = arith.constant 8 : i32
    %49 = tpu.dynamic_rotate %48 by %c8_i32 dim 0 : vector<128x32xf32>, i32 -> vector<128x32xf32>
    %c1_38 = arith.constant 1 : index
    %c0_39 = arith.constant 0 : index
    %c0_40 = arith.constant 0 : index
    %50 = vector.load %arg2[%c1_38, %c0_39, %c0_40] : memref<9x128x1xf32, #tpu.memory_space<vmem>>, vector<1x128x1xf32>
    %51 = vector.shape_cast %50 : vector<1x128x1xf32> to vector<128x1xf32>
    %52 = vector.broadcast %51 : vector<128x1xf32> to vector<128x32xf32>
    %53 = arith.mulf %52, %49 : vector<128x32xf32>
    %54 = arith.addf %45, %53 : vector<128x32xf32>
    %c0_41 = arith.constant 0 : index
    %c2 = arith.constant 2 : index
    %c0_42 = arith.constant 0 : index
    %c0_43 = arith.constant 0 : index
    %55 = vector.load %arg11[%c0_41, %c2, %c0_42, %c0_43] : memref<3x3x32x32xbf16, #tpu.memory_space<vmem>>, vector<1x1x32x32xbf16>
    %56 = vector.shape_cast %55 : vector<1x1x32x32xbf16> to vector<32x32xbf16>
    %cst_44 = arith.constant dense<0.000000e+00> : vector<128x32xf32>
    %57 = tpu.matmul %35, %56, %cst_44 {dimension_numbers = #tpu.dot_dimension_numbers<[1], [0], [0], [1], [0, 0, 1, 1], [], []>} : vector<128x32xbf16>, vector<32x32xbf16>, vector<128x32xf32> -> vector<128x32xf32>
    %c7_i32 = arith.constant 7 : i32
    %58 = tpu.dynamic_rotate %57 by %c7_i32 dim 0 : vector<128x32xf32>, i32 -> vector<128x32xf32>
    %c2_45 = arith.constant 2 : index
    %c0_46 = arith.constant 0 : index
    %c0_47 = arith.constant 0 : index
    %59 = vector.load %arg2[%c2_45, %c0_46, %c0_47] : memref<9x128x1xf32, #tpu.memory_space<vmem>>, vector<1x128x1xf32>
    %60 = vector.shape_cast %59 : vector<1x128x1xf32> to vector<128x1xf32>
    %61 = vector.broadcast %60 : vector<128x1xf32> to vector<128x32xf32>
    %62 = arith.mulf %61, %58 : vector<128x32xf32>
    %63 = arith.addf %54, %62 : vector<128x32xf32>
    %c1_48 = arith.constant 1 : index
    %c0_49 = arith.constant 0 : index
    %c0_50 = arith.constant 0 : index
    %c0_51 = arith.constant 0 : index
    %64 = vector.load %arg11[%c1_48, %c0_49, %c0_50, %c0_51] : memref<3x3x32x32xbf16, #tpu.memory_space<vmem>>, vector<1x1x32x32xbf16>
    %65 = vector.shape_cast %64 : vector<1x1x32x32xbf16> to vector<32x32xbf16>
    %cst_52 = arith.constant dense<0.000000e+00> : vector<128x32xf32>
    %66 = tpu.matmul %35, %65, %cst_52 {dimension_numbers = #tpu.dot_dimension_numbers<[1], [0], [0], [1], [0, 0, 1, 1], [], []>} : vector<128x32xbf16>, vector<32x32xbf16>, vector<128x32xf32> -> vector<128x32xf32>
    %c1_i32 = arith.constant 1 : i32
    %67 = tpu.dynamic_rotate %66 by %c1_i32 dim 0 : vector<128x32xf32>, i32 -> vector<128x32xf32>
    %c3 = arith.constant 3 : index
    %c0_53 = arith.constant 0 : index
    %c0_54 = arith.constant 0 : index
    %68 = vector.load %arg2[%c3, %c0_53, %c0_54] : memref<9x128x1xf32, #tpu.memory_space<vmem>>, vector<1x128x1xf32>
    %69 = vector.shape_cast %68 : vector<1x128x1xf32> to vector<128x1xf32>
    %70 = vector.broadcast %69 : vector<128x1xf32> to vector<128x32xf32>
    %71 = arith.mulf %70, %67 : vector<128x32xf32>
    %72 = arith.addf %63, %71 : vector<128x32xf32>
    %c1_55 = arith.constant 1 : index
    %c1_56 = arith.constant 1 : index
    %c0_57 = arith.constant 0 : index
    %c0_58 = arith.constant 0 : index
    %73 = vector.load %arg11[%c1_55, %c1_56, %c0_57, %c0_58] : memref<3x3x32x32xbf16, #tpu.memory_space<vmem>>, vector<1x1x32x32xbf16>
    %74 = vector.shape_cast %73 : vector<1x1x32x32xbf16> to vector<32x32xbf16>
    %cst_59 = arith.constant dense<0.000000e+00> : vector<128x32xf32>
    %75 = tpu.matmul %35, %74, %cst_59 {dimension_numbers = #tpu.dot_dimension_numbers<[1], [0], [0], [1], [0, 0, 1, 1], [], []>} : vector<128x32xbf16>, vector<32x32xbf16>, vector<128x32xf32> -> vector<128x32xf32>
    %76 = arith.addf %72, %75 : vector<128x32xf32>
    %c1_60 = arith.constant 1 : index
    %c2_61 = arith.constant 2 : index
    %c0_62 = arith.constant 0 : index
    %c0_63 = arith.constant 0 : index
    %77 = vector.load %arg11[%c1_60, %c2_61, %c0_62, %c0_63] : memref<3x3x32x32xbf16, #tpu.memory_space<vmem>>, vector<1x1x32x32xbf16>
    %78 = vector.shape_cast %77 : vector<1x1x32x32xbf16> to vector<32x32xbf16>
    %cst_64 = arith.constant dense<0.000000e+00> : vector<128x32xf32>
    %79 = tpu.matmul %35, %78, %cst_64 {dimension_numbers = #tpu.dot_dimension_numbers<[1], [0], [0], [1], [0, 0, 1, 1], [], []>} : vector<128x32xbf16>, vector<32x32xbf16>, vector<128x32xf32> -> vector<128x32xf32>
    %c127_i32 = arith.constant 127 : i32
    %80 = tpu.dynamic_rotate %79 by %c127_i32 dim 0 : vector<128x32xf32>, i32 -> vector<128x32xf32>
    %c5 = arith.constant 5 : index
    %c0_65 = arith.constant 0 : index
    %c0_66 = arith.constant 0 : index
    %81 = vector.load %arg2[%c5, %c0_65, %c0_66] : memref<9x128x1xf32, #tpu.memory_space<vmem>>, vector<1x128x1xf32>
    %82 = vector.shape_cast %81 : vector<1x128x1xf32> to vector<128x1xf32>
    %83 = vector.broadcast %82 : vector<128x1xf32> to vector<128x32xf32>
    %84 = arith.mulf %83, %80 : vector<128x32xf32>
    %85 = arith.addf %76, %84 : vector<128x32xf32>
    %c2_67 = arith.constant 2 : index
    %c0_68 = arith.constant 0 : index
    %c0_69 = arith.constant 0 : index
    %c0_70 = arith.constant 0 : index
    %86 = vector.load %arg11[%c2_67, %c0_68, %c0_69, %c0_70] : memref<3x3x32x32xbf16, #tpu.memory_space<vmem>>, vector<1x1x32x32xbf16>
    %87 = vector.shape_cast %86 : vector<1x1x32x32xbf16> to vector<32x32xbf16>
    %cst_71 = arith.constant dense<0.000000e+00> : vector<128x32xf32>
    %88 = tpu.matmul %35, %87, %cst_71 {dimension_numbers = #tpu.dot_dimension_numbers<[1], [0], [0], [1], [0, 0, 1, 1], [], []>} : vector<128x32xbf16>, vector<32x32xbf16>, vector<128x32xf32> -> vector<128x32xf32>
    %c121_i32 = arith.constant 121 : i32
    %89 = tpu.dynamic_rotate %88 by %c121_i32 dim 0 : vector<128x32xf32>, i32 -> vector<128x32xf32>
    %c6 = arith.constant 6 : index
    %c0_72 = arith.constant 0 : index
    %c0_73 = arith.constant 0 : index
    %90 = vector.load %arg2[%c6, %c0_72, %c0_73] : memref<9x128x1xf32, #tpu.memory_space<vmem>>, vector<1x128x1xf32>
    %91 = vector.shape_cast %90 : vector<1x128x1xf32> to vector<128x1xf32>
    %92 = vector.broadcast %91 : vector<128x1xf32> to vector<128x32xf32>
    %93 = arith.mulf %92, %89 : vector<128x32xf32>
    %94 = arith.addf %85, %93 : vector<128x32xf32>
    %c2_74 = arith.constant 2 : index
    %c1_75 = arith.constant 1 : index
    %c0_76 = arith.constant 0 : index
    %c0_77 = arith.constant 0 : index
    %95 = vector.load %arg11[%c2_74, %c1_75, %c0_76, %c0_77] : memref<3x3x32x32xbf16, #tpu.memory_space<vmem>>, vector<1x1x32x32xbf16>
    %96 = vector.shape_cast %95 : vector<1x1x32x32xbf16> to vector<32x32xbf16>
    %cst_78 = arith.constant dense<0.000000e+00> : vector<128x32xf32>
    %97 = tpu.matmul %35, %96, %cst_78 {dimension_numbers = #tpu.dot_dimension_numbers<[1], [0], [0], [1], [0, 0, 1, 1], [], []>} : vector<128x32xbf16>, vector<32x32xbf16>, vector<128x32xf32> -> vector<128x32xf32>
    %c120_i32 = arith.constant 120 : i32
    %98 = tpu.dynamic_rotate %97 by %c120_i32 dim 0 : vector<128x32xf32>, i32 -> vector<128x32xf32>
    %c7 = arith.constant 7 : index
    %c0_79 = arith.constant 0 : index
    %c0_80 = arith.constant 0 : index
    %99 = vector.load %arg2[%c7, %c0_79, %c0_80] : memref<9x128x1xf32, #tpu.memory_space<vmem>>, vector<1x128x1xf32>
    %100 = vector.shape_cast %99 : vector<1x128x1xf32> to vector<128x1xf32>
    %101 = vector.broadcast %100 : vector<128x1xf32> to vector<128x32xf32>
    %102 = arith.mulf %101, %98 : vector<128x32xf32>
    %103 = arith.addf %94, %102 : vector<128x32xf32>
    %c2_81 = arith.constant 2 : index
    %c2_82 = arith.constant 2 : index
    %c0_83 = arith.constant 0 : index
    %c0_84 = arith.constant 0 : index
    %104 = vector.load %arg11[%c2_81, %c2_82, %c0_83, %c0_84] : memref<3x3x32x32xbf16, #tpu.memory_space<vmem>>, vector<1x1x32x32xbf16>
    %105 = vector.shape_cast %104 : vector<1x1x32x32xbf16> to vector<32x32xbf16>
    %cst_85 = arith.constant dense<0.000000e+00> : vector<128x32xf32>
    %106 = tpu.matmul %35, %105, %cst_85 {dimension_numbers = #tpu.dot_dimension_numbers<[1], [0], [0], [1], [0, 0, 1, 1], [], []>} : vector<128x32xbf16>, vector<32x32xbf16>, vector<128x32xf32> -> vector<128x32xf32>
    %c119_i32 = arith.constant 119 : i32
    %107 = tpu.dynamic_rotate %106 by %c119_i32 dim 0 : vector<128x32xf32>, i32 -> vector<128x32xf32>
    %c8 = arith.constant 8 : index
    %c0_86 = arith.constant 0 : index
    %c0_87 = arith.constant 0 : index
    %108 = vector.load %arg2[%c8, %c0_86, %c0_87] : memref<9x128x1xf32, #tpu.memory_space<vmem>>, vector<1x128x1xf32>
    %109 = vector.shape_cast %108 : vector<1x128x1xf32> to vector<128x1xf32>
    %110 = vector.broadcast %109 : vector<128x1xf32> to vector<128x32xf32>
    %111 = arith.mulf %110, %107 : vector<128x32xf32>
    %112 = arith.addf %103, %111 : vector<128x32xf32>
    %c0_88 = arith.constant 0 : index
    %c0_89 = arith.constant 0 : index
    %113 = vector.load %arg12[%c0_88, %c0_89] : memref<1x32xf32, #tpu.memory_space<vmem>>, vector<1x32xf32>
    %114 = vector.broadcast %113 : vector<1x32xf32> to vector<128x32xf32>
    %115 = arith.mulf %112, %114 : vector<128x32xf32>
    %c0_90 = arith.constant 0 : index
    %c0_91 = arith.constant 0 : index
    %116 = vector.load %arg13[%c0_90, %c0_91] : memref<1x32xf32, #tpu.memory_space<vmem>>, vector<1x32xf32>
    %117 = vector.broadcast %116 : vector<1x32xf32> to vector<128x32xf32>
    %118 = arith.addf %115, %117 : vector<128x32xf32>
    %cst_92 = arith.constant 0.000000e+00 : f32
    %119 = vector.broadcast %cst_92 : f32 to vector<128x32xf32>
    %120 = arith.maximumf %118, %119 : vector<128x32xf32>
    %121 = arith.truncf %120 : vector<128x32xf32> to vector<128x32xbf16>
    %c0_93 = arith.constant 0 : index
    %c0_94 = arith.constant 0 : index
    %122 = vector.load %arg14[%c0_93, %c0_94] : memref<32x24xbf16, #tpu.memory_space<vmem>>, vector<32x24xbf16>
    %cst_95 = arith.constant dense<0.000000e+00> : vector<128x24xf32>
    %123 = tpu.matmul %121, %122, %cst_95 {dimension_numbers = #tpu.dot_dimension_numbers<[1], [0], [0], [1], [0, 0, 1, 1], [], []>} : vector<128x32xbf16>, vector<32x24xbf16>, vector<128x24xf32> -> vector<128x24xf32>
    %c0_96 = arith.constant 0 : index
    %c0_97 = arith.constant 0 : index
    %124 = vector.load %arg15[%c0_96, %c0_97] : memref<128x16xf32, #tpu.memory_space<vmem>>, vector<128x16xf32>
    %125 = vector.extract_strided_slice %123 {offsets = [0, 0], sizes = [128, 16], strides = [1, 1]} : vector<128x24xf32> to vector<128x16xf32>
    %126 = arith.addf %124, %125 : vector<128x16xf32>
    %c0_98 = arith.constant 0 : index
    %c0_99 = arith.constant 0 : index
    %127 = vector.load %arg15[%c0_98, %c0_99] : memref<128x16xf32, #tpu.memory_space<vmem>>, vector<128x16xf32>
    tpu.vector_store %arg15[%c0_98, %c0_99], %126 {strides = array<i32>} : memref<128x16xf32, #tpu.memory_space<vmem>>, vector<128x16xf32>,
    %128 = vector.extract_strided_slice %123 {offsets = [0, 16], sizes = [128, 8], strides = [1, 1]} : vector<128x24xf32> to vector<128x8xf32>
    %c0_100 = arith.constant 0 : index
    %c16 = arith.constant 16 : index
    %129 = vector.load %arg16[%c0_100, %c16] : memref<128x24xf32, #tpu.memory_space<vmem>>, vector<128x8xf32>
    tpu.vector_store %arg16[%c0_100, %c16], %128 {strides = array<i32>} : memref<128x24xf32, #tpu.memory_space<vmem>>, vector<128x8xf32>,
    return
  }
  func.func @transform_0(%arg0: i32) -> (i32, i32) {
    %c0_i32 = arith.constant 0 : i32
    %c0_i32_0 = arith.constant 0 : i32
    return %arg0, %c0_i32 : i32, i32
  }
  func.func @transform_1(%arg0: i32) -> (i32, i32, i32) {
    %c0_i32 = arith.constant 0 : i32
    %c0_i32_0 = arith.constant 0 : i32
    %c0_i32_1 = arith.constant 0 : i32
    %c0_i32_2 = arith.constant 0 : i32
    return %c0_i32, %c0_i32_0, %c0_i32_1 : i32, i32, i32
  }
  func.func @transform_2(%arg0: i32) -> (i32, i32) {
    %c0_i32 = arith.constant 0 : i32
    %c0_i32_0 = arith.constant 0 : i32
    %c0_i32_1 = arith.constant 0 : i32
    return %c0_i32, %c0_i32_0 : i32, i32
  }
  func.func @transform_3(%arg0: i32) -> (i32, i32) {
    %c0_i32 = arith.constant 0 : i32
    %c0_i32_0 = arith.constant 0 : i32
    %c0_i32_1 = arith.constant 0 : i32
    return %c0_i32, %c0_i32_0 : i32, i32
  }
  func.func @transform_4(%arg0: i32) -> (i32, i32) {
    %c0_i32 = arith.constant 0 : i32
    %c0_i32_0 = arith.constant 0 : i32
    %c0_i32_1 = arith.constant 0 : i32
    return %c0_i32, %c0_i32_0 : i32, i32
  }
  func.func @transform_5(%arg0: i32) -> (i32, i32) {
    %c0_i32 = arith.constant 0 : i32
    %c0_i32_0 = arith.constant 0 : i32
    %c0_i32_1 = arith.constant 0 : i32
    return %c0_i32, %c0_i32_0 : i32, i32
  }
  func.func @transform_6(%arg0: i32) -> (i32, i32) {
    %c0_i32 = arith.constant 0 : i32
    %c0_i32_0 = arith.constant 0 : i32
    %c0_i32_1 = arith.constant 0 : i32
    return %c0_i32, %c0_i32_0 : i32, i32
  }
  func.func @transform_7(%arg0: i32) -> (i32, i32) {
    %c0_i32 = arith.constant 0 : i32
    %c0_i32_0 = arith.constant 0 : i32
    %c0_i32_1 = arith.constant 0 : i32
    return %c0_i32, %c0_i32_0 : i32, i32
  }
  func.func @transform_8(%arg0: i32) -> (i32, i32) {
    %c0_i32 = arith.constant 0 : i32
    %c0_i32_0 = arith.constant 0 : i32
    %c0_i32_1 = arith.constant 0 : i32
    return %c0_i32, %c0_i32_0 : i32, i32
  }
  func.func @transform_9(%arg0: i32) -> (i32, i32) {
    %c0_i32 = arith.constant 0 : i32
    %c0_i32_0 = arith.constant 0 : i32
    %c0_i32_1 = arith.constant 0 : i32
    return %c0_i32, %c0_i32_0 : i32, i32
  }
  func.func @transform_10(%arg0: i32) -> (i32, i32, i32, i32) {
    %c0_i32 = arith.constant 0 : i32
    %c0_i32_0 = arith.constant 0 : i32
    %c0_i32_1 = arith.constant 0 : i32
    %c0_i32_2 = arith.constant 0 : i32
    %c0_i32_3 = arith.constant 0 : i32
    return %c0_i32, %c0_i32_0, %c0_i32_1, %c0_i32_2 : i32, i32, i32, i32
  }
  func.func @transform_11(%arg0: i32) -> (i32, i32) {
    %c0_i32 = arith.constant 0 : i32
    %c0_i32_0 = arith.constant 0 : i32
    %c0_i32_1 = arith.constant 0 : i32
    return %c0_i32, %c0_i32_0 : i32, i32
  }
  func.func @transform_12(%arg0: i32) -> (i32, i32) {
    %c0_i32 = arith.constant 0 : i32
    %c0_i32_0 = arith.constant 0 : i32
    %c0_i32_1 = arith.constant 0 : i32
    return %c0_i32, %c0_i32_0 : i32, i32
  }
  func.func @transform_13(%arg0: i32) -> (i32, i32) {
    %c0_i32 = arith.constant 0 : i32
    %c0_i32_0 = arith.constant 0 : i32
    %c0_i32_1 = arith.constant 0 : i32
    return %c0_i32, %c0_i32_0 : i32, i32
  }
  func.func @transform_14(%arg0: i32) -> (i32, i32) {
    %c0_i32 = arith.constant 0 : i32
    %c0_i32_0 = arith.constant 0 : i32
    return %arg0, %c0_i32 : i32, i32
  }
  func.func @transform_15(%arg0: i32) -> (i32, i32) {
    %c0_i32 = arith.constant 0 : i32
    %c0_i32_0 = arith.constant 0 : i32
    return %arg0, %c0_i32 : i32, i32
  }
}

</mosaic_0001>

<bundles_post_ra>
// kernel: dual_path_block_forward.1
= control target key start
LH: loop header
LB: loop body
LE: loop exit
PB: predicated region body
PF: predicated region fallthrough
CT: control target
= control target key end

     0   :  { %s6615_s0 = inlined_call_operand.vmem [shape: f32[256,16], index: 0, kind: input, shape index: {}]   ;;  %s6616_s1 = inlined_call_operand.vmem [shape: f32[9,128,1], index: 1, kind: input, shape index: {}]   ;;  %s6617_s2 = inlined_call_operand.vmem [shape: f32[1,16], index: 2, kind: input, shape index: {}]   ;;  %s6618_s3 = inlined_call_operand.vmem [shape: f32[1,16], index: 3, kind: input, shape index: {}]   ;;  %s6619_s4 = inlined_call_operand.vmem [shape: bf16[16,32], index: 4, kind: input, shape index: {}]   ;;  %s6620_s5 = inlined_call_operand.vmem [shape: f32[1,16], index: 5, kind: input, shape index: {}]   ;;  %s6621_s6 = inlined_call_operand.vmem [shape: f32[1,16], index: 6, kind: input, shape index: {}]   ;;  %s6622_s7 = inlined_call_operand.vmem [shape: bf16[16,32], index: 7, kind: input, shape index: {}]   ;;  %s6623_s8 = inlined_call_operand.vmem [shape: f32[1,32], index: 8, kind: input, shape index: {}]   ;;  %s6624_s9 = inlined_call_operand.vmem [shape: f32[1,32], index: 9, kind: input, shape index: {}]   ;;  %s6625_s10 = inlined_call_operand.vmem [shape: bf16[3,3,32,32], index: 10, kind: input, shape index: {}]   ;;  %s6626_s11 = inlined_call_operand.vmem [shape: f32[1,32], index: 11, kind: input, shape index: {}]   ;;  %s6627_s12 = inlined_call_operand.vmem [shape: f32[1,32], index: 12, kind: input, shape index: {}]   ;;  %s6628_s13 = inlined_call_operand.vmem [shape: bf16[32,24], index: 13, kind: input, shape index: {}]   ;;  %s6629_s14 = inlined_call_operand.hbm [shape: f32[256,16], index: 14, kind: output, shape index: {0}]   ;;  %s6630_s15 = inlined_call_operand.hbm [shape: f32[256,24], index: 15, kind: output, shape index: {1}]  }
   0x1   :  { %6636 = sst [smem:[#allocation82_spill]] %s6615_s0 }
   0x2   :  { %6637 = sst [smem:[#allocation83_spill]] %s6616_s1 }
   0x3   :  { %6638 = sst [smem:[#allocation84_spill]] %s6617_s2 }
   0x4   :  { %6639 = sst [smem:[#allocation85_spill]] %s6619_s4 }
   0x5   :  { %21 = vsyncpa [#allocation3], 0 }
   0x6   :  { %23 = vsyncpa [#allocation3 + $0x1], 0 }
   0x7   :  { %24 = vsyncpa [#allocation5], 0 }
   0x8   :  { %26 = vsyncpa [#allocation5 + $0x1], 0  ;;  %s4680_s18 = smov 0   ;;  %s4682_s19 = smov 0  }
   0x9   :  { %s4684_s20 = smov 0   ;;  %s4686_s21 = smov 0  }
   0xa LB: > { %6640 = sst [smem:[#allocation8_spill]] %s4588_s20  ;;  %s4701_s22 = sadd.s32 4294967295, %s4592_s21   ;;  %s4592_s21 = sphi %s4686_s21, %s6792_s21   ;;  %s4588_s20 = sphi %s4684_s20, %s6794_s20   ;;  %s4584_s19 = sphi %s4682_s19, %s6796_s19   ;;  %s4580_s18 = sphi %s4680_s18, %s6795_s18  }
   0xb   : > { %s3784_s23 = sadd.s32 4294967294, %s4592_s21   ;;  %s4705_s24 = sadd.s32 1, %s4592_s21  }
   0xc   : > { %6641 = sst [smem:[#allocation9_spill]] %s4705_s24  ;;  %s338_s25 = sadd.s32 1, %s4588_s20 }
   0xd   : > { %s335_s26 = ssub.s32 %s4592_s21, %s4705_s24  ;;  %p348_p0 = scmp.ne.s32.totalorder %s4588_s20, %s4584_s19 }
   0xe   : > { %p336_p1 = scmp.eq.s32.totalorder %s335_s26, 0  ;;  %p349_p2 = scmp.eq.s32.totalorder %s4701_s22, 1 }
   0xf   : > { %p354_p3 = scmp.ne.s32.totalorder %s4584_s19, %s4580_s18  ;;  %p355_p4 = scmp.eq.s32.totalorder %s3784_s23, 1 }
  0x10   : > { %s4716_s27 = scalar_select %p336_p1, %s4588_s20, %s338_s25  }
  0x11   : > { %p4718_p5 = por %p349_p2, %p348_p0  ;;  %p4722_p6 = por %p355_p4, %p354_p3 }
  0x12   : > { %6642 = sst [smem:[#allocation10_spill]] %s4716_s27  ;;  %p3787_p7 = scmp.ge.s32.totalorder %s4592_s21, 1 }
  0x13   : > { %s6644_s29 = scalar_select %p4722_p6, 1, 0 }
  0x14   : > { %p447_p8 = scmp.lt.s32.totalorder %s4592_s21, 3 }
  0x15   : > { %6645 = sst [smem:[#allocation11_spill]] %s6644_s29 }
  0x16   : > { %p448_p9 = pnand %p3787_p7, %p447_p8 }
  0x18   : > { %451 = sbr.rel (%p448_p9) target bundleno = 922 (0x39a), region = 76 }
  0x1f   : > { %s6646_s1 = sld [smem:[#allocation83_spill]]  ;;  %s3790_s25 = sshll.u32 %s4701_s22, 4  ;;  %v4594_v2 = vmov 0   ;;  %v4477_v6 = vld [vmem:[%s6622_s7] sm:$0xff]   ;;  %vm603_vm0 = vcmask 130048   ;;  %vm1106_vm1 = vcmask 261120  }
  0x20   : > { %4475 = vset.pattern.permute.xlu1 %v4594_v2  ;;  %4474 = vset.pattern.permute.xlu0 %v4594_v2  ;;  %p501_p10 = scmp.lt.s32.totalorder %s3790_s25, 31  ;;  %s6647_s4 = sld [smem:[#allocation85_spill]]  ;;  %v4758_v9 = vld [vmem:[%s6620_s5] ss:$0 sm:$0xff]  ;;  %vm3638_vm4 = vcmask 195712  }
  0x21   : > { %4208 = vmatprep.subr.bf16.mxu1 %v4477_v6  ;;  %s6648_s2 = sld [smem:[#allocation84_spill]]  ;;  %s6649_s0 = sld [smem:[#allocation82_spill]]  ;;  %v4771_v11 = vld [vmem:[%s6618_s3] ss:$0 sm:$0xff] }
  0x22   : > { %s6798_s25 = smov (!%p501_p10, %s3790_s25), 31  ;;  %v4776_v12 = vld [vmem:[%s6621_s6] ss:$0 sm:$0xff]  ;;  %4209 = vmatpush3.bf16.msra.mxu1 %v4477_v6  ;;  %s5306_s17 = sand.u32 1, %s4584_s19  }
  0x23   : > { %s3791_s20 = sshll.u32 %s6798_s25, 3  ;;  %s3788_s23 = sshll.u32 %s5306_s17, 7 }
  0x24   : > { %s5324_s24 = scalar_lea.vmem [#allocation2], %s3788_s23  ;;  %s4595_s26 = smov 112  }
  0x25   : > { %v1264_v0 = vld [vmem:[%s6646_s1 + $0x8] sm:$0xff]  ;;  %v1263_v1 = vld [vmem:[%s6646_s1] sm:$0xff]  ;;  %v1265_v3 = vld [vmem:[%s6646_s1 + $0x10] sm:$0xff]  ;;  %s5764_s29 = scalar_lea.vmem [#allocation4], %s3788_s23  ;;  %s4070_s23 = sshll.u32 %s4701_s22, 11 }
  0x26   : > { %v1266_v4 = vld [vmem:[%s6646_s1 + $0x18] sm:$0xff]  ;;  %1286 = vperm.xlu1 %4475, %v1264_v0   ;;  %1281 = vperm.xlu0 %4474, %v1263_v1   ;;  %v4476_v5 = vld [vmem:[%s6647_s4] sm:$0xff]   ;;  %v1268_v10 = vld [vmem:[%s6646_s1 + $0x28] sm:$0xff]  ;;  %s3690_s27 = sshll.u32 %s5764_s29, 4  ;;  %s3674_s30 = sshll.u32 %s5324_s24, 4  ;;  %s6522_s27 = int_to_ptr.vmem [resolvable:$true] %s3690_s27  ;;  %s6538_s30 = int_to_ptr.vmem [resolvable:$true] %s3674_s30 }
  0x27   : > { %4190 = vmatprep.subr.bf16.mxu0 %v4476_v5  ;;  %v1267_v7 = vld [vmem:[%s6646_s1 + $0x20] sm:$0xff]  ;;  %s4766_s25 = scalar_lea.vmem %s6649_s0, %s3791_s20  ;;  %v1269_v25 = vld [vmem:[%s6646_s1 + $0x30] sm:$0xff]  ;;  %v1270_v29 = vld [vmem:[%s6646_s1 + $0x38] sm:$0xff]  ;;  %s6520_s4 = scalar_lea.hbm %s6630_s15, %s4070_s23 }
  0x28   : > { %4191 = vmatpush3.bf16.msra.mxu0 %v4476_v5  ;;  %v4753_v8 = vld [vmem:[%s6648_s2] ss:$0 sm:$0xff]  ;;  %v510_v14 = vld [vmem:[%s4766_s25 + $0x8] sm:$0xff]  ;;  %v511_v15 = vld [vmem:[%s4766_s25 + $0x10] sm:$0xff]  ;;  %s6536_s16 = scalar_lea.hbm %s6629_s14, %s4070_s23  ;;  %s3661_s22 = scalar_lea.sflag [#allocation5], %s5306_s17 }
  0x29   : > { %v509_v13 = vld [vmem:[%s4766_s25] sm:$0xff]  ;;  %v533_v17 = vmul.f32 %v4753_v8, %v510_v14  ;;  %v829_v19 = vmul.f32 %v4758_v9, %v510_v14  ;;  %v512_v20 = vld [vmem:[%s4766_s25 + $0x18] sm:$0xff]  ;;  %v534_v21 = vmul.f32 %v4753_v8, %v511_v15  ;;  %v830_v23 = vmul.f32 %v4758_v9, %v511_v15  ;;  %v514_v35 = vld [vmem:[%s4766_s25 + $0x28] sm:$0xff]  ;;  %s4596_s0 = smov [#allocation4]  }
  0x2a   : > { %1291 = vperm.xlu1 %4475, %v1265_v3   ;;  %1296 = vperm.xlu0 %4474, %v1266_v4   ;;  %v532_v16 = vmul.f32 %v4753_v8, %v509_v13  ;;  %v828_v18 = vmul.f32 %v4758_v9, %v509_v13  ;;  %v535_v22 = vmul.f32 %v4753_v8, %v512_v20  ;;  %v513_v34 = vld [vmem:[%s4766_s25 + $0x20] sm:$0xff]  ;;  %v515_v44 = vld [vmem:[%s4766_s25 + $0x30] sm:$0xff]  ;;  %v516_v49 = vld [vmem:[%s4766_s25 + $0x38] sm:$0xff] }
  0x2b   : > { %v831_v24 = vmul.f32 %v4758_v9, %v512_v20  ;;  %v556_v27 = vadd.f32 %v4771_v11, %v533_v17  ;;  %v852_v30 = vadd.f32 %v4776_v12, %v829_v19  ;;  %v557_v31 = vadd.f32 %v4771_v11, %v534_v21  ;;  %v1271_v52 = vld [vmem:[%s6646_s1 + $0x40] sm:$0xff]  ;;  %v1272_v56 = vld [vmem:[%s6646_s1 + $0x48] sm:$0xff]  ;;  %v1273_v5 = vld [vmem:[%s6646_s1 + $0x50] sm:$0xff] }
  0x2c   : > { %v555_v26 = vadd.f32 %v4771_v11, %v532_v16  ;;  %v851_v28 = vadd.f32 %v4776_v12, %v828_v18  ;;  %v558_v32 = vadd.f32 %v4771_v11, %v535_v22  ;;  %v853_v33 = vadd.f32 %v4776_v12, %v830_v23  ;;  %v517_v63 = vld [vmem:[%s4766_s25 + $0x40] sm:$0xff]  ;;  %v518_v4 = vld [vmem:[%s4766_s25 + $0x48] sm:$0xff]  ;;  %v1274_v14 = vld [vmem:[%s6646_s1 + $0x58] sm:$0xff] }
  0x2d   : > { %v572_v37 = vmax.f32 %v556_v27, 0.0  ;;  %v854_v39 = vadd.f32 %v4776_v12, %v831_v24  ;;  %v868_v40 = vmax.f32 %v852_v30, 0.0  ;;  %v573_v41 = vmax.f32 %v557_v31, 0.0  ;;  %v519_v19 = vld [vmem:[%s4766_s25 + $0x50] sm:$0xff]  ;;  %v520_v24 = vld [vmem:[%s4766_s25 + $0x58] sm:$0xff]  ;;  %v1275_v31 = vld [vmem:[%s6646_s1 + $0x60] sm:$0xff] }
  0x2e   : > { %1301 = vperm.xlu1 %4475, %v1267_v7   ;;  %1306 = vperm.xlu0 %4474, %v1268_v10   ;;  %v571_v36 = vmax.f32 %v555_v26, 0.0  ;;  %v867_v38 = vmax.f32 %v851_v28, 0.0  ;;  %v574_v42 = vmax.f32 %v558_v32, 0.0  ;;  %v869_v43 = vmax.f32 %v853_v33, 0.0 }
  0x2f   : > { %v870_v46 = vmax.f32 %v854_v39, 0.0  ;;  %v536_v47 = vmul.f32 %v4753_v8, %v513_v34  ;;  %v537_v48 = vmul.f32 %v4753_v8, %v514_v35  ;;  %v832_v53 = vmul.f32 %v4758_v9, %v513_v34  ;;  %v1276_v34 = vld [vmem:[%s6646_s1 + $0x68] sm:$0xff]  ;;  %v521_v39 = vld [vmem:[%s4766_s25 + $0x60] sm:$0xff] }
  0x30   : > { %v587_v45 = vpack.c.bf16 %v572_v37, %v571_v36  ;;  %v883_v50 = vpack.c.bf16 %v868_v40, %v867_v38  ;;  %v588_v51 = vpack.c.bf16 %v574_v42, %v573_v41  ;;  %v833_v54 = vmul.f32 %v4758_v9, %v514_v35 }
  0x31   : > { %v884_v55 = vpack.c.bf16 %v870_v46, %v869_v43  ;;  %v559_v57 = vadd.f32 %v4771_v11, %v536_v47  ;;  %v560_v58 = vadd.f32 %v4771_v11, %v537_v48  ;;  %v538_v59 = vmul.f32 %v4753_v8, %v515_v44 }
  0x32   : > { %1311 = vperm.xlu1 %4475, %v1269_v25   ;;  %1316 = vperm.xlu0 %4474, %v1270_v29   ;;  %v855_v60 = vadd.f32 %v4776_v12, %v832_v53  ;;  %v856_v61 = vadd.f32 %v4776_v12, %v833_v54  ;;  %v539_v62 = vmul.f32 %v4753_v8, %v516_v49  ;;  %v523_v54 = vld [vmem:[%s4766_s25 + $0x70] sm:$0xff] }
  0x33   : > { %4192 = vmatprep.mubr.msk.bf16.mxu0 %vm603_vm0, %v587_v45  ;;  %4210 = vmatprep.mubr.msk.bf16.mxu1 %vm603_vm0, %v883_v50  ;;  %v575_v0 = vmax.f32 %v559_v57, 0.0  ;;  %v576_v1 = vmax.f32 %v560_v58, 0.0  ;;  %v561_v2 = vadd.f32 %v4771_v11, %v538_v59  ;;  %v834_v3 = vmul.f32 %v4758_v9, %v515_v44  ;;  %v522_v44 = vld [vmem:[%s4766_s25 + $0x68] sm:$0xff] }
  0x34   : > { %4193 = vmatmul.mubr.msk.bf16.vlgmr.msra.gmra.mrb[0].mxu0 %vm603_vm0, %v588_v51  ;;  %4211 = vmatmul.mubr.msk.bf16.vlgmr.msra.gmra.mrb[0].mxu1 %vm603_vm0, %v884_v55  ;;  %v871_v6 = vmax.f32 %v855_v60, 0.0  ;;  %v872_v7 = vmax.f32 %v856_v61, 0.0  ;;  %v562_v10 = vadd.f32 %v4771_v11, %v539_v62  ;;  %v835_v13 = vmul.f32 %v4758_v9, %v516_v49  ;;  %v1277_v49 = vld [vmem:[%s6646_s1 + $0x70] sm:$0xff]  ;;  %v1278_v55 = vld [vmem:[%s6646_s1 + $0x78] sm:$0xff] }
  0x35   : > { %v589_v15 = vpack.c.bf16 %v576_v1, %v575_v0  ;;  %v577_v16 = vmax.f32 %v561_v2, 0.0  ;;  %v857_v17 = vadd.f32 %v4776_v12, %v834_v3  ;;  %v540_v18 = vmul.f32 %v4753_v8, %v517_v63  ;;  %v524_v60 = vld [vmem:[%s4766_s25 + $0x78] sm:$0xff]  ;;  %s4498_s25 = scalar_lea.vmem %s6522_s27, 2048 }
  0x36   : > { %1321 = vperm.xlu1 %4475, %v1271_v52   ;;  %1326 = vperm.xlu0 %4474, %v1272_v56   ;;  %v885_v20 = vpack.c.bf16 %v872_v7, %v871_v6  ;;  %v578_v21 = vmax.f32 %v562_v10, 0.0  ;;  %v858_v22 = vadd.f32 %v4776_v12, %v835_v13  ;;  %v541_v23 = vmul.f32 %v4753_v8, %v518_v4  ;;  %p4499_p11 = scmp.ne.s32.totalorder %s6522_s27, %s4498_s25 }
  0x37   : > { %4196 = vmatprep.mubr.msk.bf16.mxu0 %vm603_vm0, %v589_v15  ;;  %v873_v25 = vmax.f32 %v857_v17, 0.0  ;;  %v563_v26 = vadd.f32 %v4771_v11, %v540_v18  ;;  %v836_v27 = vmul.f32 %v4758_v9, %v517_v63  ;;  %v837_v28 = vmul.f32 %v4758_v9, %v518_v4  ;;  %v3841_v15 = vld [vmem:[%s6646_s1 + $0x88] sm:$0xff] }
  0x38   : > { %4214 = vmatprep.mubr.msk.bf16.mxu1 %vm603_vm0, %v885_v20  ;;  %v590_v29 = vpack.c.bf16 %v578_v21, %v577_v16  ;;  %v874_v30 = vmax.f32 %v858_v22, 0.0  ;;  %v564_v32 = vadd.f32 %v4771_v11, %v541_v23  ;;  %v542_v33 = vmul.f32 %v4753_v8, %v519_v19  ;;  %p4500_p12 = pnand %p4499_p11, %p4718_p5 }
  0x39   : > { %v579_v35 = vmax.f32 %v563_v26, 0.0  ;;  %v859_v36 = vadd.f32 %v4776_v12, %v836_v27  ;;  %v860_v37 = vadd.f32 %v4776_v12, %v837_v28  ;;  %v543_v38 = vmul.f32 %v4753_v8, %v520_v24 }
  0x3a   : > { %1331 = vperm.xlu1 %4475, %v1273_v5   ;;  %1336 = vperm.xlu0 %4474, %v1274_v14   ;;  %v886_v40 = vpack.c.bf16 %v874_v30, %v873_v25  ;;  %v580_v41 = vmax.f32 %v564_v32, 0.0  ;;  %v565_v42 = vadd.f32 %v4771_v11, %v542_v33  ;;  %v838_v43 = vmul.f32 %v4758_v9, %v519_v19  ;;  %v3840_v5 = vld [vmem:[%s6646_s1 + $0x80] sm:$0xff]  ;;  %v3846_v33 = vld [vmem:[%s6646_s1 + $0xb0] sm:$0xff]  ;;  %p4501_p13 = pneg %p4500_p12 }
  0x3b   : > { %v875_v45 = vmax.f32 %v859_v36, 0.0  ;;  %v876_v46 = vmax.f32 %v860_v37, 0.0  ;;  %v566_v47 = vadd.f32 %v4771_v11, %v543_v38  ;;  %v839_v48 = vmul.f32 %v4758_v9, %v520_v24  ;;  %v3842_v24 = vld [vmem:[%s6646_s1 + $0x90] sm:$0xff]  ;;  %v3844_v30 = vld [vmem:[%s6646_s1 + $0xa0] sm:$0xff]  ;;  %v3849_v36 = vld [vmem:[%s6646_s1 + $0xc8] sm:$0xff] }
  0x3c   : > { %4197 = vmatmul.mubr.msk.bf16.gmra.mrb[4].mxu0 %vm603_vm0, %v590_v29  ;;  %4215 = vmatmul.mubr.msk.bf16.gmra.mrb[4].mxu1 %vm603_vm0, %v886_v40  ;;  %v591_v50 = vpack.c.bf16 %v580_v41, %v579_v35  ;;  %v581_v51 = vmax.f32 %v565_v42, 0.0  ;;  %v861_v52 = vadd.f32 %v4776_v12, %v838_v43  ;;  %v840_v53 = vmul.f32 %v4758_v9, %v521_v39  ;;  %v3848_v35 = vld [vmem:[%s6646_s1 + $0xc0] sm:$0xff]  ;;  %v3850_v37 = vld [vmem:[%s6646_s1 + $0xd0] sm:$0xff]  ;;  %v3851_v38 = vld [vmem:[%s6646_s1 + $0xd8] sm:$0xff] }
  0x3d   : > { %v887_v56 = vpack.c.bf16 %v876_v46, %v875_v45  ;;  %v582_v57 = vmax.f32 %v566_v47, 0.0  ;;  %v862_v58 = vadd.f32 %v4776_v12, %v839_v48  ;;  %v841_v59 = vmul.f32 %v4758_v9, %v522_v44  ;;  %v3853_v40 = vld [vmem:[%s6646_s1 + $0xe8] sm:$0xff]  ;;  %v3854_v41 = vld [vmem:[%s6646_s1 + $0xf0] sm:$0xff]  ;;  %v3855_v42 = vld [vmem:[%s6646_s1 + $0xf8] sm:$0xff] }
  0x3e   : > { %1341 = vperm.xlu1 %4475, %v1275_v31   ;;  %1346 = vperm.xlu0 %4474, %v1276_v34   ;;  %v877_v61 = vmax.f32 %v861_v52, 0.0  ;;  %v863_v62 = vadd.f32 %v4776_v12, %v840_v53  ;;  %v544_v63 = vmul.f32 %v4753_v8, %v521_v39  ;;  %v545_v0 = vmul.f32 %v4753_v8, %v522_v44  ;;  %v3845_v31 = vld [vmem:[%s6646_s1 + $0xa8] sm:$0xff]  ;;  %v3847_v34 = vld [vmem:[%s6646_s1 + $0xb8] sm:$0xff]  ;;  %v3852_v39 = vld [vmem:[%s6646_s1 + $0xe0] sm:$0xff] }
  0x3f   : > { %4200 = vmatprep.mubr.msk.bf16.mxu0 %vm603_vm0, %v591_v50  ;;  %4218 = vmatprep.mubr.msk.bf16.mxu1 %vm603_vm0, %v887_v56  ;;  %v592_v1 = vpack.c.bf16 %v582_v57, %v581_v51  ;;  %v878_v2 = vmax.f32 %v862_v58, 0.0  ;;  %v864_v3 = vadd.f32 %v4776_v12, %v841_v59  ;;  %v842_v4 = vmul.f32 %v4758_v9, %v523_v54  ;;  %v3870_v43 = vld [vmem:[%s6646_s1 + $0x100] sm:$0xff]  ;;  %v3871_v44 = vld [vmem:[%s6646_s1 + $0x108] sm:$0xff]  ;;  %v3872_v45 = vld [vmem:[%s6646_s1 + $0x110] sm:$0xff] }
  0x40   : > { %v879_v6 = vmax.f32 %v863_v62, 0.0  ;;  %v567_v7 = vadd.f32 %v4771_v11, %v544_v63  ;;  %v568_v10 = vadd.f32 %v4771_v11, %v545_v0  ;;  %v843_v13 = vmul.f32 %v4758_v9, %v524_v60  ;;  %v3873_v46 = vld [vmem:[%s6646_s1 + $0x118] sm:$0xff]  ;;  %v3874_v47 = vld [vmem:[%s6646_s1 + $0x120] sm:$0xff]  ;;  %v3875_v48 = vld [vmem:[%s6646_s1 + $0x128] sm:$0xff] }
  0x41   : > { %v888_v14 = vpack.c.bf16 %v878_v2, %v877_v61  ;;  %v880_v16 = vmax.f32 %v864_v3, 0.0  ;;  %v865_v17 = vadd.f32 %v4776_v12, %v842_v4  ;;  %v546_v18 = vmul.f32 %v4753_v8, %v523_v54  ;;  %v3877_v50 = vld [vmem:[%s6646_s1 + $0x138] sm:$0xff]  ;;  %v3878_v51 = vld [vmem:[%s6646_s1 + $0x140] sm:$0xff]  ;;  %v3879_v53 = vld [vmem:[%s6646_s1 + $0x148] sm:$0xff] }
  0x42   : > { %1351 = vperm.xlu1 %4475, %v1277_v49   ;;  %1356 = vperm.xlu0 %4474, %v1278_v55   ;;  %v583_v19 = vmax.f32 %v567_v7, 0.0  ;;  %v584_v20 = vmax.f32 %v568_v10, 0.0  ;;  %v866_v21 = vadd.f32 %v4776_v12, %v843_v13  ;;  %v547_v22 = vmul.f32 %v4753_v8, %v524_v60  ;;  %v3843_v8 = vld [vmem:[%s6646_s1 + $0x98] sm:$0xff]  ;;  %v3876_v49 = vld [vmem:[%s6646_s1 + $0x130] sm:$0xff]  ;;  %v4478_v52 = vld [vmem:[%s6625_s10] sm:$0xff]  }
  0x43   : > { %v889_v9 = vpack.c.bf16 %v880_v16, %v879_v6  ;;  %v569_v23 = vadd.f32 %v4771_v11, %v546_v18  ;;  %v881_v26 = vmax.f32 %v865_v17, 0.0  ;;  %4226 = vmatprep.subr.bf16.mxu0 %v4478_v52  ;;  %v3880_v54 = vld [vmem:[%s6646_s1 + $0x150] sm:$0xff]  ;;  %v3881_v55 = vld [vmem:[%s6646_s1 + $0x158] sm:$0xff]  ;;  %v3882_v56 = vld [vmem:[%s6646_s1 + $0x160] sm:$0xff] }
  0x44   : > { %4201 = vmatmul.mubr.msk.bf16.gmra.mrb[8].mxu0 %vm603_vm0, %v592_v1  ;;  %4219 = vmatmul.mubr.msk.bf16.gmra.mrb[8].mxu1 %vm603_vm0, %v888_v14  ;;  %v593_v25 = vpack.c.bf16 %v584_v20, %v583_v19  ;;  %v882_v27 = vmax.f32 %v866_v21, 0.0  ;;  %v570_v28 = vadd.f32 %v4771_v11, %v547_v22  ;;  %v3883_v57 = vld [vmem:[%s6646_s1 + $0x168] sm:$0xff]  ;;  %v3900_v58 = vld [vmem:[%s6646_s1 + $0x180] sm:$0xff]  ;;  %v3902_v61 = vld [vmem:[%s6646_s1 + $0x190] sm:$0xff] }
  0x45   : > { %4222 = vmatprep.mubr.msk.bf16.mxu1 %vm603_vm0, %v889_v9  ;;  %v585_v12 = vmax.f32 %v569_v23, 0.0  ;;  %4227 = vmatpush3.bf16.msra.mxu0 %v4478_v52  ;;  %v3901_v59 = vld [vmem:[%s6646_s1 + $0x188] sm:$0xff]  ;;  %v3903_v62 = vld [vmem:[%s6646_s1 + $0x198] sm:$0xff]  ;;  %v3944_v63 = vld [vmem:[%s6646_s1 + $0x280] sm:$0xff] }
  0x46   : > { %1524 = vperm.xlu1 %4475, %v3840_v5   ;;  %1529 = vperm.xlu0 %4474, %v3841_v15   ;;  %v586_v29 = vmax.f32 %v570_v28, 0.0  ;;  %v890_v11 = vpack.c.bf16 %v882_v27, %v881_v26  ;;  %v4479_v60 = vld [vmem:[%s6625_s10 + $0x8] sm:$0xff]   ;;  %v3946_v1 = vld [vmem:[%s6646_s1 + $0x290] sm:$0xff]  ;;  %v3947_v2 = vld [vmem:[%s6646_s1 + $0x298] sm:$0xff] }
  0x47   : > { %4204 = vmatprep.mubr.msk.bf16.mxu0 %vm603_vm0, %v593_v25  ;;  %4228 = vmatprep.subr.bf16.mxu0 %v4479_v60  ;;  %v3945_v0 = vld [vmem:[%s6646_s1 + $0x288] sm:$0xff]  ;;  %v4480_v3 = vld [vmem:[%s6625_s10 + $0x10] sm:$0xff]   ;;  %v3974_v4 = vld [vmem:[%s6646_s1 + $0x300] sm:$0xff] }
  0x48   : > { %v594_v32 = vpack.c.bf16 %v586_v29, %v585_v12  ;;  %4246 = vmatprep.subr.bf16.mxu1 %v4480_v3  ;;  %v3975_v5 = vld [vmem:[%s6646_s1 + $0x308] sm:$0xff]  ;;  %v4481_v6 = vld [vmem:[%s6625_s10 + $0x18] sm:$0xff]   ;;  %v3976_v7 = vld [vmem:[%s6646_s1 + $0x310] sm:$0xff] }
  0x49   : > { %4229 = vmatpush3.bf16.msra.mxu0 %v4479_v60  ;;  %4247 = vmatpush3.bf16.msra.mxu1 %v4480_v3  ;;  %v3977_v10 = vld [vmem:[%s6646_s1 + $0x318] sm:$0xff]  ;;  %v3904_v13 = vld [vmem:[%s6646_s1 + $0x1a0] sm:$0xff]  ;;  %v3905_v14 = vld [vmem:[%s6646_s1 + $0x1a8] sm:$0xff] }
  0x4a   : > { %1534 = vperm.xlu1 %4475, %v3842_v24   ;;  %1539 = vperm.xlu0 %4474, %v3843_v8   ;;  %v4004_v15 = vld [vmem:[%s6646_s1 + $0x380] sm:$0xff]  ;;  %v4005_v16 = vld [vmem:[%s6646_s1 + $0x388] sm:$0xff]  ;;  %v3906_v18 = vld [vmem:[%s6646_s1 + $0x1b0] sm:$0xff] }
  0x4b   : > { %4248 = vmatprep.subr.bf16.mxu1 %v4481_v6  ;;  %v5057_v17 = vld [vmem:[%s6625_s10 + $0x20] sm:$0xff]   ;;  %v3907_v19 = vld [vmem:[%s6646_s1 + $0x1b8] sm:$0xff]  ;;  %v4006_v20 = vld [vmem:[%s6646_s1 + $0x390] sm:$0xff] }
  0x4c   : > { %4205 = vmatmul.mubr.msk.bf16.gmra.mrb[12].mxu0 %vm603_vm0, %v594_v32  ;;  %4223 = vmatmul.mubr.msk.bf16.gmra.mrb[12].mxu1 %vm603_vm0, %v890_v11  ;;  %v4007_v21 = vld [vmem:[%s6646_s1 + $0x398] sm:$0xff]  ;;  %v4034_v23 = vld [vmem:[%s6646_s1 + $0x400] sm:$0xff]  ;;  %v4035_v24 = vld [vmem:[%s6646_s1 + $0x408] sm:$0xff] }
  0x4d   : > { %4249 = vmatpush3.bf16.msra.mxu1 %v4481_v6  ;;  %4266 = vmatprep.subr.bf16.mxu0 %v5057_v17  ;;  %v4036_v27 = vld [vmem:[%s6646_s1 + $0x410] sm:$0xff]  ;;  %v4037_v28 = vld [vmem:[%s6646_s1 + $0x418] sm:$0xff]  ;;  %v3953_v6 = vld [vmem:[%s6646_s1 + $0x2c8] sm:$0xff] }
  0x4e   : > { %1544 = vperm.xlu1 %4475, %v3844_v30   ;;  %1549 = vperm.xlu0 %4474, %v3845_v31   ;;  %v5099_v29 = vld [vmem:[%s6625_s10 + $0x30] sm:$0xff]   ;;  %v3948_v30 = vld [vmem:[%s6646_s1 + $0x2a0] sm:$0xff]  ;;  %v3949_v31 = vld [vmem:[%s6646_s1 + $0x2a8] sm:$0xff] }
  0x4f   : > { %4286 = vmatprep.subr.bf16.mxu1 %v5099_v29 }
  0x52   : > { %1554 = vperm.xlu1 %4475, %v3846_v33   ;;  %1559 = vperm.xlu0 %4474, %v3847_v34   ;;  %v3950_v33 = vld [vmem:[%s6646_s1 + $0x2b0] sm:$0xff]  ;;  %v3951_v34 = vld [vmem:[%s6646_s1 + $0x2b8] sm:$0xff] }
  0x56   : > { %1564 = vperm.xlu1 %4475, %v3848_v35   ;;  %1569 = vperm.xlu0 %4474, %v3849_v36  }
  0x5a   : > { %1574 = vperm.xlu1 %4475, %v3850_v37   ;;  %1579 = vperm.xlu0 %4474, %v3851_v38   ;;  %v3978_v37 = vld [vmem:[%s6646_s1 + $0x320] sm:$0xff]  ;;  %v3979_v38 = vld [vmem:[%s6646_s1 + $0x328] sm:$0xff] }
  0x5e   : > { %1584 = vperm.xlu1 %4475, %v3852_v39   ;;  %1589 = vperm.xlu0 %4474, %v3853_v40  }
  0x62   : > { %1594 = vperm.xlu1 %4475, %v3854_v41   ;;  %1599 = vperm.xlu0 %4474, %v3855_v42   ;;  %v3980_v41 = vld [vmem:[%s6646_s1 + $0x330] sm:$0xff]  ;;  %v3981_v42 = vld [vmem:[%s6646_s1 + $0x338] sm:$0xff] }
  0x66   : > { %1800 = vperm.xlu1 %4475, %v3870_v43   ;;  %1805 = vperm.xlu0 %4474, %v3871_v44  }
  0x6a   : > { %1810 = vperm.xlu1 %4475, %v3872_v45   ;;  %1815 = vperm.xlu0 %4474, %v3873_v46   ;;  %v3908_v45 = vld [vmem:[%s6646_s1 + $0x1c0] sm:$0xff]  ;;  %v3909_v46 = vld [vmem:[%s6646_s1 + $0x1c8] sm:$0xff] }
  0x6e   : > { %1820 = vperm.xlu1 %4475, %v3874_v47   ;;  %1825 = vperm.xlu0 %4474, %v3875_v48  }
  0x72   : > { %1830 = vperm.xlu1 %4475, %v3876_v49   ;;  %1835 = vperm.xlu0 %4474, %v3877_v50   ;;  %v4008_v49 = vld [vmem:[%s6646_s1 + $0x3a0] sm:$0xff]  ;;  %v4009_v50 = vld [vmem:[%s6646_s1 + $0x3a8] sm:$0xff] }
  0x76   : > { %1840 = vperm.xlu1 %4475, %v3878_v51   ;;  %1845 = vperm.xlu0 %4474, %v3879_v53   ;;  %v3910_v53 = vld [vmem:[%s6646_s1 + $0x1d0] sm:$0xff] }
  0x7a   : > { %1850 = vperm.xlu1 %4475, %v3880_v54   ;;  %1855 = vperm.xlu0 %4474, %v3881_v55   ;;  %v3911_v54 = vld [vmem:[%s6646_s1 + $0x1d8] sm:$0xff] }
  0x7e   : > { %1860 = vperm.xlu1 %4475, %v3882_v56   ;;  %1865 = vperm.xlu0 %4474, %v3883_v57   ;;  %v4010_v57 = vld [vmem:[%s6646_s1 + $0x3b0] sm:$0xff] }
  0x82   : > { %2075 = vperm.xlu1 %4475, %v3900_v58   ;;  %2080 = vperm.xlu0 %4474, %v3901_v59   ;;  %v4011_v58 = vld [vmem:[%s6646_s1 + $0x3b8] sm:$0xff] }
  0x86   : > { %2085 = vperm.xlu1 %4475, %v3902_v61   ;;  %2090 = vperm.xlu0 %4474, %v3903_v62   ;;  %v4038_v61 = vld [vmem:[%s6646_s1 + $0x420] sm:$0xff]  ;;  %v4039_v62 = vld [vmem:[%s6646_s1 + $0x428] sm:$0xff] }
  0x8a   : > { %2480 = vperm.xlu1 %4475, %v3944_v63   ;;  %2485 = vperm.xlu0 %4474, %v3945_v0  }
  0x8e   : > { %2490 = vperm.xlu1 %4475, %v3946_v1   ;;  %2495 = vperm.xlu0 %4474, %v3947_v2   ;;  %v4040_v1 = vld [vmem:[%s6646_s1 + $0x430] sm:$0xff]  ;;  %v4041_v2 = vld [vmem:[%s6646_s1 + $0x438] sm:$0xff] }
  0x92   : > { %2755 = vperm.xlu1 %4475, %v3974_v4   ;;  %2760 = vperm.xlu0 %4474, %v3975_v5   ;;  %v3952_v5 = vld [vmem:[%s6646_s1 + $0x2c0] sm:$0xff] }
  0x96   : > { %2765 = vperm.xlu1 %4475, %v3976_v7   ;;  %2770 = vperm.xlu0 %4474, %v3977_v10  }
  0x9a   : > { %2095 = vperm.xlu1 %4475, %v3904_v13   ;;  %2100 = vperm.xlu0 %4474, %v3905_v14   ;;  %v3954_v13 = vld [vmem:[%s6646_s1 + $0x2d0] sm:$0xff]  ;;  %v3955_v14 = vld [vmem:[%s6646_s1 + $0x2d8] sm:$0xff] }
  0x9e   : > { %2998 = vperm.xlu1 %4475, %v4004_v15   ;;  %3003 = vperm.xlu0 %4474, %v4005_v16  }
  0xa2   : > { %2105 = vperm.xlu1 %4475, %v3906_v18   ;;  %2110 = vperm.xlu0 %4474, %v3907_v19   ;;  %v3982_v18 = vld [vmem:[%s6646_s1 + $0x340] sm:$0xff]  ;;  %v3983_v19 = vld [vmem:[%s6646_s1 + $0x348] sm:$0xff] }
  0xa5   : > { %v5072_v22 = vpop.permute.xlu1 %1286  ;;  %v5074_v9 = vpop.permute.xlu0 %1281 }
  0xa6   : > { %3008 = vperm.xlu1 %4475, %v4006_v20   ;;  %3013 = vperm.xlu0 %4474, %v4007_v21  }
  0xa9   : > { %v5082_v25 = vpop.permute.xlu1 %1291  ;;  %v5084_v26 = vpop.permute.xlu0 %1296 }
  0xaa   : > { %3273 = vperm.xlu1 %4475, %v4034_v23   ;;  %3278 = vperm.xlu0 %4474, %v4035_v24   ;;  %v3884_v23 = vld [vmem:[%s6646_s1 + $0x170] sm:$0xff]  ;;  %v3885_v24 = vld [vmem:[%s6646_s1 + $0x178] sm:$0xff] }
  0xad   : > { %v5092_v8 = vpop.permute.xlu1 %1301  ;;  %v5094_v12 = vpop.permute.xlu0 %1306 }
  0xae   : > { %3283 = vperm.xlu1 %4475, %v4036_v27   ;;  %3288 = vperm.xlu0 %4474, %v4037_v28  }
  0xb1   : > { %v5108_v11 = vpop.permute.xlu1 %1311  ;;  %v5110_v32 = vpop.permute.xlu0 %1316 }
  0xb2   : > { %2500 = vperm.xlu1 %4475, %v3948_v30   ;;  %2505 = vperm.xlu0 %4474, %v3949_v31   ;;  %v3984_v30 = vld [vmem:[%s6646_s1 + $0x350] sm:$0xff]  ;;  %v3985_v31 = vld [vmem:[%s6646_s1 + $0x358] sm:$0xff] }
  0xb5   : > { %v5118_v35 = vpop.permute.xlu1 %1321  ;;  %v5120_v36 = vpop.permute.xlu0 %1326 }
  0xb6   : > { %2510 = vperm.xlu1 %4475, %v3950_v33   ;;  %2515 = vperm.xlu0 %4474, %v3951_v34  }
  0xb9   : > { %v5128_v39 = vpop.permute.xlu1 %1331  ;;  %v5130_v40 = vpop.permute.xlu0 %1336 }
  0xba   : > { %2775 = vperm.xlu1 %4475, %v3978_v37   ;;  %2780 = vperm.xlu0 %4474, %v3979_v38   ;;  %v3912_v37 = vld [vmem:[%s6646_s1 + $0x1e0] sm:$0xff]  ;;  %v3913_v38 = vld [vmem:[%s6646_s1 + $0x1e8] sm:$0xff] }
  0xbd   : > { %v5138_v43 = vpop.permute.xlu1 %1341  ;;  %v5140_v44 = vpop.permute.xlu0 %1346 }
  0xbe   : > { %2785 = vperm.xlu1 %4475, %v3980_v41   ;;  %2790 = vperm.xlu0 %4474, %v3981_v42  }
  0xc1   : > { %v5148_v47 = vpop.permute.xlu1 %1351  ;;  %v5150_v48 = vpop.permute.xlu0 %1356 }
  0xc2   : > { %2115 = vperm.xlu1 %4475, %v3908_v45   ;;  %2120 = vperm.xlu0 %4474, %v3909_v46   ;;  %v4012_v45 = vld [vmem:[%s6646_s1 + $0x3c0] sm:$0xff]  ;;  %v4013_v46 = vld [vmem:[%s6646_s1 + $0x3c8] sm:$0xff] }
  0xc5   : > { %v5158_v51 = vpop.permute.xlu1 %1524  ;;  %v5160_v52 = vpop.permute.xlu0 %1529 }
  0xc6   : > { %3018 = vperm.xlu1 %4475, %v4008_v49   ;;  %3023 = vperm.xlu0 %4474, %v4009_v50  }
  0xc9   : > { %v5168_v55 = vpop.permute.xlu1 %1534  ;;  %v5170_v56 = vpop.permute.xlu0 %1539 }
  0xca   : > { %2125 = vperm.xlu1 %4475, %v3910_v53   ;;  %2130 = vperm.xlu0 %4474, %v3911_v54   ;;  %v3914_v53 = vld [vmem:[%s6646_s1 + $0x1f0] sm:$0xff]  ;;  %v3915_v54 = vld [vmem:[%s6646_s1 + $0x1f8] sm:$0xff] }
  0xcd   : > { %v5178_v59 = vpop.permute.xlu1 %1544  ;;  %v5180_v60 = vpop.permute.xlu0 %1549 }
  0xce   : > { %3028 = vperm.xlu1 %4475, %v4010_v57   ;;  %3033 = vperm.xlu0 %4474, %v4011_v58  }
  0xd1   : > { %v5188_v63 = vpop.permute.xlu1 %1554  ;;  %v5190_v0 = vpop.permute.xlu0 %1559 }
  0xd2   : > { %3293 = vperm.xlu1 %4475, %v4038_v61   ;;  %3298 = vperm.xlu0 %4474, %v4039_v62   ;;  %v4014_v61 = vld [vmem:[%s6646_s1 + $0x3d0] sm:$0xff]  ;;  %v4015_v62 = vld [vmem:[%s6646_s1 + $0x3d8] sm:$0xff] }
  0xd5   : > { %v5198_v3 = vpop.permute.xlu1 %1564  ;;  %v5200_v4 = vpop.permute.xlu0 %1569 }
  0xd6   : > { %3303 = vperm.xlu1 %4475, %v4040_v1   ;;  %3308 = vperm.xlu0 %4474, %v4041_v2  }
  0xd9   : > { %v5208_v7 = vpop.permute.xlu1 %1574  ;;  %v5210_v10 = vpop.permute.xlu0 %1579 }
  0xda   : > { %2520 = vperm.xlu1 %4475, %v3952_v5   ;;  %2525 = vperm.xlu0 %4474, %v3953_v6   ;;  %v4042_v5 = vld [vmem:[%s6646_s1 + $0x440] sm:$0xff]  ;;  %v4043_v6 = vld [vmem:[%s6646_s1 + $0x448] sm:$0xff] }
  0xdd   : > { %v5218_v15 = vpop.permute.xlu1 %1584  ;;  %v5220_v16 = vpop.permute.xlu0 %1589 }
  0xde   : > { %2530 = vperm.xlu1 %4475, %v3954_v13   ;;  %2535 = vperm.xlu0 %4474, %v3955_v14  }
  0xe1   : > { %v5228_v20 = vpop.permute.xlu1 %1594  ;;  %v5230_v21 = vpop.permute.xlu0 %1599 }
  0xe2   : > { %2795 = vperm.xlu1 %4475, %v3982_v18   ;;  %2800 = vperm.xlu0 %4474, %v3983_v19   ;;  %v4044_v18 = vld [vmem:[%s6646_s1 + $0x450] sm:$0xff] }
  0xe5   : > { %v5238_v27 = vpop.permute.xlu1 %1800  ;;  %v5240_v28 = vpop.permute.xlu0 %1805 }
  0xe6   : > { %6650 = vst [vmem:[#allocation12_spill] sm:$0xff] %v5238_v27  ;;  %1870 = vperm.xlu1 %4475, %v3884_v23   ;;  %1875 = vperm.xlu0 %4474, %v3885_v24  }
  0xe9   : > { %v5248_v33 = vpop.permute.xlu1 %1810  ;;  %v5250_v34 = vpop.permute.xlu0 %1815 }
  0xea   : > { %2805 = vperm.xlu1 %4475, %v3984_v30   ;;  %2810 = vperm.xlu0 %4474, %v3985_v31   ;;  %v5320_v31 = vld [vmem:[%s6623_s8] ss:$0 sm:$0xff] }
  0xed   : > { %v5258_v41 = vpop.permute.xlu1 %1820  ;;  %v5260_v42 = vpop.permute.xlu0 %1825 }
  0xee   : > { %6651 = vst [vmem:[#allocation13_spill] sm:$0xff] %v5258_v41  ;;  %6652 = vst [vmem:[#allocation14_spill] sm:$0xff] %v5260_v42  ;;  %2135 = vperm.xlu1 %4475, %v3912_v37   ;;  %2140 = vperm.xlu0 %4474, %v3913_v38  }
  0xf1   : > { %v5268_v49 = vpop.permute.xlu1 %1830  ;;  %v5270_v50 = vpop.permute.xlu0 %1835 }
  0xf2   : > { %6653 = vst [vmem:[#allocation15_spill] sm:$0xff] %v5268_v49  ;;  %6654 = vst [vmem:[#allocation16_spill] sm:$0xff] %v5270_v50  ;;  %3038 = vperm.xlu1 %4475, %v4012_v45   ;;  %3043 = vperm.xlu0 %4474, %v4013_v46  }
  0xf5   : > { %v5278_v57 = vpop.permute.xlu1 %1840  ;;  %v5280_v58 = vpop.permute.xlu0 %1845 }
  0xf6   : > { %6655 = vst [vmem:[#allocation17_spill] sm:$0xff] %v5278_v57  ;;  %6656 = vst [vmem:[#allocation18_spill] sm:$0xff] %v5280_v58  ;;  %2145 = vperm.xlu1 %4475, %v3914_v53   ;;  %2150 = vperm.xlu0 %4474, %v3915_v54   ;;  %v5335_v53 = vld [vmem:[%s6624_s9] ss:$0 sm:$0xff] }
  0xf9   : > { %v5288_v1 = vpop.permute.xlu1 %1850  ;;  %v5290_v2 = vpop.permute.xlu0 %1855 }
  0xfa   : > { %6657 = vst [vmem:[#allocation19_spill] sm:$0xff] %v5288_v1  ;;  %6658 = vst [vmem:[#allocation20_spill] sm:$0xff] %v5290_v2  ;;  %3048 = vperm.xlu1 %4475, %v4014_v61   ;;  %3053 = vperm.xlu0 %4474, %v4015_v62  }
  0xfd   : > { %v5298_v13 = vpop.permute.xlu1 %1860  ;;  %v5300_v14 = vpop.permute.xlu0 %1865 }
  0xfe   : > { %6659 = vst [vmem:[#allocation21_spill] sm:$0xff] %v5298_v13  ;;  %6660 = vst [vmem:[#allocation22_spill] sm:$0xff] %v5300_v14  ;;  %3313 = vperm.xlu1 %4475, %v4042_v5   ;;  %3318 = vperm.xlu0 %4474, %v4043_v6  }
 0x101   : > { %v5308_v19 = vpop.permute.xlu1 %2075  ;;  %v5310_v23 = vpop.permute.xlu0 %2080 }
 0x102   : > { %6661 = vst [vmem:[#allocation23_spill] sm:$0xff] %v5308_v19  ;;  %3323 = vperm.xlu1 %4475, %v4044_v18  }
 0x105   : > { %v5313_v24 = vpop.permute.xlu1 %2085  ;;  %v5315_v30 = vpop.permute.xlu0 %2090 }
 0x107   : > { %v4194_v37 = vpop.f32.mrb[0].mxu0  ;;  %v4212_v38 = vpop.f32.mrb[0].mxu1 }
 0x108   : > { %727 = vst.msk [vmem:[%s5324_s24 + $0x10] sm:$0xff] %vm603_vm0, %v4194_v37  ;;  %761 = vrot.lane.b32.xlu1 %v4194_v37, %s4595_s26  ;;  %v1029_v46 = vmul.f32 %v4212_v38, %v5320_v31  ;;  %v662_v61 = vpop.f32.mrb[1].mxu0  ;;  %v957_v62 = vpop.f32.mrb[1].mxu1 }
 0x109   : > { %v5328_v45 = vpop.permute.xlu1 %2480  ;;  %v5337_v54 = vpop.permute.xlu0 %2485  ;;  %725 = vst.msk [vmem:[%s5324_s24] sm:$0xff] %vm603_vm0, %v662_v61  ;;  %757 = vrot.lane.b32.xlu0 %v662_v61, %s4595_s26  ;;  %v1027_v6 = vmul.f32 %v5320_v31, %v957_v62 }
 0x10a   : > { %6662 = vst [vmem:[#allocation24_spill] sm:$0xff] %v5328_v45  ;;  %6663 = vst [vmem:[#allocation25_spill] sm:$0xff] %v5337_v54  ;;  %v4195_v5 = vpop.f32.mrb[2].mxu0  ;;  %v4213_v18 = vpop.f32.mrb[2].mxu1  ;;  %v1052_v38 = vadd.f32 %v5335_v53, %v1029_v46 }
 0x10b   : > { %728 = vst.msk [vmem:[%s5324_s24 + $0x18] sm:$0xff] %vm603_vm0, %v4195_v5  ;;  %v665_v37 = vpop.f32.mrb[3].mxu0  ;;  %v1030_v45 = vmul.f32 %v4213_v18, %v5320_v31  ;;  %v960_v19 = vpop.f32.mrb[3].mxu1  ;;  %v1050_v61 = vadd.f32 %v5335_v53, %v1027_v6 }
 0x10c   : > { %726 = vst.msk [vmem:[%s5324_s24 + $0x8] sm:$0xff] %vm603_vm0, %v665_v37  ;;  %763 = vrot.lane.b32.xlu1 %v4195_v5, %s4595_s26  ;;  %v1028_v62 = vmul.f32 %v5320_v31, %v960_v19  ;;  %v1068_v13 = vmax.f32 %v1052_v38, 0.0 }
 0x10d   : > { %v5347_v54 = vpop.permute.xlu1 %2490  ;;  %v5354_v14 = vpop.permute.xlu0 %2495  ;;  %v1053_v27 = vadd.f32 %v5335_v53, %v1030_v45  ;;  %759 = vrot.lane.b32.xlu0 %v665_v37, %s4595_s26  ;;  %v1066_v6 = vmax.f32 %v1050_v61, 0.0 }
 0x10e   : > { %6664 = vst [vmem:[#allocation26_spill] sm:$0xff] %v5347_v54  ;;  %6665 = vst [vmem:[#allocation27_spill] sm:$0xff] %v5354_v14  ;;  %v1051_v46 = vadd.f32 %v5335_v53, %v1028_v62 }
 0x10f   : > { %v4198_v18 = vpop.f32.mrb[4].mxu0  ;;  %v1069_v54 = vmax.f32 %v1053_v27, 0.0  ;;  %v4216_v19 = vpop.f32.mrb[4].mxu1 }
 0x110   : > { %731 = vst.msk [vmem:[%s5324_s24 + $0x30] sm:$0xff] %vm603_vm0, %v4198_v18  ;;  %v678_v5 = vpop.f32.mrb[5].mxu0  ;;  %v1067_v58 = vmax.f32 %v1051_v46, 0.0  ;;  %v1033_v37 = vmul.f32 %v4216_v19, %v5320_v31  ;;  %v973_v38 = vpop.f32.mrb[5].mxu1 }
 0x111   : > { %v5361_v1 = vpop.permute.xlu1 %2755  ;;  %v5363_v2 = vpop.permute.xlu0 %2760  ;;  %729 = vst.msk [vmem:[%s5324_s24 + $0x20] sm:$0xff] %vm603_vm0, %v678_v5  ;;  %v5367_v45 = vpack.c.bf16 %v1069_v54, %v1068_v13  ;;  %769 = vrot.lane.b32.xlu0 %v4198_v18, %s4595_s26  ;;  %v1031_v61 = vmul.f32 %v5320_v31, %v973_v38 }
 0x112   : > { %6666 = vst [vmem:[#allocation28_spill] sm:$0xff] %v5361_v1  ;;  %6667 = vst [vmem:[#allocation29_spill] sm:$0xff] %v5363_v2  ;;  %v4199_v27 = vpop.f32.mrb[6].mxu0  ;;  %v5371_v62 = vpack.c.bf16 %v1067_v58, %v1066_v6  ;;  %v4217_v46 = vpop.f32.mrb[6].mxu1  ;;  %v1056_v13 = vadd.f32 %v5335_v53, %v1033_v37  ;;  %v4483_v58 = vld [vmem:[%s6625_s10 + $0x28] sm:$0xff]  }
 0x113   : > { %732 = vst.msk [vmem:[%s5324_s24 + $0x38] sm:$0xff] %vm603_vm0, %v4199_v27  ;;  %771 = vrot.lane.b32.xlu1 %v4199_v27, %s4595_s26  ;;  %v681_v2 = vpop.f32.mrb[7].mxu0  ;;  %v1034_v54 = vmul.f32 %v4217_v46, %v5320_v31  ;;  %v976_v19 = vpop.f32.mrb[7].mxu1  ;;  %v1054_v18 = vadd.f32 %v5335_v53, %v1031_v61  ;;  %v4485_v27 = vld [vmem:[%s6625_s10 + $0x38] sm:$0xff]  }
 0x114   : > { %730 = vst.msk [vmem:[%s5324_s24 + $0x28] sm:$0xff] %vm603_vm0, %v681_v2  ;;  %v1032_v6 = vmul.f32 %v5320_v31, %v976_v19  ;;  %4230 = vmatprep.mubr.msk.bf16.mxu0 %vm1106_vm1, %v5371_v62  ;;  %4250 = vmatprep.mubr.msk.bf16.mxu1 %vm1106_vm1, %v5371_v62  ;;  %v1072_v19 = vmax.f32 %v1056_v13, 0.0 }
 0x115   : > { %v5379_v1 = vpop.permute.xlu1 %2765  ;;  %v5392_v37 = vpop.permute.xlu0 %2770  ;;  %v1057_v38 = vadd.f32 %v5335_v53, %v1034_v54  ;;  %4231 = vmatmul.mubr.msk.bf16.vlgmr.msra.gmra.mrb[16].mxu0 %vm1106_vm1, %v5367_v45  ;;  %4251 = vmatmul.mubr.msk.bf16.vlgmr.msra.gmra.mrb[16].mxu1 %vm1106_vm1, %v5367_v45 }
 0x116   : > { %6668 = vst [vmem:[#allocation30_spill] sm:$0xff] %v5379_v1  ;;  %6669 = vst [vmem:[#allocation31_spill] sm:$0xff] %v5392_v37  ;;  %v1055_v61 = vadd.f32 %v5335_v53, %v1032_v6  ;;  %4267 = vmatpush3.bf16.msra.mxu0 %v5057_v17  ;;  %765 = vrot.lane.b32.xlu0 %v678_v5, %s4595_s26  ;;  %v5413_v6 = vld [vmem:[%s6625_s10 + $0x40] sm:$0xff]   ;;  %v1070_v17 = vmax.f32 %v1054_v18, 0.0 }
 0x117   : > { %v4202_v46 = vpop.f32.mrb[8].mxu0  ;;  %v1073_v54 = vmax.f32 %v1057_v38, 0.0  ;;  %767 = vrot.lane.b32.xlu1 %v681_v2, %s4595_s26  ;;  %4268 = vmatprep.subr.bf16.mxu0 %v4483_v58  ;;  %v4220_v5 = vpop.f32.mrb[8].mxu1 }
 0x118   : > { %735 = vst.msk [vmem:[%s5324_s24 + $0x50] sm:$0xff] %vm603_vm0, %v4202_v46  ;;  %v694_v1 = vpop.f32.mrb[9].mxu0  ;;  %v1071_v14 = vmax.f32 %v1055_v61, 0.0  ;;  %4287 = vmatpush3.bf16.msra.mxu1 %v5099_v29  ;;  %v1037_v13 = vmul.f32 %v4220_v5, %v5320_v31  ;;  %v989_v38 = vpop.f32.mrb[9].mxu1 }
 0x119   : > { %v5408_v37 = vpop.permute.xlu1 %2095  ;;  %v5415_v57 = vpop.permute.xlu0 %2100  ;;  %733 = vst.msk [vmem:[%s5324_s24 + $0x40] sm:$0xff] %vm603_vm0, %v694_v1  ;;  %v5420_v2 = vpack.c.bf16 %v1073_v54, %v1072_v19  ;;  %4288 = vmatprep.subr.bf16.mxu1 %v4485_v27  ;;  %v1035_v18 = vmul.f32 %v5320_v31, %v989_v38 }
 0x11a   : > { %6670 = vst [vmem:[#allocation32_spill] sm:$0xff] %v5408_v37  ;;  %6671 = vst [vmem:[#allocation33_spill] sm:$0xff] %v5415_v57  ;;  %v4203_v49 = vpop.f32.mrb[10].mxu0  ;;  %v5423_v42 = vpack.c.bf16 %v1071_v14, %v1070_v17  ;;  %v4221_v61 = vpop.f32.mrb[10].mxu1  ;;  %777 = vrot.lane.b32.xlu0 %v4202_v46, %s4595_s26  ;;  %4269 = vmatpush3.bf16.msra.mxu0 %v4483_v58  ;;  %v1060_v29 = vadd.f32 %v5335_v53, %v1037_v13  ;;  %v5440_v14 = vld [vmem:[%s6625_s10 + $0x50] sm:$0xff]  }
 0x11b   : > { %736 = vst.msk [vmem:[%s5324_s24 + $0x58] sm:$0xff] %vm603_vm0, %v4203_v49  ;;  %v697_v57 = vpop.f32.mrb[11].mxu0  ;;  %v1038_v19 = vmul.f32 %v4221_v61, %v5320_v31  ;;  %v992_v54 = vpop.f32.mrb[11].mxu1  ;;  %779 = vrot.lane.b32.xlu1 %v4203_v49, %s4595_s26  ;;  %4306 = vmatprep.subr.bf16.mxu0 %v5413_v6  ;;  %v1058_v58 = vadd.f32 %v5335_v53, %v1035_v18 }
 0x11c   : > { %734 = vst.msk [vmem:[%s5324_s24 + $0x48] sm:$0xff] %vm603_vm0, %v697_v57  ;;  %v1036_v46 = vmul.f32 %v5320_v31, %v992_v54  ;;  %4234 = vmatprep.mubr.msk.bf16.mxu0 %vm1106_vm1, %v5423_v42  ;;  %4254 = vmatprep.mubr.msk.bf16.mxu1 %vm1106_vm1, %v5423_v42  ;;  %v1076_v18 = vmax.f32 %v1060_v29, 0.0 }
 0x11d   : > { %v5432_v5 = vpop.permute.xlu1 %2998  ;;  %v5448_v49 = vpop.permute.xlu0 %3003  ;;  %v1061_v17 = vadd.f32 %v5335_v53, %v1038_v19  ;;  %4235 = vmatmul.mubr.msk.bf16.gmra.mrb[20].mxu0 %vm1106_vm1, %v5420_v2  ;;  %4255 = vmatmul.mubr.msk.bf16.gmra.mrb[20].mxu1 %vm1106_vm1, %v5420_v2 }
 0x11e   : > { %6672 = vst [vmem:[#allocation34_spill] sm:$0xff] %v5432_v5  ;;  %6673 = vst [vmem:[#allocation35_spill] sm:$0xff] %v5448_v49  ;;  %v1059_v13 = vadd.f32 %v5335_v53, %v1036_v46  ;;  %773 = vrot.lane.b32.xlu0 %v694_v1, %s4595_s26  ;;  %4289 = vmatpush3.bf16.msra.mxu1 %v4485_v27  ;;  %v1074_v5 = vmax.f32 %v1058_v58, 0.0  ;;  %v3956_v1 = vld [vmem:[%s6646_s1 + $0x2e0] sm:$0xff] }
 0x11f   : > { %v4206_v38 = vpop.f32.mrb[12].mxu0  ;;  %v1077_v61 = vmax.f32 %v1061_v17, 0.0  ;;  %775 = vrot.lane.b32.xlu1 %v697_v57, %s4595_s26  ;;  %4326 = vmatprep.subr.bf16.mxu1 %v5440_v14  ;;  %v4224_v46 = vpop.f32.mrb[12].mxu1 }
 0x120   : > { %739 = vst.msk [vmem:[%s5324_s24 + $0x70] sm:$0xff] %vm603_vm0, %v4206_v38  ;;  %v710_v19 = vpop.f32.mrb[13].mxu0  ;;  %v1075_v49 = vmax.f32 %v1059_v13, 0.0  ;;  %v1041_v27 = vmul.f32 %v4224_v46, %v5320_v31  ;;  %v1005_v29 = vpop.f32.mrb[13].mxu1 }
 0x121   : > { %v5458_v54 = vpop.permute.xlu1 %2105  ;;  %v5463_v50 = vpop.permute.xlu0 %2110  ;;  %737 = vst.msk [vmem:[%s5324_s24 + $0x60] sm:$0xff] %vm603_vm0, %v710_v19  ;;  %v5470_v57 = vpack.c.bf16 %v1077_v61, %v1076_v18  ;;  %v1039_v58 = vmul.f32 %v5320_v31, %v1005_v29 }
 0x122   : > { %6674 = vst [vmem:[#allocation36_spill] sm:$0xff] %v5458_v54  ;;  %6675 = vst [vmem:[#allocation37_spill] sm:$0xff] %v5463_v50  ;;  %v4207_v17 = vpop.f32.mrb[14].mxu0  ;;  %v5473_v54 = vpack.c.bf16 %v1075_v49, %v1074_v5  ;;  %v4225_v13 = vpop.f32.mrb[14].mxu1  ;;  %785 = vrot.lane.b32.xlu0 %v4206_v38, %s4595_s26  ;;  %v1064_v37 = vadd.f32 %v5335_v53, %v1041_v27 }
 0x123   : > { %740 = vst.msk [vmem:[%s5324_s24 + $0x78] sm:$0xff] %vm603_vm0, %v4207_v17  ;;  %v713_v50 = vpop.f32.mrb[15].mxu0  ;;  %v1042_v41 = vmul.f32 %v4225_v13, %v5320_v31  ;;  %v1008_v18 = vpop.f32.mrb[15].mxu1  ;;  %2540 = vperm.xlu1 %4475, %v3956_v1   ;;  %v1062_v5 = vadd.f32 %v5335_v53, %v1039_v58 }
 0x124   : > { %738 = vst.msk [vmem:[%s5324_s24 + $0x68] sm:$0xff] %vm603_vm0, %v713_v50  ;;  %v1040_v49 = vmul.f32 %v5320_v31, %v1008_v18  ;;  %4238 = vmatprep.mubr.msk.bf16.mxu0 %vm1106_vm1, %v5473_v54  ;;  %4258 = vmatprep.mubr.msk.bf16.mxu1 %vm1106_vm1, %v5473_v54  ;;  %v1080_v31 = vmax.f32 %v1064_v37, 0.0 }
 0x125   : > { %v5481_v61 = vpop.permute.xlu1 %3008  ;;  %v5491_v38 = vpop.permute.xlu0 %3013  ;;  %v1065_v46 = vadd.f32 %v5335_v53, %v1042_v41  ;;  %4239 = vmatmul.mubr.msk.bf16.gmra.mrb[24].mxu0 %vm1106_vm1, %v5470_v57  ;;  %4259 = vmatmul.mubr.msk.bf16.gmra.mrb[24].mxu1 %vm1106_vm1, %v5470_v57  ;;  %v4045_v41 = vld [vmem:[%s6646_s1 + $0x458] sm:$0xff]  ;;  %v1078_v58 = vmax.f32 %v1062_v5, 0.0 }
 0x126   : > { %6676 = vst [vmem:[#allocation38_spill] sm:$0xff] %v5481_v61  ;;  %6677 = vst [vmem:[#allocation39_spill] sm:$0xff] %v5491_v38  ;;  %v1063_v1 = vadd.f32 %v5335_v53, %v1040_v49  ;;  %781 = vrot.lane.b32.xlu0 %v710_v19, %s4595_s26  ;;  %v3957_v19 = vld [vmem:[%s6646_s1 + $0x2e8] sm:$0xff]  ;;  %v3959_v49 = vld [vmem:[%s6646_s1 + $0x2f8] sm:$0xff] }
 0x127   : > { %v1081_v27 = vmax.f32 %v1065_v46, 0.0  ;;  %787 = vrot.lane.b32.xlu1 %v4207_v17, %s4595_s26  ;;  %v3958_v17 = vld [vmem:[%s6646_s1 + $0x2f0] sm:$0xff]  ;;  %v3986_v46 = vld [vmem:[%s6646_s1 + $0x360] sm:$0xff] }
 0x128   : > { %v1079_v13 = vmax.f32 %v1063_v1, 0.0 }
 0x129   : > { %v5501_v29 = vpop.permute.xlu1 %3273  ;;  %v5506_v18 = vpop.permute.xlu0 %3278  ;;  %v5508_v38 = vpack.c.bf16 %v1081_v27, %v1080_v31  ;;  %v3987_v27 = vld [vmem:[%s6646_s1 + $0x368] sm:$0xff] }
 0x12a   : > { %6678 = vst [vmem:[#allocation40_spill] sm:$0xff] %v5501_v29  ;;  %6679 = vst [vmem:[#allocation41_spill] sm:$0xff] %v5506_v18  ;;  %v5510_v61 = vpack.c.bf16 %v1079_v13, %v1078_v58  ;;  %3328 = vperm.xlu0 %4474, %v4045_v41   ;;  %v4487_v41 = vld [vmem:[%s6625_s10 + $0x48] sm:$0xff]   ;;  %v3988_v58 = vld [vmem:[%s6646_s1 + $0x370] sm:$0xff] }
 0x12b   : > { %783 = vrot.lane.b32.xlu1 %v713_v50, %s4595_s26  ;;  %v4489_v13 = vld [vmem:[%s6625_s10 + $0x58] sm:$0xff]   ;;  %v4046_v29 = vld [vmem:[%s6646_s1 + $0x460] sm:$0xff] }
 0x12c   : > { %4242 = vmatprep.mubr.msk.bf16.mxu0 %vm1106_vm1, %v5510_v61  ;;  %4262 = vmatprep.mubr.msk.bf16.mxu1 %vm1106_vm1, %v5510_v61 }
 0x12d   : > { %v5513_v53 = vpop.permute.xlu1 %3283  ;;  %v5519_v37 = vpop.permute.xlu0 %3288  ;;  %4243 = vmatmul.mubr.msk.bf16.gmra.mrb[28].mxu0 %vm1106_vm1, %v5508_v38  ;;  %4263 = vmatmul.mubr.msk.bf16.gmra.mrb[28].mxu1 %vm1106_vm1, %v5508_v38 }
 0x12e   : > { %6680 = vst [vmem:[#allocation42_spill] sm:$0xff] %v5513_v53  ;;  %6681 = vst [vmem:[#allocation43_spill] sm:$0xff] %v5519_v37  ;;  %4270 = vmatprep.mubr.msk.bf16.mxu0 %vm1106_vm1, %v5371_v62  ;;  %4290 = vmatprep.mubr.msk.bf16.mxu1 %vm1106_vm1, %v5371_v62  ;;  %v4017_v37 = vld [vmem:[%s6646_s1 + $0x3e8] sm:$0xff]  ;;  %v4492_v53 = vld [vmem:[%s6625_s10 + $0x70] sm:$0xff]  }
 0x12f   : > { %2545 = vperm.xlu0 %4474, %v3957_v19   ;;  %2550 = vperm.xlu1 %4475, %v3958_v17   ;;  %v4490_v17 = vld [vmem:[%s6625_s10 + $0x60] sm:$0xff]  }
 0x131   : > { %v5535_v50 = vpop.permute.xlu1 %2500  ;;  %v5537_v5 = vpop.permute.xlu0 %2505 }
 0x132   : > { %6682 = vst [vmem:[#allocation44_spill] sm:$0xff] %v5535_v50  ;;  %6683 = vst [vmem:[#allocation45_spill] sm:$0xff] %v5537_v5 }
 0x133   : > { %2555 = vperm.xlu0 %4474, %v3959_v49   ;;  %2815 = vperm.xlu1 %4475, %v3986_v46   ;;  %v4016_v46 = vld [vmem:[%s6646_s1 + $0x3e0] sm:$0xff] }
 0x135   : > { %v5545_v1 = vpop.permute.xlu1 %2510  ;;  %v5547_v31 = vpop.permute.xlu0 %2515  ;;  %4271 = vmatmul.mubr.msk.bf16.vlgmr.msra.gmra.mrb[32].mxu0 %vm1106_vm1, %v5367_v45  ;;  %4291 = vmatmul.mubr.msk.bf16.vlgmr.msra.gmra.mrb[32].mxu1 %vm1106_vm1, %v5367_v45 }
 0x136   : > { %6684 = vst [vmem:[#allocation46_spill] sm:$0xff] %v5545_v1  ;;  %6685 = vst [vmem:[#allocation47_spill] sm:$0xff] %v5547_v31  ;;  %4307 = vmatpush3.bf16.msra.mxu0 %v5413_v6  ;;  %4274 = vmatprep.mubr.msk.bf16.mxu0 %vm1106_vm1, %v5423_v42  ;;  %v3989_v6 = vld [vmem:[%s6646_s1 + $0x378] sm:$0xff] }
 0x137   : > { %4294 = vmatprep.mubr.msk.bf16.mxu1 %vm1106_vm1, %v5423_v42  ;;  %2820 = vperm.xlu0 %4474, %v3987_v27  }
 0x138   : > { %2825 = vperm.xlu1 %4475, %v3988_v58   ;;  %4308 = vmatprep.subr.bf16.mxu0 %v4487_v41 }
 0x139   : > { %v5570_v19 = vpop.permute.xlu1 %2775  ;;  %v5575_v49 = vpop.permute.xlu0 %2780  ;;  %4327 = vmatpush3.bf16.msra.mxu1 %v5440_v14  ;;  %v4018_v14 = vld [vmem:[%s6646_s1 + $0x3f0] sm:$0xff] }
 0x13a   : > { %6686 = vst [vmem:[#allocation48_spill] sm:$0xff] %v5570_v19  ;;  %6687 = vst [vmem:[#allocation49_spill] sm:$0xff] %v5575_v49  ;;  %4309 = vmatpush3.bf16.msra.mxu0 %v4487_v41  ;;  %4328 = vmatprep.subr.bf16.mxu1 %v4489_v13 }
 0x13b   : > { %2830 = vperm.xlu0 %4474, %v3989_v6   ;;  %4346 = vmatprep.subr.bf16.mxu0 %v4490_v17 }
 0x13c   : > { %3058 = vperm.xlu1 %4475, %v4016_v46   ;;  %v4019_v46 = vld [vmem:[%s6646_s1 + $0x3f8] sm:$0xff] }
 0x13d   : > { %v5584_v27 = vpop.permute.xlu1 %2785  ;;  %v5586_v58 = vpop.permute.xlu0 %2790  ;;  %4275 = vmatmul.mubr.msk.bf16.gmra.mrb[36].mxu0 %vm1106_vm1, %v5420_v2  ;;  %4295 = vmatmul.mubr.msk.bf16.gmra.mrb[36].mxu1 %vm1106_vm1, %v5420_v2 }
 0x13e   : > { %6688 = vst [vmem:[#allocation50_spill] sm:$0xff] %v5584_v27  ;;  %6689 = vst [vmem:[#allocation51_spill] sm:$0xff] %v5586_v58  ;;  %4278 = vmatprep.mubr.msk.bf16.mxu0 %vm1106_vm1, %v5473_v54  ;;  %4298 = vmatprep.mubr.msk.bf16.mxu1 %vm1106_vm1, %v5473_v54  ;;  %v4049_v58 = vld [vmem:[%s6646_s1 + $0x478] sm:$0xff] }
 0x13f   : > { %3063 = vperm.xlu0 %4474, %v4017_v37   ;;  %4329 = vmatpush3.bf16.msra.mxu1 %v4489_v13  ;;  %v4047_v13 = vld [vmem:[%s6646_s1 + $0x468] sm:$0xff] }
 0x140   : > { %3068 = vperm.xlu1 %4475, %v4018_v14   ;;  %4366 = vmatprep.subr.bf16.mxu1 %v4492_v53  ;;  %v4048_v14 = vld [vmem:[%s6646_s1 + $0x470] sm:$0xff]  ;;  %s4502_s1 = sshll.u32 %s4596_s0, 4  ;;  %s4503_s1 = int_to_ptr.vmem [resolvable:$false] %s4502_s1 }
 0x141   : > { %v5605_v41 = vpop.permute.xlu1 %2115  ;;  %v5607_v6 = vpop.permute.xlu0 %2120  ;;  %s4504_s2 = scalar_lea.vmem %s4503_s1, 4096  ;;  %p4505_p0 = scmp.lt.s32.totalorder %s6522_s27, %s4503_s1 }
 0x142   : > { %p4506_p1 = scmp.lt.s32.totalorder %s4504_s2, %s4498_s25 }
 0x143   : > { %3073 = vperm.xlu0 %4474, %v4019_v46  }
 0x144   : > { %3333 = vperm.xlu1 %4475, %v4046_v29   ;;  %p4507_p2 = por %p4506_p1, %p4505_p0 }
 0x145   : > { %v5615_v18 = vpop.permute.xlu1 %3018  ;;  %v5617_v37 = vpop.permute.xlu0 %3023  ;;  %4279 = vmatmul.mubr.msk.bf16.gmra.mrb[40].mxu0 %vm1106_vm1, %v5470_v57  ;;  %4299 = vmatmul.mubr.msk.bf16.gmra.mrb[40].mxu1 %vm1106_vm1, %v5470_v57 }
 0x146   : > { %6690 = vst [vmem:[#allocation52_spill] sm:$0xff] %v5615_v18  ;;  %6691 = vst [vmem:[#allocation53_spill] sm:$0xff] %v5617_v37  ;;  %4282 = vmatprep.mubr.msk.bf16.mxu0 %vm1106_vm1, %v5510_v61  ;;  %4302 = vmatprep.mubr.msk.bf16.mxu1 %vm1106_vm1, %v5510_v61  ;;  %p4508_p3 = pnand %p4507_p2, %p4501_p13 }
 0x147   : > { %3338 = vperm.xlu0 %4474, %v4047_v13  }
 0x148   : > { %3343 = vperm.xlu1 %4475, %v4048_v14  }
 0x149   : > { %v5633_v29 = vpop.permute.xlu1 %2125  ;;  %v5635_v46 = vpop.permute.xlu0 %2130 }
 0x14b   : > { %3348 = vperm.xlu0 %4474, %v4049_v58  }
 0x14d   : > { %v5640_v18 = vpop.permute.xlu1 %3028  ;;  %v5642_v37 = vpop.permute.xlu0 %3033  ;;  %4283 = vmatmul.mubr.msk.bf16.gmra.mrb[44].mxu0 %vm1106_vm1, %v5508_v38  ;;  %4303 = vmatmul.mubr.msk.bf16.gmra.mrb[44].mxu1 %vm1106_vm1, %v5508_v38 }
 0x14e   : > { %6692 = vst [vmem:[#allocation54_spill] sm:$0xff] %v5640_v18  ;;  %6693 = vst [vmem:[#allocation55_spill] sm:$0xff] %v5642_v37  ;;  %4310 = vmatprep.mubr.msk.bf16.mxu0 %vm1106_vm1, %v5371_v62  ;;  %4330 = vmatprep.mubr.msk.bf16.mxu1 %vm1106_vm1, %v5371_v62  ;;  %v4491_v37 = vld [vmem:[%s6625_s10 + $0x68] sm:$0xff]  }
 0x151   : > { %v5652_v13 = vpop.permute.xlu1 %3293  ;;  %v5654_v14 = vpop.permute.xlu0 %3298 }
 0x152   : > { %6694 = vst [vmem:[#allocation56_spill] sm:$0xff] %v5652_v13  ;;  %6695 = vst [vmem:[#allocation57_spill] sm:$0xff] %v5654_v14  ;;  %v4493_v13 = vld [vmem:[%s6625_s10 + $0x78] sm:$0xff]  }
 0x155   : > { %v5656_v58 = vpop.permute.xlu1 %3303  ;;  %v5661_v18 = vpop.permute.xlu0 %3308  ;;  %4311 = vmatmul.mubr.msk.bf16.vlgmr.msra.gmra.mrb[48].mxu0 %vm1106_vm1, %v5367_v45  ;;  %4331 = vmatmul.mubr.msk.bf16.vlgmr.msra.gmra.mrb[48].mxu1 %vm1106_vm1, %v5367_v45 }
 0x156   : > { %6696 = vst [vmem:[#allocation58_spill] sm:$0xff] %v5656_v58  ;;  %6697 = vst [vmem:[#allocation59_spill] sm:$0xff] %v5661_v18  ;;  %4347 = vmatpush3.bf16.msra.mxu0 %v4490_v17  ;;  %4314 = vmatprep.mubr.msk.bf16.mxu0 %vm1106_vm1, %v5423_v42  ;;  %v4494_v18 = vld [vmem:[%s6625_s10 + $0x80] sm:$0xff]  }
 0x157   : > { %4334 = vmatprep.mubr.msk.bf16.mxu1 %vm1106_vm1, %v5423_v42  ;;  %4348 = vmatprep.subr.bf16.mxu0 %v4491_v37 }
 0x158   : > { %4367 = vmatpush3.bf16.msra.mxu1 %v4492_v53 }
 0x159   : > { %v5674_v58 = vpop.permute.xlu1 %2520  ;;  %v5679_v14 = vpop.permute.xlu0 %2525  ;;  %4368 = vmatprep.subr.bf16.mxu1 %v4493_v13 }
 0x15a   : > { %6698 = vst [vmem:[#allocation60_spill] sm:$0xff] %v5674_v58  ;;  %6699 = vst [vmem:[#allocation61_spill] sm:$0xff] %v5679_v14  ;;  %4349 = vmatpush3.bf16.msra.mxu0 %v4491_v37  ;;  %v4495_v58 = vld [vmem:[%s6625_s10 + $0x88] sm:$0xff]  }
 0x15b   : > { %4386 = vmatprep.subr.bf16.mxu0 %v4494_v18 }
 0x15c   : > { %4369 = vmatpush3.bf16.msra.mxu1 %v4493_v13 }
 0x15d   : > { %v5681_v49 = vpop.permute.xlu1 %2530  ;;  %v5683_v17 = vpop.permute.xlu0 %2535  ;;  %4315 = vmatmul.mubr.msk.bf16.gmra.mrb[52].mxu0 %vm1106_vm1, %v5420_v2  ;;  %4335 = vmatmul.mubr.msk.bf16.gmra.mrb[52].mxu1 %vm1106_vm1, %v5420_v2 }
 0x15e   : > { %6700 = vst [vmem:[#allocation62_spill] sm:$0xff] %v5681_v49  ;;  %6701 = vst [vmem:[#allocation63_spill] sm:$0xff] %v5683_v17  ;;  %4318 = vmatprep.mubr.msk.bf16.mxu0 %vm1106_vm1, %v5473_v54  ;;  %4338 = vmatprep.mubr.msk.bf16.mxu1 %vm1106_vm1, %v5473_v54 }
 0x161   : > { %v5693_v53 = vpop.permute.xlu1 %2795  ;;  %v5695_v37 = vpop.permute.xlu0 %2800 }
 0x162   : > { %6702 = vst [vmem:[#allocation64_spill] sm:$0xff] %v5693_v53  ;;  %6703 = vst [vmem:[#allocation65_spill] sm:$0xff] %v5695_v37 }
 0x165   : > { %v5697_v19 = vpop.permute.xlu1 %1870  ;;  %v5699_v27 = vpop.permute.xlu0 %1875  ;;  %4319 = vmatmul.mubr.msk.bf16.gmra.mrb[56].mxu0 %vm1106_vm1, %v5470_v57  ;;  %4339 = vmatmul.mubr.msk.bf16.gmra.mrb[56].mxu1 %vm1106_vm1, %v5470_v57 }
 0x166   : > { %6704 = vst [vmem:[#allocation66_spill] sm:$0xff] %v5697_v19  ;;  %6705 = vst [vmem:[#allocation67_spill] sm:$0xff] %v5699_v27  ;;  %4322 = vmatprep.mubr.msk.bf16.mxu0 %vm1106_vm1, %v5510_v61  ;;  %4342 = vmatprep.mubr.msk.bf16.mxu1 %vm1106_vm1, %v5510_v61 }
 0x169   : > { %v5709_v13 = vpop.permute.xlu1 %2805  ;;  %v5711_v53 = vpop.permute.xlu0 %2810 }
 0x16a   : > { %6706 = vst [vmem:[#allocation68_spill] sm:$0xff] %v5709_v13  ;;  %6707 = vst [vmem:[#allocation69_spill] sm:$0xff] %v5711_v53 }
 0x16d   : > { %v5713_v37 = vpop.permute.xlu1 %2135  ;;  %v5715_v17 = vpop.permute.xlu0 %2140  ;;  %4323 = vmatmul.mubr.msk.bf16.gmra.mrb[60].mxu0 %vm1106_vm1, %v5508_v38  ;;  %4343 = vmatmul.mubr.msk.bf16.gmra.mrb[60].mxu1 %vm1106_vm1, %v5508_v38 }
 0x16e   : > { %6708 = vst [vmem:[#allocation70_spill] sm:$0xff] %v5713_v37  ;;  %6709 = vst [vmem:[#allocation71_spill] sm:$0xff] %v5715_v17  ;;  %4350 = vmatprep.mubr.msk.bf16.mxu0 %vm1106_vm1, %v5371_v62  ;;  %4370 = vmatprep.mubr.msk.bf16.mxu1 %vm1106_vm1, %v5371_v62 }
 0x171   : > { %v5725_v14 = vpop.permute.xlu1 %3038  ;;  %v5727_v13 = vpop.permute.xlu0 %3043 }
 0x172   : > { %6710 = vst [vmem:[#allocation72_spill] sm:$0xff] %v5725_v14  ;;  %6711 = vst [vmem:[#allocation73_spill] sm:$0xff] %v5727_v13 }
 0x175   : > { %v5729_v53 = vpop.permute.xlu1 %2145  ;;  %v5734_v49 = vpop.permute.xlu0 %2150  ;;  %4351 = vmatmul.mubr.msk.bf16.vlgmr.msra.gmra.mrb[64].mxu0 %vm1106_vm1, %v5367_v45  ;;  %4371 = vmatmul.mubr.msk.bf16.vlgmr.msra.gmra.mrb[64].mxu1 %vm1106_vm1, %v5367_v45 }
 0x176   : > { %6712 = vst [vmem:[#allocation74_spill] sm:$0xff] %v5729_v53  ;;  %6713 = vst [vmem:[#allocation75_spill] sm:$0xff] %v5734_v49  ;;  %4387 = vmatpush3.bf16.msra.mxu0 %v4494_v18  ;;  %4354 = vmatprep.mubr.msk.bf16.mxu0 %vm1106_vm1, %v5423_v42 }
 0x177   : > { %4374 = vmatprep.mubr.msk.bf16.mxu1 %vm1106_vm1, %v5423_v42  ;;  %4388 = vmatprep.subr.bf16.mxu0 %v4495_v58 }
 0x179   : > { %v5744_v14 = vpop.permute.xlu1 %3048  ;;  %v5746_v13 = vpop.permute.xlu0 %3053 }
 0x17a   : > { %6714 = vst [vmem:[#allocation76_spill] sm:$0xff] %v5744_v14  ;;  %6715 = vst [vmem:[#allocation77_spill] sm:$0xff] %v5746_v13  ;;  %4389 = vmatpush3.bf16.msra.mxu0 %v4495_v58 }
 0x17d   : > { %v5748_v31 = vpop.permute.xlu1 %3313  ;;  %v5750_v5 = vpop.permute.xlu0 %3318  ;;  %4355 = vmatmul.mubr.msk.bf16.gmra.mrb[68].mxu0 %vm1106_vm1, %v5420_v2  ;;  %4375 = vmatmul.mubr.msk.bf16.gmra.mrb[68].mxu1 %vm1106_vm1, %v5420_v2 }
 0x17e   : > { %6716 = vst [vmem:[#allocation78_spill] sm:$0xff] %v5748_v31  ;;  %6717 = vst [vmem:[#allocation79_spill] sm:$0xff] %v5750_v5  ;;  %4358 = vmatprep.mubr.msk.bf16.mxu0 %vm1106_vm1, %v5473_v54  ;;  %4378 = vmatprep.mubr.msk.bf16.mxu1 %vm1106_vm1, %v5473_v54 }
 0x181   : > { %v5760_v18 = vpop.permute.xlu1 %3323  ;;  %v758_v13 = vpop.permute.xlu0 %757 }
 0x182   : > { %6718 = vst [vmem:[#allocation80_spill] sm:$0xff] %v5760_v18  ;;  %805 = vst.msk [vmem:[%s5764_s29] sm:$0xff] %vm603_vm0, %v758_v13 }
 0x185   : > { %v762_v58 = vpop.permute.xlu1 %761  ;;  %v760_v31 = vpop.permute.xlu0 %759  ;;  %4359 = vmatmul.mubr.msk.bf16.gmra.mrb[72].mxu0 %vm1106_vm1, %v5470_v57  ;;  %4379 = vmatmul.mubr.msk.bf16.gmra.mrb[72].mxu1 %vm1106_vm1, %v5470_v57 }
 0x186   : > { %807 = vst.msk [vmem:[%s5764_s29 + $0x10] sm:$0xff] %vm603_vm0, %v762_v58  ;;  %806 = vst.msk [vmem:[%s5764_s29 + $0x8] sm:$0xff] %vm603_vm0, %v760_v31  ;;  %4362 = vmatprep.mubr.msk.bf16.mxu0 %vm1106_vm1, %v5510_v61  ;;  %4382 = vmatprep.mubr.msk.bf16.mxu1 %vm1106_vm1, %v5510_v61 }
 0x189   : > { %v764_v13 = vpop.permute.xlu1 %763  ;;  %v770_v58 = vpop.permute.xlu0 %769 }
 0x18a   : > { %808 = vst.msk [vmem:[%s5764_s29 + $0x18] sm:$0xff] %vm603_vm0, %v764_v13  ;;  %811 = vst.msk [vmem:[%s5764_s29 + $0x30] sm:$0xff] %vm603_vm0, %v770_v58 }
 0x18d   : > { %v772_v18 = vpop.permute.xlu1 %771  ;;  %v766_v5 = vpop.permute.xlu0 %765  ;;  %4363 = vmatmul.mubr.msk.bf16.gmra.mrb[76].mxu0 %vm1106_vm1, %v5508_v38  ;;  %4383 = vmatmul.mubr.msk.bf16.gmra.mrb[76].mxu1 %vm1106_vm1, %v5508_v38 }
 0x18e   : > { %812 = vst.msk [vmem:[%s5764_s29 + $0x38] sm:$0xff] %vm603_vm0, %v772_v18  ;;  %809 = vst.msk [vmem:[%s5764_s29 + $0x20] sm:$0xff] %vm603_vm0, %v766_v5  ;;  %4390 = vmatprep.mubr.msk.bf16.mxu0 %vm1106_vm1, %v5371_v62 }
 0x191   : > { %v768_v31 = vpop.permute.xlu1 %767  ;;  %v778_v13 = vpop.permute.xlu0 %777 }
 0x192   : > { %810 = vst.msk [vmem:[%s5764_s29 + $0x28] sm:$0xff] %vm603_vm0, %v768_v31  ;;  %815 = vst.msk [vmem:[%s5764_s29 + $0x50] sm:$0xff] %vm603_vm0, %v778_v13 }
 0x195   : > { %v780_v18 = vpop.permute.xlu1 %779  ;;  %v774_v58 = vpop.permute.xlu0 %773  ;;  %4391 = vmatmul.mubr.msk.bf16.vlgmr.msra.gmra.mrb[80].mxu0 %vm1106_vm1, %v5367_v45 }
 0x196   : > { %816 = vst.msk [vmem:[%s5764_s29 + $0x58] sm:$0xff] %vm603_vm0, %v780_v18  ;;  %813 = vst.msk [vmem:[%s5764_s29 + $0x40] sm:$0xff] %vm603_vm0, %v774_v58  ;;  %4394 = vmatprep.mubr.msk.bf16.mxu0 %vm1106_vm1, %v5423_v42 }
 0x199   : > { %v776_v62 = vpop.permute.xlu1 %775  ;;  %v786_v5 = vpop.permute.xlu0 %785 }
 0x19a   : > { %814 = vst.msk [vmem:[%s5764_s29 + $0x48] sm:$0xff] %vm603_vm0, %v776_v62  ;;  %819 = vst.msk [vmem:[%s5764_s29 + $0x70] sm:$0xff] %vm603_vm0, %v786_v5 }
 0x19d   : > { %v782_v31 = vpop.permute.xlu0 %781  ;;  %4395 = vmatmul.mubr.msk.bf16.gmra.mrb[84].mxu0 %vm1106_vm1, %v5420_v2  ;;  %v1244_v2 = vlaneseq }
 0x19e   : > { %817 = vst.msk [vmem:[%s5764_s29 + $0x60] sm:$0xff] %vm603_vm0, %v782_v31  ;;  %4398 = vmatprep.mubr.msk.bf16.mxu0 %vm1106_vm1, %v5473_v54  ;;  %v4496_v31 = vld [vmem:[%s6628_s13] sm:$0xff]  }
 0x19f   : > { %v5828_v18 = vshrl.u32 %v1244_v2, 7  ;;  %4406 = vmatprep.subr.bf16.mxu1 %v4496_v31 }
 0x1a0   : > { %4407 = vmatpush3.bf16.msra.mxu1 %v4496_v31 }
 0x1a1   : > { %vm1246_vm2 = vcmp.lt.s32.totalorder %v5828_v18, 1  ;;  %vm1764_vm3 = vcmp.lt.s32.totalorder %v5828_v18, 7 }
 0x1a2   : > { %v5816_v45 = vpop.permute.xlu1 %2540 }
 0x1a3   : > { %6719 = vst [vmem:[#allocation81_spill] sm:$0xff] %v5816_v45 }
 0x1a5   : > { %4399 = vmatmul.mubr.msk.bf16.gmra.mrb[88].mxu0 %vm1106_vm1, %v5470_v57 }
 0x1a6   : > { %4402 = vmatprep.mubr.msk.bf16.mxu0 %vm1106_vm1, %v5510_v61  ;;  %v788_v42 = vpop.permute.xlu1 %787 }
 0x1a7   : > { %820 = vst.msk [vmem:[%s5764_s29 + $0x78] sm:$0xff] %vm603_vm0, %v788_v42 }
 0x1aa   : > { %v784_v13 = vpop.permute.xlu1 %783 }
 0x1ab   : > { %818 = vst.msk [vmem:[%s5764_s29 + $0x68] sm:$0xff] %vm603_vm0, %v784_v13 }
 0x1ad   : > { %4403 = vmatmul.mubr.msk.bf16.gmra.mrb[92].mxu0 %vm1106_vm1, %v5508_v38 }
 0x1e8   : > { %v4232_v54 = vpop.f32.mrb[16].mxu0  ;;  %v4252_v58 = vpop.f32.mrb[16].mxu1 }
 0x1e9   : > { %v5830_v62 = vpop.f32.mrb[17].mxu0  ;;  %v5832_v57 = vpop.f32.mrb[17].mxu1  ;;  %v1230_v42 = vrot.slane %v4232_v54, 7 }
 0x1ea   : > { %v4233_v5 = vpop.f32.mrb[18].mxu0  ;;  %v4253_v61 = vpop.f32.mrb[18].mxu1  ;;  %v6635_v2 = vrot.slane %v5830_v62, 7 }
 0x1eb   : > { %v1231_v13 = vrot.slane %v4233_v5, 7  ;;  %v1168_v38 = vpop.f32.mrb[19].mxu0  ;;  %v1445_v14 = vpop.f32.mrb[19].mxu1  ;;  %v1606_v17 = vmul.f32 %v4253_v61, %v5178_v59  ;;  %v1605_v5 = vmul.f32 %v4252_v58, %v5170_v56 }
 0x1ec   : > { %v1229_v45 = vrot.slane %v1168_v38, 7  ;;  %v1604_v31 = vmul.f32 %v5168_v55, %v1445_v14 }
 0x1ed   : > { %v1259_v50 = vsel %vm1246_vm2, %v1230_v42, %v1231_v13 }
 0x1ee   : > { %v1363_v1 = vmul.f32 %v5092_v8, %v1259_v50  ;;  %v1260_v49 = vsel %vm1246_vm2, %v1229_v45, %v1230_v42  ;;  %v1261_v54 = vsel %vm1246_vm2, %v6635_v2, %v1229_v45 }
 0x1ef   : > { %v1362_v38 = vmul.f32 %v5084_v26, %v1260_v49  ;;  %v1361_v37 = vmul.f32 %v5082_v25, %v1261_v54 }
 0x1f0   : > { %v5853_v53 = vadd.f32 %v1606_v17, %v1363_v1  ;;  %v4236_v8 = vpop.f32.mrb[20].mxu0  ;;  %v4256_v59 = vpop.f32.mrb[20].mxu1 }
 0x1f1   : > { %v5855_v50 = vadd.f32 %v1604_v31, %v1361_v37  ;;  %v1181_v61 = vpop.f32.mrb[21].mxu0  ;;  %v1458_v42 = vpop.f32.mrb[21].mxu1  ;;  %v5857_v19 = vadd.f32 %v1605_v5, %v1362_v38  ;;  %v1234_v56 = vrot.slane %v4236_v8, 7  ;;  %v1609_v1 = vmul.f32 %v4256_v59, %v5190_v0 }
 0x1f2   : > { %v1232_v27 = vrot.slane %v1181_v61, 7  ;;  %v4237_v45 = vpop.f32.mrb[22].mxu0  ;;  %v4257_v2 = vpop.f32.mrb[22].mxu1  ;;  %v1607_v17 = vmul.f32 %v5180_v60, %v1458_v42 }
 0x1f3   : > { %v1235_v58 = vrot.slane %v4237_v45, 7  ;;  %v1184_v26 = vpop.f32.mrb[23].mxu0  ;;  %v1461_v49 = vpop.f32.mrb[23].mxu1  ;;  %v1610_v5 = vmul.f32 %v4257_v2, %v5198_v3 }
 0x1f4   : > { %v1258_v25 = vsel %vm1246_vm2, %v1231_v13, %v1232_v27  ;;  %v1233_v55 = vrot.slane %v1184_v26, 7  ;;  %v1608_v60 = vmul.f32 %v5188_v63, %v1461_v49 }
 0x1f5   : > { %v1364_v14 = vmul.f32 %v5094_v12, %v1258_v25  ;;  %v1255_v37 = vsel %vm1246_vm2, %v1234_v56, %v1235_v58 }
 0x1f6   : > { %v1367_v54 = vmul.f32 %v5118_v35, %v1255_v37  ;;  %v1256_v38 = vsel %vm1246_vm2, %v1233_v55, %v1234_v56  ;;  %v1257_v13 = vsel %vm1246_vm2, %v1232_v27, %v1233_v55  ;;  %v4497_v37 = vld [vmem:[%s6628_s13 + $0x8] sm:$0xff]  }
 0x1f7   : > { %v5872_v31 = vadd.f32 %v1607_v17, %v1364_v14  ;;  %v1366_v0 = vmul.f32 %v5110_v32, %v1256_v38  ;;  %v1365_v12 = vmul.f32 %v5108_v11, %v1257_v13  ;;  %4408 = vmatprep.subr.bf16.mxu1 %v4497_v37 }
 0x1f8   : > { %v5877_v8 = vadd.f32 %v1610_v5, %v1367_v54  ;;  %v4240_v59 = vpop.f32.mrb[24].mxu0  ;;  %v4260_v35 = vpop.f32.mrb[24].mxu1  ;;  %4409 = vmatpush3.bf16.msra.mxu1 %v4497_v37 }
 0x1f9   : > { %v5879_v61 = vadd.f32 %v1608_v60, %v1365_v12  ;;  %v1197_v3 = vpop.f32.mrb[25].mxu0  ;;  %v1474_v2 = vpop.f32.mrb[25].mxu1  ;;  %v5881_v42 = vadd.f32 %v1609_v1, %v1366_v0  ;;  %v1238_v26 = vrot.slane %v4240_v59, 7  ;;  %v1613_v49 = vmul.f32 %v4260_v35, %v5210_v10 }
 0x1fa   : > { %v1236_v45 = vrot.slane %v1197_v3, 7  ;;  %v4241_v27 = vpop.f32.mrb[26].mxu0  ;;  %v4261_v56 = vpop.f32.mrb[26].mxu1  ;;  %v1611_v17 = vmul.f32 %v5200_v4, %v1474_v2 }
 0x1fb   : > { %v1239_v25 = vrot.slane %v4241_v27, 7  ;;  %v1200_v32 = vpop.f32.mrb[27].mxu0  ;;  %v1477_v55 = vpop.f32.mrb[27].mxu1  ;;  %v1614_v5 = vmul.f32 %v4261_v56, %v5218_v15 }
 0x1fc   : > { %v1254_v11 = vsel %vm1246_vm2, %v1235_v58, %v1236_v45  ;;  %v1237_v63 = vrot.slane %v1200_v32, 7  ;;  %v1612_v13 = vmul.f32 %v5208_v7, %v1477_v55 }
 0x1fd   : > { %v1368_v14 = vmul.f32 %v5120_v36, %v1254_v11  ;;  %v1251_v1 = vsel %vm1246_vm2, %v1238_v26, %v1239_v25 }
 0x1fe   : > { %v1371_v54 = vmul.f32 %v5138_v43, %v1251_v1  ;;  %v1252_v58 = vsel %vm1246_vm2, %v1237_v63, %v1238_v26  ;;  %v1253_v10 = vsel %vm1246_vm2, %v1236_v45, %v1237_v63 }
 0x1ff   : > { %v5899_v36 = vadd.f32 %v1611_v17, %v1368_v14  ;;  %v1370_v4 = vmul.f32 %v5130_v40, %v1252_v58  ;;  %v1369_v38 = vmul.f32 %v5128_v39, %v1253_v10  ;;  %v1603_v39 = vmul.f32 %v5160_v52, %v5832_v57 }
 0x200   : > { %v5904_v0 = vadd.f32 %v1614_v5, %v1371_v54  ;;  %v4244_v43 = vpop.f32.mrb[28].mxu0  ;;  %v4264_v12 = vpop.f32.mrb[28].mxu1  ;;  %v6720_v14 = vrot.slane %v5830_v62, 7 }
 0x201   : > { %v5906_v15 = vadd.f32 %v1612_v13, %v1369_v38  ;;  %v1213_v60 = vpop.f32.mrb[29].mxu0  ;;  %v1490_v59 = vpop.f32.mrb[29].mxu1  ;;  %v5908_v35 = vadd.f32 %v1613_v49, %v1370_v4  ;;  %v1242_v40 = vrot.slane %v4244_v43, 7  ;;  %v1617_v26 = vmul.f32 %v4264_v12, %v5230_v21 }
 0x202   : > { %v1240_v3 = vrot.slane %v1213_v60, 7  ;;  %v4245_v2 = vpop.f32.mrb[30].mxu0  ;;  %v4265_v45 = vpop.f32.mrb[30].mxu1  ;;  %v1615_v55 = vmul.f32 %v5220_v16, %v1490_v59 }
 0x203   : > { %v1243_v7 = vrot.slane %v4245_v2, 7  ;;  %v1216_v27 = vpop.f32.mrb[31].mxu0  ;;  %v1493_v56 = vpop.f32.mrb[31].mxu1  ;;  %v1602_v57 = vmul.f32 %v4265_v45, %v5158_v51 }
 0x204   : > { %v1250_v32 = vsel %vm1246_vm2, %v1239_v25, %v1240_v3  ;;  %v1241_v11 = vrot.slane %v1216_v27, 7  ;;  %v1616_v37 = vmul.f32 %v5228_v20, %v1493_v56 }
 0x205   : > { %v1372_v63 = vmul.f32 %v5140_v44, %v1250_v32  ;;  %v1247_v49 = vsel %vm1246_vm2, %v1242_v40, %v1243_v7  ;;  %v1262_v52 = vsel %vm1246_vm2, %v1243_v7, %v6720_v14 }
 0x206   : > { %v1360_v21 = vmul.f32 %v5072_v22, %v1262_v52  ;;  %v1359_v17 = vmul.f32 %v5074_v9, %v1247_v49  ;;  %v1248_v16 = vsel %vm1246_vm2, %v1241_v11, %v1242_v40  ;;  %v1249_v44 = vsel %vm1246_vm2, %v1240_v3, %v1241_v11 }
 0x207   : > { %v5930_v25 = vadd.f32 %v1615_v55, %v1372_v63  ;;  %v1374_v1 = vmul.f32 %v5150_v48, %v1248_v16  ;;  %v1373_v62 = vmul.f32 %v5148_v47, %v1249_v44 }
 0x208   : > { %v5935_v54 = vadd.f32 %v1602_v57, %v1359_v17  ;;  %v4272_v51 = vpop.f32.mrb[32].mxu0  ;;  %v4292_v22 = vpop.f32.mrb[32].mxu1  ;;  %v1619_v5 = vadd.f32 %v1603_v39, %v1360_v21 }
 0x209   : > { %v5937_v9 = vadd.f32 %v1616_v37, %v1373_v62  ;;  %v5939_v58 = vpop.f32.mrb[33].mxu0  ;;  %v5941_v10 = vpop.f32.mrb[33].mxu1  ;;  %v5943_v4 = vadd.f32 %v1617_v26, %v1374_v1  ;;  %v1750_v47 = vrot.slane %v4272_v51, 1  ;;  %v2026_v13 = vrot.slane %v4292_v22, 7 }
 0x20a   : > { %v4273_v38 = vpop.f32.mrb[34].mxu0  ;;  %v4293_v48 = vpop.f32.mrb[34].mxu1  ;;  %v1748_v59 = vrot.slane %v5939_v58, 1  ;;  %v2024_v45 = vrot.slane %v5941_v10, 7 }
 0x20b   : > { %v1751_v20 = vrot.slane %v4273_v38, 1  ;;  %v2027_v43 = vrot.slane %v4293_v48, 7  ;;  %v1688_v12 = vpop.f32.mrb[35].mxu0  ;;  %v1964_v60 = vpop.f32.mrb[35].mxu1 }
 0x20c   : > { %v1749_v3 = vrot.slane %v1688_v12, 1  ;;  %v2025_v2 = vrot.slane %v1964_v60, 7  ;;  %v6721_v12 = vld [vmem:[#allocation13_spill] sm:$0xff] }
 0x20d   : > { %v1777_v39 = vsel %vm1764_vm3, %v1750_v47, %v1751_v20  ;;  %v2052_v40 = vsel %vm1246_vm2, %v2026_v13, %v2027_v43 }
 0x20e   : > { %v1881_v7 = vmul.f32 %v5250_v34, %v1777_v39  ;;  %v1778_v27 = vsel %vm1764_vm3, %v1749_v3, %v1750_v47  ;;  %v1779_v56 = vsel %vm1764_vm3, %v1748_v59, %v1749_v3  ;;  %v2053_v26 = vsel %vm1246_vm2, %v2025_v2, %v2026_v13  ;;  %v6722_v39 = vld [vmem:[#allocation32_spill] sm:$0xff] }
 0x20f   : > { %v1879_v32 = vmul.f32 %v5240_v28, %v1779_v56  ;;  %v1880_v55 = vmul.f32 %v5248_v33, %v1778_v27  ;;  %v2054_v34 = vsel %vm1246_vm2, %v2024_v45, %v2025_v2  ;;  %v2155_v49 = vmul.f32 %v5313_v24, %v2053_v26  ;;  %v6724_v26 = vld [vmem:[#allocation14_spill] sm:$0xff] }
 0x210   : > { %v4276_v11 = vpop.f32.mrb[36].mxu0  ;;  %v4296_v63 = vpop.f32.mrb[36].mxu1  ;;  %v1897_v14 = vadd.f32 %v1881_v7, %v5857_v19  ;;  %v2156_v52 = vmul.f32 %v5315_v30, %v2052_v40  ;;  %v2154_v33 = vmul.f32 %v5310_v23, %v2054_v34  ;;  %v6723_v7 = vld [vmem:[#allocation16_spill] sm:$0xff] }
 0x211   : > { %v1754_v57 = vrot.slane %v4276_v11, 1  ;;  %v1701_v21 = vpop.f32.mrb[37].mxu0  ;;  %v1977_v17 = vpop.f32.mrb[37].mxu1  ;;  %v1896_v28 = vadd.f32 %v1880_v55, %v5855_v50  ;;  %v1895_v16 = vadd.f32 %v1879_v32, %v1619_v5  ;;  %v2030_v44 = vrot.slane %v4296_v63, 7  ;;  %v6725_v55 = vld [vmem:[#allocation15_spill] sm:$0xff]  ;;  %v6726_v63 = vld [vmem:[#allocation36_spill] sm:$0xff] }
 0x212   : > { %v1752_v1 = vrot.slane %v1701_v21, 1  ;;  %v2028_v62 = vrot.slane %v1977_v17, 7  ;;  %v4277_v37 = vpop.f32.mrb[38].mxu0  ;;  %v4297_v51 = vpop.f32.mrb[38].mxu1  ;;  %v5972_v22 = vadd.f32 %v2156_v52, %v1897_v14  ;;  %v6727_v17 = vld [vmem:[#allocation37_spill] sm:$0xff] }
 0x213   : > { %v1755_v24 = vrot.slane %v4277_v37, 1  ;;  %v2031_v38 = vrot.slane %v4297_v51, 7  ;;  %v1704_v19 = vpop.f32.mrb[39].mxu0  ;;  %v1980_v48 = vpop.f32.mrb[39].mxu1  ;;  %v5974_v30 = vadd.f32 %v2155_v49, %v1896_v28  ;;  %v5976_v47 = vadd.f32 %v2154_v33, %v1895_v16  ;;  %v6728_v16 = vld [vmem:[#allocation33_spill] sm:$0xff] }
 0x214   : > { %v1776_v50 = vsel %vm1764_vm3, %v1751_v20, %v1752_v1  ;;  %v2051_v23 = vsel %vm1246_vm2, %v2027_v43, %v2028_v62  ;;  %v1753_v5 = vrot.slane %v1704_v19, 1  ;;  %v2029_v13 = vrot.slane %v1980_v48, 7 }
 0x215   : > { %v1882_v60 = vmul.f32 %v6721_v12, %v1776_v50  ;;  %v1773_v3 = vsel %vm1764_vm3, %v1754_v57, %v1755_v24  ;;  %v2048_v2 = vsel %vm1246_vm2, %v2030_v44, %v2031_v38  ;;  %v2157_v40 = vmul.f32 %v6722_v39, %v2051_v23 }
 0x216   : > { %v1885_v27 = vmul.f32 %v6723_v7, %v1773_v3  ;;  %v1774_v20 = vsel %vm1764_vm3, %v1753_v5, %v1754_v57  ;;  %v1775_v43 = vsel %vm1764_vm3, %v1752_v1, %v1753_v5  ;;  %v2049_v56 = vsel %vm1246_vm2, %v2029_v13, %v2030_v44 }
 0x217   : > { %v1883_v32 = vmul.f32 %v6724_v26, %v1775_v43  ;;  %v1884_v34 = vmul.f32 %v6725_v55, %v1774_v20  ;;  %v2050_v11 = vsel %vm1246_vm2, %v2028_v62, %v2029_v13  ;;  %v2159_v49 = vmul.f32 %v6726_v63, %v2049_v56 }
 0x218   : > { %v4280_v14 = vpop.f32.mrb[40].mxu0  ;;  %v4300_v52 = vpop.f32.mrb[40].mxu1  ;;  %v1898_v21 = vadd.f32 %v1882_v60, %v5853_v53  ;;  %v1901_v57 = vadd.f32 %v1885_v27, %v5881_v42  ;;  %v2160_v28 = vmul.f32 %v6727_v17, %v2048_v2  ;;  %v2158_v33 = vmul.f32 %v6728_v16, %v2050_v11  ;;  %v6731_v11 = vld [vmem:[#allocation18_spill] sm:$0xff] }
 0x219   : > { %v1758_v44 = vrot.slane %v4280_v14, 1  ;;  %v2034_v1 = vrot.slane %v4300_v52, 7  ;;  %v1717_v37 = vpop.f32.mrb[41].mxu0  ;;  %v1993_v51 = vpop.f32.mrb[41].mxu1  ;;  %v1900_v19 = vadd.f32 %v1884_v34, %v5879_v61  ;;  %v1899_v62 = vadd.f32 %v1883_v32, %v5872_v31  ;;  %v6730_v32 = vld [vmem:[#allocation20_spill] sm:$0xff] }
 0x21a   : > { %v1756_v48 = vrot.slane %v1717_v37, 1  ;;  %v2032_v50 = vrot.slane %v1993_v51, 7  ;;  %v4281_v23 = vpop.f32.mrb[42].mxu0  ;;  %v4301_v5 = vpop.f32.mrb[42].mxu1  ;;  %v6006_v13 = vadd.f32 %v2157_v40, %v1898_v21  ;;  %v6008_v53 = vadd.f32 %v2160_v28, %v1901_v57  ;;  %v6729_v40 = vld [vmem:[#allocation17_spill] sm:$0xff] }
 0x21b   : > { %v1759_v42 = vrot.slane %v4281_v23, 1  ;;  %v2035_v12 = vrot.slane %v4301_v5, 7  ;;  %v1720_v60 = vpop.f32.mrb[43].mxu0  ;;  %v1996_v3 = vpop.f32.mrb[43].mxu1  ;;  %v6010_v2 = vadd.f32 %v2159_v49, %v1900_v19  ;;  %v6012_v39 = vadd.f32 %v2158_v33, %v1899_v62  ;;  %v6732_v49 = vld [vmem:[#allocation19_spill] sm:$0xff] }
 0x21c   : > { %v1772_v61 = vsel %vm1764_vm3, %v1755_v24, %v1756_v48  ;;  %v2047_v31 = vsel %vm1246_vm2, %v2031_v38, %v2032_v50  ;;  %v1757_v7 = vrot.slane %v1720_v60, 1  ;;  %v2033_v27 = vrot.slane %v1996_v3, 7 }
 0x21d   : > { %v1886_v20 = vmul.f32 %v6729_v40, %v1772_v61  ;;  %v1769_v43 = vsel %vm1764_vm3, %v1758_v44, %v1759_v42  ;;  %v2044_v56 = vsel %vm1246_vm2, %v2034_v1, %v2035_v12  ;;  %v2161_v26 = vmul.f32 %v5605_v41, %v2047_v31 }
 0x21e   : > { %v1889_v55 = vmul.f32 %v6730_v32, %v1769_v43  ;;  %v1770_v24 = vsel %vm1764_vm3, %v1757_v7, %v1758_v44  ;;  %v1771_v38 = vsel %vm1764_vm3, %v1756_v48, %v1757_v7  ;;  %v2045_v34 = vsel %vm1246_vm2, %v2033_v27, %v2034_v1  ;;  %v6735_v32 = vld [vmem:[#allocation67_spill] sm:$0xff] }
 0x21f   : > { %v1887_v63 = vmul.f32 %v6731_v11, %v1771_v38  ;;  %v1888_v14 = vmul.f32 %v6732_v49, %v1770_v24  ;;  %v2046_v52 = vsel %vm1246_vm2, %v2032_v50, %v2033_v27  ;;  %v2163_v41 = vmul.f32 %v5633_v29, %v2045_v34  ;;  %v6733_v27 = vld [vmem:[#allocation21_spill] sm:$0xff]  ;;  %v6736_v38 = vld [vmem:[#allocation66_spill] sm:$0xff] }
 0x220   : > { %v4284_v21 = vpop.f32.mrb[44].mxu0  ;;  %v4304_v57 = vpop.f32.mrb[44].mxu1  ;;  %v1902_v17 = vadd.f32 %v1886_v20, %v5877_v8  ;;  %v1905_v28 = vadd.f32 %v1889_v55, %v5908_v35  ;;  %v2164_v16 = vmul.f32 %v5635_v46, %v2044_v56  ;;  %v2162_v33 = vmul.f32 %v5607_v6, %v2046_v52  ;;  %v6738_v52 = vld [vmem:[#allocation23_spill] sm:$0xff] }
 0x221   : > { %v1762_v44 = vrot.slane %v4284_v21, 1  ;;  %v2038_v1 = vrot.slane %v4304_v57, 7  ;;  %v1733_v37 = vpop.f32.mrb[45].mxu0  ;;  %v2009_v51 = vpop.f32.mrb[45].mxu1  ;;  %v1904_v19 = vadd.f32 %v1888_v14, %v5906_v15  ;;  %v1903_v62 = vadd.f32 %v1887_v63, %v5899_v36  ;;  %v6737_v63 = vld [vmem:[#allocation22_spill] sm:$0xff] }
 0x222   : > { %v1760_v48 = vrot.slane %v1733_v37, 1  ;;  %v2036_v29 = vrot.slane %v2009_v51, 7  ;;  %v4285_v50 = vpop.f32.mrb[46].mxu0  ;;  %v4305_v23 = vpop.f32.mrb[46].mxu1  ;;  %v6042_v5 = vadd.f32 %v2161_v26, %v1902_v17  ;;  %v6044_v8 = vadd.f32 %v2164_v16, %v1905_v28  ;;  %v6734_v26 = vld [vmem:[#allocation12_spill] sm:$0xff]  ;;  %v6739_v21 = vld [vmem:[#allocation74_spill] sm:$0xff] }
 0x223   : > { %v1763_v35 = vrot.slane %v4285_v50, 1  ;;  %v2039_v46 = vrot.slane %v4305_v23, 7  ;;  %v1736_v60 = vpop.f32.mrb[47].mxu0  ;;  %v2012_v6 = vpop.f32.mrb[47].mxu1  ;;  %v6046_v3 = vadd.f32 %v2163_v41, %v1904_v19  ;;  %v6048_v61 = vadd.f32 %v2162_v33, %v1903_v62 }
 0x224   : > { %v1768_v15 = vsel %vm1764_vm3, %v1759_v42, %v1760_v48  ;;  %v2043_v36 = vsel %vm1246_vm2, %v2035_v12, %v2036_v29  ;;  %v1761_v31 = vrot.slane %v1736_v60, 1  ;;  %v2037_v7 = vrot.slane %v2012_v6, 7  ;;  %v6741_v60 = vld [vmem:[#allocation75_spill] sm:$0xff] }
 0x225   : > { %v1890_v40 = vmul.f32 %v6733_v27, %v1768_v15  ;;  %v1765_v20 = vsel %vm1764_vm3, %v1762_v44, %v1763_v35  ;;  %v1780_v43 = vsel %vm1764_vm3, %v1763_v35, %v1748_v59  ;;  %v2040_v56 = vsel %vm1246_vm2, %v2038_v1, %v2039_v46 }
 0x226   : > { %v1878_v42 = vmul.f32 %v6734_v26, %v1780_v43  ;;  %v1893_v55 = vmul.f32 %v6735_v32, %v1765_v20  ;;  %v2055_v12 = vsel %vm1246_vm2, %v2039_v46, %v2024_v45  ;;  %v1766_v24 = vsel %vm1764_vm3, %v1761_v31, %v1762_v44  ;;  %v6744_v26 = vld [vmem:[#allocation24_spill] sm:$0xff]  ;;  %v6745_v32 = vld [vmem:[#allocation25_spill] sm:$0xff] }
 0x227   : > { %v1767_v58 = vsel %vm1764_vm3, %v1760_v48, %v1761_v31  ;;  %v1892_v59 = vmul.f32 %v6736_v38, %v1766_v24  ;;  %v2041_v34 = vsel %vm1246_vm2, %v2037_v7, %v2038_v1  ;;  %v2042_v11 = vsel %vm1246_vm2, %v2036_v29, %v2037_v7 }
 0x228   : > { %v1891_v49 = vmul.f32 %v6737_v63, %v1767_v58  ;;  %v4312_v10 = vpop.f32.mrb[48].mxu0  ;;  %v4332_v14 = vpop.f32.mrb[48].mxu1  ;;  %v1894_v45 = vadd.f32 %v1878_v42, %v5935_v54  ;;  %v2153_v41 = vmul.f32 %v6738_v52, %v2055_v12  ;;  %v2167_v57 = vmul.f32 %v6739_v21, %v2041_v34  ;;  %v6740_v54 = vld [vmem:[#allocation70_spill] sm:$0xff] }
 0x229   : > { %v2301_v17 = vadd.f32 %v4312_v10, %v5974_v30  ;;  %v2431_v28 = vrot.slane %v4332_v14, 1  ;;  %v2236_v16 = vpop.f32.mrb[49].mxu0  ;;  %v6083_v33 = vpop.f32.mrb[49].mxu1  ;;  %v1908_v44 = vadd.f32 %v1892_v59, %v5937_v9  ;;  %v1906_v1 = vadd.f32 %v1890_v40, %v5904_v0  ;;  %v6743_v40 = vld [vmem:[#allocation26_spill] sm:$0xff] }
 0x22a   : > { %v2169_v37 = vadd.f32 %v2153_v41, %v1894_v45  ;;  %v2429_v51 = vrot.slane %v6083_v33, 1  ;;  %v4313_v19 = vpop.f32.mrb[50].mxu0  ;;  %v4333_v62 = vpop.f32.mrb[50].mxu1  ;;  %v2165_v48 = vmul.f32 %v6740_v54, %v2043_v36  ;;  %v1909_v29 = vadd.f32 %v1893_v55, %v5943_v4 }
 0x22b   : > { %v2302_v50 = vadd.f32 %v4313_v19, %v5972_v22  ;;  %v2432_v30 = vrot.slane %v4333_v62, 1  ;;  %v2239_v23 = vpop.f32.mrb[51].mxu0  ;;  %v2369_v35 = vpop.f32.mrb[51].mxu1  ;;  %v6091_v46 = vadd.f32 %v2167_v57, %v1908_v44  ;;  %v2168_v9 = vmul.f32 %v6741_v60, %v2040_v56  ;;  %v6742_v22 = vld [vmem:[#allocation71_spill] sm:$0xff] }
 0x22c   : > { %v2299_v6 = vadd.f32 %v2236_v16, %v2169_v37  ;;  %v2300_v0 = vadd.f32 %v2239_v23, %v5976_v47  ;;  %v2430_v15 = vrot.slane %v2369_v35, 1  ;;  %v6095_v31 = vadd.f32 %v2165_v48, %v1906_v1  ;;  %v6110_v56 = vpop.permute.xlu0 %3328  ;;  %v6746_v44 = vld [vmem:[#allocation27_spill] sm:$0xff]  ;;  %v6747_v37 = vld [vmem:[#allocation46_spill] sm:$0xff]  ;;  %v6748_v48 = vld [vmem:[#allocation44_spill] sm:$0xff] }
 0x22d   : > { %v2457_v36 = vsel %vm1764_vm3, %v2431_v28, %v2432_v30  ;;  %v6099_v7 = vadd.f32 %v2168_v9, %v1909_v29  ;;  %v1907_v4 = vadd.f32 %v1891_v49, %v5930_v25  ;;  %v2166_v27 = vmul.f32 %v6742_v22, %v2042_v11 }
 0x22e   : > { %v2560_v20 = vmul.f32 %v6743_v40, %v2457_v36  ;;  %v2458_v43 = vsel %vm1764_vm3, %v2430_v15, %v2431_v28  ;;  %v2459_v47 = vsel %vm1764_vm3, %v2429_v51, %v2430_v15 }
 0x22f   : > { %v2558_v42 = vmul.f32 %v6744_v26, %v2459_v47  ;;  %v2559_v55 = vmul.f32 %v6745_v32, %v2458_v43  ;;  %v6114_v12 = vadd.f32 %v2166_v27, %v1907_v4 }
 0x230   : > { %v4316_v25 = vpop.f32.mrb[52].mxu0  ;;  %v4336_v24 = vpop.f32.mrb[52].mxu1  ;;  %v6116_v58 = vadd.f32 %v2560_v20, %v2301_v17 }
 0x231   : > { %v6118_v38 = vadd.f32 %v2559_v55, %v2300_v0  ;;  %v2305_v59 = vadd.f32 %v4316_v25, %v6010_v2  ;;  %v2252_v34 = vpop.f32.mrb[53].mxu0  ;;  %v2382_v11 = vpop.f32.mrb[53].mxu1  ;;  %v6121_v63 = vadd.f32 %v2558_v42, %v2299_v6  ;;  %v2435_v52 = vrot.slane %v4336_v24, 1  ;;  %v6750_v25 = vld [vmem:[#allocation47_spill] sm:$0xff] }
 0x232   : > { %v2303_v49 = vadd.f32 %v2252_v34, %v6006_v13  ;;  %v2433_v10 = vrot.slane %v2382_v11, 1  ;;  %v4317_v14 = vpop.f32.mrb[54].mxu0  ;;  %v4337_v45 = vpop.f32.mrb[54].mxu1 }
 0x233   : > { %v2306_v41 = vadd.f32 %v4317_v14, %v6008_v53  ;;  %v2436_v21 = vrot.slane %v4337_v45, 1  ;;  %v2255_v57 = vpop.f32.mrb[55].mxu0  ;;  %v2385_v17 = vpop.f32.mrb[55].mxu1  ;;  %v6753_v45 = vld [vmem:[#allocation61_spill] sm:$0xff] }
 0x234   : > { %v2456_v28 = vsel %vm1764_vm3, %v2432_v30, %v2433_v10  ;;  %v2304_v2 = vadd.f32 %v2255_v57, %v6012_v39  ;;  %v2434_v16 = vrot.slane %v2385_v17, 1  ;;  %v6136_v54 = vpop.permute.xlu0 %2545  ;;  %v6749_v30 = vld [vmem:[#allocation45_spill] sm:$0xff] }
 0x235   : > { %v2561_v1 = vmul.f32 %v6746_v44, %v2456_v28  ;;  %v2453_v13 = vsel %vm1764_vm3, %v2435_v52, %v2436_v21 }
 0x236   : > { %v2564_v19 = vmul.f32 %v6747_v37, %v2453_v13  ;;  %v2454_v62 = vsel %vm1764_vm3, %v2434_v16, %v2435_v52  ;;  %v2455_v53 = vsel %vm1764_vm3, %v2433_v10, %v2434_v16  ;;  %v6752_v10 = vld [vmem:[#allocation60_spill] sm:$0xff] }
 0x237   : > { %v2562_v29 = vmul.f32 %v6748_v48, %v2455_v53  ;;  %v2563_v39 = vmul.f32 %v6749_v30, %v2454_v62  ;;  %v6140_v23 = vadd.f32 %v2561_v1, %v2302_v50 }
 0x238   : > { %v4320_v35 = vpop.f32.mrb[56].mxu0  ;;  %v4340_v60 = vpop.f32.mrb[56].mxu1  ;;  %v6142_v9 = vadd.f32 %v2564_v19, %v2305_v59  ;;  %v6751_v59 = vld [vmem:[#allocation62_spill] sm:$0xff] }
 0x239   : > { %v6144_v6 = vadd.f32 %v2563_v39, %v2304_v2  ;;  %v2309_v0 = vadd.f32 %v4320_v35, %v6046_v3  ;;  %v2268_v15 = vpop.f32.mrb[57].mxu0  ;;  %v2398_v36 = vpop.f32.mrb[57].mxu1  ;;  %v6147_v4 = vadd.f32 %v2562_v29, %v2303_v49  ;;  %v2439_v43 = vrot.slane %v4340_v60, 1 }
 0x23a   : > { %v2307_v22 = vadd.f32 %v2268_v15, %v6042_v5  ;;  %v2437_v27 = vrot.slane %v2398_v36, 1  ;;  %v4321_v40 = vpop.f32.mrb[58].mxu0  ;;  %v4341_v20 = vpop.f32.mrb[58].mxu1 }
 0x23b   : > { %v2310_v50 = vadd.f32 %v4321_v40, %v6044_v8  ;;  %v2440_v47 = vrot.slane %v4341_v20, 1  ;;  %v2271_v26 = vpop.f32.mrb[59].mxu0  ;;  %v2401_v42 = vpop.f32.mrb[59].mxu1  ;;  %v6755_v20 = vld [vmem:[#allocation81_spill] sm:$0xff] }
 0x23c   : > { %v2452_v32 = vsel %vm1764_vm3, %v2436_v21, %v2437_v27  ;;  %v2308_v3 = vadd.f32 %v2271_v26, %v6048_v61  ;;  %v2438_v55 = vrot.slane %v2401_v42, 1  ;;  %v2556_v49 = vpop.permute.xlu0 %2555  ;;  %v2551_v60 = vpop.permute.xlu1 %2550 }
 0x23d   : > { %v2565_v24 = vmul.f32 %v6750_v25, %v2452_v32  ;;  %v2449_v5 = vsel %vm1764_vm3, %v2439_v43, %v2440_v47 }
 0x23e   : > { %v2568_v34 = vmul.f32 %v6751_v59, %v2449_v5  ;;  %v2450_v11 = vsel %vm1764_vm3, %v2438_v55, %v2439_v43  ;;  %v2451_v8 = vsel %vm1764_vm3, %v2437_v27, %v2438_v55 }
 0x23f   : > { %v2566_v14 = vmul.f32 %v6752_v10, %v2451_v8  ;;  %v2567_v52 = vmul.f32 %v6753_v45, %v2450_v11  ;;  %v6164_v61 = vadd.f32 %v2565_v24, %v2306_v41 }
 0x240   : > { %v4324_v21 = vpop.f32.mrb[60].mxu0  ;;  %v4344_v57 = vpop.f32.mrb[60].mxu1  ;;  %v6166_v17 = vadd.f32 %v2568_v34, %v2309_v0  ;;  %v6754_v0 = vld [vmem:[#allocation63_spill] sm:$0xff] }
 0x241   : > { %v6168_v28 = vadd.f32 %v2567_v52, %v2308_v3  ;;  %v2313_v2 = vadd.f32 %v4324_v21, %v6091_v46  ;;  %v2284_v16 = vpop.f32.mrb[61].mxu0  ;;  %v2414_v44 = vpop.f32.mrb[61].mxu1  ;;  %v6171_v1 = vadd.f32 %v2566_v14, %v2307_v22  ;;  %v2443_v53 = vrot.slane %v4344_v57, 1  ;;  %v6756_v14 = vld [vmem:[#allocation30_spill] sm:$0xff] }
 0x242   : > { %v2311_v13 = vadd.f32 %v2284_v16, %v6095_v31  ;;  %v2441_v37 = vrot.slane %v2414_v44, 1  ;;  %v4325_v19 = vpop.f32.mrb[62].mxu0  ;;  %v4345_v62 = vpop.f32.mrb[62].mxu1  ;;  %v6757_v16 = vld [vmem:[#allocation28_spill] sm:$0xff] }
 0x243   : > { %v2314_v41 = vadd.f32 %v4325_v19, %v6099_v7  ;;  %v2444_v48 = vrot.slane %v4345_v62, 1  ;;  %v2287_v29 = vpop.f32.mrb[63].mxu0  ;;  %v2417_v30 = vpop.f32.mrb[63].mxu1  ;;  %v6759_v62 = vld [vmem:[#allocation38_spill] sm:$0xff] }
 0x244   : > { %v2448_v39 = vsel %vm1764_vm3, %v2440_v47, %v2441_v37  ;;  %v2312_v46 = vadd.f32 %v2287_v29, %v6114_v12  ;;  %v2442_v35 = vrot.slane %v2417_v30, 1  ;;  %v6189_v40 = vpop.permute.xlu0 %2820  ;;  %v6217_v57 = vpop.permute.xlu1 %2815  ;;  %v6760_v29 = vld [vmem:[#allocation35_spill] sm:$0xff] }
 0x245   : > { %v2569_v15 = vmul.f32 %v6754_v0, %v2448_v39  ;;  %v2445_v31 = vsel %vm1764_vm3, %v2443_v53, %v2444_v48  ;;  %v2460_v7 = vsel %vm1764_vm3, %v2444_v48, %v2429_v51 }
 0x246   : > { %v2572_v36 = vmul.f32 %v2551_v60, %v2445_v31  ;;  %v2573_v22 = vmul.f32 %v2556_v49, %v2460_v7  ;;  %v2446_v27 = vsel %vm1764_vm3, %v2442_v35, %v2443_v53  ;;  %v2447_v12 = vsel %vm1764_vm3, %v2441_v37, %v2442_v35  ;;  %v6761_v35 = vld [vmem:[#allocation34_spill] sm:$0xff] }
 0x247   : > { %v2570_v43 = vmul.f32 %v6755_v20, %v2447_v12  ;;  %v2571_v47 = vmul.f32 %v6136_v54, %v2446_v27  ;;  %v6193_v26 = vadd.f32 %v2569_v15, %v2310_v50 }
 0x248   : > { %v6195_v33 = vadd.f32 %v2573_v22, %v2314_v41  ;;  %v4352_v42 = vpop.f32.mrb[64].mxu0  ;;  %v4372_v51 = vpop.f32.mrb[64].mxu1  ;;  %v6197_v32 = vadd.f32 %v2572_v36, %v2313_v2 }
 0x249   : > { %v6199_v3 = vadd.f32 %v2571_v47, %v2312_v46  ;;  %v6201_v55 = vpop.f32.mrb[65].mxu0  ;;  %v6203_v25 = vpop.f32.mrb[65].mxu1  ;;  %v6205_v24 = vadd.f32 %v2570_v43, %v2311_v13  ;;  %v2706_v34 = vrot.slane %v4352_v42, 7  ;;  %v6758_v13 = vld [vmem:[#allocation29_spill] sm:$0xff]  ;;  %v3077_v30 = vmul.f32 %v4372_v51, %v6760_v29  ;;  %v6762_v42 = vld [vmem:[#allocation31_spill] sm:$0xff] }
 0x24a   : > { %v4353_v5 = vpop.f32.mrb[66].mxu0  ;;  %v4373_v59 = vpop.f32.mrb[66].mxu1  ;;  %v2704_v8 = vrot.slane %v6201_v55, 7 }
 0x24b   : > { %v2707_v54 = vrot.slane %v4353_v5, 7  ;;  %v2644_v50 = vpop.f32.mrb[67].mxu0  ;;  %v2919_v11 = vpop.f32.mrb[67].mxu1  ;;  %v3078_v53 = vmul.f32 %v4373_v59, %v6759_v62  ;;  %v6763_v59 = vld [vmem:[#allocation50_spill] sm:$0xff] }
 0x24c   : > { %v2705_v49 = vrot.slane %v2644_v50, 7  ;;  %v6219_v2 = vpop.permute.xlu0 %2830  ;;  %v3076_v60 = vmul.f32 %v6761_v35, %v2919_v11  ;;  %v6768_v62 = vld [vmem:[#allocation54_spill] sm:$0xff] }
 0x24d   : > { %v2732_v10 = vsel %vm1246_vm2, %v2706_v34, %v2707_v54 }
 0x24e   : > { %v2835_v45 = vmul.f32 %v6756_v14, %v2732_v10  ;;  %v2733_v52 = vsel %vm1246_vm2, %v2705_v49, %v2706_v34  ;;  %v2734_v21 = vsel %vm1246_vm2, %v2704_v8, %v2705_v49  ;;  %v6245_v49 = vpop.permute.xlu1 %2825  ;;  %v6764_v14 = vld [vmem:[#allocation39_spill] sm:$0xff] }
 0x24f   : > { %v2833_v44 = vmul.f32 %v6757_v16, %v2734_v21  ;;  %v2834_v37 = vmul.f32 %v6758_v13, %v2733_v52  ;;  %v6765_v52 = vld [vmem:[#allocation48_spill] sm:$0xff]  ;;  %v6766_v16 = vld [vmem:[#allocation49_spill] sm:$0xff] }
 0x250   : > { %v2851_v19 = vadd.f32 %v2835_v45, %v6116_v58  ;;  %v4356_v41 = vpop.f32.mrb[68].mxu0  ;;  %v4376_v48 = vpop.f32.mrb[68].mxu1  ;;  %v6767_v13 = vld [vmem:[#allocation53_spill] sm:$0xff] }
 0x251   : > { %v2850_v39 = vadd.f32 %v2834_v37, %v6118_v38  ;;  %v2849_v46 = vadd.f32 %v2833_v44, %v6121_v63  ;;  %v2657_v0 = vpop.f32.mrb[69].mxu0  ;;  %v2932_v15 = vpop.f32.mrb[69].mxu1  ;;  %v2710_v27 = vrot.slane %v4356_v41, 7  ;;  %v3081_v37 = vmul.f32 %v4376_v48, %v6767_v13  ;;  %v6775_v13 = vld [vmem:[#allocation73_spill] sm:$0xff] }
 0x252   : > { %v6229_v31 = vadd.f32 %v3078_v53, %v2851_v19  ;;  %v2708_v7 = vrot.slane %v2657_v0, 7  ;;  %v4357_v36 = vpop.f32.mrb[70].mxu0  ;;  %v4377_v22 = vpop.f32.mrb[70].mxu1  ;;  %v3079_v45 = vmul.f32 %v6764_v14, %v2932_v15 }
 0x253   : > { %v6231_v58 = vadd.f32 %v3076_v60, %v2849_v46  ;;  %v2711_v12 = vrot.slane %v4357_v36, 7  ;;  %v2660_v20 = vpop.f32.mrb[71].mxu0  ;;  %v2935_v43 = vpop.f32.mrb[71].mxu1  ;;  %v6233_v47 = vadd.f32 %v3077_v30, %v2850_v39  ;;  %v3082_v53 = vmul.f32 %v4377_v22, %v6768_v62  ;;  %v6769_v46 = vld [vmem:[#allocation52_spill] sm:$0xff] }
 0x254   : > { %v2731_v38 = vsel %vm1246_vm2, %v2707_v54, %v2708_v7  ;;  %v2709_v63 = vrot.slane %v2660_v20, 7  ;;  %v6247_v10 = vpop.permute.xlu0 %3063  ;;  %v3080_v35 = vmul.f32 %v6769_v46, %v2935_v43  ;;  %v6770_v43 = vld [vmem:[#allocation51_spill] sm:$0xff]  ;;  %v6776_v62 = vld [vmem:[#allocation76_spill] sm:$0xff] }
 0x255   : > { %v2836_v51 = vmul.f32 %v6762_v42, %v2731_v38  ;;  %v2728_v5 = vsel %vm1246_vm2, %v2710_v27, %v2711_v12 }
 0x256   : > { %v2839_v34 = vmul.f32 %v6763_v59, %v2728_v5  ;;  %v2729_v50 = vsel %vm1246_vm2, %v2709_v63, %v2710_v27  ;;  %v2730_v11 = vsel %vm1246_vm2, %v2708_v7, %v2709_v63  ;;  %v6771_v5 = vld [vmem:[#allocation68_spill] sm:$0xff] }
 0x257   : > { %v2852_v54 = vadd.f32 %v2836_v51, %v6140_v23  ;;  %v2837_v21 = vmul.f32 %v6765_v52, %v2730_v11  ;;  %v2838_v44 = vmul.f32 %v6766_v16, %v2729_v50  ;;  %v3059_v11 = vpop.permute.xlu1 %3058  ;;  %v6773_v52 = vld [vmem:[#allocation64_spill] sm:$0xff]  ;;  %v6774_v16 = vld [vmem:[#allocation65_spill] sm:$0xff] }
 0x258   : > { %v2855_v19 = vadd.f32 %v2839_v34, %v6142_v9  ;;  %v4360_v41 = vpop.f32.mrb[72].mxu0  ;;  %v4380_v29 = vpop.f32.mrb[72].mxu1 }
 0x259   : > { %v6256_v30 = vadd.f32 %v3079_v45, %v2852_v54  ;;  %v2854_v39 = vadd.f32 %v2838_v44, %v6144_v6  ;;  %v2853_v23 = vadd.f32 %v2837_v21, %v6147_v4  ;;  %v2673_v60 = vpop.f32.mrb[73].mxu0  ;;  %v2948_v0 = vpop.f32.mrb[73].mxu1  ;;  %v2714_v22 = vrot.slane %v4360_v41, 7  ;;  %v6772_v45 = vld [vmem:[#allocation55_spill] sm:$0xff] }
 0x25a   : > { %v6261_v15 = vadd.f32 %v3082_v53, %v2855_v19  ;;  %v2712_v7 = vrot.slane %v2673_v60, 7  ;;  %v4361_v48 = vpop.f32.mrb[74].mxu0  ;;  %v4381_v36 = vpop.f32.mrb[74].mxu1 }
 0x25b   : > { %v6263_v9 = vadd.f32 %v3080_v35, %v2853_v23  ;;  %v2715_v27 = vrot.slane %v4361_v48, 7  ;;  %v2676_v20 = vpop.f32.mrb[75].mxu0  ;;  %v2951_v38 = vpop.f32.mrb[75].mxu1  ;;  %v6265_v63 = vadd.f32 %v3081_v37, %v2854_v39  ;;  %v3085_v37 = vmul.f32 %v4380_v29, %v6775_v13  ;;  %v6777_v35 = vld [vmem:[#allocation72_spill] sm:$0xff] }
 0x25c   : > { %v2727_v6 = vsel %vm1246_vm2, %v2711_v12, %v2712_v7  ;;  %v2713_v4 = vrot.slane %v2676_v20, 7  ;;  %v3074_v54 = vpop.permute.xlu0 %3073  ;;  %v3083_v12 = vmul.f32 %v6772_v45, %v2948_v0  ;;  %v3086_v53 = vmul.f32 %v4381_v36, %v6776_v62 }
 0x25d   : > { %v2840_v42 = vmul.f32 %v6770_v43, %v2727_v6  ;;  %v2724_v51 = vsel %vm1246_vm2, %v2714_v22, %v2715_v27  ;;  %v3084_v60 = vmul.f32 %v6777_v35, %v2951_v38  ;;  %v3091_v38 = vmul.f32 %v3074_v54, %v6203_v25  ;;  %v3069_v54 = vpop.permute.xlu1 %3068 }
 0x25e   : > { %v2843_v59 = vmul.f32 %v6771_v5, %v2724_v51  ;;  %v2725_v34 = vsel %vm1246_vm2, %v2713_v4, %v2714_v22  ;;  %v2726_v50 = vsel %vm1246_vm2, %v2712_v7, %v2713_v4  ;;  %v6778_v51 = vld [vmem:[#allocation69_spill] sm:$0xff] }
 0x25f   : > { %v2856_v14 = vadd.f32 %v2840_v42, %v6164_v61  ;;  %v2841_v21 = vmul.f32 %v6773_v52, %v2726_v50  ;;  %v2842_v44 = vmul.f32 %v6774_v16, %v2725_v34 }
 0x260   : > { %v2859_v19 = vadd.f32 %v2843_v59, %v6166_v17  ;;  %v4364_v41 = vpop.f32.mrb[76].mxu0  ;;  %v4384_v39 = vpop.f32.mrb[76].mxu1 }
 0x261   : > { %v6284_v23 = vadd.f32 %v3083_v12, %v2856_v14  ;;  %v2858_v46 = vadd.f32 %v2842_v44, %v6168_v28  ;;  %v2857_v61 = vadd.f32 %v2841_v21, %v6171_v1  ;;  %v2689_v0 = vpop.f32.mrb[77].mxu0  ;;  %v2964_v7 = vpop.f32.mrb[77].mxu1  ;;  %v2718_v36 = vrot.slane %v4364_v41, 7  ;;  %v6779_v12 = vld [vmem:[#allocation77_spill] sm:$0xff] }
 0x262   : > { %v6289_v48 = vadd.f32 %v3086_v53, %v2859_v19  ;;  %v2716_v22 = vrot.slane %v2689_v0, 7  ;;  %v4365_v29 = vpop.f32.mrb[78].mxu0  ;;  %v4385_v20 = vpop.f32.mrb[78].mxu1  ;;  %v3087_v52 = vmul.f32 %v6779_v12, %v2964_v7 }
 0x263   : > { %v6291_v17 = vadd.f32 %v3084_v60, %v2857_v61  ;;  %v2719_v6 = vrot.slane %v4365_v29, 7  ;;  %v2692_v4 = vpop.f32.mrb[79].mxu0  ;;  %v2967_v43 = vpop.f32.mrb[79].mxu1  ;;  %v6293_v42 = vadd.f32 %v3085_v37, %v2858_v46  ;;  %v3090_v44 = vmul.f32 %v4385_v20, %v3069_v54  ;;  %v6781_v29 = vld [vmem:[#allocation40_spill] sm:$0xff]  ;;  %v6782_v54 = vld [vmem:[#allocation42_spill] sm:$0xff] }
 0x264   : > { %v2723_v28 = vsel %vm1246_vm2, %v2715_v27, %v2716_v22  ;;  %v2717_v1 = vrot.slane %v2692_v4, 7  ;;  %v3088_v62 = vmul.f32 %v3059_v11, %v2967_v43  ;;  %v6780_v11 = vld [vmem:[#allocation41_spill] sm:$0xff] }
 0x265   : > { %v2844_v5 = vmul.f32 %v6778_v51, %v2723_v28  ;;  %v2720_v59 = vsel %vm1246_vm2, %v2718_v36, %v2719_v6  ;;  %v2735_v34 = vsel %vm1246_vm2, %v2719_v6, %v2704_v8  ;;  %v6315_v8 = vpop.permute.xlu0 %3338 }
 0x266   : > { %v2847_v50 = vmul.f32 %v6245_v49, %v2720_v59  ;;  %v2848_v14 = vmul.f32 %v6219_v2, %v2735_v34  ;;  %v2721_v27 = vsel %vm1246_vm2, %v2717_v1, %v2718_v36  ;;  %v2722_v25 = vsel %vm1246_vm2, %v2716_v22, %v2717_v1  ;;  %v6345_v22 = vld [vmem:[%s6626_s11] ss:$0 sm:$0xff] }
 0x267   : > { %v2860_v45 = vadd.f32 %v2844_v5, %v6193_v26  ;;  %v2845_v55 = vmul.f32 %v6217_v57, %v2722_v25  ;;  %v2846_v21 = vmul.f32 %v6189_v40, %v2721_v27  ;;  %v3089_v49 = vmul.f32 %v4384_v39, %v6247_v10 }
 0x268   : > { %v2864_v2 = vadd.f32 %v2848_v14, %v6195_v33  ;;  %v2863_v16 = vadd.f32 %v2847_v50, %v6197_v32  ;;  %v4392_v13 = vpop.f32.mrb[80].mxu0 }
 0x269   : > { %v6320_v37 = vadd.f32 %v3087_v52, %v2860_v45  ;;  %v2862_v26 = vadd.f32 %v2846_v21, %v6199_v3  ;;  %v2861_v19 = vadd.f32 %v2845_v55, %v6205_v24  ;;  %v6324_v57 = vpop.f32.mrb[81].mxu0  ;;  %v3224_v33 = vrot.slane %v4392_v13, 1  ;;  %v3349_v24 = vpop.permute.xlu0 %3348  ;;  %v6783_v55 = vld [vmem:[#allocation57_spill] sm:$0xff]  ;;  %v6784_v13 = vld [vmem:[#allocation43_spill] sm:$0xff] }
 0x26a   : > { %v6326_v40 = vadd.f32 %v3090_v44, %v2863_v16  ;;  %v4393_v53 = vpop.f32.mrb[82].mxu0  ;;  %v3107_v41 = vadd.f32 %v3091_v38, %v2864_v2  ;;  %v3222_v61 = vrot.slane %v6324_v57, 1  ;;  %v6353_v38 = vld [vmem:[%s6627_s12] ss:$0 sm:$0xff] }
 0x26b   : > { %v6328_v10 = vadd.f32 %v3088_v62, %v2861_v19  ;;  %v3225_v39 = vrot.slane %v4393_v53, 1  ;;  %v3162_v32 = vpop.f32.mrb[83].mxu0  ;;  %v6330_v46 = vadd.f32 %v3089_v49, %v2862_v26  ;;  %v6785_v19 = vld [vmem:[#allocation56_spill] sm:$0xff] }
 0x26c   : > { %v3223_v35 = vrot.slane %v3162_v32, 1 }
 0x26d   : > { %v3250_v3 = vsel %vm1764_vm3, %v3224_v33, %v3225_v39 }
 0x26e   : > { %v3352_v60 = vmul.f32 %v6780_v11, %v3250_v3  ;;  %v3251_v0 = vsel %vm1764_vm3, %v3223_v35, %v3224_v33  ;;  %v3252_v7 = vsel %vm1764_vm3, %v3222_v61, %v3223_v35 }
 0x26f   : > { %v3351_v20 = vmul.f32 %v6781_v29, %v3251_v0  ;;  %v3366_v36 = vmul.f32 %v3349_v24, %v3252_v7 }
 0x270   : > { %v3368_v6 = vadd.f32 %v3352_v60, %v6233_v47  ;;  %v4396_v4 = vpop.f32.mrb[84].mxu0 }
 0x271   : > { %v3367_v43 = vadd.f32 %v3351_v20, %v6231_v58  ;;  %v3382_v28 = vadd.f32 %v3366_v36, %v3107_v41  ;;  %v3175_v1 = vpop.f32.mrb[85].mxu0  ;;  %v3228_v50 = vrot.slane %v4396_v4, 1 }
 0x272   : > { %v3391_v51 = vmul.f32 %v6345_v22, %v3368_v6  ;;  %v3226_v5 = vrot.slane %v3175_v1, 1  ;;  %v4397_v59 = vpop.f32.mrb[86].mxu0 }
 0x273   : > { %v3390_v34 = vmul.f32 %v6345_v22, %v3367_v43  ;;  %v3229_v14 = vrot.slane %v4397_v59, 1  ;;  %v3178_v27 = vpop.f32.mrb[87].mxu0  ;;  %v3405_v6 = vmul.f32 %v6345_v22, %v3382_v28 }
 0x274   : > { %v3249_v47 = vsel %vm1764_vm3, %v3225_v39, %v3226_v5  ;;  %v3227_v58 = vrot.slane %v3178_v27, 1  ;;  %v3414_v25 = vadd.f32 %v6353_v38, %v3391_v51  ;;  %v6786_v51 = vld [vmem:[#allocation58_spill] sm:$0xff] }
 0x275   : > { %v3353_v45 = vmul.f32 %v6782_v54, %v3249_v47  ;;  %v3246_v12 = vsel %vm1764_vm3, %v3228_v50, %v3229_v14  ;;  %v3413_v52 = vadd.f32 %v6353_v38, %v3390_v34  ;;  %v6787_v34 = vld [vmem:[#allocation79_spill] sm:$0xff]  ;;  %v3334_v47 = vpop.permute.xlu1 %3333 }
 0x276   : > { %v3356_v21 = vmul.f32 %v6783_v55, %v3246_v12  ;;  %v3247_v49 = vsel %vm1764_vm3, %v3227_v58, %v3228_v50  ;;  %v3248_v2 = vsel %vm1764_vm3, %v3226_v5, %v3227_v58  ;;  %v3430_v16 = vmax.f32 %v3414_v25, 0.0  ;;  %v6788_v54 = vld [vmem:[#allocation59_spill] sm:$0xff]  ;;  %v6789_v12 = vld [vmem:[#allocation78_spill] sm:$0xff] }
 0x277   : > { %v3369_v44 = vadd.f32 %v3353_v45, %v6229_v31  ;;  %v3354_v26 = vmul.f32 %v6784_v13, %v3248_v2  ;;  %v3355_v62 = vmul.f32 %v6785_v19, %v3247_v49  ;;  %v3429_v53 = vmax.f32 %v3413_v52, 0.0 }
 0x278   : > { %v3372_v41 = vadd.f32 %v3356_v21, %v6265_v63  ;;  %v4400_v33 = vpop.f32.mrb[88].mxu0 }
 0x279   : > { %v3392_v39 = vmul.f32 %v6345_v22, %v3369_v44  ;;  %v3370_v32 = vadd.f32 %v3354_v26, %v6256_v30  ;;  %v3371_v35 = vadd.f32 %v3355_v62, %v6263_v9  ;;  %v3191_v3 = vpop.f32.mrb[89].mxu0  ;;  %v3232_v11 = vrot.slane %v4400_v33, 1 }
 0x27a   : > { %v3395_v24 = vmul.f32 %v6345_v22, %v3372_v41  ;;  %v3230_v60 = vrot.slane %v3191_v3, 1  ;;  %v4401_v31 = vpop.f32.mrb[90].mxu0  ;;  %v3445_v0 = vpack.c.bf16 %v3430_v16, %v3429_v53  ;;  %v3428_v33 = vadd.f32 %v6353_v38, %v3405_v6 }
 0x27b   : > { %v3415_v7 = vadd.f32 %v6353_v38, %v3392_v39  ;;  %v3393_v29 = vmul.f32 %v6345_v22, %v3370_v32  ;;  %v3394_v63 = vmul.f32 %v6345_v22, %v3371_v35  ;;  %v3233_v20 = vrot.slane %v4401_v31, 1  ;;  %v3194_v36 = vpop.f32.mrb[91].mxu0  ;;  %v6790_v31 = vld [vmem:[#allocation80_spill] sm:$0xff] }
 0x27c   : > { %v3245_v30 = vsel %vm1764_vm3, %v3229_v14, %v3230_v60  ;;  %v3231_v9 = vrot.slane %v3194_v36, 1  ;;  %4410 = vmatprep.mubr.msk.bf16.mxu1 %vm1106_vm1, %v3445_v0  ;;  %v3418_v4 = vadd.f32 %v6353_v38, %v3395_v24 }
 0x27d   : > { %v3431_v43 = vmax.f32 %v3415_v7, 0.0  ;;  %v3416_v1 = vadd.f32 %v6353_v38, %v3393_v29  ;;  %v3357_v5 = vmul.f32 %v6786_v51, %v3245_v30  ;;  %v3242_v59 = vsel %vm1764_vm3, %v3232_v11, %v3233_v20 }
 0x27e   : > { %v3360_v50 = vmul.f32 %v6787_v34, %v3242_v59  ;;  %v3243_v28 = vsel %vm1764_vm3, %v3231_v9, %v3232_v11  ;;  %v3244_v14 = vsel %vm1764_vm3, %v3230_v60, %v3231_v9  ;;  %v3417_v27 = vadd.f32 %v6353_v38, %v3394_v63  ;;  %v3344_v60 = vpop.permute.xlu1 %3343 }
 0x27f   : > { %v3432_v58 = vmax.f32 %v3416_v1, 0.0  ;;  %v3373_v25 = vadd.f32 %v3357_v5, %v6261_v15  ;;  %v3358_v45 = vmul.f32 %v6788_v54, %v3244_v14  ;;  %v3359_v52 = vmul.f32 %v6789_v12, %v3243_v28 }
 0x280   : > { %v3376_v55 = vadd.f32 %v3360_v50, %v6293_v42  ;;  %v4404_v21 = vpop.f32.mrb[92].mxu0  ;;  %v3433_v49 = vmax.f32 %v3417_v27, 0.0  ;;  %v3434_v2 = vmax.f32 %v3418_v4, 0.0 }
 0x281   : > { %v3446_v16 = vpack.c.bf16 %v3432_v58, %v3431_v43  ;;  %v3396_v44 = vmul.f32 %v6345_v22, %v3373_v25  ;;  %v3374_v13 = vadd.f32 %v3358_v45, %v6284_v23  ;;  %v3375_v26 = vadd.f32 %v3359_v52, %v6291_v17  ;;  %v3207_v19 = vpop.f32.mrb[93].mxu0 }
 0x282   : > { %v3399_v62 = vmul.f32 %v6345_v22, %v3376_v55  ;;  %v3234_v15 = vrot.slane %v3207_v19, 1  ;;  %v4405_v53 = vpop.f32.mrb[94].mxu0  ;;  %v3447_v41 = vpack.c.bf16 %v3434_v2, %v3433_v49  ;;  %v3236_v39 = vrot.slane %v4404_v21, 1  ;;  %v3592_v2 = vld [vmem:[%s5324_s24 + $0x10] sm:$0xff] }
 0x283   : > { %v3397_v42 = vmul.f32 %v6345_v22, %v3374_v13  ;;  %v3237_v32 = vrot.slane %v4405_v53, 1  ;;  %v3210_v35 = vpop.f32.mrb[95].mxu0  ;;  %4411 = vmatmul.mubr.msk.bf16.vlgmr.msra.gmra.mrb[80].mxu1 %vm1106_vm1, %v3446_v16  ;;  %v3419_v3 = vadd.f32 %v6353_v38, %v3396_v44  ;;  %v3398_v23 = vmul.f32 %v6345_v22, %v3375_v26  ;;  %v3590_v13 = vld [vmem:[%s5324_s24] sm:$0xff] }
 0x284   : > { %v3241_v17 = vsel %vm1764_vm3, %v3233_v20, %v3234_v15  ;;  %v3235_v24 = vrot.slane %v3210_v35, 1  ;;  %4414 = vmatprep.mubr.msk.bf16.mxu1 %vm1106_vm1, %v3447_v41  ;;  %v3422_v11 = vadd.f32 %v6353_v38, %v3399_v62  ;;  %v3593_v62 = vld [vmem:[%s5324_s24 + $0x18] sm:$0xff]  ;;  %v3591_v41 = vld [vmem:[%s5324_s24 + $0x8] sm:$0xff] }
 0x285   : > { %v3361_v0 = vmul.f32 %v6790_v31, %v3241_v17  ;;  %v3238_v7 = vsel %vm1764_vm3, %v3236_v39, %v3237_v32  ;;  %v3253_v29 = vsel %vm1764_vm3, %v3237_v32, %v3222_v61  ;;  %v3420_v63 = vadd.f32 %v6353_v38, %v3397_v42  ;;  %v3595_v31 = vld [vmem:[%s5324_s24 + $0x28] sm:$0xff] }
 0x286   : > { %v3364_v20 = vmul.f32 %v6315_v8, %v3238_v7  ;;  %v3365_v36 = vmul.f32 %v3344_v60, %v3253_v29  ;;  %v3239_v6 = vsel %vm1764_vm3, %v3235_v24, %v3236_v39  ;;  %v3240_v30 = vsel %vm1764_vm3, %v3234_v15, %v3235_v24  ;;  %v3596_v39 = vld [vmem:[%s5324_s24 + $0x30] sm:$0xff]  ;;  %v3597_v24 = vld [vmem:[%s5324_s24 + $0x38] sm:$0xff] }
 0x287   : > { %v3377_v9 = vadd.f32 %v3361_v0, %v6289_v48  ;;  %v3362_v4 = vmul.f32 %v6110_v56, %v3240_v30  ;;  %v3363_v43 = vmul.f32 %v3334_v47, %v3239_v6  ;;  %v3435_v57 = vmax.f32 %v3419_v3, 0.0  ;;  %v3594_v3 = vld [vmem:[%s5324_s24 + $0x20] sm:$0xff]  ;;  %v3600_v29 = vld [vmem:[%s5324_s24 + $0x50] sm:$0xff] }
 0x288   : > { %v3380_v1 = vadd.f32 %v3364_v20, %v6330_v46  ;;  %v3381_v61 = vadd.f32 %v3365_v36, %v6326_v40  ;;  %v3436_v51 = vmax.f32 %v3420_v63, 0.0  ;;  %v3421_v8 = vadd.f32 %v6353_v38, %v3398_v23  ;;  %v3598_v36 = vld [vmem:[%s5324_s24 + $0x40] sm:$0xff] }
 0x289   : > { %v3400_v5 = vmul.f32 %v6345_v22, %v3377_v9  ;;  %v3378_v59 = vadd.f32 %v3362_v4, %v6320_v37  ;;  %v3379_v18 = vadd.f32 %v3363_v43, %v6328_v10  ;;  %v3438_v34 = vmax.f32 %v3422_v11, 0.0  ;;  %v3601_v9 = vld [vmem:[%s5324_s24 + $0x58] sm:$0xff] }
 0x28a   : > { %v3403_v48 = vmul.f32 %v6345_v22, %v3380_v1  ;;  %v3404_v56 = vmul.f32 %v6345_v22, %v3381_v61  ;;  %v3448_v50 = vpack.c.bf16 %v3436_v51, %v3435_v57  ;;  %v3437_v28 = vmax.f32 %v3421_v8, 0.0  ;;  %v3599_v57 = vld [vmem:[%s5324_s24 + $0x48] sm:$0xff]  ;;  %v3604_v51 = vld [vmem:[%s5324_s24 + $0x70] sm:$0xff] }
 0x28b   : > { %v3401_v46 = vmul.f32 %v6345_v22, %v3378_v59  ;;  %v3402_v40 = vmul.f32 %v6345_v22, %v3379_v18  ;;  %v3423_v14 = vadd.f32 %v6353_v38, %v3400_v5  ;;  %v3444_v22 = vmax.f32 %v3428_v33, 0.0  ;;  %v3602_v59 = vld [vmem:[%s5324_s24 + $0x60] sm:$0xff] }
 0x28c   : > { %4415 = vmatmul.mubr.msk.bf16.gmra.mrb[84].mxu1 %vm1106_vm1, %v3448_v50  ;;  %v3449_v27 = vpack.c.bf16 %v3438_v34, %v3437_v28  ;;  %v3426_v37 = vadd.f32 %v6353_v38, %v3403_v48  ;;  %v3427_v10 = vadd.f32 %v6353_v38, %v3404_v56  ;;  %v3605_v48 = vld [vmem:[%s5324_s24 + $0x78] sm:$0xff]  ;;  %v3603_v28 = vld [vmem:[%s5324_s24 + $0x68] sm:$0xff] }
 0x28d   : > { %v3424_v47 = vadd.f32 %v6353_v38, %v3401_v46  ;;  %v3425_v58 = vadd.f32 %v6353_v38, %v3402_v40  ;;  %v3439_v45 = vmax.f32 %v3423_v14, 0.0 }
 0x28e   : > { %4418 = vmatprep.mubr.msk.bf16.mxu1 %vm1106_vm1, %v3449_v27  ;;  %v3442_v25 = vmax.f32 %v3426_v37, 0.0  ;;  %v3443_v54 = vmax.f32 %v3427_v10, 0.0 }
 0x28f   : > { %v3440_v12 = vmax.f32 %v3424_v47, 0.0  ;;  %v3441_v52 = vmax.f32 %v3425_v58, 0.0 }
 0x290   : > { %v3452_v55 = vpack.c.bf16 %v3444_v22, %v3443_v54 }
 0x291   : > { %v3450_v21 = vpack.c.bf16 %v3440_v12, %v3439_v45  ;;  %v3451_v49 = vpack.c.bf16 %v3442_v25, %v3441_v52 }
 0x294   : > { %4419 = vmatmul.mubr.msk.bf16.gmra.mrb[88].mxu1 %vm1106_vm1, %v3450_v21 }
 0x295   : > { %4422 = vmatprep.mubr.msk.bf16.mxu1 %vm1106_vm1, %v3451_v49 }
 0x29c   : > { %4423 = vmatmul.mubr.msk.bf16.gmra.mrb[92].mxu1 %vm1106_vm1, %v3452_v55 }
 0x356   : > { %v4412_v38 = vpop.f32.mrb[80].mxu1 }
 0x357   : > { %v3608_v16 = vadd.f32 %v4412_v38, %v3592_v2  ;;  %3641 = vst.msk [vmem:[%s5764_s29 + $0x10] sm:$0xff] %vm3638_vm4, %v4412_v38  ;;  %v3527_v44 = vpop.f32.mrb[81].mxu1 }
 0x358   : > { %v3606_v26 = vadd.f32 %v3590_v13, %v3527_v44  ;;  %3639 = vst.msk [vmem:[%s5764_s29] sm:$0xff] %vm3638_vm4, %v3527_v44  ;;  %v4413_v19 = vpop.f32.mrb[82].mxu1 }
 0x359   : > { %3624 = vst.msk [vmem:[%s5324_s24 + $0x10] sm:$0xff] %vm603_vm0, %v3608_v16  ;;  %v3609_v15 = vadd.f32 %v4413_v19, %v3593_v62  ;;  %v3530_v53 = vpop.f32.mrb[83].mxu1 }
 0x35a   : > { %3642 = vst.msk [vmem:[%s5764_s29 + $0x18] sm:$0xff] %vm3638_vm4, %v4413_v19  ;;  %v3607_v33 = vadd.f32 %v3591_v41, %v3530_v53  ;;  %3640 = vst.msk [vmem:[%s5764_s29 + $0x8] sm:$0xff] %vm3638_vm4, %v3530_v53 }
 0x35b   : > { %3622 = vst.msk [vmem:[%s5324_s24] sm:$0xff] %vm603_vm0, %v3606_v26  ;;  %3625 = vst.msk [vmem:[%s5324_s24 + $0x18] sm:$0xff] %vm603_vm0, %v3609_v15 }
 0x35c   : > { %3623 = vst.msk [vmem:[%s5324_s24 + $0x8] sm:$0xff] %vm603_vm0, %v3607_v33 }
 0x35f   : > { %v4416_v42 = vpop.f32.mrb[84].mxu1 }
 0x360   : > { %v3612_v32 = vadd.f32 %v4416_v42, %v3596_v39  ;;  %3645 = vst.msk [vmem:[%s5764_s29 + $0x30] sm:$0xff] %vm3638_vm4, %v4416_v42  ;;  %v3543_v35 = vpop.f32.mrb[85].mxu1 }
 0x361   : > { %v3610_v23 = vadd.f32 %v3594_v3, %v3543_v35  ;;  %3643 = vst.msk [vmem:[%s5764_s29 + $0x20] sm:$0xff] %vm3638_vm4, %v3543_v35  ;;  %v4417_v17 = vpop.f32.mrb[86].mxu1 }
 0x362   : > { %3628 = vst.msk [vmem:[%s5324_s24 + $0x30] sm:$0xff] %vm603_vm0, %v3612_v32  ;;  %v3613_v11 = vadd.f32 %v4417_v17, %v3597_v24  ;;  %v3546_v60 = vpop.f32.mrb[87].mxu1 }
 0x363   : > { %3646 = vst.msk [vmem:[%s5764_s29 + $0x38] sm:$0xff] %vm3638_vm4, %v4417_v17  ;;  %v3611_v0 = vadd.f32 %v3595_v31, %v3546_v60  ;;  %3644 = vst.msk [vmem:[%s5764_s29 + $0x28] sm:$0xff] %vm3638_vm4, %v3546_v60 }
 0x364   : > { %3626 = vst.msk [vmem:[%s5324_s24 + $0x20] sm:$0xff] %vm603_vm0, %v3610_v23  ;;  %3629 = vst.msk [vmem:[%s5324_s24 + $0x38] sm:$0xff] %vm603_vm0, %v3613_v11 }
 0x365   : > { %3627 = vst.msk [vmem:[%s5324_s24 + $0x28] sm:$0xff] %vm603_vm0, %v3611_v0 }
 0x367   : > { %v4420_v7 = vpop.f32.mrb[88].mxu1 }
 0x368   : > { %v3616_v63 = vadd.f32 %v4420_v7, %v3600_v29  ;;  %3649 = vst.msk [vmem:[%s5764_s29 + $0x50] sm:$0xff] %vm3638_vm4, %v4420_v7  ;;  %v3559_v20 = vpop.f32.mrb[89].mxu1 }
 0x369   : > { %v3614_v6 = vadd.f32 %v3598_v36, %v3559_v20  ;;  %3647 = vst.msk [vmem:[%s5764_s29 + $0x40] sm:$0xff] %vm3638_vm4, %v3559_v20  ;;  %v4421_v30 = vpop.f32.mrb[90].mxu1 }
 0x36a   : > { %3632 = vst.msk [vmem:[%s5324_s24 + $0x50] sm:$0xff] %vm603_vm0, %v3616_v63  ;;  %v3617_v4 = vadd.f32 %v4421_v30, %v3601_v9  ;;  %v3562_v43 = vpop.f32.mrb[91].mxu1 }
 0x36b   : > { %3650 = vst.msk [vmem:[%s5764_s29 + $0x58] sm:$0xff] %vm3638_vm4, %v4421_v30  ;;  %v3615_v1 = vadd.f32 %v3599_v57, %v3562_v43  ;;  %3648 = vst.msk [vmem:[%s5764_s29 + $0x48] sm:$0xff] %vm3638_vm4, %v3562_v43 }
 0x36c   : > { %3630 = vst.msk [vmem:[%s5324_s24 + $0x40] sm:$0xff] %vm603_vm0, %v3614_v6  ;;  %3633 = vst.msk [vmem:[%s5324_s24 + $0x58] sm:$0xff] %vm603_vm0, %v3617_v4 }
 0x36d   : > { %3631 = vst.msk [vmem:[%s5324_s24 + $0x48] sm:$0xff] %vm603_vm0, %v3615_v1 }
 0x36f   : > { %v4424_v61 = vpop.f32.mrb[92].mxu1 }
 0x370   : > { %v3620_v8 = vadd.f32 %v4424_v61, %v3604_v51  ;;  %3653 = vst.msk [vmem:[%s5764_s29 + $0x70] sm:$0xff] %vm3638_vm4, %v4424_v61  ;;  %v3575_v5 = vpop.f32.mrb[93].mxu1 }
 0x371   : > { %v3618_v18 = vadd.f32 %v3602_v59, %v3575_v5  ;;  %3651 = vst.msk [vmem:[%s5764_s29 + $0x60] sm:$0xff] %vm3638_vm4, %v3575_v5  ;;  %v4425_v34 = vpop.f32.mrb[94].mxu1 }
 0x372   : > { %3636 = vst.msk [vmem:[%s5324_s24 + $0x70] sm:$0xff] %vm603_vm0, %v3620_v8  ;;  %v3621_v56 = vadd.f32 %v4425_v34, %v3605_v48  ;;  %v3578_v50 = vpop.f32.mrb[95].mxu1 }
 0x373   : > { %3654 = vst.msk [vmem:[%s5764_s29 + $0x78] sm:$0xff] %vm3638_vm4, %v4425_v34  ;;  %v3619_v46 = vadd.f32 %v3603_v28, %v3578_v50  ;;  %3652 = vst.msk [vmem:[%s5764_s29 + $0x68] sm:$0xff] %vm3638_vm4, %v3578_v50 }
 0x374   : > { %3634 = vst.msk [vmem:[%s5324_s24 + $0x60] sm:$0xff] %vm603_vm0, %v3618_v18  ;;  %3637 = vst.msk [vmem:[%s5324_s24 + $0x78] sm:$0xff] %vm603_vm0, %v3621_v56 }
 0x375   : > { %4511 = shalt.err (!%p4508_p3)
}
 0x376   : > { %s4512_s29 = scalar_lea.hbm %s6520_s4, 2048  ;;  %s4516_s0 = scalar_lea.hbm %s6630_s15, 4096 }
 0x377   : > { %p4513_p4 = scmp.ne.s32.totalorder %s6520_s4, %s4512_s29  ;;  %p4517_p9 = scmp.lt.u32.totalorder %s6520_s4, %s6630_s15 }
 0x378   : > { %p4518_p10 = scmp.lt.u32.totalorder %s4516_s0, %s4512_s29  ;;  %p4520_p12 = scmp.lt.u32.totalorder %s4512_s29, %s6520_s4 }
 0x379   : > { %p4514_p7 = pnand %p4513_p4, %p4718_p5 }
 0x37a   : > { %p4519_p11 = por %p4518_p10, %p4517_p9 }
 0x37b   : > { %p4515_p8 = pneg %p4514_p7 }
 0x37c   : > { %p4521_p13 = por %p4520_p12, %p4519_p11 }
 0x37e   : > { %p4522_p0 = pnand %p4521_p13, %p4515_p8 }
 0x380   : > { %4525 = shalt.err (!%p4522_p0)
}
 0x381   : > { %s4597_s2 = smov 128   ;;  %s4598_s25 = smov 8   ;;  %3635 = vst.msk [vmem:[%s5324_s24 + $0x68] sm:$0xff] %vm603_vm0, %v3619_v46 }
 0x382   : > { %4427 = dma.vmem_to_hbm [thread:$0]  (%p4718_p5), %s6522_s27, 2048, %s6520_s4, %s3661_s22, %s4597_s2, %s4597_s2, %s4598_s25  }
 0x383   : > { %s3656_s29 = scalar_lea.sflag [#allocation3], %s5306_s17  ;;  %s4526_s23 = scalar_lea.vmem %s6538_s30, 2048 }
 0x384   : > { %p4527_p1 = scmp.ne.s32.totalorder %s6538_s30, %s4526_s23  ;;  %s4599_s20 = smov [#allocation2]  }
 0x385   : > { %s4530_s0 = sshll.u32 %s4599_s20, 4  ;;  %s4531_s0 = int_to_ptr.vmem [resolvable:$false] %s4530_s0 }
 0x386   : > { %p4528_p2 = pnand %p4527_p1, %p4718_p5  ;;  %s4532_s26 = scalar_lea.vmem %s4531_s0, 4096 }
 0x387   : > { %p4533_p4 = scmp.lt.s32.totalorder %s6538_s30, %s4531_s0  ;;  %p4534_p7 = scmp.lt.s32.totalorder %s4532_s26, %s4526_s23 }
 0x388   : > { %p4529_p3 = pneg %p4528_p2 }
 0x389   : > { %p4535_p8 = por %p4534_p7, %p4533_p4 }
 0x38b   : > { %p4536_p9 = pnand %p4535_p8, %p4529_p3 }
 0x38d   : > { %4539 = shalt.err (!%p4536_p9)
}
 0x38e   : > { %s4540_s24 = scalar_lea.hbm %s6536_s16, 2048  ;;  %s4544_s22 = scalar_lea.hbm %s6629_s14, 4096 }
 0x38f   : > { %p4541_p10 = scmp.ne.s32.totalorder %s6536_s16, %s4540_s24  ;;  %p4545_p13 = scmp.lt.u32.totalorder %s6536_s16, %s6629_s14 }
 0x390   : > { %p4546_p0 = scmp.lt.u32.totalorder %s4544_s22, %s4540_s24  ;;  %p4548_p2 = scmp.lt.u32.totalorder %s4540_s24, %s6536_s16 }
 0x391   : > { %p4542_p11 = pnand %p4541_p10, %p4718_p5 }
 0x392   : > { %p4547_p1 = por %p4546_p0, %p4545_p13 }
 0x393   : > { %p4543_p12 = pneg %p4542_p11 }
 0x394   : > { %p4549_p3 = por %p4548_p2, %p4547_p1 }
 0x396   : > { %p4550_p4 = pnand %p4549_p3, %p4543_p12 }
 0x398   : > { %4553 = shalt.err (!%p4550_p4)
}
 0x399   : > { %4426 = dma.vmem_to_hbm [thread:$0]  (%p4718_p5), %s6538_s30, 2048, %s6536_s16, %s3656_s29, %s4597_s2, %s4597_s2, %s4598_s25  }
 0x39a PF: > { %p4437_p7 = scmp.ge.s32.totalorder %s4592_s21, 2  ;;  %s3705_s0 = sand.u32 1, %s4580_s18  }
 0x39b   : > { %s3706_s26 = scalar_lea.sflag [#allocation3], %s3705_s0 }
 0x39c   : > { %p4431_p8 = pnand %p4437_p7, %p4722_p6 }
 0x39e   : > { %4571 = dma.done.wait (!%p4431_p8), %s3706_s26, 2048  }
 0x39f   : > { %4573 = vsyncadd (!%p4431_p8), %s3706_s26, 4294965248  ;;  %s3715_s28 = scalar_lea.sflag [#allocation5], %s3705_s0 }
 0x3a0   : > { %4575 = dma.done.wait (!%p4431_p8), %s3715_s28, 2048  }
 0x3a1   : > { %4577 = vsyncadd (!%p4431_p8), %s3715_s28, 4294965248  ;;  %s6792_s21 = sld [smem:[#allocation9_spill]]  ;;  %s6793_s17 = sld [smem:[#allocation8_spill]] }
 0x3a2   : > { %s6794_s20 = sld [smem:[#allocation10_spill]]  ;;  %s6795_s18 = smov %s4584_s19 }
 0x3a7   : > { %p29_p5 = scmp.ge.s32.totalorder %s6792_s21, 4   ;;  %s6796_s19 = smov %s6793_s17 }
 0x3a9   :  { %31 = sbr.rel (!%p29_p5) target bundleno = 10 (0xa), region = 143 }
 0x3b0   :  { %3720 = vsyncpa [#allocation3], 1 }
 0x3b1   :  { %3722 = vsyncpa [#allocation3 + $0x1], 1 }
 0x3b2   :  { %3723 = vsyncpa [#allocation5], 1 }
 0x3b3   :  { %3725 = vsyncpa [#allocation5 + $0x1], 1 }

// kernel: dual_path_block_forward.1
= control target key start
LH: loop header
LB: loop body
LE: loop exit
PB: predicated region body
PF: predicated region fallthrough
CT: control target
= control target key end

     0   :  { %s6615_s0 = inlined_call_operand.vmem [shape: f32[256,16], index: 0, kind: input, shape index: {}]   ;;  %s6616_s1 = inlined_call_operand.vmem [shape: f32[9,128,1], index: 1, kind: input, shape index: {}]   ;;  %s6617_s2 = inlined_call_operand.vmem [shape: f32[1,16], index: 2, kind: input, shape index: {}]   ;;  %s6618_s3 = inlined_call_operand.vmem [shape: f32[1,16], index: 3, kind: input, shape index: {}]   ;;  %s6619_s4 = inlined_call_operand.vmem [shape: bf16[16,32], index: 4, kind: input, shape index: {}]   ;;  %s6620_s5 = inlined_call_operand.vmem [shape: f32[1,16], index: 5, kind: input, shape index: {}]   ;;  %s6621_s6 = inlined_call_operand.vmem [shape: f32[1,16], index: 6, kind: input, shape index: {}]   ;;  %s6622_s7 = inlined_call_operand.vmem [shape: bf16[16,32], index: 7, kind: input, shape index: {}]   ;;  %s6623_s8 = inlined_call_operand.vmem [shape: f32[1,32], index: 8, kind: input, shape index: {}]   ;;  %s6624_s9 = inlined_call_operand.vmem [shape: f32[1,32], index: 9, kind: input, shape index: {}]   ;;  %s6625_s10 = inlined_call_operand.vmem [shape: bf16[3,3,32,32], index: 10, kind: input, shape index: {}]   ;;  %s6626_s11 = inlined_call_operand.vmem [shape: f32[1,32], index: 11, kind: input, shape index: {}]   ;;  %s6627_s12 = inlined_call_operand.vmem [shape: f32[1,32], index: 12, kind: input, shape index: {}]   ;;  %s6628_s13 = inlined_call_operand.vmem [shape: bf16[32,24], index: 13, kind: input, shape index: {}]   ;;  %s6629_s14 = inlined_call_operand.hbm [shape: f32[256,16], index: 14, kind: output, shape index: {0}]   ;;  %s6630_s15 = inlined_call_operand.hbm [shape: f32[256,24], index: 15, kind: output, shape index: {1}]  }
   0x1   :  { %6636 = sst [smem:[#allocation82_spill]] %s6615_s0 }
   0x2   :  { %6637 = sst [smem:[#allocation83_spill]] %s6616_s1 }
   0x3   :  { %6638 = sst [smem:[#allocation84_spill]] %s6617_s2 }
   0x4   :  { %6639 = sst [smem:[#allocation85_spill]] %s6619_s4 }
   0x5   :  { %21 = vsyncpa [#allocation3], 0 }
   0x6   :  { %23 = vsyncpa [#allocation3 + $0x1], 0 }
   0x7   :  { %24 = vsyncpa [#allocation5], 0 }
   0x8   :  { %26 = vsyncpa [#allocation5 + $0x1], 0  ;;  %s4680_s18 = smov 0   ;;  %s4682_s19 = smov 0  }
   0x9   :  { %s4684_s20 = smov 0   ;;  %s4686_s21 = smov 0  }
   0xa LB: > { %6640 = sst [smem:[#allocation8_spill]] %s4588_s20  ;;  %s4701_s22 = sadd.s32 4294967295, %s4592_s21   ;;  %s4592_s21 = sphi %s4686_s21, %s6792_s21   ;;  %s4588_s20 = sphi %s4684_s20, %s6794_s20   ;;  %s4584_s19 = sphi %s4682_s19, %s6796_s19   ;;  %s4580_s18 = sphi %s4680_s18, %s6795_s18  }
   0xb   : > { %s3784_s23 = sadd.s32 4294967294, %s4592_s21   ;;  %s4705_s24 = sadd.s32 1, %s4592_s21  }
   0xc   : > { %6641 = sst [smem:[#allocation9_spill]] %s4705_s24  ;;  %s338_s25 = sadd.s32 1, %s4588_s20 }
   0xd   : > { %s335_s26 = ssub.s32 %s4592_s21, %s4705_s24  ;;  %p348_p0 = scmp.ne.s32.totalorder %s4588_s20, %s4584_s19 }
   0xe   : > { %p336_p1 = scmp.eq.s32.totalorder %s335_s26, 0  ;;  %p349_p2 = scmp.eq.s32.totalorder %s4701_s22, 1 }
   0xf   : > { %p354_p3 = scmp.ne.s32.totalorder %s4584_s19, %s4580_s18  ;;  %p355_p4 = scmp.eq.s32.totalorder %s3784_s23, 1 }
  0x10   : > { %s4716_s27 = scalar_select %p336_p1, %s4588_s20, %s338_s25  }
  0x11   : > { %p4718_p5 = por %p349_p2, %p348_p0  ;;  %p4722_p6 = por %p355_p4, %p354_p3 }
  0x12   : > { %6642 = sst [smem:[#allocation10_spill]] %s4716_s27  ;;  %p3787_p7 = scmp.ge.s32.totalorder %s4592_s21, 1 }
  0x13   : > { %s6644_s29 = scalar_select %p4722_p6, 1, 0 }
  0x14   : > { %p447_p8 = scmp.lt.s32.totalorder %s4592_s21, 3 }
  0x15   : > { %6645 = sst [smem:[#allocation11_spill]] %s6644_s29 }
  0x16   : > { %p448_p9 = pnand %p3787_p7, %p447_p8 }
  0x18   : > { %451 = sbr.rel (%p448_p9) target bundleno = 922 (0x39a), region = 76 }
  0x1f   : > { %s6646_s1 = sld [smem:[#allocation83_spill]]  ;;  %s3790_s25 = sshll.u32 %s4701_s22, 4  ;;  %v4594_v2 = vmov 0   ;;  %v4477_v6 = vld [vmem:[%s6622_s7] sm:$0xff]   ;;  %vm603_vm0 = vcmask 130048   ;;  %vm1106_vm1 = vcmask 261120  }
  0x20   : > { %4475 = vset.pattern.permute.xlu1 %v4594_v2  ;;  %4474 = vset.pattern.permute.xlu0 %v4594_v2  ;;  %p501_p10 = scmp.lt.s32.totalorder %s3790_s25, 31  ;;  %s6647_s4 = sld [smem:[#allocation85_spill]]  ;;  %v4758_v9 = vld [vmem:[%s6620_s5] ss:$0 sm:$0xff]  ;;  %vm3638_vm4 = vcmask 195712  }
  0x21   : > { %4208 = vmatprep.subr.bf16.mxu1 %v4477_v6  ;;  %s6648_s2 = sld [smem:[#allocation84_spill]]  ;;  %s6649_s0 = sld [smem:[#allocation82_spill]]  ;;  %v4771_v11 = vld [vmem:[%s6618_s3] ss:$0 sm:$0xff] }
  0x22   : > { %s6798_s25 = smov (!%p501_p10, %s3790_s25), 31  ;;  %v4776_v12 = vld [vmem:[%s6621_s6] ss:$0 sm:$0xff]  ;;  %4209 = vmatpush3.bf16.msra.mxu1 %v4477_v6  ;;  %s5306_s17 = sand.u32 1, %s4584_s19  }
  0x23   : > { %s3791_s20 = sshll.u32 %s6798_s25, 3  ;;  %s3788_s23 = sshll.u32 %s5306_s17, 7 }
  0x24   : > { %s5324_s24 = scalar_lea.vmem [#allocation2], %s3788_s23  ;;  %s4595_s26 = smov 112  }
  0x25   : > { %v1264_v0 = vld [vmem:[%s6646_s1 + $0x8] sm:$0xff]  ;;  %v1263_v1 = vld [vmem:[%s6646_s1] sm:$0xff]  ;;  %v1265_v3 = vld [vmem:[%s6646_s1 + $0x10] sm:$0xff]  ;;  %s5764_s29 = scalar_lea.vmem [#allocation4], %s3788_s23  ;;  %s4070_s23 = sshll.u32 %s4701_s22, 11 }
  0x26   : > { %v1266_v4 = vld [vmem:[%s6646_s1 + $0x18] sm:$0xff]  ;;  %1286 = vperm.xlu1 %4475, %v1264_v0   ;;  %1281 = vperm.xlu0 %4474, %v1263_v1   ;;  %v4476_v5 = vld [vmem:[%s6647_s4] sm:$0xff]   ;;  %v1268_v10 = vld [vmem:[%s6646_s1 + $0x28] sm:$0xff]  ;;  %s3690_s27 = sshll.u32 %s5764_s29, 4  ;;  %s3674_s30 = sshll.u32 %s5324_s24, 4  ;;  %s6522_s27 = int_to_ptr.vmem [resolvable:$true] %s3690_s27  ;;  %s6538_s30 = int_to_ptr.vmem [resolvable:$true] %s3674_s30 }
  0x27   : > { %4190 = vmatprep.subr.bf16.mxu0 %v4476_v5  ;;  %v1267_v7 = vld [vmem:[%s6646_s1 + $0x20] sm:$0xff]  ;;  %s4766_s25 = scalar_lea.vmem %s6649_s0, %s3791_s20  ;;  %v1269_v25 = vld [vmem:[%s6646_s1 + $0x30] sm:$0xff]  ;;  %v1270_v29 = vld [vmem:[%s6646_s1 + $0x38] sm:$0xff]  ;;  %s6520_s4 = scalar_lea.hbm %s6630_s15, %s4070_s23 }
  0x28   : > { %4191 = vmatpush3.bf16.msra.mxu0 %v4476_v5  ;;  %v4753_v8 = vld [vmem:[%s6648_s2] ss:$0 sm:$0xff]  ;;  %v510_v14 = vld [vmem:[%s4766_s25 + $0x8] sm:$0xff]  ;;  %v511_v15 = vld [vmem:[%s4766_s25 + $0x10] sm:$0xff]  ;;  %s6536_s16 = scalar_lea.hbm %s6629_s14, %s4070_s23  ;;  %s3661_s22 = scalar_lea.sflag [#allocation5], %s5306_s17 }
  0x29   : > { %v509_v13 = vld [vmem:[%s4766_s25] sm:$0xff]  ;;  %v533_v17 = vmul.f32 %v4753_v8, %v510_v14  ;;  %v829_v19 = vmul.f32 %v4758_v9, %v510_v14  ;;  %v512_v20 = vld [vmem:[%s4766_s25 + $0x18] sm:$0xff]  ;;  %v534_v21 = vmul.f32 %v4753_v8, %v511_v15  ;;  %v830_v23 = vmul.f32 %v4758_v9, %v511_v15  ;;  %v514_v35 = vld [vmem:[%s4766_s25 + $0x28] sm:$0xff]  ;;  %s4596_s0 = smov [#allocation4]  }
  0x2a   : > { %1291 = vperm.xlu1 %4475, %v1265_v3   ;;  %1296 = vperm.xlu0 %4474, %v1266_v4   ;;  %v532_v16 = vmul.f32 %v4753_v8, %v509_v13  ;;  %v828_v18 = vmul.f32 %v4758_v9, %v509_v13  ;;  %v535_v22 = vmul.f32 %v4753_v8, %v512_v20  ;;  %v513_v34 = vld [vmem:[%s4766_s25 + $0x20] sm:$0xff]  ;;  %v515_v44 = vld [vmem:[%s4766_s25 + $0x30] sm:$0xff]  ;;  %v516_v49 = vld [vmem:[%s4766_s25 + $0x38] sm:$0xff] }
  0x2b   : > { %v831_v24 = vmul.f32 %v4758_v9, %v512_v20  ;;  %v556_v27 = vadd.f32 %v4771_v11, %v533_v17  ;;  %v852_v30 = vadd.f32 %v4776_v12, %v829_v19  ;;  %v557_v31 = vadd.f32 %v4771_v11, %v534_v21  ;;  %v1271_v52 = vld [vmem:[%s6646_s1 + $0x40] sm:$0xff]  ;;  %v1272_v56 = vld [vmem:[%s6646_s1 + $0x48] sm:$0xff]  ;;  %v1273_v5 = vld [vmem:[%s6646_s1 + $0x50] sm:$0xff] }
  0x2c   : > { %v555_v26 = vadd.f32 %v4771_v11, %v532_v16  ;;  %v851_v28 = vadd.f32 %v4776_v12, %v828_v18  ;;  %v558_v32 = vadd.f32 %v4771_v11, %v535_v22  ;;  %v853_v33 = vadd.f32 %v4776_v12, %v830_v23  ;;  %v517_v63 = vld [vmem:[%s4766_s25 + $0x40] sm:$0xff]  ;;  %v518_v4 = vld [vmem:[%s4766_s25 + $0x48] sm:$0xff]  ;;  %v1274_v14 = vld [vmem:[%s6646_s1 + $0x58] sm:$0xff] }
  0x2d   : > { %v572_v37 = vmax.f32 %v556_v27, 0.0  ;;  %v854_v39 = vadd.f32 %v4776_v12, %v831_v24  ;;  %v868_v40 = vmax.f32 %v852_v30, 0.0  ;;  %v573_v41 = vmax.f32 %v557_v31, 0.0  ;;  %v519_v19 = vld [vmem:[%s4766_s25 + $0x50] sm:$0xff]  ;;  %v520_v24 = vld [vmem:[%s4766_s25 + $0x58] sm:$0xff]  ;;  %v1275_v31 = vld [vmem:[%s6646_s1 + $0x60] sm:$0xff] }
  0x2e   : > { %1301 = vperm.xlu1 %4475, %v1267_v7   ;;  %1306 = vperm.xlu0 %4474, %v1268_v10   ;;  %v571_v36 = vmax.f32 %v555_v26, 0.0  ;;  %v867_v38 = vmax.f32 %v851_v28, 0.0  ;;  %v574_v42 = vmax.f32 %v558_v32, 0.0  ;;  %v869_v43 = vmax.f32 %v853_v33, 0.0 }
  0x2f   : > { %v870_v46 = vmax.f32 %v854_v39, 0.0  ;;  %v536_v47 = vmul.f32 %v4753_v8, %v513_v34  ;;  %v537_v48 = vmul.f32 %v4753_v8, %v514_v35  ;;  %v832_v53 = vmul.f32 %v4758_v9, %v513_v34  ;;  %v1276_v34 = vld [vmem:[%s6646_s1 + $0x68] sm:$0xff]  ;;  %v521_v39 = vld [vmem:[%s4766_s25 + $0x60] sm:$0xff] }
  0x30   : > { %v587_v45 = vpack.c.bf16 %v572_v37, %v571_v36  ;;  %v883_v50 = vpack.c.bf16 %v868_v40, %v867_v38  ;;  %v588_v51 = vpack.c.bf16 %v574_v42, %v573_v41  ;;  %v833_v54 = vmul.f32 %v4758_v9, %v514_v35 }
  0x31   : > { %v884_v55 = vpack.c.bf16 %v870_v46, %v869_v43  ;;  %v559_v57 = vadd.f32 %v4771_v11, %v536_v47  ;;  %v560_v58 = vadd.f32 %v4771_v11, %v537_v48  ;;  %v538_v59 = vmul.f32 %v4753_v8, %v515_v44 }
  0x32   : > { %1311 = vperm.xlu1 %4475, %v1269_v25   ;;  %1316 = vperm.xlu0 %4474, %v1270_v29   ;;  %v855_v60 = vadd.f32 %v4776_v12, %v832_v53  ;;  %v856_v61 = vadd.f32 %v4776_v12, %v833_v54  ;;  %v539_v62 = vmul.f32 %v4753_v8, %v516_v49  ;;  %v523_v54 = vld [vmem:[%s4766_s25 + $0x70] sm:$0xff] }
  0x33   : > { %4192 = vmatprep.mubr.msk.bf16.mxu0 %vm603_vm0, %v587_v45  ;;  %4210 = vmatprep.mubr.msk.bf16.mxu1 %vm603_vm0, %v883_v50  ;;  %v575_v0 = vmax.f32 %v559_v57, 0.0  ;;  %v576_v1 = vmax.f32 %v560_v58, 0.0  ;;  %v561_v2 = vadd.f32 %v4771_v11, %v538_v59  ;;  %v834_v3 = vmul.f32 %v4758_v9, %v515_v44  ;;  %v522_v44 = vld [vmem:[%s4766_s25 + $0x68] sm:$0xff] }
  0x34   : > { %4193 = vmatmul.mubr.msk.bf16.vlgmr.msra.gmra.mrb[0].mxu0 %vm603_vm0, %v588_v51  ;;  %4211 = vmatmul.mubr.msk.bf16.vlgmr.msra.gmra.mrb[0].mxu1 %vm603_vm0, %v884_v55  ;;  %v871_v6 = vmax.f32 %v855_v60, 0.0  ;;  %v872_v7 = vmax.f32 %v856_v61, 0.0  ;;  %v562_v10 = vadd.f32 %v4771_v11, %v539_v62  ;;  %v835_v13 = vmul.f32 %v4758_v9, %v516_v49  ;;  %v1277_v49 = vld [vmem:[%s6646_s1 + $0x70] sm:$0xff]  ;;  %v1278_v55 = vld [vmem:[%s6646_s1 + $0x78] sm:$0xff] }
  0x35   : > { %v589_v15 = vpack.c.bf16 %v576_v1, %v575_v0  ;;  %v577_v16 = vmax.f32 %v561_v2, 0.0  ;;  %v857_v17 = vadd.f32 %v4776_v12, %v834_v3  ;;  %v540_v18 = vmul.f32 %v4753_v8, %v517_v63  ;;  %v524_v60 = vld [vmem:[%s4766_s25 + $0x78] sm:$0xff]  ;;  %s4498_s25 = scalar_lea.vmem %s6522_s27, 2048 }
  0x36   : > { %1321 = vperm.xlu1 %4475, %v1271_v52   ;;  %1326 = vperm.xlu0 %4474, %v1272_v56   ;;  %v885_v20 = vpack.c.bf16 %v872_v7, %v871_v6  ;;  %v578_v21 = vmax.f32 %v562_v10, 0.0  ;;  %v858_v22 = vadd.f32 %v4776_v12, %v835_v13  ;;  %v541_v23 = vmul.f32 %v4753_v8, %v518_v4  ;;  %p4499_p11 = scmp.ne.s32.totalorder %s6522_s27, %s4498_s25 }
  0x37   : > { %4196 = vmatprep.mubr.msk.bf16.mxu0 %vm603_vm0, %v589_v15  ;;  %v873_v25 = vmax.f32 %v857_v17, 0.0  ;;  %v563_v26 = vadd.f32 %v4771_v11, %v540_v18  ;;  %v836_v27 = vmul.f32 %v4758_v9, %v517_v63  ;;  %v837_v28 = vmul.f32 %v4758_v9, %v518_v4  ;;  %v3841_v15 = vld [vmem:[%s6646_s1 + $0x88] sm:$0xff] }
  0x38   : > { %4214 = vmatprep.mubr.msk.bf16.mxu1 %vm603_vm0, %v885_v20  ;;  %v590_v29 = vpack.c.bf16 %v578_v21, %v577_v16  ;;  %v874_v30 = vmax.f32 %v858_v22, 0.0  ;;  %v564_v32 = vadd.f32 %v4771_v11, %v541_v23  ;;  %v542_v33 = vmul.f32 %v4753_v8, %v519_v19  ;;  %p4500_p12 = pnand %p4499_p11, %p4718_p5 }
  0x39   : > { %v579_v35 = vmax.f32 %v563_v26, 0.0  ;;  %v859_v36 = vadd.f32 %v4776_v12, %v836_v27  ;;  %v860_v37 = vadd.f32 %v4776_v12, %v837_v28  ;;  %v543_v38 = vmul.f32 %v4753_v8, %v520_v24 }
  0x3a   : > { %1331 = vperm.xlu1 %4475, %v1273_v5   ;;  %1336 = vperm.xlu0 %4474, %v1274_v14   ;;  %v886_v40 = vpack.c.bf16 %v874_v30, %v873_v25  ;;  %v580_v41 = vmax.f32 %v564_v32, 0.0  ;;  %v565_v42 = vadd.f32 %v4771_v11, %v542_v33  ;;  %v838_v43 = vmul.f32 %v4758_v9, %v519_v19  ;;  %v3840_v5 = vld [vmem:[%s6646_s1 + $0x80] sm:$0xff]  ;;  %v3846_v33 = vld [vmem:[%s6646_s1 + $0xb0] sm:$0xff]  ;;  %p4501_p13 = pneg %p4500_p12 }
  0x3b   : > { %v875_v45 = vmax.f32 %v859_v36, 0.0  ;;  %v876_v46 = vmax.f32 %v860_v37, 0.0  ;;  %v566_v47 = vadd.f32 %v4771_v11, %v543_v38  ;;  %v839_v48 = vmul.f32 %v4758_v9, %v520_v24  ;;  %v3842_v24 = vld [vmem:[%s6646_s1 + $0x90] sm:$0xff]  ;;  %v3844_v30 = vld [vmem:[%s6646_s1 + $0xa0] sm:$0xff]  ;;  %v3849_v36 = vld [vmem:[%s6646_s1 + $0xc8] sm:$0xff] }
  0x3c   : > { %4197 = vmatmul.mubr.msk.bf16.gmra.mrb[4].mxu0 %vm603_vm0, %v590_v29  ;;  %4215 = vmatmul.mubr.msk.bf16.gmra.mrb[4].mxu1 %vm603_vm0, %v886_v40  ;;  %v591_v50 = vpack.c.bf16 %v580_v41, %v579_v35  ;;  %v581_v51 = vmax.f32 %v565_v42, 0.0  ;;  %v861_v52 = vadd.f32 %v4776_v12, %v838_v43  ;;  %v840_v53 = vmul.f32 %v4758_v9, %v521_v39  ;;  %v3848_v35 = vld [vmem:[%s6646_s1 + $0xc0] sm:$0xff]  ;;  %v3850_v37 = vld [vmem:[%s6646_s1 + $0xd0] sm:$0xff]  ;;  %v3851_v38 = vld [vmem:[%s6646_s1 + $0xd8] sm:$0xff] }
  0x3d   : > { %v887_v56 = vpack.c.bf16 %v876_v46, %v875_v45  ;;  %v582_v57 = vmax.f32 %v566_v47, 0.0  ;;  %v862_v58 = vadd.f32 %v4776_v12, %v839_v48  ;;  %v841_v59 = vmul.f32 %v4758_v9, %v522_v44  ;;  %v3853_v40 = vld [vmem:[%s6646_s1 + $0xe8] sm:$0xff]  ;;  %v3854_v41 = vld [vmem:[%s6646_s1 + $0xf0] sm:$0xff]  ;;  %v3855_v42 = vld [vmem:[%s6646_s1 + $0xf8] sm:$0xff] }
  0x3e   : > { %1341 = vperm.xlu1 %4475, %v1275_v31   ;;  %1346 = vperm.xlu0 %4474, %v1276_v34   ;;  %v877_v61 = vmax.f32 %v861_v52, 0.0  ;;  %v863_v62 = vadd.f32 %v4776_v12, %v840_v53  ;;  %v544_v63 = vmul.f32 %v4753_v8, %v521_v39  ;;  %v545_v0 = vmul.f32 %v4753_v8, %v522_v44  ;;  %v3845_v31 = vld [vmem:[%s6646_s1 + $0xa8] sm:$0xff]  ;;  %v3847_v34 = vld [vmem:[%s6646_s1 + $0xb8] sm:$0xff]  ;;  %v3852_v39 = vld [vmem:[%s6646_s1 + $0xe0] sm:$0xff] }
  0x3f   : > { %4200 = vmatprep.mubr.msk.bf16.mxu0 %vm603_vm0, %v591_v50  ;;  %4218 = vmatprep.mubr.msk.bf16.mxu1 %vm603_vm0, %v887_v56  ;;  %v592_v1 = vpack.c.bf16 %v582_v57, %v581_v51  ;;  %v878_v2 = vmax.f32 %v862_v58, 0.0  ;;  %v864_v3 = vadd.f32 %v4776_v12, %v841_v59  ;;  %v842_v4 = vmul.f32 %v4758_v9, %v523_v54  ;;  %v3870_v43 = vld [vmem:[%s6646_s1 + $0x100] sm:$0xff]  ;;  %v3871_v44 = vld [vmem:[%s6646_s1 + $0x108] sm:$0xff]  ;;  %v3872_v45 = vld [vmem:[%s6646_s1 + $0x110] sm:$0xff] }
  0x40   : > { %v879_v6 = vmax.f32 %v863_v62, 0.0  ;;  %v567_v7 = vadd.f32 %v4771_v11, %v544_v63  ;;  %v568_v10 = vadd.f32 %v4771_v11, %v545_v0  ;;  %v843_v13 = vmul.f32 %v4758_v9, %v524_v60  ;;  %v3873_v46 = vld [vmem:[%s6646_s1 + $0x118] sm:$0xff]  ;;  %v3874_v47 = vld [vmem:[%s6646_s1 + $0x120] sm:$0xff]  ;;  %v3875_v48 = vld [vmem:[%s6646_s1 + $0x128] sm:$0xff] }
  0x41   : > { %v888_v14 = vpack.c.bf16 %v878_v2, %v877_v61  ;;  %v880_v16 = vmax.f32 %v864_v3, 0.0  ;;  %v865_v17 = vadd.f32 %v4776_v12, %v842_v4  ;;  %v546_v18 = vmul.f32 %v4753_v8, %v523_v54  ;;  %v3877_v50 = vld [vmem:[%s6646_s1 + $0x138] sm:$0xff]  ;;  %v3878_v51 = vld [vmem:[%s6646_s1 + $0x140] sm:$0xff]  ;;  %v3879_v53 = vld [vmem:[%s6646_s1 + $0x148] sm:$0xff] }
  0x42   : > { %1351 = vperm.xlu1 %4475, %v1277_v49   ;;  %1356 = vperm.xlu0 %4474, %v1278_v55   ;;  %v583_v19 = vmax.f32 %v567_v7, 0.0  ;;  %v584_v20 = vmax.f32 %v568_v10, 0.0  ;;  %v866_v21 = vadd.f32 %v4776_v12, %v843_v13  ;;  %v547_v22 = vmul.f32 %v4753_v8, %v524_v60  ;;  %v3843_v8 = vld [vmem:[%s6646_s1 + $0x98] sm:$0xff]  ;;  %v3876_v49 = vld [vmem:[%s6646_s1 + $0x130] sm:$0xff]  ;;  %v4478_v52 = vld [vmem:[%s6625_s10] sm:$0xff]  }
  0x43   : > { %v889_v9 = vpack.c.bf16 %v880_v16, %v879_v6  ;;  %v569_v23 = vadd.f32 %v4771_v11, %v546_v18  ;;  %v881_v26 = vmax.f32 %v865_v17, 0.0  ;;  %4226 = vmatprep.subr.bf16.mxu0 %v4478_v52  ;;  %v3880_v54 = vld [vmem:[%s6646_s1 + $0x150] sm:$0xff]  ;;  %v3881_v55 = vld [vmem:[%s6646_s1 + $0x158] sm:$0xff]  ;;  %v3882_v56 = vld [vmem:[%s6646_s1 + $0x160] sm:$0xff] }
  0x44   : > { %4201 = vmatmul.mubr.msk.bf16.gmra.mrb[8].mxu0 %vm603_vm0, %v592_v1  ;;  %4219 = vmatmul.mubr.msk.bf16.gmra.mrb[8].mxu1 %vm603_vm0, %v888_v14  ;;  %v593_v25 = vpack.c.bf16 %v584_v20, %v583_v19  ;;  %v882_v27 = vmax.f32 %v866_v21, 0.0  ;;  %v570_v28 = vadd.f32 %v4771_v11, %v547_v22  ;;  %v3883_v57 = vld [vmem:[%s6646_s1 + $0x168] sm:$0xff]  ;;  %v3900_v58 = vld [vmem:[%s6646_s1 + $0x180] sm:$0xff]  ;;  %v3902_v61 = vld [vmem:[%s6646_s1 + $0x190] sm:$0xff] }
  0x45   : > { %4222 = vmatprep.mubr.msk.bf16.mxu1 %vm603_vm0, %v889_v9  ;;  %v585_v12 = vmax.f32 %v569_v23, 0.0  ;;  %4227 = vmatpush3.bf16.msra.mxu0 %v4478_v52  ;;  %v3901_v59 = vld [vmem:[%s6646_s1 + $0x188] sm:$0xff]  ;;  %v3903_v62 = vld [vmem:[%s6646_s1 + $0x198] sm:$0xff]  ;;  %v3944_v63 = vld [vmem:[%s6646_s1 + $0x280] sm:$0xff] }
  0x46   : > { %1524 = vperm.xlu1 %4475, %v3840_v5   ;;  %1529 = vperm.xlu0 %4474, %v3841_v15   ;;  %v586_v29 = vmax.f32 %v570_v28, 0.0  ;;  %v890_v11 = vpack.c.bf16 %v882_v27, %v881_v26  ;;  %v4479_v60 = vld [vmem:[%s6625_s10 + $0x8] sm:$0xff]   ;;  %v3946_v1 = vld [vmem:[%s6646_s1 + $0x290] sm:$0xff]  ;;  %v3947_v2 = vld [vmem:[%s6646_s1 + $0x298] sm:$0xff] }
  0x47   : > { %4204 = vmatprep.mubr.msk.bf16.mxu0 %vm603_vm0, %v593_v25  ;;  %4228 = vmatprep.subr.bf16.mxu0 %v4479_v60  ;;  %v3945_v0 = vld [vmem:[%s6646_s1 + $0x288] sm:$0xff]  ;;  %v4480_v3 = vld [vmem:[%s6625_s10 + $0x10] sm:$0xff]   ;;  %v3974_v4 = vld [vmem:[%s6646_s1 + $0x300] sm:$0xff] }
  0x48   : > { %v594_v32 = vpack.c.bf16 %v586_v29, %v585_v12  ;;  %4246 = vmatprep.subr.bf16.mxu1 %v4480_v3  ;;  %v3975_v5 = vld [vmem:[%s6646_s1 + $0x308] sm:$0xff]  ;;  %v4481_v6 = vld [vmem:[%s6625_s10 + $0x18] sm:$0xff]   ;;  %v3976_v7 = vld [vmem:[%s6646_s1 + $0x310] sm:$0xff] }
  0x49   : > { %4229 = vmatpush3.bf16.msra.mxu0 %v4479_v60  ;;  %4247 = vmatpush3.bf16.msra.mxu1 %v4480_v3  ;;  %v3977_v10 = vld [vmem:[%s6646_s1 + $0x318] sm:$0xff]  ;;  %v3904_v13 = vld [vmem:[%s6646_s1 + $0x1a0] sm:$0xff]  ;;  %v3905_v14 = vld [vmem:[%s6646_s1 + $0x1a8] sm:$0xff] }
  0x4a   : > { %1534 = vperm.xlu1 %4475, %v3842_v24   ;;  %1539 = vperm.xlu0 %4474, %v3843_v8   ;;  %v4004_v15 = vld [vmem:[%s6646_s1 + $0x380] sm:$0xff]  ;;  %v4005_v16 = vld [vmem:[%s6646_s1 + $0x388] sm:$0xff]  ;;  %v3906_v18 = vld [vmem:[%s6646_s1 + $0x1b0] sm:$0xff] }
  0x4b   : > { %4248 = vmatprep.subr.bf16.mxu1 %v4481_v6  ;;  %v5057_v17 = vld [vmem:[%s6625_s10 + $0x20] sm:$0xff]   ;;  %v3907_v19 = vld [vmem:[%s6646_s1 + $0x1b8] sm:$0xff]  ;;  %v4006_v20 = vld [vmem:[%s6646_s1 + $0x390] sm:$0xff] }
  0x4c   : > { %4205 = vmatmul.mubr.msk.bf16.gmra.mrb[12].mxu0 %vm603_vm0, %v594_v32  ;;  %4223 = vmatmul.mubr.msk.bf16.gmra.mrb[12].mxu1 %vm603_vm0, %v890_v11  ;;  %v4007_v21 = vld [vmem:[%s6646_s1 + $0x398] sm:$0xff]  ;;  %v4034_v23 = vld [vmem:[%s6646_s1 + $0x400] sm:$0xff]  ;;  %v4035_v24 = vld [vmem:[%s6646_s1 + $0x408] sm:$0xff] }
  0x4d   : > { %4249 = vmatpush3.bf16.msra.mxu1 %v4481_v6  ;;  %4266 = vmatprep.subr.bf16.mxu0 %v5057_v17  ;;  %v4036_v27 = vld [vmem:[%s6646_s1 + $0x410] sm:$0xff]  ;;  %v4037_v28 = vld [vmem:[%s6646_s1 + $0x418] sm:$0xff]  ;;  %v3953_v6 = vld [vmem:[%s6646_s1 + $0x2c8] sm:$0xff] }
  0x4e   : > { %1544 = vperm.xlu1 %4475, %v3844_v30   ;;  %1549 = vperm.xlu0 %4474, %v3845_v31   ;;  %v5099_v29 = vld [vmem:[%s6625_s10 + $0x30] sm:$0xff]   ;;  %v3948_v30 = vld [vmem:[%s6646_s1 + $0x2a0] sm:$0xff]  ;;  %v3949_v31 = vld [vmem:[%s6646_s1 + $0x2a8] sm:$0xff] }
  0x4f   : > { %4286 = vmatprep.subr.bf16.mxu1 %v5099_v29 }
  0x52   : > { %1554 = vperm.xlu1 %4475, %v3846_v33   ;;  %1559 = vperm.xlu0 %4474, %v3847_v34   ;;  %v3950_v33 = vld [vmem:[%s6646_s1 + $0x2b0] sm:$0xff]  ;;  %v3951_v34 = vld [vmem:[%s6646_s1 + $0x2b8] sm:$0xff] }
  0x56   : > { %1564 = vperm.xlu1 %4475, %v3848_v35   ;;  %1569 = vperm.xlu0 %4474, %v3849_v36  }
  0x5a   : > { %1574 = vperm.xlu1 %4475, %v3850_v37   ;;  %1579 = vperm.xlu0 %4474, %v3851_v38   ;;  %v3978_v37 = vld [vmem:[%s6646_s1 + $0x320] sm:$0xff]  ;;  %v3979_v38 = vld [vmem:[%s6646_s1 + $0x328] sm:$0xff] }
  0x5e   : > { %1584 = vperm.xlu1 %4475, %v3852_v39   ;;  %1589 = vperm.xlu0 %4474, %v3853_v40  }
  0x62   : > { %1594 = vperm.xlu1 %4475, %v3854_v41   ;;  %1599 = vperm.xlu0 %4474, %v3855_v42   ;;  %v3980_v41 = vld [vmem:[%s6646_s1 + $0x330] sm:$0xff]  ;;  %v3981_v42 = vld [vmem:[%s6646_s1 + $0x338] sm:$0xff] }
  0x66   : > { %1800 = vperm.xlu1 %4475, %v3870_v43   ;;  %1805 = vperm.xlu0 %4474, %v3871_v44  }
  0x6a   : > { %1810 = vperm.xlu1 %4475, %v3872_v45   ;;  %1815 = vperm.xlu0 %4474, %v3873_v46   ;;  %v3908_v45 = vld [vmem:[%s6646_s1 + $0x1c0] sm:$0xff]  ;;  %v3909_v46 = vld [vmem:[%s6646_s1 + $0x1c8] sm:$0xff] }
  0x6e   : > { %1820 = vperm.xlu1 %4475, %v3874_v47   ;;  %1825 = vperm.xlu0 %4474, %v3875_v48  }
  0x72   : > { %1830 = vperm.xlu1 %4475, %v3876_v49   ;;  %1835 = vperm.xlu0 %4474, %v3877_v50   ;;  %v4008_v49 = vld [vmem:[%s6646_s1 + $0x3a0] sm:$0xff]  ;;  %v4009_v50 = vld [vmem:[%s6646_s1 + $0x3a8] sm:$0xff] }
  0x76   : > { %1840 = vperm.xlu1 %4475, %v3878_v51   ;;  %1845 = vperm.xlu0 %4474, %v3879_v53   ;;  %v3910_v53 = vld [vmem:[%s6646_s1 + $0x1d0] sm:$0xff] }
  0x7a   : > { %1850 = vperm.xlu1 %4475, %v3880_v54   ;;  %1855 = vperm.xlu0 %4474, %v3881_v55   ;;  %v3911_v54 = vld [vmem:[%s6646_s1 + $0x1d8] sm:$0xff] }
  0x7e   : > { %1860 = vperm.xlu1 %4475, %v3882_v56   ;;  %1865 = vperm.xlu0 %4474, %v3883_v57   ;;  %v4010_v57 = vld [vmem:[%s6646_s1 + $0x3b0] sm:$0xff] }
  0x82   : > { %2075 = vperm.xlu1 %4475, %v3900_v58   ;;  %2080 = vperm.xlu0 %4474, %v3901_v59   ;;  %v4011_v58 = vld [vmem:[%s6646_s1 + $0x3b8] sm:$0xff] }
  0x86   : > { %2085 = vperm.xlu1 %4475, %v3902_v61   ;;  %2090 = vperm.xlu0 %4474, %v3903_v62   ;;  %v4038_v61 = vld [vmem:[%s6646_s1 + $0x420] sm:$0xff]  ;;  %v4039_v62 = vld [vmem:[%s6646_s1 + $0x428] sm:$0xff] }
  0x8a   : > { %2480 = vperm.xlu1 %4475, %v3944_v63   ;;  %2485 = vperm.xlu0 %4474, %v3945_v0  }
  0x8e   : > { %2490 = vperm.xlu1 %4475, %v3946_v1   ;;  %2495 = vperm.xlu0 %4474, %v3947_v2   ;;  %v4040_v1 = vld [vmem:[%s6646_s1 + $0x430] sm:$0xff]  ;;  %v4041_v2 = vld [vmem:[%s6646_s1 + $0x438] sm:$0xff] }
  0x92   : > { %2755 = vperm.xlu1 %4475, %v3974_v4   ;;  %2760 = vperm.xlu0 %4474, %v3975_v5   ;;  %v3952_v5 = vld [vmem:[%s6646_s1 + $0x2c0] sm:$0xff] }
  0x96   : > { %2765 = vperm.xlu1 %4475, %v3976_v7   ;;  %2770 = vperm.xlu0 %4474, %v3977_v10  }
  0x9a   : > { %2095 = vperm.xlu1 %4475, %v3904_v13   ;;  %2100 = vperm.xlu0 %4474, %v3905_v14   ;;  %v3954_v13 = vld [vmem:[%s6646_s1 + $0x2d0] sm:$0xff]  ;;  %v3955_v14 = vld [vmem:[%s6646_s1 + $0x2d8] sm:$0xff] }
  0x9e   : > { %2998 = vperm.xlu1 %4475, %v4004_v15   ;;  %3003 = vperm.xlu0 %4474, %v4005_v16  }
  0xa2   : > { %2105 = vperm.xlu1 %4475, %v3906_v18   ;;  %2110 = vperm.xlu0 %4474, %v3907_v19   ;;  %v3982_v18 = vld [vmem:[%s6646_s1 + $0x340] sm:$0xff]  ;;  %v3983_v19 = vld [vmem:[%s6646_s1 + $0x348] sm:$0xff] }
  0xa5   : > { %v5072_v22 = vpop.permute.xlu1 %1286  ;;  %v5074_v9 = vpop.permute.xlu0 %1281 }
  0xa6   : > { %3008 = vperm.xlu1 %4475, %v4006_v20   ;;  %3013 = vperm.xlu0 %4474, %v4007_v21  }
  0xa9   : > { %v5082_v25 = vpop.permute.xlu1 %1291  ;;  %v5084_v26 = vpop.permute.xlu0 %1296 }
  0xaa   : > { %3273 = vperm.xlu1 %4475, %v4034_v23   ;;  %3278 = vperm.xlu0 %4474, %v4035_v24   ;;  %v3884_v23 = vld [vmem:[%s6646_s1 + $0x170] sm:$0xff]  ;;  %v3885_v24 = vld [vmem:[%s6646_s1 + $0x178] sm:$0xff] }
  0xad   : > { %v5092_v8 = vpop.permute.xlu1 %1301  ;;  %v5094_v12 = vpop.permute.xlu0 %1306 }
  0xae   : > { %3283 = vperm.xlu1 %4475, %v4036_v27   ;;  %3288 = vperm.xlu0 %4474, %v4037_v28  }
  0xb1   : > { %v5108_v11 = vpop.permute.xlu1 %1311  ;;  %v5110_v32 = vpop.permute.xlu0 %1316 }
  0xb2   : > { %2500 = vperm.xlu1 %4475, %v3948_v30   ;;  %2505 = vperm.xlu0 %4474, %v3949_v31   ;;  %v3984_v30 = vld [vmem:[%s6646_s1 + $0x350] sm:$0xff]  ;;  %v3985_v31 = vld [vmem:[%s6646_s1 + $0x358] sm:$0xff] }
  0xb5   : > { %v5118_v35 = vpop.permute.xlu1 %1321  ;;  %v5120_v36 = vpop.permute.xlu0 %1326 }
  0xb6   : > { %2510 = vperm.xlu1 %4475, %v3950_v33   ;;  %2515 = vperm.xlu0 %4474, %v3951_v34  }
  0xb9   : > { %v5128_v39 = vpop.permute.xlu1 %1331  ;;  %v5130_v40 = vpop.permute.xlu0 %1336 }
  0xba   : > { %2775 = vperm.xlu1 %4475, %v3978_v37   ;;  %2780 = vperm.xlu0 %4474, %v3979_v38   ;;  %v3912_v37 = vld [vmem:[%s6646_s1 + $0x1e0] sm:$0xff]  ;;  %v3913_v38 = vld [vmem:[%s6646_s1 + $0x1e8] sm:$0xff] }
  0xbd   : > { %v5138_v43 = vpop.permute.xlu1 %1341  ;;  %v5140_v44 = vpop.permute.xlu0 %1346 }
  0xbe   : > { %2785 = vperm.xlu1 %4475, %v3980_v41   ;;  %2790 = vperm.xlu0 %4474, %v3981_v42  }
  0xc1   : > { %v5148_v47 = vpop.permute.xlu1 %1351  ;;  %v5150_v48 = vpop.permute.xlu0 %1356 }
  0xc2   : > { %2115 = vperm.xlu1 %4475, %v3908_v45   ;;  %2120 = vperm.xlu0 %4474, %v3909_v46   ;;  %v4012_v45 = vld [vmem:[%s6646_s1 + $0x3c0] sm:$0xff]  ;;  %v4013_v46 = vld [vmem:[%s6646_s1 + $0x3c8] sm:$0xff] }
  0xc5   : > { %v5158_v51 = vpop.permute.xlu1 %1524  ;;  %v5160_v52 = vpop.permute.xlu0 %1529 }
  0xc6   : > { %3018 = vperm.xlu1 %4475, %v4008_v49   ;;  %3023 = vperm.xlu0 %4474, %v4009_v50  }
  0xc9   : > { %v5168_v55 = vpop.permute.xlu1 %1534  ;;  %v5170_v56 = vpop.permute.xlu0 %1539 }
  0xca   : > { %2125 = vperm.xlu1 %4475, %v3910_v53   ;;  %2130 = vperm.xlu0 %4474, %v3911_v54   ;;  %v3914_v53 = vld [vmem:[%s6646_s1 + $0x1f0] sm:$0xff]  ;;  %v3915_v54 = vld [vmem:[%s6646_s1 + $0x1f8] sm:$0xff] }
  0xcd   : > { %v5178_v59 = vpop.permute.xlu1 %1544  ;;  %v5180_v60 = vpop.permute.xlu0 %1549 }
  0xce   : > { %3028 = vperm.xlu1 %4475, %v4010_v57   ;;  %3033 = vperm.xlu0 %4474, %v4011_v58  }
  0xd1   : > { %v5188_v63 = vpop.permute.xlu1 %1554  ;;  %v5190_v0 = vpop.permute.xlu0 %1559 }
  0xd2   : > { %3293 = vperm.xlu1 %4475, %v4038_v61   ;;  %3298 = vperm.xlu0 %4474, %v4039_v62   ;;  %v4014_v61 = vld [vmem:[%s6646_s1 + $0x3d0] sm:$0xff]  ;;  %v4015_v62 = vld [vmem:[%s6646_s1 + $0x3d8] sm:$0xff] }
  0xd5   : > { %v5198_v3 = vpop.permute.xlu1 %1564  ;;  %v5200_v4 = vpop.permute.xlu0 %1569 }
  0xd6   : > { %3303 = vperm.xlu1 %4475, %v4040_v1   ;;  %3308 = vperm.xlu0 %4474, %v4041_v2  }
  0xd9   : > { %v5208_v7 = vpop.permute.xlu1 %1574  ;;  %v5210_v10 = vpop.permute.xlu0 %1579 }
  0xda   : > { %2520 = vperm.xlu1 %4475, %v3952_v5   ;;  %2525 = vperm.xlu0 %4474, %v3953_v6   ;;  %v4042_v5 = vld [vmem:[%s6646_s1 + $0x440] sm:$0xff]  ;;  %v4043_v6 = vld [vmem:[%s6646_s1 + $0x448] sm:$0xff] }
  0xdd   : > { %v5218_v15 = vpop.permute.xlu1 %1584  ;;  %v5220_v16 = vpop.permute.xlu0 %1589 }
  0xde   : > { %2530 = vperm.xlu1 %4475, %v3954_v13   ;;  %2535 = vperm.xlu0 %4474, %v3955_v14  }
  0xe1   : > { %v5228_v20 = vpop.permute.xlu1 %1594  ;;  %v5230_v21 = vpop.permute.xlu0 %1599 }
  0xe2   : > { %2795 = vperm.xlu1 %4475, %v3982_v18   ;;  %2800 = vperm.xlu0 %4474, %v3983_v19   ;;  %v4044_v18 = vld [vmem:[%s6646_s1 + $0x450] sm:$0xff] }
  0xe5   : > { %v5238_v27 = vpop.permute.xlu1 %1800  ;;  %v5240_v28 = vpop.permute.xlu0 %1805 }
  0xe6   : > { %6650 = vst [vmem:[#allocation12_spill] sm:$0xff] %v5238_v27  ;;  %1870 = vperm.xlu1 %4475, %v3884_v23   ;;  %1875 = vperm.xlu0 %4474, %v3885_v24  }
  0xe9   : > { %v5248_v33 = vpop.permute.xlu1 %1810  ;;  %v5250_v34 = vpop.permute.xlu0 %1815 }
  0xea   : > { %2805 = vperm.xlu1 %4475, %v3984_v30   ;;  %2810 = vperm.xlu0 %4474, %v3985_v31   ;;  %v5320_v31 = vld [vmem:[%s6623_s8] ss:$0 sm:$0xff] }
  0xed   : > { %v5258_v41 = vpop.permute.xlu1 %1820  ;;  %v5260_v42 = vpop.permute.xlu0 %1825 }
  0xee   : > { %6651 = vst [vmem:[#allocation13_spill] sm:$0xff] %v5258_v41  ;;  %6652 = vst [vmem:[#allocation14_spill] sm:$0xff] %v5260_v42  ;;  %2135 = vperm.xlu1 %4475, %v3912_v37   ;;  %2140 = vperm.xlu0 %4474, %v3913_v38  }
  0xf1   : > { %v5268_v49 = vpop.permute.xlu1 %1830  ;;  %v5270_v50 = vpop.permute.xlu0 %1835 }
  0xf2   : > { %6653 = vst [vmem:[#allocation15_spill] sm:$0xff] %v5268_v49  ;;  %6654 = vst [vmem:[#allocation16_spill] sm:$0xff] %v5270_v50  ;;  %3038 = vperm.xlu1 %4475, %v4012_v45   ;;  %3043 = vperm.xlu0 %4474, %v4013_v46  }
  0xf5   : > { %v5278_v57 = vpop.permute.xlu1 %1840  ;;  %v5280_v58 = vpop.permute.xlu0 %1845 }
  0xf6   : > { %6655 = vst [vmem:[#allocation17_spill] sm:$0xff] %v5278_v57  ;;  %6656 = vst [vmem:[#allocation18_spill] sm:$0xff] %v5280_v58  ;;  %2145 = vperm.xlu1 %4475, %v3914_v53   ;;  %2150 = vperm.xlu0 %4474, %v3915_v54   ;;  %v5335_v53 = vld [vmem:[%s6624_s9] ss:$0 sm:$0xff] }
  0xf9   : > { %v5288_v1 = vpop.permute.xlu1 %1850  ;;  %v5290_v2 = vpop.permute.xlu0 %1855 }
  0xfa   : > { %6657 = vst [vmem:[#allocation19_spill] sm:$0xff] %v5288_v1  ;;  %6658 = vst [vmem:[#allocation20_spill] sm:$0xff] %v5290_v2  ;;  %3048 = vperm.xlu1 %4475, %v4014_v61   ;;  %3053 = vperm.xlu0 %4474, %v4015_v62  }
  0xfd   : > { %v5298_v13 = vpop.permute.xlu1 %1860  ;;  %v5300_v14 = vpop.permute.xlu0 %1865 }
  0xfe   : > { %6659 = vst [vmem:[#allocation21_spill] sm:$0xff] %v5298_v13  ;;  %6660 = vst [vmem:[#allocation22_spill] sm:$0xff] %v5300_v14  ;;  %3313 = vperm.xlu1 %4475, %v4042_v5   ;;  %3318 = vperm.xlu0 %4474, %v4043_v6  }
 0x101   : > { %v5308_v19 = vpop.permute.xlu1 %2075  ;;  %v5310_v23 = vpop.permute.xlu0 %2080 }
 0x102   : > { %6661 = vst [vmem:[#allocation23_spill] sm:$0xff] %v5308_v19  ;;  %3323 = vperm.xlu1 %4475, %v4044_v18  }
 0x105   : > { %v5313_v24 = vpop.permute.xlu1 %2085  ;;  %v5315_v30 = vpop.permute.xlu0 %2090 }
 0x107   : > { %v4194_v37 = vpop.f32.mrb[0].mxu0  ;;  %v4212_v38 = vpop.f32.mrb[0].mxu1 }
 0x108   : > { %727 = vst.msk [vmem:[%s5324_s24 + $0x10] sm:$0xff] %vm603_vm0, %v4194_v37  ;;  %761 = vrot.lane.b32.xlu1 %v4194_v37, %s4595_s26  ;;  %v1029_v46 = vmul.f32 %v4212_v38, %v5320_v31  ;;  %v662_v61 = vpop.f32.mrb[1].mxu0  ;;  %v957_v62 = vpop.f32.mrb[1].mxu1 }
 0x109   : > { %v5328_v45 = vpop.permute.xlu1 %2480  ;;  %v5337_v54 = vpop.permute.xlu0 %2485  ;;  %725 = vst.msk [vmem:[%s5324_s24] sm:$0xff] %vm603_vm0, %v662_v61  ;;  %757 = vrot.lane.b32.xlu0 %v662_v61, %s4595_s26  ;;  %v1027_v6 = vmul.f32 %v5320_v31, %v957_v62 }
 0x10a   : > { %6662 = vst [vmem:[#allocation24_spill] sm:$0xff] %v5328_v45  ;;  %6663 = vst [vmem:[#allocation25_spill] sm:$0xff] %v5337_v54  ;;  %v4195_v5 = vpop.f32.mrb[2].mxu0  ;;  %v4213_v18 = vpop.f32.mrb[2].mxu1  ;;  %v1052_v38 = vadd.f32 %v5335_v53, %v1029_v46 }
 0x10b   : > { %728 = vst.msk [vmem:[%s5324_s24 + $0x18] sm:$0xff] %vm603_vm0, %v4195_v5  ;;  %v665_v37 = vpop.f32.mrb[3].mxu0  ;;  %v1030_v45 = vmul.f32 %v4213_v18, %v5320_v31  ;;  %v960_v19 = vpop.f32.mrb[3].mxu1  ;;  %v1050_v61 = vadd.f32 %v5335_v53, %v1027_v6 }
 0x10c   : > { %726 = vst.msk [vmem:[%s5324_s24 + $0x8] sm:$0xff] %vm603_vm0, %v665_v37  ;;  %763 = vrot.lane.b32.xlu1 %v4195_v5, %s4595_s26  ;;  %v1028_v62 = vmul.f32 %v5320_v31, %v960_v19  ;;  %v1068_v13 = vmax.f32 %v1052_v38, 0.0 }
 0x10d   : > { %v5347_v54 = vpop.permute.xlu1 %2490  ;;  %v5354_v14 = vpop.permute.xlu0 %2495  ;;  %v1053_v27 = vadd.f32 %v5335_v53, %v1030_v45  ;;  %759 = vrot.lane.b32.xlu0 %v665_v37, %s4595_s26  ;;  %v1066_v6 = vmax.f32 %v1050_v61, 0.0 }
 0x10e   : > { %6664 = vst [vmem:[#allocation26_spill] sm:$0xff] %v5347_v54  ;;  %6665 = vst [vmem:[#allocation27_spill] sm:$0xff] %v5354_v14  ;;  %v1051_v46 = vadd.f32 %v5335_v53, %v1028_v62 }
 0x10f   : > { %v4198_v18 = vpop.f32.mrb[4].mxu0  ;;  %v1069_v54 = vmax.f32 %v1053_v27, 0.0  ;;  %v4216_v19 = vpop.f32.mrb[4].mxu1 }
 0x110   : > { %731 = vst.msk [vmem:[%s5324_s24 + $0x30] sm:$0xff] %vm603_vm0, %v4198_v18  ;;  %v678_v5 = vpop.f32.mrb[5].mxu0  ;;  %v1067_v58 = vmax.f32 %v1051_v46, 0.0  ;;  %v1033_v37 = vmul.f32 %v4216_v19, %v5320_v31  ;;  %v973_v38 = vpop.f32.mrb[5].mxu1 }
 0x111   : > { %v5361_v1 = vpop.permute.xlu1 %2755  ;;  %v5363_v2 = vpop.permute.xlu0 %2760  ;;  %729 = vst.msk [vmem:[%s5324_s24 + $0x20] sm:$0xff] %vm603_vm0, %v678_v5  ;;  %v5367_v45 = vpack.c.bf16 %v1069_v54, %v1068_v13  ;;  %769 = vrot.lane.b32.xlu0 %v4198_v18, %s4595_s26  ;;  %v1031_v61 = vmul.f32 %v5320_v31, %v973_v38 }
 0x112   : > { %6666 = vst [vmem:[#allocation28_spill] sm:$0xff] %v5361_v1  ;;  %6667 = vst [vmem:[#allocation29_spill] sm:$0xff] %v5363_v2  ;;  %v4199_v27 = vpop.f32.mrb[6].mxu0  ;;  %v5371_v62 = vpack.c.bf16 %v1067_v58, %v1066_v6  ;;  %v4217_v46 = vpop.f32.mrb[6].mxu1  ;;  %v1056_v13 = vadd.f32 %v5335_v53, %v1033_v37  ;;  %v4483_v58 = vld [vmem:[%s6625_s10 + $0x28] sm:$0xff]  }
 0x113   : > { %732 = vst.msk [vmem:[%s5324_s24 + $0x38] sm:$0xff] %vm603_vm0, %v4199_v27  ;;  %771 = vrot.lane.b32.xlu1 %v4199_v27, %s4595_s26  ;;  %v681_v2 = vpop.f32.mrb[7].mxu0  ;;  %v1034_v54 = vmul.f32 %v4217_v46, %v5320_v31  ;;  %v976_v19 = vpop.f32.mrb[7].mxu1  ;;  %v1054_v18 = vadd.f32 %v5335_v53, %v1031_v61  ;;  %v4485_v27 = vld [vmem:[%s6625_s10 + $0x38] sm:$0xff]  }
 0x114   : > { %730 = vst.msk [vmem:[%s5324_s24 + $0x28] sm:$0xff] %vm603_vm0, %v681_v2  ;;  %v1032_v6 = vmul.f32 %v5320_v31, %v976_v19  ;;  %4230 = vmatprep.mubr.msk.bf16.mxu0 %vm1106_vm1, %v5371_v62  ;;  %4250 = vmatprep.mubr.msk.bf16.mxu1 %vm1106_vm1, %v5371_v62  ;;  %v1072_v19 = vmax.f32 %v1056_v13, 0.0 }
 0x115   : > { %v5379_v1 = vpop.permute.xlu1 %2765  ;;  %v5392_v37 = vpop.permute.xlu0 %2770  ;;  %v1057_v38 = vadd.f32 %v5335_v53, %v1034_v54  ;;  %4231 = vmatmul.mubr.msk.bf16.vlgmr.msra.gmra.mrb[16].mxu0 %vm1106_vm1, %v5367_v45  ;;  %4251 = vmatmul.mubr.msk.bf16.vlgmr.msra.gmra.mrb[16].mxu1 %vm1106_vm1, %v5367_v45 }
 0x116   : > { %6668 = vst [vmem:[#allocation30_spill] sm:$0xff] %v5379_v1  ;;  %6669 = vst [vmem:[#allocation31_spill] sm:$0xff] %v5392_v37  ;;  %v1055_v61 = vadd.f32 %v5335_v53, %v1032_v6  ;;  %4267 = vmatpush3.bf16.msra.mxu0 %v5057_v17  ;;  %765 = vrot.lane.b32.xlu0 %v678_v5, %s4595_s26  ;;  %v5413_v6 = vld [vmem:[%s6625_s10 + $0x40] sm:$0xff]   ;;  %v1070_v17 = vmax.f32 %v1054_v18, 0.0 }
 0x117   : > { %v4202_v46 = vpop.f32.mrb[8].mxu0  ;;  %v1073_v54 = vmax.f32 %v1057_v38, 0.0  ;;  %767 = vrot.lane.b32.xlu1 %v681_v2, %s4595_s26  ;;  %4268 = vmatprep.subr.bf16.mxu0 %v4483_v58  ;;  %v4220_v5 = vpop.f32.mrb[8].mxu1 }
 0x118   : > { %735 = vst.msk [vmem:[%s5324_s24 + $0x50] sm:$0xff] %vm603_vm0, %v4202_v46  ;;  %v694_v1 = vpop.f32.mrb[9].mxu0  ;;  %v1071_v14 = vmax.f32 %v1055_v61, 0.0  ;;  %4287 = vmatpush3.bf16.msra.mxu1 %v5099_v29  ;;  %v1037_v13 = vmul.f32 %v4220_v5, %v5320_v31  ;;  %v989_v38 = vpop.f32.mrb[9].mxu1 }
 0x119   : > { %v5408_v37 = vpop.permute.xlu1 %2095  ;;  %v5415_v57 = vpop.permute.xlu0 %2100  ;;  %733 = vst.msk [vmem:[%s5324_s24 + $0x40] sm:$0xff] %vm603_vm0, %v694_v1  ;;  %v5420_v2 = vpack.c.bf16 %v1073_v54, %v1072_v19  ;;  %4288 = vmatprep.subr.bf16.mxu1 %v4485_v27  ;;  %v1035_v18 = vmul.f32 %v5320_v31, %v989_v38 }
 0x11a   : > { %6670 = vst [vmem:[#allocation32_spill] sm:$0xff] %v5408_v37  ;;  %6671 = vst [vmem:[#allocation33_spill] sm:$0xff] %v5415_v57  ;;  %v4203_v49 = vpop.f32.mrb[10].mxu0  ;;  %v5423_v42 = vpack.c.bf16 %v1071_v14, %v1070_v17  ;;  %v4221_v61 = vpop.f32.mrb[10].mxu1  ;;  %777 = vrot.lane.b32.xlu0 %v4202_v46, %s4595_s26  ;;  %4269 = vmatpush3.bf16.msra.mxu0 %v4483_v58  ;;  %v1060_v29 = vadd.f32 %v5335_v53, %v1037_v13  ;;  %v5440_v14 = vld [vmem:[%s6625_s10 + $0x50] sm:$0xff]  }
 0x11b   : > { %736 = vst.msk [vmem:[%s5324_s24 + $0x58] sm:$0xff] %vm603_vm0, %v4203_v49  ;;  %v697_v57 = vpop.f32.mrb[11].mxu0  ;;  %v1038_v19 = vmul.f32 %v4221_v61, %v5320_v31  ;;  %v992_v54 = vpop.f32.mrb[11].mxu1  ;;  %779 = vrot.lane.b32.xlu1 %v4203_v49, %s4595_s26  ;;  %4306 = vmatprep.subr.bf16.mxu0 %v5413_v6  ;;  %v1058_v58 = vadd.f32 %v5335_v53, %v1035_v18 }
 0x11c   : > { %734 = vst.msk [vmem:[%s5324_s24 + $0x48] sm:$0xff] %vm603_vm0, %v697_v57  ;;  %v1036_v46 = vmul.f32 %v5320_v31, %v992_v54  ;;  %4234 = vmatprep.mubr.msk.bf16.mxu0 %vm1106_vm1, %v5423_v42  ;;  %4254 = vmatprep.mubr.msk.bf16.mxu1 %vm1106_vm1, %v5423_v42  ;;  %v1076_v18 = vmax.f32 %v1060_v29, 0.0 }
 0x11d   : > { %v5432_v5 = vpop.permute.xlu1 %2998  ;;  %v5448_v49 = vpop.permute.xlu0 %3003  ;;  %v1061_v17 = vadd.f32 %v5335_v53, %v1038_v19  ;;  %4235 = vmatmul.mubr.msk.bf16.gmra.mrb[20].mxu0 %vm1106_vm1, %v5420_v2  ;;  %4255 = vmatmul.mubr.msk.bf16.gmra.mrb[20].mxu1 %vm1106_vm1, %v5420_v2 }
 0x11e   : > { %6672 = vst [vmem:[#allocation34_spill] sm:$0xff] %v5432_v5  ;;  %6673 = vst [vmem:[#allocation35_spill] sm:$0xff] %v5448_v49  ;;  %v1059_v13 = vadd.f32 %v5335_v53, %v1036_v46  ;;  %773 = vrot.lane.b32.xlu0 %v694_v1, %s4595_s26  ;;  %4289 = vmatpush3.bf16.msra.mxu1 %v4485_v27  ;;  %v1074_v5 = vmax.f32 %v1058_v58, 0.0  ;;  %v3956_v1 = vld [vmem:[%s6646_s1 + $0x2e0] sm:$0xff] }
 0x11f   : > { %v4206_v38 = vpop.f32.mrb[12].mxu0  ;;  %v1077_v61 = vmax.f32 %v1061_v17, 0.0  ;;  %775 = vrot.lane.b32.xlu1 %v697_v57, %s4595_s26  ;;  %4326 = vmatprep.subr.bf16.mxu1 %v5440_v14  ;;  %v4224_v46 = vpop.f32.mrb[12].mxu1 }
 0x120   : > { %739 = vst.msk [vmem:[%s5324_s24 + $0x70] sm:$0xff] %vm603_vm0, %v4206_v38  ;;  %v710_v19 = vpop.f32.mrb[13].mxu0  ;;  %v1075_v49 = vmax.f32 %v1059_v13, 0.0  ;;  %v1041_v27 = vmul.f32 %v4224_v46, %v5320_v31  ;;  %v1005_v29 = vpop.f32.mrb[13].mxu1 }
 0x121   : > { %v5458_v54 = vpop.permute.xlu1 %2105  ;;  %v5463_v50 = vpop.permute.xlu0 %2110  ;;  %737 = vst.msk [vmem:[%s5324_s24 + $0x60] sm:$0xff] %vm603_vm0, %v710_v19  ;;  %v5470_v57 = vpack.c.bf16 %v1077_v61, %v1076_v18  ;;  %v1039_v58 = vmul.f32 %v5320_v31, %v1005_v29 }
 0x122   : > { %6674 = vst [vmem:[#allocation36_spill] sm:$0xff] %v5458_v54  ;;  %6675 = vst [vmem:[#allocation37_spill] sm:$0xff] %v5463_v50  ;;  %v4207_v17 = vpop.f32.mrb[14].mxu0  ;;  %v5473_v54 = vpack.c.bf16 %v1075_v49, %v1074_v5  ;;  %v4225_v13 = vpop.f32.mrb[14].mxu1  ;;  %785 = vrot.lane.b32.xlu0 %v4206_v38, %s4595_s26  ;;  %v1064_v37 = vadd.f32 %v5335_v53, %v1041_v27 }
 0x123   : > { %740 = vst.msk [vmem:[%s5324_s24 + $0x78] sm:$0xff] %vm603_vm0, %v4207_v17  ;;  %v713_v50 = vpop.f32.mrb[15].mxu0  ;;  %v1042_v41 = vmul.f32 %v4225_v13, %v5320_v31  ;;  %v1008_v18 = vpop.f32.mrb[15].mxu1  ;;  %2540 = vperm.xlu1 %4475, %v3956_v1   ;;  %v1062_v5 = vadd.f32 %v5335_v53, %v1039_v58 }
 0x124   : > { %738 = vst.msk [vmem:[%s5324_s24 + $0x68] sm:$0xff] %vm603_vm0, %v713_v50  ;;  %v1040_v49 = vmul.f32 %v5320_v31, %v1008_v18  ;;  %4238 = vmatprep.mubr.msk.bf16.mxu0 %vm1106_vm1, %v5473_v54  ;;  %4258 = vmatprep.mubr.msk.bf16.mxu1 %vm1106_vm1, %v5473_v54  ;;  %v1080_v31 = vmax.f32 %v1064_v37, 0.0 }
 0x125   : > { %v5481_v61 = vpop.permute.xlu1 %3008  ;;  %v5491_v38 = vpop.permute.xlu0 %3013  ;;  %v1065_v46 = vadd.f32 %v5335_v53, %v1042_v41  ;;  %4239 = vmatmul.mubr.msk.bf16.gmra.mrb[24].mxu0 %vm1106_vm1, %v5470_v57  ;;  %4259 = vmatmul.mubr.msk.bf16.gmra.mrb[24].mxu1 %vm1106_vm1, %v5470_v57  ;;  %v4045_v41 = vld [vmem:[%s6646_s1 + $0x458] sm:$0xff]  ;;  %v1078_v58 = vmax.f32 %v1062_v5, 0.0 }
 0x126   : > { %6676 = vst [vmem:[#allocation38_spill] sm:$0xff] %v5481_v61  ;;  %6677 = vst [vmem:[#allocation39_spill] sm:$0xff] %v5491_v38  ;;  %v1063_v1 = vadd.f32 %v5335_v53, %v1040_v49  ;;  %781 = vrot.lane.b32.xlu0 %v710_v19, %s4595_s26  ;;  %v3957_v19 = vld [vmem:[%s6646_s1 + $0x2e8] sm:$0xff]  ;;  %v3959_v49 = vld [vmem:[%s6646_s1 + $0x2f8] sm:$0xff] }
 0x127   : > { %v1081_v27 = vmax.f32 %v1065_v46, 0.0  ;;  %787 = vrot.lane.b32.xlu1 %v4207_v17, %s4595_s26  ;;  %v3958_v17 = vld [vmem:[%s6646_s1 + $0x2f0] sm:$0xff]  ;;  %v3986_v46 = vld [vmem:[%s6646_s1 + $0x360] sm:$0xff] }
 0x128   : > { %v1079_v13 = vmax.f32 %v1063_v1, 0.0 }
 0x129   : > { %v5501_v29 = vpop.permute.xlu1 %3273  ;;  %v5506_v18 = vpop.permute.xlu0 %3278  ;;  %v5508_v38 = vpack.c.bf16 %v1081_v27, %v1080_v31  ;;  %v3987_v27 = vld [vmem:[%s6646_s1 + $0x368] sm:$0xff] }
 0x12a   : > { %6678 = vst [vmem:[#allocation40_spill] sm:$0xff] %v5501_v29  ;;  %6679 = vst [vmem:[#allocation41_spill] sm:$0xff] %v5506_v18  ;;  %v5510_v61 = vpack.c.bf16 %v1079_v13, %v1078_v58  ;;  %3328 = vperm.xlu0 %4474, %v4045_v41   ;;  %v4487_v41 = vld [vmem:[%s6625_s10 + $0x48] sm:$0xff]   ;;  %v3988_v58 = vld [vmem:[%s6646_s1 + $0x370] sm:$0xff] }
 0x12b   : > { %783 = vrot.lane.b32.xlu1 %v713_v50, %s4595_s26  ;;  %v4489_v13 = vld [vmem:[%s6625_s10 + $0x58] sm:$0xff]   ;;  %v4046_v29 = vld [vmem:[%s6646_s1 + $0x460] sm:$0xff] }
 0x12c   : > { %4242 = vmatprep.mubr.msk.bf16.mxu0 %vm1106_vm1, %v5510_v61  ;;  %4262 = vmatprep.mubr.msk.bf16.mxu1 %vm1106_vm1, %v5510_v61 }
 0x12d   : > { %v5513_v53 = vpop.permute.xlu1 %3283  ;;  %v5519_v37 = vpop.permute.xlu0 %3288  ;;  %4243 = vmatmul.mubr.msk.bf16.gmra.mrb[28].mxu0 %vm1106_vm1, %v5508_v38  ;;  %4263 = vmatmul.mubr.msk.bf16.gmra.mrb[28].mxu1 %vm1106_vm1, %v5508_v38 }
 0x12e   : > { %6680 = vst [vmem:[#allocation42_spill] sm:$0xff] %v5513_v53  ;;  %6681 = vst [vmem:[#allocation43_spill] sm:$0xff] %v5519_v37  ;;  %4270 = vmatprep.mubr.msk.bf16.mxu0 %vm1106_vm1, %v5371_v62  ;;  %4290 = vmatprep.mubr.msk.bf16.mxu1 %vm1106_vm1, %v5371_v62  ;;  %v4017_v37 = vld [vmem:[%s6646_s1 + $0x3e8] sm:$0xff]  ;;  %v4492_v53 = vld [vmem:[%s6625_s10 + $0x70] sm:$0xff]  }
 0x12f   : > { %2545 = vperm.xlu0 %4474, %v3957_v19   ;;  %2550 = vperm.xlu1 %4475, %v3958_v17   ;;  %v4490_v17 = vld [vmem:[%s6625_s10 + $0x60] sm:$0xff]  }
 0x131   : > { %v5535_v50 = vpop.permute.xlu1 %2500  ;;  %v5537_v5 = vpop.permute.xlu0 %2505 }
 0x132   : > { %6682 = vst [vmem:[#allocation44_spill] sm:$0xff] %v5535_v50  ;;  %6683 = vst [vmem:[#allocation45_spill] sm:$0xff] %v5537_v5 }
 0x133   : > { %2555 = vperm.xlu0 %4474, %v3959_v49   ;;  %2815 = vperm.xlu1 %4475, %v3986_v46   ;;  %v4016_v46 = vld [vmem:[%s6646_s1 + $0x3e0] sm:$0xff] }
 0x135   : > { %v5545_v1 = vpop.permute.xlu1 %2510  ;;  %v5547_v31 = vpop.permute.xlu0 %2515  ;;  %4271 = vmatmul.mubr.msk.bf16.vlgmr.msra.gmra.mrb[32].mxu0 %vm1106_vm1, %v5367_v45  ;;  %4291 = vmatmul.mubr.msk.bf16.vlgmr.msra.gmra.mrb[32].mxu1 %vm1106_vm1, %v5367_v45 }
 0x136   : > { %6684 = vst [vmem:[#allocation46_spill] sm:$0xff] %v5545_v1  ;;  %6685 = vst [vmem:[#allocation47_spill] sm:$0xff] %v5547_v31  ;;  %4307 = vmatpush3.bf16.msra.mxu0 %v5413_v6  ;;  %4274 = vmatprep.mubr.msk.bf16.mxu0 %vm1106_vm1, %v5423_v42  ;;  %v3989_v6 = vld [vmem:[%s6646_s1 + $0x378] sm:$0xff] }
 0x137   : > { %4294 = vmatprep.mubr.msk.bf16.mxu1 %vm1106_vm1, %v5423_v42  ;;  %2820 = vperm.xlu0 %4474, %v3987_v27  }
 0x138   : > { %2825 = vperm.xlu1 %4475, %v3988_v58   ;;  %4308 = vmatprep.subr.bf16.mxu0 %v4487_v41 }
 0x139   : > { %v5570_v19 = vpop.permute.xlu1 %2775  ;;  %v5575_v49 = vpop.permute.xlu0 %2780  ;;  %4327 = vmatpush3.bf16.msra.mxu1 %v5440_v14  ;;  %v4018_v14 = vld [vmem:[%s6646_s1 + $0x3f0] sm:$0xff] }
 0x13a   : > { %6686 = vst [vmem:[#allocation48_spill] sm:$0xff] %v5570_v19  ;;  %6687 = vst [vmem:[#allocation49_spill] sm:$0xff] %v5575_v49  ;;  %4309 = vmatpush3.bf16.msra.mxu0 %v4487_v41  ;;  %4328 = vmatprep.subr.bf16.mxu1 %v4489_v13 }
 0x13b   : > { %2830 = vperm.xlu0 %4474, %v3989_v6   ;;  %4346 = vmatprep.subr.bf16.mxu0 %v4490_v17 }
 0x13c   : > { %3058 = vperm.xlu1 %4475, %v4016_v46   ;;  %v4019_v46 = vld [vmem:[%s6646_s1 + $0x3f8] sm:$0xff] }
 0x13d   : > { %v5584_v27 = vpop.permute.xlu1 %2785  ;;  %v5586_v58 = vpop.permute.xlu0 %2790  ;;  %4275 = vmatmul.mubr.msk.bf16.gmra.mrb[36].mxu0 %vm1106_vm1, %v5420_v2  ;;  %4295 = vmatmul.mubr.msk.bf16.gmra.mrb[36].mxu1 %vm1106_vm1, %v5420_v2 }
 0x13e   : > { %6688 = vst [vmem:[#allocation50_spill] sm:$0xff] %v5584_v27  ;;  %6689 = vst [vmem:[#allocation51_spill] sm:$0xff] %v5586_v58  ;;  %4278 = vmatprep.mubr.msk.bf16.mxu0 %vm1106_vm1, %v5473_v54  ;;  %4298 = vmatprep.mubr.msk.bf16.mxu1 %vm1106_vm1, %v5473_v54  ;;  %v4049_v58 = vld [vmem:[%s6646_s1 + $0x478] sm:$0xff] }
 0x13f   : > { %3063 = vperm.xlu0 %4474, %v4017_v37   ;;  %4329 = vmatpush3.bf16.msra.mxu1 %v4489_v13  ;;  %v4047_v13 = vld [vmem:[%s6646_s1 + $0x468] sm:$0xff] }
 0x140   : > { %3068 = vperm.xlu1 %4475, %v4018_v14   ;;  %4366 = vmatprep.subr.bf16.mxu1 %v4492_v53  ;;  %v4048_v14 = vld [vmem:[%s6646_s1 + $0x470] sm:$0xff]  ;;  %s4502_s1 = sshll.u32 %s4596_s0, 4  ;;  %s4503_s1 = int_to_ptr.vmem [resolvable:$false] %s4502_s1 }
 0x141   : > { %v5605_v41 = vpop.permute.xlu1 %2115  ;;  %v5607_v6 = vpop.permute.xlu0 %2120  ;;  %s4504_s2 = scalar_lea.vmem %s4503_s1, 4096  ;;  %p4505_p0 = scmp.lt.s32.totalorder %s6522_s27, %s4503_s1 }
 0x142   : > { %p4506_p1 = scmp.lt.s32.totalorder %s4504_s2, %s4498_s25 }
 0x143   : > { %3073 = vperm.xlu0 %4474, %v4019_v46  }
 0x144   : > { %3333 = vperm.xlu1 %4475, %v4046_v29   ;;  %p4507_p2 = por %p4506_p1, %p4505_p0 }
 0x145   : > { %v5615_v18 = vpop.permute.xlu1 %3018  ;;  %v5617_v37 = vpop.permute.xlu0 %3023  ;;  %4279 = vmatmul.mubr.msk.bf16.gmra.mrb[40].mxu0 %vm1106_vm1, %v5470_v57  ;;  %4299 = vmatmul.mubr.msk.bf16.gmra.mrb[40].mxu1 %vm1106_vm1, %v5470_v57 }
 0x146   : > { %6690 = vst [vmem:[#allocation52_spill] sm:$0xff] %v5615_v18  ;;  %6691 = vst [vmem:[#allocation53_spill] sm:$0xff] %v5617_v37  ;;  %4282 = vmatprep.mubr.msk.bf16.mxu0 %vm1106_vm1, %v5510_v61  ;;  %4302 = vmatprep.mubr.msk.bf16.mxu1 %vm1106_vm1, %v5510_v61  ;;  %p4508_p3 = pnand %p4507_p2, %p4501_p13 }
 0x147   : > { %3338 = vperm.xlu0 %4474, %v4047_v13  }
 0x148   : > { %3343 = vperm.xlu1 %4475, %v4048_v14  }
 0x149   : > { %v5633_v29 = vpop.permute.xlu1 %2125  ;;  %v5635_v46 = vpop.permute.xlu0 %2130 }
 0x14b   : > { %3348 = vperm.xlu0 %4474, %v4049_v58  }
 0x14d   : > { %v5640_v18 = vpop.permute.xlu1 %3028  ;;  %v5642_v37 = vpop.permute.xlu0 %3033  ;;  %4283 = vmatmul.mubr.msk.bf16.gmra.mrb[44].mxu0 %vm1106_vm1, %v5508_v38  ;;  %4303 = vmatmul.mubr.msk.bf16.gmra.mrb[44].mxu1 %vm1106_vm1, %v5508_v38 }
 0x14e   : > { %6692 = vst [vmem:[#allocation54_spill] sm:$0xff] %v5640_v18  ;;  %6693 = vst [vmem:[#allocation55_spill] sm:$0xff] %v5642_v37  ;;  %4310 = vmatprep.mubr.msk.bf16.mxu0 %vm1106_vm1, %v5371_v62  ;;  %4330 = vmatprep.mubr.msk.bf16.mxu1 %vm1106_vm1, %v5371_v62  ;;  %v4491_v37 = vld [vmem:[%s6625_s10 + $0x68] sm:$0xff]  }
 0x151   : > { %v5652_v13 = vpop.permute.xlu1 %3293  ;;  %v5654_v14 = vpop.permute.xlu0 %3298 }
 0x152   : > { %6694 = vst [vmem:[#allocation56_spill] sm:$0xff] %v5652_v13  ;;  %6695 = vst [vmem:[#allocation57_spill] sm:$0xff] %v5654_v14  ;;  %v4493_v13 = vld [vmem:[%s6625_s10 + $0x78] sm:$0xff]  }
 0x155   : > { %v5656_v58 = vpop.permute.xlu1 %3303  ;;  %v5661_v18 = vpop.permute.xlu0 %3308  ;;  %4311 = vmatmul.mubr.msk.bf16.vlgmr.msra.gmra.mrb[48].mxu0 %vm1106_vm1, %v5367_v45  ;;  %4331 = vmatmul.mubr.msk.bf16.vlgmr.msra.gmra.mrb[48].mxu1 %vm1106_vm1, %v5367_v45 }
 0x156   : > { %6696 = vst [vmem:[#allocation58_spill] sm:$0xff] %v5656_v58  ;;  %6697 = vst [vmem:[#allocation59_spill] sm:$0xff] %v5661_v18  ;;  %4347 = vmatpush3.bf16.msra.mxu0 %v4490_v17  ;;  %4314 = vmatprep.mubr.msk.bf16.mxu0 %vm1106_vm1, %v5423_v42  ;;  %v4494_v18 = vld [vmem:[%s6625_s10 + $0x80] sm:$0xff]  }
 0x157   : > { %4334 = vmatprep.mubr.msk.bf16.mxu1 %vm1106_vm1, %v5423_v42  ;;  %4348 = vmatprep.subr.bf16.mxu0 %v4491_v37 }
 0x158   : > { %4367 = vmatpush3.bf16.msra.mxu1 %v4492_v53 }
 0x159   : > { %v5674_v58 = vpop.permute.xlu1 %2520  ;;  %v5679_v14 = vpop.permute.xlu0 %2525  ;;  %4368 = vmatprep.subr.bf16.mxu1 %v4493_v13 }
 0x15a   : > { %6698 = vst [vmem:[#allocation60_spill] sm:$0xff] %v5674_v58  ;;  %6699 = vst [vmem:[#allocation61_spill] sm:$0xff] %v5679_v14  ;;  %4349 = vmatpush3.bf16.msra.mxu0 %v4491_v37  ;;  %v4495_v58 = vld [vmem:[%s6625_s10 + $0x88] sm:$0xff]  }
 0x15b   : > { %4386 = vmatprep.subr.bf16.mxu0 %v4494_v18 }
 0x15c   : > { %4369 = vmatpush3.bf16.msra.mxu1 %v4493_v13 }
 0x15d   : > { %v5681_v49 = vpop.permute.xlu1 %2530  ;;  %v5683_v17 = vpop.permute.xlu0 %2535  ;;  %4315 = vmatmul.mubr.msk.bf16.gmra.mrb[52].mxu0 %vm1106_vm1, %v5420_v2  ;;  %4335 = vmatmul.mubr.msk.bf16.gmra.mrb[52].mxu1 %vm1106_vm1, %v5420_v2 }
 0x15e   : > { %6700 = vst [vmem:[#allocation62_spill] sm:$0xff] %v5681_v49  ;;  %6701 = vst [vmem:[#allocation63_spill] sm:$0xff] %v5683_v17  ;;  %4318 = vmatprep.mubr.msk.bf16.mxu0 %vm1106_vm1, %v5473_v54  ;;  %4338 = vmatprep.mubr.msk.bf16.mxu1 %vm1106_vm1, %v5473_v54 }
 0x161   : > { %v5693_v53 = vpop.permute.xlu1 %2795  ;;  %v5695_v37 = vpop.permute.xlu0 %2800 }
 0x162   : > { %6702 = vst [vmem:[#allocation64_spill] sm:$0xff] %v5693_v53  ;;  %6703 = vst [vmem:[#allocation65_spill] sm:$0xff] %v5695_v37 }
 0x165   : > { %v5697_v19 = vpop.permute.xlu1 %1870  ;;  %v5699_v27 = vpop.permute.xlu0 %1875  ;;  %4319 = vmatmul.mubr.msk.bf16.gmra.mrb[56].mxu0 %vm1106_vm1, %v5470_v57  ;;  %4339 = vmatmul.mubr.msk.bf16.gmra.mrb[56].mxu1 %vm1106_vm1, %v5470_v57 }
 0x166   : > { %6704 = vst [vmem:[#allocation66_spill] sm:$0xff] %v5697_v19  ;;  %6705 = vst [vmem:[#allocation67_spill] sm:$0xff] %v5699_v27  ;;  %4322 = vmatprep.mubr.msk.bf16.mxu0 %vm1106_vm1, %v5510_v61  ;;  %4342 = vmatprep.mubr.msk.bf16.mxu1 %vm1106_vm1, %v5510_v61 }
 0x169   : > { %v5709_v13 = vpop.permute.xlu1 %2805  ;;  %v5711_v53 = vpop.permute.xlu0 %2810 }
 0x16a   : > { %6706 = vst [vmem:[#allocation68_spill] sm:$0xff] %v5709_v13  ;;  %6707 = vst [vmem:[#allocation69_spill] sm:$0xff] %v5711_v53 }
 0x16d   : > { %v5713_v37 = vpop.permute.xlu1 %2135  ;;  %v5715_v17 = vpop.permute.xlu0 %2140  ;;  %4323 = vmatmul.mubr.msk.bf16.gmra.mrb[60].mxu0 %vm1106_vm1, %v5508_v38  ;;  %4343 = vmatmul.mubr.msk.bf16.gmra.mrb[60].mxu1 %vm1106_vm1, %v5508_v38 }
 0x16e   : > { %6708 = vst [vmem:[#allocation70_spill] sm:$0xff] %v5713_v37  ;;  %6709 = vst [vmem:[#allocation71_spill] sm:$0xff] %v5715_v17  ;;  %4350 = vmatprep.mubr.msk.bf16.mxu0 %vm1106_vm1, %v5371_v62  ;;  %4370 = vmatprep.mubr.msk.bf16.mxu1 %vm1106_vm1, %v5371_v62 }
 0x171   : > { %v5725_v14 = vpop.permute.xlu1 %3038  ;;  %v5727_v13 = vpop.permute.xlu0 %3043 }
 0x172   : > { %6710 = vst [vmem:[#allocation72_spill] sm:$0xff] %v5725_v14  ;;  %6711 = vst [vmem:[#allocation73_spill] sm:$0xff] %v5727_v13 }
 0x175   : > { %v5729_v53 = vpop.permute.xlu1 %2145  ;;  %v5734_v49 = vpop.permute.xlu0 %2150  ;;  %4351 = vmatmul.mubr.msk.bf16.vlgmr.msra.gmra.mrb[64].mxu0 %vm1106_vm1, %v5367_v45  ;;  %4371 = vmatmul.mubr.msk.bf16.vlgmr.msra.gmra.mrb[64].mxu1 %vm1106_vm1, %v5367_v45 }
 0x176   : > { %6712 = vst [vmem:[#allocation74_spill] sm:$0xff] %v5729_v53  ;;  %6713 = vst [vmem:[#allocation75_spill] sm:$0xff] %v5734_v49  ;;  %4387 = vmatpush3.bf16.msra.mxu0 %v4494_v18  ;;  %4354 = vmatprep.mubr.msk.bf16.mxu0 %vm1106_vm1, %v5423_v42 }
 0x177   : > { %4374 = vmatprep.mubr.msk.bf16.mxu1 %vm1106_vm1, %v5423_v42  ;;  %4388 = vmatprep.subr.bf16.mxu0 %v4495_v58 }
 0x179   : > { %v5744_v14 = vpop.permute.xlu1 %3048  ;;  %v5746_v13 = vpop.permute.xlu0 %3053 }
 0x17a   : > { %6714 = vst [vmem:[#allocation76_spill] sm:$0xff] %v5744_v14  ;;  %6715 = vst [vmem:[#allocation77_spill] sm:$0xff] %v5746_v13  ;;  %4389 = vmatpush3.bf16.msra.mxu0 %v4495_v58 }
 0x17d   : > { %v5748_v31 = vpop.permute.xlu1 %3313  ;;  %v5750_v5 = vpop.permute.xlu0 %3318  ;;  %4355 = vmatmul.mubr.msk.bf16.gmra.mrb[68].mxu0 %vm1106_vm1, %v5420_v2  ;;  %4375 = vmatmul.mubr.msk.bf16.gmra.mrb[68].mxu1 %vm1106_vm1, %v5420_v2 }
 0x17e   : > { %6716 = vst [vmem:[#allocation78_spill] sm:$0xff] %v5748_v31  ;;  %6717 = vst [vmem:[#allocation79_spill] sm:$0xff] %v5750_v5  ;;  %4358 = vmatprep.mubr.msk.bf16.mxu0 %vm1106_vm1, %v5473_v54  ;;  %4378 = vmatprep.mubr.msk.bf16.mxu1 %vm1106_vm1, %v5473_v54 }
 0x181   : > { %v5760_v18 = vpop.permute.xlu1 %3323  ;;  %v758_v13 = vpop.permute.xlu0 %757 }
 0x182   : > { %6718 = vst [vmem:[#allocation80_spill] sm:$0xff] %v5760_v18  ;;  %805 = vst.msk [vmem:[%s5764_s29] sm:$0xff] %vm603_vm0, %v758_v13 }
 0x185   : > { %v762_v58 = vpop.permute.xlu1 %761  ;;  %v760_v31 = vpop.permute.xlu0 %759  ;;  %4359 = vmatmul.mubr.msk.bf16.gmra.mrb[72].mxu0 %vm1106_vm1, %v5470_v57  ;;  %4379 = vmatmul.mubr.msk.bf16.gmra.mrb[72].mxu1 %vm1106_vm1, %v5470_v57 }
 0x186   : > { %807 = vst.msk [vmem:[%s5764_s29 + $0x10] sm:$0xff] %vm603_vm0, %v762_v58  ;;  %806 = vst.msk [vmem:[%s5764_s29 + $0x8] sm:$0xff] %vm603_vm0, %v760_v31  ;;  %4362 = vmatprep.mubr.msk.bf16.mxu0 %vm1106_vm1, %v5510_v61  ;;  %4382 = vmatprep.mubr.msk.bf16.mxu1 %vm1106_vm1, %v5510_v61 }
 0x189   : > { %v764_v13 = vpop.permute.xlu1 %763  ;;  %v770_v58 = vpop.permute.xlu0 %769 }
 0x18a   : > { %808 = vst.msk [vmem:[%s5764_s29 + $0x18] sm:$0xff] %vm603_vm0, %v764_v13  ;;  %811 = vst.msk [vmem:[%s5764_s29 + $0x30] sm:$0xff] %vm603_vm0, %v770_v58 }
 0x18d   : > { %v772_v18 = vpop.permute.xlu1 %771  ;;  %v766_v5 = vpop.permute.xlu0 %765  ;;  %4363 = vmatmul.mubr.msk.bf16.gmra.mrb[76].mxu0 %vm1106_vm1, %v5508_v38  ;;  %4383 = vmatmul.mubr.msk.bf16.gmra.mrb[76].mxu1 %vm1106_vm1, %v5508_v38 }
 0x18e   : > { %812 = vst.msk [vmem:[%s5764_s29 + $0x38] sm:$0xff] %vm603_vm0, %v772_v18  ;;  %809 = vst.msk [vmem:[%s5764_s29 + $0x20] sm:$0xff] %vm603_vm0, %v766_v5  ;;  %4390 = vmatprep.mubr.msk.bf16.mxu0 %vm1106_vm1, %v5371_v62 }
 0x191   : > { %v768_v31 = vpop.permute.xlu1 %767  ;;  %v778_v13 = vpop.permute.xlu0 %777 }
 0x192   : > { %810 = vst.msk [vmem:[%s5764_s29 + $0x28] sm:$0xff] %vm603_vm0, %v768_v31  ;;  %815 = vst.msk [vmem:[%s5764_s29 + $0x50] sm:$0xff] %vm603_vm0, %v778_v13 }
 0x195   : > { %v780_v18 = vpop.permute.xlu1 %779  ;;  %v774_v58 = vpop.permute.xlu0 %773  ;;  %4391 = vmatmul.mubr.msk.bf16.vlgmr.msra.gmra.mrb[80].mxu0 %vm1106_vm1, %v5367_v45 }
 0x196   : > { %816 = vst.msk [vmem:[%s5764_s29 + $0x58] sm:$0xff] %vm603_vm0, %v780_v18  ;;  %813 = vst.msk [vmem:[%s5764_s29 + $0x40] sm:$0xff] %vm603_vm0, %v774_v58  ;;  %4394 = vmatprep.mubr.msk.bf16.mxu0 %vm1106_vm1, %v5423_v42 }
 0x199   : > { %v776_v62 = vpop.permute.xlu1 %775  ;;  %v786_v5 = vpop.permute.xlu0 %785 }
 0x19a   : > { %814 = vst.msk [vmem:[%s5764_s29 + $0x48] sm:$0xff] %vm603_vm0, %v776_v62  ;;  %819 = vst.msk [vmem:[%s5764_s29 + $0x70] sm:$0xff] %vm603_vm0, %v786_v5 }
 0x19d   : > { %v782_v31 = vpop.permute.xlu0 %781  ;;  %4395 = vmatmul.mubr.msk.bf16.gmra.mrb[84].mxu0 %vm1106_vm1, %v5420_v2  ;;  %v1244_v2 = vlaneseq }
 0x19e   : > { %817 = vst.msk [vmem:[%s5764_s29 + $0x60] sm:$0xff] %vm603_vm0, %v782_v31  ;;  %4398 = vmatprep.mubr.msk.bf16.mxu0 %vm1106_vm1, %v5473_v54  ;;  %v4496_v31 = vld [vmem:[%s6628_s13] sm:$0xff]  }
 0x19f   : > { %v5828_v18 = vshrl.u32 %v1244_v2, 7  ;;  %4406 = vmatprep.subr.bf16.mxu1 %v4496_v31 }
 0x1a0   : > { %4407 = vmatpush3.bf16.msra.mxu1 %v4496_v31 }
 0x1a1   : > { %vm1246_vm2 = vcmp.lt.s32.totalorder %v5828_v18, 1  ;;  %vm1764_vm3 = vcmp.lt.s32.totalorder %v5828_v18, 7 }
 0x1a2   : > { %v5816_v45 = vpop.permute.xlu1 %2540 }
 0x1a3   : > { %6719 = vst [vmem:[#allocation81_spill] sm:$0xff] %v5816_v45 }
 0x1a5   : > { %4399 = vmatmul.mubr.msk.bf16.gmra.mrb[88].mxu0 %vm1106_vm1, %v5470_v57 }
 0x1a6   : > { %4402 = vmatprep.mubr.msk.bf16.mxu0 %vm1106_vm1, %v5510_v61  ;;  %v788_v42 = vpop.permute.xlu1 %787 }
 0x1a7   : > { %820 = vst.msk [vmem:[%s5764_s29 + $0x78] sm:$0xff] %vm603_vm0, %v788_v42 }
 0x1aa   : > { %v784_v13 = vpop.permute.xlu1 %783 }
 0x1ab   : > { %818 = vst.msk [vmem:[%s5764_s29 + $0x68] sm:$0xff] %vm603_vm0, %v784_v13 }
 0x1ad   : > { %4403 = vmatmul.mubr.msk.bf16.gmra.mrb[92].mxu0 %vm1106_vm1, %v5508_v38 }
 0x1e8   : > { %v4232_v54 = vpop.f32.mrb[16].mxu0  ;;  %v4252_v58 = vpop.f32.mrb[16].mxu1 }
 0x1e9   : > { %v5830_v62 = vpop.f32.mrb[17].mxu0  ;;  %v5832_v57 = vpop.f32.mrb[17].mxu1  ;;  %v1230_v42 = vrot.slane %v4232_v54, 7 }
 0x1ea   : > { %v4233_v5 = vpop.f32.mrb[18].mxu0  ;;  %v4253_v61 = vpop.f32.mrb[18].mxu1  ;;  %v6635_v2 = vrot.slane %v5830_v62, 7 }
 0x1eb   : > { %v1231_v13 = vrot.slane %v4233_v5, 7  ;;  %v1168_v38 = vpop.f32.mrb[19].mxu0  ;;  %v1445_v14 = vpop.f32.mrb[19].mxu1  ;;  %v1606_v17 = vmul.f32 %v4253_v61, %v5178_v59  ;;  %v1605_v5 = vmul.f32 %v4252_v58, %v5170_v56 }
 0x1ec   : > { %v1229_v45 = vrot.slane %v1168_v38, 7  ;;  %v1604_v31 = vmul.f32 %v5168_v55, %v1445_v14 }
 0x1ed   : > { %v1259_v50 = vsel %vm1246_vm2, %v1230_v42, %v1231_v13 }
 0x1ee   : > { %v1363_v1 = vmul.f32 %v5092_v8, %v1259_v50  ;;  %v1260_v49 = vsel %vm1246_vm2, %v1229_v45, %v1230_v42  ;;  %v1261_v54 = vsel %vm1246_vm2, %v6635_v2, %v1229_v45 }
 0x1ef   : > { %v1362_v38 = vmul.f32 %v5084_v26, %v1260_v49  ;;  %v1361_v37 = vmul.f32 %v5082_v25, %v1261_v54 }
 0x1f0   : > { %v5853_v53 = vadd.f32 %v1606_v17, %v1363_v1  ;;  %v4236_v8 = vpop.f32.mrb[20].mxu0  ;;  %v4256_v59 = vpop.f32.mrb[20].mxu1 }
 0x1f1   : > { %v5855_v50 = vadd.f32 %v1604_v31, %v1361_v37  ;;  %v1181_v61 = vpop.f32.mrb[21].mxu0  ;;  %v1458_v42 = vpop.f32.mrb[21].mxu1  ;;  %v5857_v19 = vadd.f32 %v1605_v5, %v1362_v38  ;;  %v1234_v56 = vrot.slane %v4236_v8, 7  ;;  %v1609_v1 = vmul.f32 %v4256_v59, %v5190_v0 }
 0x1f2   : > { %v1232_v27 = vrot.slane %v1181_v61, 7  ;;  %v4237_v45 = vpop.f32.mrb[22].mxu0  ;;  %v4257_v2 = vpop.f32.mrb[22].mxu1  ;;  %v1607_v17 = vmul.f32 %v5180_v60, %v1458_v42 }
 0x1f3   : > { %v1235_v58 = vrot.slane %v4237_v45, 7  ;;  %v1184_v26 = vpop.f32.mrb[23].mxu0  ;;  %v1461_v49 = vpop.f32.mrb[23].mxu1  ;;  %v1610_v5 = vmul.f32 %v4257_v2, %v5198_v3 }
 0x1f4   : > { %v1258_v25 = vsel %vm1246_vm2, %v1231_v13, %v1232_v27  ;;  %v1233_v55 = vrot.slane %v1184_v26, 7  ;;  %v1608_v60 = vmul.f32 %v5188_v63, %v1461_v49 }
 0x1f5   : > { %v1364_v14 = vmul.f32 %v5094_v12, %v1258_v25  ;;  %v1255_v37 = vsel %vm1246_vm2, %v1234_v56, %v1235_v58 }
 0x1f6   : > { %v1367_v54 = vmul.f32 %v5118_v35, %v1255_v37  ;;  %v1256_v38 = vsel %vm1246_vm2, %v1233_v55, %v1234_v56  ;;  %v1257_v13 = vsel %vm1246_vm2, %v1232_v27, %v1233_v55  ;;  %v4497_v37 = vld [vmem:[%s6628_s13 + $0x8] sm:$0xff]  }
 0x1f7   : > { %v5872_v31 = vadd.f32 %v1607_v17, %v1364_v14  ;;  %v1366_v0 = vmul.f32 %v5110_v32, %v1256_v38  ;;  %v1365_v12 = vmul.f32 %v5108_v11, %v1257_v13  ;;  %4408 = vmatprep.subr.bf16.mxu1 %v4497_v37 }
 0x1f8   : > { %v5877_v8 = vadd.f32 %v1610_v5, %v1367_v54  ;;  %v4240_v59 = vpop.f32.mrb[24].mxu0  ;;  %v4260_v35 = vpop.f32.mrb[24].mxu1  ;;  %4409 = vmatpush3.bf16.msra.mxu1 %v4497_v37 }
 0x1f9   : > { %v5879_v61 = vadd.f32 %v1608_v60, %v1365_v12  ;;  %v1197_v3 = vpop.f32.mrb[25].mxu0  ;;  %v1474_v2 = vpop.f32.mrb[25].mxu1  ;;  %v5881_v42 = vadd.f32 %v1609_v1, %v1366_v0  ;;  %v1238_v26 = vrot.slane %v4240_v59, 7  ;;  %v1613_v49 = vmul.f32 %v4260_v35, %v5210_v10 }
 0x1fa   : > { %v1236_v45 = vrot.slane %v1197_v3, 7  ;;  %v4241_v27 = vpop.f32.mrb[26].mxu0  ;;  %v4261_v56 = vpop.f32.mrb[26].mxu1  ;;  %v1611_v17 = vmul.f32 %v5200_v4, %v1474_v2 }
 0x1fb   : > { %v1239_v25 = vrot.slane %v4241_v27, 7  ;;  %v1200_v32 = vpop.f32.mrb[27].mxu0  ;;  %v1477_v55 = vpop.f32.mrb[27].mxu1  ;;  %v1614_v5 = vmul.f32 %v4261_v56, %v5218_v15 }
 0x1fc   : > { %v1254_v11 = vsel %vm1246_vm2, %v1235_v58, %v1236_v45  ;;  %v1237_v63 = vrot.slane %v1200_v32, 7  ;;  %v1612_v13 = vmul.f32 %v5208_v7, %v1477_v55 }
 0x1fd   : > { %v1368_v14 = vmul.f32 %v5120_v36, %v1254_v11  ;;  %v1251_v1 = vsel %vm1246_vm2, %v1238_v26, %v1239_v25 }
 0x1fe   : > { %v1371_v54 = vmul.f32 %v5138_v43, %v1251_v1  ;;  %v1252_v58 = vsel %vm1246_vm2, %v1237_v63, %v1238_v26  ;;  %v1253_v10 = vsel %vm1246_vm2, %v1236_v45, %v1237_v63 }
 0x1ff   : > { %v5899_v36 = vadd.f32 %v1611_v17, %v1368_v14  ;;  %v1370_v4 = vmul.f32 %v5130_v40, %v1252_v58  ;;  %v1369_v38 = vmul.f32 %v5128_v39, %v1253_v10  ;;  %v1603_v39 = vmul.f32 %v5160_v52, %v5832_v57 }
 0x200   : > { %v5904_v0 = vadd.f32 %v1614_v5, %v1371_v54  ;;  %v4244_v43 = vpop.f32.mrb[28].mxu0  ;;  %v4264_v12 = vpop.f32.mrb[28].mxu1  ;;  %v6720_v14 = vrot.slane %v5830_v62, 7 }
 0x201   : > { %v5906_v15 = vadd.f32 %v1612_v13, %v1369_v38  ;;  %v1213_v60 = vpop.f32.mrb[29].mxu0  ;;  %v1490_v59 = vpop.f32.mrb[29].mxu1  ;;  %v5908_v35 = vadd.f32 %v1613_v49, %v1370_v4  ;;  %v1242_v40 = vrot.slane %v4244_v43, 7  ;;  %v1617_v26 = vmul.f32 %v4264_v12, %v5230_v21 }
 0x202   : > { %v1240_v3 = vrot.slane %v1213_v60, 7  ;;  %v4245_v2 = vpop.f32.mrb[30].mxu0  ;;  %v4265_v45 = vpop.f32.mrb[30].mxu1  ;;  %v1615_v55 = vmul.f32 %v5220_v16, %v1490_v59 }
 0x203   : > { %v1243_v7 = vrot.slane %v4245_v2, 7  ;;  %v1216_v27 = vpop.f32.mrb[31].mxu0  ;;  %v1493_v56 = vpop.f32.mrb[31].mxu1  ;;  %v1602_v57 = vmul.f32 %v4265_v45, %v5158_v51 }
 0x204   : > { %v1250_v32 = vsel %vm1246_vm2, %v1239_v25, %v1240_v3  ;;  %v1241_v11 = vrot.slane %v1216_v27, 7  ;;  %v1616_v37 = vmul.f32 %v5228_v20, %v1493_v56 }
 0x205   : > { %v1372_v63 = vmul.f32 %v5140_v44, %v1250_v32  ;;  %v1247_v49 = vsel %vm1246_vm2, %v1242_v40, %v1243_v7  ;;  %v1262_v52 = vsel %vm1246_vm2, %v1243_v7, %v6720_v14 }
 0x206   : > { %v1360_v21 = vmul.f32 %v5072_v22, %v1262_v52  ;;  %v1359_v17 = vmul.f32 %v5074_v9, %v1247_v49  ;;  %v1248_v16 = vsel %vm1246_vm2, %v1241_v11, %v1242_v40  ;;  %v1249_v44 = vsel %vm1246_vm2, %v1240_v3, %v1241_v11 }
 0x207   : > { %v5930_v25 = vadd.f32 %v1615_v55, %v1372_v63  ;;  %v1374_v1 = vmul.f32 %v5150_v48, %v1248_v16  ;;  %v1373_v62 = vmul.f32 %v5148_v47, %v1249_v44 }
 0x208   : > { %v5935_v54 = vadd.f32 %v1602_v57, %v1359_v17  ;;  %v4272_v51 = vpop.f32.mrb[32].mxu0  ;;  %v4292_v22 = vpop.f32.mrb[32].mxu1  ;;  %v1619_v5 = vadd.f32 %v1603_v39, %v1360_v21 }
 0x209   : > { %v5937_v9 = vadd.f32 %v1616_v37, %v1373_v62  ;;  %v5939_v58 = vpop.f32.mrb[33].mxu0  ;;  %v5941_v10 = vpop.f32.mrb[33].mxu1  ;;  %v5943_v4 = vadd.f32 %v1617_v26, %v1374_v1  ;;  %v1750_v47 = vrot.slane %v4272_v51, 1  ;;  %v2026_v13 = vrot.slane %v4292_v22, 7 }
 0x20a   : > { %v4273_v38 = vpop.f32.mrb[34].mxu0  ;;  %v4293_v48 = vpop.f32.mrb[34].mxu1  ;;  %v1748_v59 = vrot.slane %v5939_v58, 1  ;;  %v2024_v45 = vrot.slane %v5941_v10, 7 }
 0x20b   : > { %v1751_v20 = vrot.slane %v4273_v38, 1  ;;  %v2027_v43 = vrot.slane %v4293_v48, 7  ;;  %v1688_v12 = vpop.f32.mrb[35].mxu0  ;;  %v1964_v60 = vpop.f32.mrb[35].mxu1 }
 0x20c   : > { %v1749_v3 = vrot.slane %v1688_v12, 1  ;;  %v2025_v2 = vrot.slane %v1964_v60, 7  ;;  %v6721_v12 = vld [vmem:[#allocation13_spill] sm:$0xff] }
 0x20d   : > { %v1777_v39 = vsel %vm1764_vm3, %v1750_v47, %v1751_v20  ;;  %v2052_v40 = vsel %vm1246_vm2, %v2026_v13, %v2027_v43 }
 0x20e   : > { %v1881_v7 = vmul.f32 %v5250_v34, %v1777_v39  ;;  %v1778_v27 = vsel %vm1764_vm3, %v1749_v3, %v1750_v47  ;;  %v1779_v56 = vsel %vm1764_vm3, %v1748_v59, %v1749_v3  ;;  %v2053_v26 = vsel %vm1246_vm2, %v2025_v2, %v2026_v13  ;;  %v6722_v39 = vld [vmem:[#allocation32_spill] sm:$0xff] }
 0x20f   : > { %v1879_v32 = vmul.f32 %v5240_v28, %v1779_v56  ;;  %v1880_v55 = vmul.f32 %v5248_v33, %v1778_v27  ;;  %v2054_v34 = vsel %vm1246_vm2, %v2024_v45, %v2025_v2  ;;  %v2155_v49 = vmul.f32 %v5313_v24, %v2053_v26  ;;  %v6724_v26 = vld [vmem:[#allocation14_spill] sm:$0xff] }
 0x210   : > { %v4276_v11 = vpop.f32.mrb[36].mxu0  ;;  %v4296_v63 = vpop.f32.mrb[36].mxu1  ;;  %v1897_v14 = vadd.f32 %v1881_v7, %v5857_v19  ;;  %v2156_v52 = vmul.f32 %v5315_v30, %v2052_v40  ;;  %v2154_v33 = vmul.f32 %v5310_v23, %v2054_v34  ;;  %v6723_v7 = vld [vmem:[#allocation16_spill] sm:$0xff] }
 0x211   : > { %v1754_v57 = vrot.slane %v4276_v11, 1  ;;  %v1701_v21 = vpop.f32.mrb[37].mxu0  ;;  %v1977_v17 = vpop.f32.mrb[37].mxu1  ;;  %v1896_v28 = vadd.f32 %v1880_v55, %v5855_v50  ;;  %v1895_v16 = vadd.f32 %v1879_v32, %v1619_v5  ;;  %v2030_v44 = vrot.slane %v4296_v63, 7  ;;  %v6725_v55 = vld [vmem:[#allocation15_spill] sm:$0xff]  ;;  %v6726_v63 = vld [vmem:[#allocation36_spill] sm:$0xff] }
 0x212   : > { %v1752_v1 = vrot.slane %v1701_v21, 1  ;;  %v2028_v62 = vrot.slane %v1977_v17, 7  ;;  %v4277_v37 = vpop.f32.mrb[38].mxu0  ;;  %v4297_v51 = vpop.f32.mrb[38].mxu1  ;;  %v5972_v22 = vadd.f32 %v2156_v52, %v1897_v14  ;;  %v6727_v17 = vld [vmem:[#allocation37_spill] sm:$0xff] }
 0x213   : > { %v1755_v24 = vrot.slane %v4277_v37, 1  ;;  %v2031_v38 = vrot.slane %v4297_v51, 7  ;;  %v1704_v19 = vpop.f32.mrb[39].mxu0  ;;  %v1980_v48 = vpop.f32.mrb[39].mxu1  ;;  %v5974_v30 = vadd.f32 %v2155_v49, %v1896_v28  ;;  %v5976_v47 = vadd.f32 %v2154_v33, %v1895_v16  ;;  %v6728_v16 = vld [vmem:[#allocation33_spill] sm:$0xff] }
 0x214   : > { %v1776_v50 = vsel %vm1764_vm3, %v1751_v20, %v1752_v1  ;;  %v2051_v23 = vsel %vm1246_vm2, %v2027_v43, %v2028_v62  ;;  %v1753_v5 = vrot.slane %v1704_v19, 1  ;;  %v2029_v13 = vrot.slane %v1980_v48, 7 }
 0x215   : > { %v1882_v60 = vmul.f32 %v6721_v12, %v1776_v50  ;;  %v1773_v3 = vsel %vm1764_vm3, %v1754_v57, %v1755_v24  ;;  %v2048_v2 = vsel %vm1246_vm2, %v2030_v44, %v2031_v38  ;;  %v2157_v40 = vmul.f32 %v6722_v39, %v2051_v23 }
 0x216   : > { %v1885_v27 = vmul.f32 %v6723_v7, %v1773_v3  ;;  %v1774_v20 = vsel %vm1764_vm3, %v1753_v5, %v1754_v57  ;;  %v1775_v43 = vsel %vm1764_vm3, %v1752_v1, %v1753_v5  ;;  %v2049_v56 = vsel %vm1246_vm2, %v2029_v13, %v2030_v44 }
 0x217   : > { %v1883_v32 = vmul.f32 %v6724_v26, %v1775_v43  ;;  %v1884_v34 = vmul.f32 %v6725_v55, %v1774_v20  ;;  %v2050_v11 = vsel %vm1246_vm2, %v2028_v62, %v2029_v13  ;;  %v2159_v49 = vmul.f32 %v6726_v63, %v2049_v56 }
 0x218   : > { %v4280_v14 = vpop.f32.mrb[40].mxu0  ;;  %v4300_v52 = vpop.f32.mrb[40].mxu1  ;;  %v1898_v21 = vadd.f32 %v1882_v60, %v5853_v53  ;;  %v1901_v57 = vadd.f32 %v1885_v27, %v5881_v42  ;;  %v2160_v28 = vmul.f32 %v6727_v17, %v2048_v2  ;;  %v2158_v33 = vmul.f32 %v6728_v16, %v2050_v11  ;;  %v6731_v11 = vld [vmem:[#allocation18_spill] sm:$0xff] }
 0x219   : > { %v1758_v44 = vrot.slane %v4280_v14, 1  ;;  %v2034_v1 = vrot.slane %v4300_v52, 7  ;;  %v1717_v37 = vpop.f32.mrb[41].mxu0  ;;  %v1993_v51 = vpop.f32.mrb[41].mxu1  ;;  %v1900_v19 = vadd.f32 %v1884_v34, %v5879_v61  ;;  %v1899_v62 = vadd.f32 %v1883_v32, %v5872_v31  ;;  %v6730_v32 = vld [vmem:[#allocation20_spill] sm:$0xff] }
 0x21a   : > { %v1756_v48 = vrot.slane %v1717_v37, 1  ;;  %v2032_v50 = vrot.slane %v1993_v51, 7  ;;  %v4281_v23 = vpop.f32.mrb[42].mxu0  ;;  %v4301_v5 = vpop.f32.mrb[42].mxu1  ;;  %v6006_v13 = vadd.f32 %v2157_v40, %v1898_v21  ;;  %v6008_v53 = vadd.f32 %v2160_v28, %v1901_v57  ;;  %v6729_v40 = vld [vmem:[#allocation17_spill] sm:$0xff] }
 0x21b   : > { %v1759_v42 = vrot.slane %v4281_v23, 1  ;;  %v2035_v12 = vrot.slane %v4301_v5, 7  ;;  %v1720_v60 = vpop.f32.mrb[43].mxu0  ;;  %v1996_v3 = vpop.f32.mrb[43].mxu1  ;;  %v6010_v2 = vadd.f32 %v2159_v49, %v1900_v19  ;;  %v6012_v39 = vadd.f32 %v2158_v33, %v1899_v62  ;;  %v6732_v49 = vld [vmem:[#allocation19_spill] sm:$0xff] }
 0x21c   : > { %v1772_v61 = vsel %vm1764_vm3, %v1755_v24, %v1756_v48  ;;  %v2047_v31 = vsel %vm1246_vm2, %v2031_v38, %v2032_v50  ;;  %v1757_v7 = vrot.slane %v1720_v60, 1  ;;  %v2033_v27 = vrot.slane %v1996_v3, 7 }
 0x21d   : > { %v1886_v20 = vmul.f32 %v6729_v40, %v1772_v61  ;;  %v1769_v43 = vsel %vm1764_vm3, %v1758_v44, %v1759_v42  ;;  %v2044_v56 = vsel %vm1246_vm2, %v2034_v1, %v2035_v12  ;;  %v2161_v26 = vmul.f32 %v5605_v41, %v2047_v31 }
 0x21e   : > { %v1889_v55 = vmul.f32 %v6730_v32, %v1769_v43  ;;  %v1770_v24 = vsel %vm1764_vm3, %v1757_v7, %v1758_v44  ;;  %v1771_v38 = vsel %vm1764_vm3, %v1756_v48, %v1757_v7  ;;  %v2045_v34 = vsel %vm1246_vm2, %v2033_v27, %v2034_v1  ;;  %v6735_v32 = vld [vmem:[#allocation67_spill] sm:$0xff] }
 0x21f   : > { %v1887_v63 = vmul.f32 %v6731_v11, %v1771_v38  ;;  %v1888_v14 = vmul.f32 %v6732_v49, %v1770_v24  ;;  %v2046_v52 = vsel %vm1246_vm2, %v2032_v50, %v2033_v27  ;;  %v2163_v41 = vmul.f32 %v5633_v29, %v2045_v34  ;;  %v6733_v27 = vld [vmem:[#allocation21_spill] sm:$0xff]  ;;  %v6736_v38 = vld [vmem:[#allocation66_spill] sm:$0xff] }
 0x220   : > { %v4284_v21 = vpop.f32.mrb[44].mxu0  ;;  %v4304_v57 = vpop.f32.mrb[44].mxu1  ;;  %v1902_v17 = vadd.f32 %v1886_v20, %v5877_v8  ;;  %v1905_v28 = vadd.f32 %v1889_v55, %v5908_v35  ;;  %v2164_v16 = vmul.f32 %v5635_v46, %v2044_v56  ;;  %v2162_v33 = vmul.f32 %v5607_v6, %v2046_v52  ;;  %v6738_v52 = vld [vmem:[#allocation23_spill] sm:$0xff] }
 0x221   : > { %v1762_v44 = vrot.slane %v4284_v21, 1  ;;  %v2038_v1 = vrot.slane %v4304_v57, 7  ;;  %v1733_v37 = vpop.f32.mrb[45].mxu0  ;;  %v2009_v51 = vpop.f32.mrb[45].mxu1  ;;  %v1904_v19 = vadd.f32 %v1888_v14, %v5906_v15  ;;  %v1903_v62 = vadd.f32 %v1887_v63, %v5899_v36  ;;  %v6737_v63 = vld [vmem:[#allocation22_spill] sm:$0xff] }
 0x222   : > { %v1760_v48 = vrot.slane %v1733_v37, 1  ;;  %v2036_v29 = vrot.slane %v2009_v51, 7  ;;  %v4285_v50 = vpop.f32.mrb[46].mxu0  ;;  %v4305_v23 = vpop.f32.mrb[46].mxu1  ;;  %v6042_v5 = vadd.f32 %v2161_v26, %v1902_v17  ;;  %v6044_v8 = vadd.f32 %v2164_v16, %v1905_v28  ;;  %v6734_v26 = vld [vmem:[#allocation12_spill] sm:$0xff]  ;;  %v6739_v21 = vld [vmem:[#allocation74_spill] sm:$0xff] }
 0x223   : > { %v1763_v35 = vrot.slane %v4285_v50, 1  ;;  %v2039_v46 = vrot.slane %v4305_v23, 7  ;;  %v1736_v60 = vpop.f32.mrb[47].mxu0  ;;  %v2012_v6 = vpop.f32.mrb[47].mxu1  ;;  %v6046_v3 = vadd.f32 %v2163_v41, %v1904_v19  ;;  %v6048_v61 = vadd.f32 %v2162_v33, %v1903_v62 }
 0x224   : > { %v1768_v15 = vsel %vm1764_vm3, %v1759_v42, %v1760_v48  ;;  %v2043_v36 = vsel %vm1246_vm2, %v2035_v12, %v2036_v29  ;;  %v1761_v31 = vrot.slane %v1736_v60, 1  ;;  %v2037_v7 = vrot.slane %v2012_v6, 7  ;;  %v6741_v60 = vld [vmem:[#allocation75_spill] sm:$0xff] }
 0x225   : > { %v1890_v40 = vmul.f32 %v6733_v27, %v1768_v15  ;;  %v1765_v20 = vsel %vm1764_vm3, %v1762_v44, %v1763_v35  ;;  %v1780_v43 = vsel %vm1764_vm3, %v1763_v35, %v1748_v59  ;;  %v2040_v56 = vsel %vm1246_vm2, %v2038_v1, %v2039_v46 }
 0x226   : > { %v1878_v42 = vmul.f32 %v6734_v26, %v1780_v43  ;;  %v1893_v55 = vmul.f32 %v6735_v32, %v1765_v20  ;;  %v2055_v12 = vsel %vm1246_vm2, %v2039_v46, %v2024_v45  ;;  %v1766_v24 = vsel %vm1764_vm3, %v1761_v31, %v1762_v44  ;;  %v6744_v26 = vld [vmem:[#allocation24_spill] sm:$0xff]  ;;  %v6745_v32 = vld [vmem:[#allocation25_spill] sm:$0xff] }
 0x227   : > { %v1767_v58 = vsel %vm1764_vm3, %v1760_v48, %v1761_v31  ;;  %v1892_v59 = vmul.f32 %v6736_v38, %v1766_v24  ;;  %v2041_v34 = vsel %vm1246_vm2, %v2037_v7, %v2038_v1  ;;  %v2042_v11 = vsel %vm1246_vm2, %v2036_v29, %v2037_v7 }
 0x228   : > { %v1891_v49 = vmul.f32 %v6737_v63, %v1767_v58  ;;  %v4312_v10 = vpop.f32.mrb[48].mxu0  ;;  %v4332_v14 = vpop.f32.mrb[48].mxu1  ;;  %v1894_v45 = vadd.f32 %v1878_v42, %v5935_v54  ;;  %v2153_v41 = vmul.f32 %v6738_v52, %v2055_v12  ;;  %v2167_v57 = vmul.f32 %v6739_v21, %v2041_v34  ;;  %v6740_v54 = vld [vmem:[#allocation70_spill] sm:$0xff] }
 0x229   : > { %v2301_v17 = vadd.f32 %v4312_v10, %v5974_v30  ;;  %v2431_v28 = vrot.slane %v4332_v14, 1  ;;  %v2236_v16 = vpop.f32.mrb[49].mxu0  ;;  %v6083_v33 = vpop.f32.mrb[49].mxu1  ;;  %v1908_v44 = vadd.f32 %v1892_v59, %v5937_v9  ;;  %v1906_v1 = vadd.f32 %v1890_v40, %v5904_v0  ;;  %v6743_v40 = vld [vmem:[#allocation26_spill] sm:$0xff] }
 0x22a   : > { %v2169_v37 = vadd.f32 %v2153_v41, %v1894_v45  ;;  %v2429_v51 = vrot.slane %v6083_v33, 1  ;;  %v4313_v19 = vpop.f32.mrb[50].mxu0  ;;  %v4333_v62 = vpop.f32.mrb[50].mxu1  ;;  %v2165_v48 = vmul.f32 %v6740_v54, %v2043_v36  ;;  %v1909_v29 = vadd.f32 %v1893_v55, %v5943_v4 }
 0x22b   : > { %v2302_v50 = vadd.f32 %v4313_v19, %v5972_v22  ;;  %v2432_v30 = vrot.slane %v4333_v62, 1  ;;  %v2239_v23 = vpop.f32.mrb[51].mxu0  ;;  %v2369_v35 = vpop.f32.mrb[51].mxu1  ;;  %v6091_v46 = vadd.f32 %v2167_v57, %v1908_v44  ;;  %v2168_v9 = vmul.f32 %v6741_v60, %v2040_v56  ;;  %v6742_v22 = vld [vmem:[#allocation71_spill] sm:$0xff] }
 0x22c   : > { %v2299_v6 = vadd.f32 %v2236_v16, %v2169_v37  ;;  %v2300_v0 = vadd.f32 %v2239_v23, %v5976_v47  ;;  %v2430_v15 = vrot.slane %v2369_v35, 1  ;;  %v6095_v31 = vadd.f32 %v2165_v48, %v1906_v1  ;;  %v6110_v56 = vpop.permute.xlu0 %3328  ;;  %v6746_v44 = vld [vmem:[#allocation27_spill] sm:$0xff]  ;;  %v6747_v37 = vld [vmem:[#allocation46_spill] sm:$0xff]  ;;  %v6748_v48 = vld [vmem:[#allocation44_spill] sm:$0xff] }
 0x22d   : > { %v2457_v36 = vsel %vm1764_vm3, %v2431_v28, %v2432_v30  ;;  %v6099_v7 = vadd.f32 %v2168_v9, %v1909_v29  ;;  %v1907_v4 = vadd.f32 %v1891_v49, %v5930_v25  ;;  %v2166_v27 = vmul.f32 %v6742_v22, %v2042_v11 }
 0x22e   : > { %v2560_v20 = vmul.f32 %v6743_v40, %v2457_v36  ;;  %v2458_v43 = vsel %vm1764_vm3, %v2430_v15, %v2431_v28  ;;  %v2459_v47 = vsel %vm1764_vm3, %v2429_v51, %v2430_v15 }
 0x22f   : > { %v2558_v42 = vmul.f32 %v6744_v26, %v2459_v47  ;;  %v2559_v55 = vmul.f32 %v6745_v32, %v2458_v43  ;;  %v6114_v12 = vadd.f32 %v2166_v27, %v1907_v4 }
 0x230   : > { %v4316_v25 = vpop.f32.mrb[52].mxu0  ;;  %v4336_v24 = vpop.f32.mrb[52].mxu1  ;;  %v6116_v58 = vadd.f32 %v2560_v20, %v2301_v17 }
 0x231   : > { %v6118_v38 = vadd.f32 %v2559_v55, %v2300_v0  ;;  %v2305_v59 = vadd.f32 %v4316_v25, %v6010_v2  ;;  %v2252_v34 = vpop.f32.mrb[53].mxu0  ;;  %v2382_v11 = vpop.f32.mrb[53].mxu1  ;;  %v6121_v63 = vadd.f32 %v2558_v42, %v2299_v6  ;;  %v2435_v52 = vrot.slane %v4336_v24, 1  ;;  %v6750_v25 = vld [vmem:[#allocation47_spill] sm:$0xff] }
 0x232   : > { %v2303_v49 = vadd.f32 %v2252_v34, %v6006_v13  ;;  %v2433_v10 = vrot.slane %v2382_v11, 1  ;;  %v4317_v14 = vpop.f32.mrb[54].mxu0  ;;  %v4337_v45 = vpop.f32.mrb[54].mxu1 }
 0x233   : > { %v2306_v41 = vadd.f32 %v4317_v14, %v6008_v53  ;;  %v2436_v21 = vrot.slane %v4337_v45, 1  ;;  %v2255_v57 = vpop.f32.mrb[55].mxu0  ;;  %v2385_v17 = vpop.f32.mrb[55].mxu1  ;;  %v6753_v45 = vld [vmem:[#allocation61_spill] sm:$0xff] }
 0x234   : > { %v2456_v28 = vsel %vm1764_vm3, %v2432_v30, %v2433_v10  ;;  %v2304_v2 = vadd.f32 %v2255_v57, %v6012_v39  ;;  %v2434_v16 = vrot.slane %v2385_v17, 1  ;;  %v6136_v54 = vpop.permute.xlu0 %2545  ;;  %v6749_v30 = vld [vmem:[#allocation45_spill] sm:$0xff] }
 0x235   : > { %v2561_v1 = vmul.f32 %v6746_v44, %v2456_v28  ;;  %v2453_v13 = vsel %vm1764_vm3, %v2435_v52, %v2436_v21 }
 0x236   : > { %v2564_v19 = vmul.f32 %v6747_v37, %v2453_v13  ;;  %v2454_v62 = vsel %vm1764_vm3, %v2434_v16, %v2435_v52  ;;  %v2455_v53 = vsel %vm1764_vm3, %v2433_v10, %v2434_v16  ;;  %v6752_v10 = vld [vmem:[#allocation60_spill] sm:$0xff] }
 0x237   : > { %v2562_v29 = vmul.f32 %v6748_v48, %v2455_v53  ;;  %v2563_v39 = vmul.f32 %v6749_v30, %v2454_v62  ;;  %v6140_v23 = vadd.f32 %v2561_v1, %v2302_v50 }
 0x238   : > { %v4320_v35 = vpop.f32.mrb[56].mxu0  ;;  %v4340_v60 = vpop.f32.mrb[56].mxu1  ;;  %v6142_v9 = vadd.f32 %v2564_v19, %v2305_v59  ;;  %v6751_v59 = vld [vmem:[#allocation62_spill] sm:$0xff] }
 0x239   : > { %v6144_v6 = vadd.f32 %v2563_v39, %v2304_v2  ;;  %v2309_v0 = vadd.f32 %v4320_v35, %v6046_v3  ;;  %v2268_v15 = vpop.f32.mrb[57].mxu0  ;;  %v2398_v36 = vpop.f32.mrb[57].mxu1  ;;  %v6147_v4 = vadd.f32 %v2562_v29, %v2303_v49  ;;  %v2439_v43 = vrot.slane %v4340_v60, 1 }
 0x23a   : > { %v2307_v22 = vadd.f32 %v2268_v15, %v6042_v5  ;;  %v2437_v27 = vrot.slane %v2398_v36, 1  ;;  %v4321_v40 = vpop.f32.mrb[58].mxu0  ;;  %v4341_v20 = vpop.f32.mrb[58].mxu1 }
 0x23b   : > { %v2310_v50 = vadd.f32 %v4321_v40, %v6044_v8  ;;  %v2440_v47 = vrot.slane %v4341_v20, 1  ;;  %v2271_v26 = vpop.f32.mrb[59].mxu0  ;;  %v2401_v42 = vpop.f32.mrb[59].mxu1  ;;  %v6755_v20 = vld [vmem:[#allocation81_spill] sm:$0xff] }
 0x23c   : > { %v2452_v32 = vsel %vm1764_vm3, %v2436_v21, %v2437_v27  ;;  %v2308_v3 = vadd.f32 %v2271_v26, %v6048_v61  ;;  %v2438_v55 = vrot.slane %v2401_v42, 1  ;;  %v2556_v49 = vpop.permute.xlu0 %2555  ;;  %v2551_v60 = vpop.permute.xlu1 %2550 }
 0x23d   : > { %v2565_v24 = vmul.f32 %v6750_v25, %v2452_v32  ;;  %v2449_v5 = vsel %vm1764_vm3, %v2439_v43, %v2440_v47 }
 0x23e   : > { %v2568_v34 = vmul.f32 %v6751_v59, %v2449_v5  ;;  %v2450_v11 = vsel %vm1764_vm3, %v2438_v55, %v2439_v43  ;;  %v2451_v8 = vsel %vm1764_vm3, %v2437_v27, %v2438_v55 }
 0x23f   : > { %v2566_v14 = vmul.f32 %v6752_v10, %v2451_v8  ;;  %v2567_v52 = vmul.f32 %v6753_v45, %v2450_v11  ;;  %v6164_v61 = vadd.f32 %v2565_v24, %v2306_v41 }
 0x240   : > { %v4324_v21 = vpop.f32.mrb[60].mxu0  ;;  %v4344_v57 = vpop.f32.mrb[60].mxu1  ;;  %v6166_v17 = vadd.f32 %v2568_v34, %v2309_v0  ;;  %v6754_v0 = vld [vmem:[#allocation63_spill] sm:$0xff] }
 0x241   : > { %v6168_v28 = vadd.f32 %v2567_v52, %v2308_v3  ;;  %v2313_v2 = vadd.f32 %v4324_v21, %v6091_v46  ;;  %v2284_v16 = vpop.f32.mrb[61].mxu0  ;;  %v2414_v44 = vpop.f32.mrb[61].mxu1  ;;  %v6171_v1 = vadd.f32 %v2566_v14, %v2307_v22  ;;  %v2443_v53 = vrot.slane %v4344_v57, 1  ;;  %v6756_v14 = vld [vmem:[#allocation30_spill] sm:$0xff] }
 0x242   : > { %v2311_v13 = vadd.f32 %v2284_v16, %v6095_v31  ;;  %v2441_v37 = vrot.slane %v2414_v44, 1  ;;  %v4325_v19 = vpop.f32.mrb[62].mxu0  ;;  %v4345_v62 = vpop.f32.mrb[62].mxu1  ;;  %v6757_v16 = vld [vmem:[#allocation28_spill] sm:$0xff] }
 0x243   : > { %v2314_v41 = vadd.f32 %v4325_v19, %v6099_v7  ;;  %v2444_v48 = vrot.slane %v4345_v62, 1  ;;  %v2287_v29 = vpop.f32.mrb[63].mxu0  ;;  %v2417_v30 = vpop.f32.mrb[63].mxu1  ;;  %v6759_v62 = vld [vmem:[#allocation38_spill] sm:$0xff] }
 0x244   : > { %v2448_v39 = vsel %vm1764_vm3, %v2440_v47, %v2441_v37  ;;  %v2312_v46 = vadd.f32 %v2287_v29, %v6114_v12  ;;  %v2442_v35 = vrot.slane %v2417_v30, 1  ;;  %v6189_v40 = vpop.permute.xlu0 %2820  ;;  %v6217_v57 = vpop.permute.xlu1 %2815  ;;  %v6760_v29 = vld [vmem:[#allocation35_spill] sm:$0xff] }
 0x245   : > { %v2569_v15 = vmul.f32 %v6754_v0, %v2448_v39  ;;  %v2445_v31 = vsel %vm1764_vm3, %v2443_v53, %v2444_v48  ;;  %v2460_v7 = vsel %vm1764_vm3, %v2444_v48, %v2429_v51 }
 0x246   : > { %v2572_v36 = vmul.f32 %v2551_v60, %v2445_v31  ;;  %v2573_v22 = vmul.f32 %v2556_v49, %v2460_v7  ;;  %v2446_v27 = vsel %vm1764_vm3, %v2442_v35, %v2443_v53  ;;  %v2447_v12 = vsel %vm1764_vm3, %v2441_v37, %v2442_v35  ;;  %v6761_v35 = vld [vmem:[#allocation34_spill] sm:$0xff] }
 0x247   : > { %v2570_v43 = vmul.f32 %v6755_v20, %v2447_v12  ;;  %v2571_v47 = vmul.f32 %v6136_v54, %v2446_v27  ;;  %v6193_v26 = vadd.f32 %v2569_v15, %v2310_v50 }
 0x248   : > { %v6195_v33 = vadd.f32 %v2573_v22, %v2314_v41  ;;  %v4352_v42 = vpop.f32.mrb[64].mxu0  ;;  %v4372_v51 = vpop.f32.mrb[64].mxu1  ;;  %v6197_v32 = vadd.f32 %v2572_v36, %v2313_v2 }
 0x249   : > { %v6199_v3 = vadd.f32 %v2571_v47, %v2312_v46  ;;  %v6201_v55 = vpop.f32.mrb[65].mxu0  ;;  %v6203_v25 = vpop.f32.mrb[65].mxu1  ;;  %v6205_v24 = vadd.f32 %v2570_v43, %v2311_v13  ;;  %v2706_v34 = vrot.slane %v4352_v42, 7  ;;  %v6758_v13 = vld [vmem:[#allocation29_spill] sm:$0xff]  ;;  %v3077_v30 = vmul.f32 %v4372_v51, %v6760_v29  ;;  %v6762_v42 = vld [vmem:[#allocation31_spill] sm:$0xff] }
 0x24a   : > { %v4353_v5 = vpop.f32.mrb[66].mxu0  ;;  %v4373_v59 = vpop.f32.mrb[66].mxu1  ;;  %v2704_v8 = vrot.slane %v6201_v55, 7 }
 0x24b   : > { %v2707_v54 = vrot.slane %v4353_v5, 7  ;;  %v2644_v50 = vpop.f32.mrb[67].mxu0  ;;  %v2919_v11 = vpop.f32.mrb[67].mxu1  ;;  %v3078_v53 = vmul.f32 %v4373_v59, %v6759_v62  ;;  %v6763_v59 = vld [vmem:[#allocation50_spill] sm:$0xff] }
 0x24c   : > { %v2705_v49 = vrot.slane %v2644_v50, 7  ;;  %v6219_v2 = vpop.permute.xlu0 %2830  ;;  %v3076_v60 = vmul.f32 %v6761_v35, %v2919_v11  ;;  %v6768_v62 = vld [vmem:[#allocation54_spill] sm:$0xff] }
 0x24d   : > { %v2732_v10 = vsel %vm1246_vm2, %v2706_v34, %v2707_v54 }
 0x24e   : > { %v2835_v45 = vmul.f32 %v6756_v14, %v2732_v10  ;;  %v2733_v52 = vsel %vm1246_vm2, %v2705_v49, %v2706_v34  ;;  %v2734_v21 = vsel %vm1246_vm2, %v2704_v8, %v2705_v49  ;;  %v6245_v49 = vpop.permute.xlu1 %2825  ;;  %v6764_v14 = vld [vmem:[#allocation39_spill] sm:$0xff] }
 0x24f   : > { %v2833_v44 = vmul.f32 %v6757_v16, %v2734_v21  ;;  %v2834_v37 = vmul.f32 %v6758_v13, %v2733_v52  ;;  %v6765_v52 = vld [vmem:[#allocation48_spill] sm:$0xff]  ;;  %v6766_v16 = vld [vmem:[#allocation49_spill] sm:$0xff] }
 0x250   : > { %v2851_v19 = vadd.f32 %v2835_v45, %v6116_v58  ;;  %v4356_v41 = vpop.f32.mrb[68].mxu0  ;;  %v4376_v48 = vpop.f32.mrb[68].mxu1  ;;  %v6767_v13 = vld [vmem:[#allocation53_spill] sm:$0xff] }
 0x251   : > { %v2850_v39 = vadd.f32 %v2834_v37, %v6118_v38  ;;  %v2849_v46 = vadd.f32 %v2833_v44, %v6121_v63  ;;  %v2657_v0 = vpop.f32.mrb[69].mxu0  ;;  %v2932_v15 = vpop.f32.mrb[69].mxu1  ;;  %v2710_v27 = vrot.slane %v4356_v41, 7  ;;  %v3081_v37 = vmul.f32 %v4376_v48, %v6767_v13  ;;  %v6775_v13 = vld [vmem:[#allocation73_spill] sm:$0xff] }
 0x252   : > { %v6229_v31 = vadd.f32 %v3078_v53, %v2851_v19  ;;  %v2708_v7 = vrot.slane %v2657_v0, 7  ;;  %v4357_v36 = vpop.f32.mrb[70].mxu0  ;;  %v4377_v22 = vpop.f32.mrb[70].mxu1  ;;  %v3079_v45 = vmul.f32 %v6764_v14, %v2932_v15 }
 0x253   : > { %v6231_v58 = vadd.f32 %v3076_v60, %v2849_v46  ;;  %v2711_v12 = vrot.slane %v4357_v36, 7  ;;  %v2660_v20 = vpop.f32.mrb[71].mxu0  ;;  %v2935_v43 = vpop.f32.mrb[71].mxu1  ;;  %v6233_v47 = vadd.f32 %v3077_v30, %v2850_v39  ;;  %v3082_v53 = vmul.f32 %v4377_v22, %v6768_v62  ;;  %v6769_v46 = vld [vmem:[#allocation52_spill] sm:$0xff] }
 0x254   : > { %v2731_v38 = vsel %vm1246_vm2, %v2707_v54, %v2708_v7  ;;  %v2709_v63 = vrot.slane %v2660_v20, 7  ;;  %v6247_v10 = vpop.permute.xlu0 %3063  ;;  %v3080_v35 = vmul.f32 %v6769_v46, %v2935_v43  ;;  %v6770_v43 = vld [vmem:[#allocation51_spill] sm:$0xff]  ;;  %v6776_v62 = vld [vmem:[#allocation76_spill] sm:$0xff] }
 0x255   : > { %v2836_v51 = vmul.f32 %v6762_v42, %v2731_v38  ;;  %v2728_v5 = vsel %vm1246_vm2, %v2710_v27, %v2711_v12 }
 0x256   : > { %v2839_v34 = vmul.f32 %v6763_v59, %v2728_v5  ;;  %v2729_v50 = vsel %vm1246_vm2, %v2709_v63, %v2710_v27  ;;  %v2730_v11 = vsel %vm1246_vm2, %v2708_v7, %v2709_v63  ;;  %v6771_v5 = vld [vmem:[#allocation68_spill] sm:$0xff] }
 0x257   : > { %v2852_v54 = vadd.f32 %v2836_v51, %v6140_v23  ;;  %v2837_v21 = vmul.f32 %v6765_v52, %v2730_v11  ;;  %v2838_v44 = vmul.f32 %v6766_v16, %v2729_v50  ;;  %v3059_v11 = vpop.permute.xlu1 %3058  ;;  %v6773_v52 = vld [vmem:[#allocation64_spill] sm:$0xff]  ;;  %v6774_v16 = vld [vmem:[#allocation65_spill] sm:$0xff] }
 0x258   : > { %v2855_v19 = vadd.f32 %v2839_v34, %v6142_v9  ;;  %v4360_v41 = vpop.f32.mrb[72].mxu0  ;;  %v4380_v29 = vpop.f32.mrb[72].mxu1 }
 0x259   : > { %v6256_v30 = vadd.f32 %v3079_v45, %v2852_v54  ;;  %v2854_v39 = vadd.f32 %v2838_v44, %v6144_v6  ;;  %v2853_v23 = vadd.f32 %v2837_v21, %v6147_v4  ;;  %v2673_v60 = vpop.f32.mrb[73].mxu0  ;;  %v2948_v0 = vpop.f32.mrb[73].mxu1  ;;  %v2714_v22 = vrot.slane %v4360_v41, 7  ;;  %v6772_v45 = vld [vmem:[#allocation55_spill] sm:$0xff] }
 0x25a   : > { %v6261_v15 = vadd.f32 %v3082_v53, %v2855_v19  ;;  %v2712_v7 = vrot.slane %v2673_v60, 7  ;;  %v4361_v48 = vpop.f32.mrb[74].mxu0  ;;  %v4381_v36 = vpop.f32.mrb[74].mxu1 }
 0x25b   : > { %v6263_v9 = vadd.f32 %v3080_v35, %v2853_v23  ;;  %v2715_v27 = vrot.slane %v4361_v48, 7  ;;  %v2676_v20 = vpop.f32.mrb[75].mxu0  ;;  %v2951_v38 = vpop.f32.mrb[75].mxu1  ;;  %v6265_v63 = vadd.f32 %v3081_v37, %v2854_v39  ;;  %v3085_v37 = vmul.f32 %v4380_v29, %v6775_v13  ;;  %v6777_v35 = vld [vmem:[#allocation72_spill] sm:$0xff] }
 0x25c   : > { %v2727_v6 = vsel %vm1246_vm2, %v2711_v12, %v2712_v7  ;;  %v2713_v4 = vrot.slane %v2676_v20, 7  ;;  %v3074_v54 = vpop.permute.xlu0 %3073  ;;  %v3083_v12 = vmul.f32 %v6772_v45, %v2948_v0  ;;  %v3086_v53 = vmul.f32 %v4381_v36, %v6776_v62 }
 0x25d   : > { %v2840_v42 = vmul.f32 %v6770_v43, %v2727_v6  ;;  %v2724_v51 = vsel %vm1246_vm2, %v2714_v22, %v2715_v27  ;;  %v3084_v60 = vmul.f32 %v6777_v35, %v2951_v38  ;;  %v3091_v38 = vmul.f32 %v3074_v54, %v6203_v25  ;;  %v3069_v54 = vpop.permute.xlu1 %3068 }
 0x25e   : > { %v2843_v59 = vmul.f32 %v6771_v5, %v2724_v51  ;;  %v2725_v34 = vsel %vm1246_vm2, %v2713_v4, %v2714_v22  ;;  %v2726_v50 = vsel %vm1246_vm2, %v2712_v7, %v2713_v4  ;;  %v6778_v51 = vld [vmem:[#allocation69_spill] sm:$0xff] }
 0x25f   : > { %v2856_v14 = vadd.f32 %v2840_v42, %v6164_v61  ;;  %v2841_v21 = vmul.f32 %v6773_v52, %v2726_v50  ;;  %v2842_v44 = vmul.f32 %v6774_v16, %v2725_v34 }
 0x260   : > { %v2859_v19 = vadd.f32 %v2843_v59, %v6166_v17  ;;  %v4364_v41 = vpop.f32.mrb[76].mxu0  ;;  %v4384_v39 = vpop.f32.mrb[76].mxu1 }
 0x261   : > { %v6284_v23 = vadd.f32 %v3083_v12, %v2856_v14  ;;  %v2858_v46 = vadd.f32 %v2842_v44, %v6168_v28  ;;  %v2857_v61 = vadd.f32 %v2841_v21, %v6171_v1  ;;  %v2689_v0 = vpop.f32.mrb[77].mxu0  ;;  %v2964_v7 = vpop.f32.mrb[77].mxu1  ;;  %v2718_v36 = vrot.slane %v4364_v41, 7  ;;  %v6779_v12 = vld [vmem:[#allocation77_spill] sm:$0xff] }
 0x262   : > { %v6289_v48 = vadd.f32 %v3086_v53, %v2859_v19  ;;  %v2716_v22 = vrot.slane %v2689_v0, 7  ;;  %v4365_v29 = vpop.f32.mrb[78].mxu0  ;;  %v4385_v20 = vpop.f32.mrb[78].mxu1  ;;  %v3087_v52 = vmul.f32 %v6779_v12, %v2964_v7 }
 0x263   : > { %v6291_v17 = vadd.f32 %v3084_v60, %v2857_v61  ;;  %v2719_v6 = vrot.slane %v4365_v29, 7  ;;  %v2692_v4 = vpop.f32.mrb[79].mxu0  ;;  %v2967_v43 = vpop.f32.mrb[79].mxu1  ;;  %v6293_v42 = vadd.f32 %v3085_v37, %v2858_v46  ;;  %v3090_v44 = vmul.f32 %v4385_v20, %v3069_v54  ;;  %v6781_v29 = vld [vmem:[#allocation40_spill] sm:$0xff]  ;;  %v6782_v54 = vld [vmem:[#allocation42_spill] sm:$0xff] }
 0x264   : > { %v2723_v28 = vsel %vm1246_vm2, %v2715_v27, %v2716_v22  ;;  %v2717_v1 = vrot.slane %v2692_v4, 7  ;;  %v3088_v62 = vmul.f32 %v3059_v11, %v2967_v43  ;;  %v6780_v11 = vld [vmem:[#allocation41_spill] sm:$0xff] }
 0x265   : > { %v2844_v5 = vmul.f32 %v6778_v51, %v2723_v28  ;;  %v2720_v59 = vsel %vm1246_vm2, %v2718_v36, %v2719_v6  ;;  %v2735_v34 = vsel %vm1246_vm2, %v2719_v6, %v2704_v8  ;;  %v6315_v8 = vpop.permute.xlu0 %3338 }
 0x266   : > { %v2847_v50 = vmul.f32 %v6245_v49, %v2720_v59  ;;  %v2848_v14 = vmul.f32 %v6219_v2, %v2735_v34  ;;  %v2721_v27 = vsel %vm1246_vm2, %v2717_v1, %v2718_v36  ;;  %v2722_v25 = vsel %vm1246_vm2, %v2716_v22, %v2717_v1  ;;  %v6345_v22 = vld [vmem:[%s6626_s11] ss:$0 sm:$0xff] }
 0x267   : > { %v2860_v45 = vadd.f32 %v2844_v5, %v6193_v26  ;;  %v2845_v55 = vmul.f32 %v6217_v57, %v2722_v25  ;;  %v2846_v21 = vmul.f32 %v6189_v40, %v2721_v27  ;;  %v3089_v49 = vmul.f32 %v4384_v39, %v6247_v10 }
 0x268   : > { %v2864_v2 = vadd.f32 %v2848_v14, %v6195_v33  ;;  %v2863_v16 = vadd.f32 %v2847_v50, %v6197_v32  ;;  %v4392_v13 = vpop.f32.mrb[80].mxu0 }
 0x269   : > { %v6320_v37 = vadd.f32 %v3087_v52, %v2860_v45  ;;  %v2862_v26 = vadd.f32 %v2846_v21, %v6199_v3  ;;  %v2861_v19 = vadd.f32 %v2845_v55, %v6205_v24  ;;  %v6324_v57 = vpop.f32.mrb[81].mxu0  ;;  %v3224_v33 = vrot.slane %v4392_v13, 1  ;;  %v3349_v24 = vpop.permute.xlu0 %3348  ;;  %v6783_v55 = vld [vmem:[#allocation57_spill] sm:$0xff]  ;;  %v6784_v13 = vld [vmem:[#allocation43_spill] sm:$0xff] }
 0x26a   : > { %v6326_v40 = vadd.f32 %v3090_v44, %v2863_v16  ;;  %v4393_v53 = vpop.f32.mrb[82].mxu0  ;;  %v3107_v41 = vadd.f32 %v3091_v38, %v2864_v2  ;;  %v3222_v61 = vrot.slane %v6324_v57, 1  ;;  %v6353_v38 = vld [vmem:[%s6627_s12] ss:$0 sm:$0xff] }
 0x26b   : > { %v6328_v10 = vadd.f32 %v3088_v62, %v2861_v19  ;;  %v3225_v39 = vrot.slane %v4393_v53, 1  ;;  %v3162_v32 = vpop.f32.mrb[83].mxu0  ;;  %v6330_v46 = vadd.f32 %v3089_v49, %v2862_v26  ;;  %v6785_v19 = vld [vmem:[#allocation56_spill] sm:$0xff] }
 0x26c   : > { %v3223_v35 = vrot.slane %v3162_v32, 1 }
 0x26d   : > { %v3250_v3 = vsel %vm1764_vm3, %v3224_v33, %v3225_v39 }
 0x26e   : > { %v3352_v60 = vmul.f32 %v6780_v11, %v3250_v3  ;;  %v3251_v0 = vsel %vm1764_vm3, %v3223_v35, %v3224_v33  ;;  %v3252_v7 = vsel %vm1764_vm3, %v3222_v61, %v3223_v35 }
 0x26f   : > { %v3351_v20 = vmul.f32 %v6781_v29, %v3251_v0  ;;  %v3366_v36 = vmul.f32 %v3349_v24, %v3252_v7 }
 0x270   : > { %v3368_v6 = vadd.f32 %v3352_v60, %v6233_v47  ;;  %v4396_v4 = vpop.f32.mrb[84].mxu0 }
 0x271   : > { %v3367_v43 = vadd.f32 %v3351_v20, %v6231_v58  ;;  %v3382_v28 = vadd.f32 %v3366_v36, %v3107_v41  ;;  %v3175_v1 = vpop.f32.mrb[85].mxu0  ;;  %v3228_v50 = vrot.slane %v4396_v4, 1 }
 0x272   : > { %v3391_v51 = vmul.f32 %v6345_v22, %v3368_v6  ;;  %v3226_v5 = vrot.slane %v3175_v1, 1  ;;  %v4397_v59 = vpop.f32.mrb[86].mxu0 }
 0x273   : > { %v3390_v34 = vmul.f32 %v6345_v22, %v3367_v43  ;;  %v3229_v14 = vrot.slane %v4397_v59, 1  ;;  %v3178_v27 = vpop.f32.mrb[87].mxu0  ;;  %v3405_v6 = vmul.f32 %v6345_v22, %v3382_v28 }
 0x274   : > { %v3249_v47 = vsel %vm1764_vm3, %v3225_v39, %v3226_v5  ;;  %v3227_v58 = vrot.slane %v3178_v27, 1  ;;  %v3414_v25 = vadd.f32 %v6353_v38, %v3391_v51  ;;  %v6786_v51 = vld [vmem:[#allocation58_spill] sm:$0xff] }
 0x275   : > { %v3353_v45 = vmul.f32 %v6782_v54, %v3249_v47  ;;  %v3246_v12 = vsel %vm1764_vm3, %v3228_v50, %v3229_v14  ;;  %v3413_v52 = vadd.f32 %v6353_v38, %v3390_v34  ;;  %v6787_v34 = vld [vmem:[#allocation79_spill] sm:$0xff]  ;;  %v3334_v47 = vpop.permute.xlu1 %3333 }
 0x276   : > { %v3356_v21 = vmul.f32 %v6783_v55, %v3246_v12  ;;  %v3247_v49 = vsel %vm1764_vm3, %v3227_v58, %v3228_v50  ;;  %v3248_v2 = vsel %vm1764_vm3, %v3226_v5, %v3227_v58  ;;  %v3430_v16 = vmax.f32 %v3414_v25, 0.0  ;;  %v6788_v54 = vld [vmem:[#allocation59_spill] sm:$0xff]  ;;  %v6789_v12 = vld [vmem:[#allocation78_spill] sm:$0xff] }
 0x277   : > { %v3369_v44 = vadd.f32 %v3353_v45, %v6229_v31  ;;  %v3354_v26 = vmul.f32 %v6784_v13, %v3248_v2  ;;  %v3355_v62 = vmul.f32 %v6785_v19, %v3247_v49  ;;  %v3429_v53 = vmax.f32 %v3413_v52, 0.0 }
 0x278   : > { %v3372_v41 = vadd.f32 %v3356_v21, %v6265_v63  ;;  %v4400_v33 = vpop.f32.mrb[88].mxu0 }
 0x279   : > { %v3392_v39 = vmul.f32 %v6345_v22, %v3369_v44  ;;  %v3370_v32 = vadd.f32 %v3354_v26, %v6256_v30  ;;  %v3371_v35 = vadd.f32 %v3355_v62, %v6263_v9  ;;  %v3191_v3 = vpop.f32.mrb[89].mxu0  ;;  %v3232_v11 = vrot.slane %v4400_v33, 1 }
 0x27a   : > { %v3395_v24 = vmul.f32 %v6345_v22, %v3372_v41  ;;  %v3230_v60 = vrot.slane %v3191_v3, 1  ;;  %v4401_v31 = vpop.f32.mrb[90].mxu0  ;;  %v3445_v0 = vpack.c.bf16 %v3430_v16, %v3429_v53  ;;  %v3428_v33 = vadd.f32 %v6353_v38, %v3405_v6 }
 0x27b   : > { %v3415_v7 = vadd.f32 %v6353_v38, %v3392_v39  ;;  %v3393_v29 = vmul.f32 %v6345_v22, %v3370_v32  ;;  %v3394_v63 = vmul.f32 %v6345_v22, %v3371_v35  ;;  %v3233_v20 = vrot.slane %v4401_v31, 1  ;;  %v3194_v36 = vpop.f32.mrb[91].mxu0  ;;  %v6790_v31 = vld [vmem:[#allocation80_spill] sm:$0xff] }
 0x27c   : > { %v3245_v30 = vsel %vm1764_vm3, %v3229_v14, %v3230_v60  ;;  %v3231_v9 = vrot.slane %v3194_v36, 1  ;;  %4410 = vmatprep.mubr.msk.bf16.mxu1 %vm1106_vm1, %v3445_v0  ;;  %v3418_v4 = vadd.f32 %v6353_v38, %v3395_v24 }
 0x27d   : > { %v3431_v43 = vmax.f32 %v3415_v7, 0.0  ;;  %v3416_v1 = vadd.f32 %v6353_v38, %v3393_v29  ;;  %v3357_v5 = vmul.f32 %v6786_v51, %v3245_v30  ;;  %v3242_v59 = vsel %vm1764_vm3, %v3232_v11, %v3233_v20 }
 0x27e   : > { %v3360_v50 = vmul.f32 %v6787_v34, %v3242_v59  ;;  %v3243_v28 = vsel %vm1764_vm3, %v3231_v9, %v3232_v11  ;;  %v3244_v14 = vsel %vm1764_vm3, %v3230_v60, %v3231_v9  ;;  %v3417_v27 = vadd.f32 %v6353_v38, %v3394_v63  ;;  %v3344_v60 = vpop.permute.xlu1 %3343 }
 0x27f   : > { %v3432_v58 = vmax.f32 %v3416_v1, 0.0  ;;  %v3373_v25 = vadd.f32 %v3357_v5, %v6261_v15  ;;  %v3358_v45 = vmul.f32 %v6788_v54, %v3244_v14  ;;  %v3359_v52 = vmul.f32 %v6789_v12, %v3243_v28 }
 0x280   : > { %v3376_v55 = vadd.f32 %v3360_v50, %v6293_v42  ;;  %v4404_v21 = vpop.f32.mrb[92].mxu0  ;;  %v3433_v49 = vmax.f32 %v3417_v27, 0.0  ;;  %v3434_v2 = vmax.f32 %v3418_v4, 0.0 }
 0x281   : > { %v3446_v16 = vpack.c.bf16 %v3432_v58, %v3431_v43  ;;  %v3396_v44 = vmul.f32 %v6345_v22, %v3373_v25  ;;  %v3374_v13 = vadd.f32 %v3358_v45, %v6284_v23  ;;  %v3375_v26 = vadd.f32 %v3359_v52, %v6291_v17  ;;  %v3207_v19 = vpop.f32.mrb[93].mxu0 }
 0x282   : > { %v3399_v62 = vmul.f32 %v6345_v22, %v3376_v55  ;;  %v3234_v15 = vrot.slane %v3207_v19, 1  ;;  %v4405_v53 = vpop.f32.mrb[94].mxu0  ;;  %v3447_v41 = vpack.c.bf16 %v3434_v2, %v3433_v49  ;;  %v3236_v39 = vrot.slane %v4404_v21, 1  ;;  %v3592_v2 = vld [vmem:[%s5324_s24 + $0x10] sm:$0xff] }
 0x283   : > { %v3397_v42 = vmul.f32 %v6345_v22, %v3374_v13  ;;  %v3237_v32 = vrot.slane %v4405_v53, 1  ;;  %v3210_v35 = vpop.f32.mrb[95].mxu0  ;;  %4411 = vmatmul.mubr.msk.bf16.vlgmr.msra.gmra.mrb[80].mxu1 %vm1106_vm1, %v3446_v16  ;;  %v3419_v3 = vadd.f32 %v6353_v38, %v3396_v44  ;;  %v3398_v23 = vmul.f32 %v6345_v22, %v3375_v26  ;;  %v3590_v13 = vld [vmem:[%s5324_s24] sm:$0xff] }
 0x284   : > { %v3241_v17 = vsel %vm1764_vm3, %v3233_v20, %v3234_v15  ;;  %v3235_v24 = vrot.slane %v3210_v35, 1  ;;  %4414 = vmatprep.mubr.msk.bf16.mxu1 %vm1106_vm1, %v3447_v41  ;;  %v3422_v11 = vadd.f32 %v6353_v38, %v3399_v62  ;;  %v3593_v62 = vld [vmem:[%s5324_s24 + $0x18] sm:$0xff]  ;;  %v3591_v41 = vld [vmem:[%s5324_s24 + $0x8] sm:$0xff] }
 0x285   : > { %v3361_v0 = vmul.f32 %v6790_v31, %v3241_v17  ;;  %v3238_v7 = vsel %vm1764_vm3, %v3236_v39, %v3237_v32  ;;  %v3253_v29 = vsel %vm1764_vm3, %v3237_v32, %v3222_v61  ;;  %v3420_v63 = vadd.f32 %v6353_v38, %v3397_v42  ;;  %v3595_v31 = vld [vmem:[%s5324_s24 + $0x28] sm:$0xff] }
 0x286   : > { %v3364_v20 = vmul.f32 %v6315_v8, %v3238_v7  ;;  %v3365_v36 = vmul.f32 %v3344_v60, %v3253_v29  ;;  %v3239_v6 = vsel %vm1764_vm3, %v3235_v24, %v3236_v39  ;;  %v3240_v30 = vsel %vm1764_vm3, %v3234_v15, %v3235_v24  ;;  %v3596_v39 = vld [vmem:[%s5324_s24 + $0x30] sm:$0xff]  ;;  %v3597_v24 = vld [vmem:[%s5324_s24 + $0x38] sm:$0xff] }
 0x287   : > { %v3377_v9 = vadd.f32 %v3361_v0, %v6289_v48  ;;  %v3362_v4 = vmul.f32 %v6110_v56, %v3240_v30  ;;  %v3363_v43 = vmul.f32 %v3334_v47, %v3239_v6  ;;  %v3435_v57 = vmax.f32 %v3419_v3, 0.0  ;;  %v3594_v3 = vld [vmem:[%s5324_s24 + $0x20] sm:$0xff]  ;;  %v3600_v29 = vld [vmem:[%s5324_s24 + $0x50] sm:$0xff] }
 0x288   : > { %v3380_v1 = vadd.f32 %v3364_v20, %v6330_v46  ;;  %v3381_v61 = vadd.f32 %v3365_v36, %v6326_v40  ;;  %v3436_v51 = vmax.f32 %v3420_v63, 0.0  ;;  %v3421_v8 = vadd.f32 %v6353_v38, %v3398_v23  ;;  %v3598_v36 = vld [vmem:[%s5324_s24 + $0x40] sm:$0xff] }
 0x289   : > { %v3400_v5 = vmul.f32 %v6345_v22, %v3377_v9  ;;  %v3378_v59 = vadd.f32 %v3362_v4, %v6320_v37  ;;  %v3379_v18 = vadd.f32 %v3363_v43, %v6328_v10  ;;  %v3438_v34 = vmax.f32 %v3422_v11, 0.0  ;;  %v3601_v9 = vld [vmem:[%s5324_s24 + $0x58] sm:$0xff] }
 0x28a   : > { %v3403_v48 = vmul.f32 %v6345_v22, %v3380_v1  ;;  %v3404_v56 = vmul.f32 %v6345_v22, %v3381_v61  ;;  %v3448_v50 = vpack.c.bf16 %v3436_v51, %v3435_v57  ;;  %v3437_v28 = vmax.f32 %v3421_v8, 0.0  ;;  %v3599_v57 = vld [vmem:[%s5324_s24 + $0x48] sm:$0xff]  ;;  %v3604_v51 = vld [vmem:[%s5324_s24 + $0x70] sm:$0xff] }
 0x28b   : > { %v3401_v46 = vmul.f32 %v6345_v22, %v3378_v59  ;;  %v3402_v40 = vmul.f32 %v6345_v22, %v3379_v18  ;;  %v3423_v14 = vadd.f32 %v6353_v38, %v3400_v5  ;;  %v3444_v22 = vmax.f32 %v3428_v33, 0.0  ;;  %v3602_v59 = vld [vmem:[%s5324_s24 + $0x60] sm:$0xff] }
 0x28c   : > { %4415 = vmatmul.mubr.msk.bf16.gmra.mrb[84].mxu1 %vm1106_vm1, %v3448_v50  ;;  %v3449_v27 = vpack.c.bf16 %v3438_v34, %v3437_v28  ;;  %v3426_v37 = vadd.f32 %v6353_v38, %v3403_v48  ;;  %v3427_v10 = vadd.f32 %v6353_v38, %v3404_v56  ;;  %v3605_v48 = vld [vmem:[%s5324_s24 + $0x78] sm:$0xff]  ;;  %v3603_v28 = vld [vmem:[%s5324_s24 + $0x68] sm:$0xff] }
 0x28d   : > { %v3424_v47 = vadd.f32 %v6353_v38, %v3401_v46  ;;  %v3425_v58 = vadd.f32 %v6353_v38, %v3402_v40  ;;  %v3439_v45 = vmax.f32 %v3423_v14, 0.0 }
 0x28e   : > { %4418 = vmatprep.mubr.msk.bf16.mxu1 %vm1106_vm1, %v3449_v27  ;;  %v3442_v25 = vmax.f32 %v3426_v37, 0.0  ;;  %v3443_v54 = vmax.f32 %v3427_v10, 0.0 }
 0x28f   : > { %v3440_v12 = vmax.f32 %v3424_v47, 0.0  ;;  %v3441_v52 = vmax.f32 %v3425_v58, 0.0 }
 0x290   : > { %v3452_v55 = vpack.c.bf16 %v3444_v22, %v3443_v54 }
 0x291   : > { %v3450_v21 = vpack.c.bf16 %v3440_v12, %v3439_v45  ;;  %v3451_v49 = vpack.c.bf16 %v3442_v25, %v3441_v52 }
 0x294   : > { %4419 = vmatmul.mubr.msk.bf16.gmra.mrb[88].mxu1 %vm1106_vm1, %v3450_v21 }
 0x295   : > { %4422 = vmatprep.mubr.msk.bf16.mxu1 %vm1106_vm1, %v3451_v49 }
 0x29c   : > { %4423 = vmatmul.mubr.msk.bf16.gmra.mrb[92].mxu1 %vm1106_vm1, %v3452_v55 }
 0x356   : > { %v4412_v38 = vpop.f32.mrb[80].mxu1 }
 0x357   : > { %v3608_v16 = vadd.f32 %v4412_v38, %v3592_v2  ;;  %3641 = vst.msk [vmem:[%s5764_s29 + $0x10] sm:$0xff] %vm3638_vm4, %v4412_v38  ;;  %v3527_v44 = vpop.f32.mrb[81].mxu1 }
 0x358   : > { %v3606_v26 = vadd.f32 %v3590_v13, %v3527_v44  ;;  %3639 = vst.msk [vmem:[%s5764_s29] sm:$0xff] %vm3638_vm4, %v3527_v44  ;;  %v4413_v19 = vpop.f32.mrb[82].mxu1 }
 0x359   : > { %3624 = vst.msk [vmem:[%s5324_s24 + $0x10] sm:$0xff] %vm603_vm0, %v3608_v16  ;;  %v3609_v15 = vadd.f32 %v4413_v19, %v3593_v62  ;;  %v3530_v53 = vpop.f32.mrb[83].mxu1 }
 0x35a   : > { %3642 = vst.msk [vmem:[%s5764_s29 + $0x18] sm:$0xff] %vm3638_vm4, %v4413_v19  ;;  %v3607_v33 = vadd.f32 %v3591_v41, %v3530_v53  ;;  %3640 = vst.msk [vmem:[%s5764_s29 + $0x8] sm:$0xff] %vm3638_vm4, %v3530_v53 }
 0x35b   : > { %3622 = vst.msk [vmem:[%s5324_s24] sm:$0xff] %vm603_vm0, %v3606_v26  ;;  %3625 = vst.msk [vmem:[%s5324_s24 + $0x18] sm:$0xff] %vm603_vm0, %v3609_v15 }
 0x35c   : > { %3623 = vst.msk [vmem:[%s5324_s24 + $0x8] sm:$0xff] %vm603_vm0, %v3607_v33 }
 0x35f   : > { %v4416_v42 = vpop.f32.mrb[84].mxu1 }
 0x360   : > { %v3612_v32 = vadd.f32 %v4416_v42, %v3596_v39  ;;  %3645 = vst.msk [vmem:[%s5764_s29 + $0x30] sm:$0xff] %vm3638_vm4, %v4416_v42  ;;  %v3543_v35 = vpop.f32.mrb[85].mxu1 }
 0x361   : > { %v3610_v23 = vadd.f32 %v3594_v3, %v3543_v35  ;;  %3643 = vst.msk [vmem:[%s5764_s29 + $0x20] sm:$0xff] %vm3638_vm4, %v3543_v35  ;;  %v4417_v17 = vpop.f32.mrb[86].mxu1 }
 0x362   : > { %3628 = vst.msk [vmem:[%s5324_s24 + $0x30] sm:$0xff] %vm603_vm0, %v3612_v32  ;;  %v3613_v11 = vadd.f32 %v4417_v17, %v3597_v24  ;;  %v3546_v60 = vpop.f32.mrb[87].mxu1 }
 0x363   : > { %3646 = vst.msk [vmem:[%s5764_s29 + $0x38] sm:$0xff] %vm3638_vm4, %v4417_v17  ;;  %v3611_v0 = vadd.f32 %v3595_v31, %v3546_v60  ;;  %3644 = vst.msk [vmem:[%s5764_s29 + $0x28] sm:$0xff] %vm3638_vm4, %v3546_v60 }
 0x364   : > { %3626 = vst.msk [vmem:[%s5324_s24 + $0x20] sm:$0xff] %vm603_vm0, %v3610_v23  ;;  %3629 = vst.msk [vmem:[%s5324_s24 + $0x38] sm:$0xff] %vm603_vm0, %v3613_v11 }
 0x365   : > { %3627 = vst.msk [vmem:[%s5324_s24 + $0x28] sm:$0xff] %vm603_vm0, %v3611_v0 }
 0x367   : > { %v4420_v7 = vpop.f32.mrb[88].mxu1 }
 0x368   : > { %v3616_v63 = vadd.f32 %v4420_v7, %v3600_v29  ;;  %3649 = vst.msk [vmem:[%s5764_s29 + $0x50] sm:$0xff] %vm3638_vm4, %v4420_v7  ;;  %v3559_v20 = vpop.f32.mrb[89].mxu1 }
 0x369   : > { %v3614_v6 = vadd.f32 %v3598_v36, %v3559_v20  ;;  %3647 = vst.msk [vmem:[%s5764_s29 + $0x40] sm:$0xff] %vm3638_vm4, %v3559_v20  ;;  %v4421_v30 = vpop.f32.mrb[90].mxu1 }
 0x36a   : > { %3632 = vst.msk [vmem:[%s5324_s24 + $0x50] sm:$0xff] %vm603_vm0, %v3616_v63  ;;  %v3617_v4 = vadd.f32 %v4421_v30, %v3601_v9  ;;  %v3562_v43 = vpop.f32.mrb[91].mxu1 }
 0x36b   : > { %3650 = vst.msk [vmem:[%s5764_s29 + $0x58] sm:$0xff] %vm3638_vm4, %v4421_v30  ;;  %v3615_v1 = vadd.f32 %v3599_v57, %v3562_v43  ;;  %3648 = vst.msk [vmem:[%s5764_s29 + $0x48] sm:$0xff] %vm3638_vm4, %v3562_v43 }
 0x36c   : > { %3630 = vst.msk [vmem:[%s5324_s24 + $0x40] sm:$0xff] %vm603_vm0, %v3614_v6  ;;  %3633 = vst.msk [vmem:[%s5324_s24 + $0x58] sm:$0xff] %vm603_vm0, %v3617_v4 }
 0x36d   : > { %3631 = vst.msk [vmem:[%s5324_s24 + $0x48] sm:$0xff] %vm603_vm0, %v3615_v1 }
 0x36f   : > { %v4424_v61 = vpop.f32.mrb[92].mxu1 }
 0x370   : > { %v3620_v8 = vadd.f32 %v4424_v61, %v3604_v51  ;;  %3653 = vst.msk [vmem:[%s5764_s29 + $0x70] sm:$0xff] %vm3638_vm4, %v4424_v61  ;;  %v3575_v5 = vpop.f32.mrb[93].mxu1 }
 0x371   : > { %v3618_v18 = vadd.f32 %v3602_v59, %v3575_v5  ;;  %3651 = vst.msk [vmem:[%s5764_s29 + $0x60] sm:$0xff] %vm3638_vm4, %v3575_v5  ;;  %v4425_v34 = vpop.f32.mrb[94].mxu1 }
 0x372   : > { %3636 = vst.msk [vmem:[%s5324_s24 + $0x70] sm:$0xff] %vm603_vm0, %v3620_v8  ;;  %v3621_v56 = vadd.f32 %v4425_v34, %v3605_v48  ;;  %v3578_v50 = vpop.f32.mrb[95].mxu1 }
 0x373   : > { %3654 = vst.msk [vmem:[%s5764_s29 + $0x78] sm:$0xff] %vm3638_vm4, %v4425_v34  ;;  %v3619_v46 = vadd.f32 %v3603_v28, %v3578_v50  ;;  %3652 = vst.msk [vmem:[%s5764_s29 + $0x68] sm:$0xff] %vm3638_vm4, %v3578_v50 }
 0x374   : > { %3634 = vst.msk [vmem:[%s5324_s24 + $0x60] sm:$0xff] %vm603_vm0, %v3618_v18  ;;  %3637 = vst.msk [vmem:[%s5324_s24 + $0x78] sm:$0xff] %vm603_vm0, %v3621_v56 }
 0x375   : > { %4511 = shalt.err (!%p4508_p3)
}
 0x376   : > { %s4512_s29 = scalar_lea.hbm %s6520_s4, 2048  ;;  %s4516_s0 = scalar_lea.hbm %s6630_s15, 4096 }
 0x377   : > { %p4513_p4 = scmp.ne.s32.totalorder %s6520_s4, %s4512_s29  ;;  %p4517_p9 = scmp.lt.u32.totalorder %s6520_s4, %s6630_s15 }
 0x378   : > { %p4518_p10 = scmp.lt.u32.totalorder %s4516_s0, %s4512_s29  ;;  %p4520_p12 = scmp.lt.u32.totalorder %s4512_s29, %s6520_s4 }
 0x379   : > { %p4514_p7 = pnand %p4513_p4, %p4718_p5 }
 0x37a   : > { %p4519_p11 = por %p4518_p10, %p4517_p9 }
 0x37b   : > { %p4515_p8 = pneg %p4514_p7 }
 0x37c   : > { %p4521_p13 = por %p4520_p12, %p4519_p11 }
 0x37e   : > { %p4522_p0 = pnand %p4521_p13, %p4515_p8 }
 0x380   : > { %4525 = shalt.err (!%p4522_p0)
}
 0x381   : > { %s4597_s2 = smov 128   ;;  %s4598_s25 = smov 8   ;;  %3635 = vst.msk [vmem:[%s5324_s24 + $0x68] sm:$0xff] %vm603_vm0, %v3619_v46 }
 0x382   : > { %4427 = dma.vmem_to_hbm [thread:$0]  (%p4718_p5), %s6522_s27, 2048, %s6520_s4, %s3661_s22, %s4597_s2, %s4597_s2, %s4598_s25  }
 0x383   : > { %s3656_s29 = scalar_lea.sflag [#allocation3], %s5306_s17  ;;  %s4526_s23 = scalar_lea.vmem %s6538_s30, 2048 }
 0x384   : > { %p4527_p1 = scmp.ne.s32.totalorder %s6538_s30, %s4526_s23  ;;  %s4599_s20 = smov [#allocation2]  }
 0x385   : > { %s4530_s0 = sshll.u32 %s4599_s20, 4  ;;  %s4531_s0 = int_to_ptr.vmem [resolvable:$false] %s4530_s0 }
 0x386   : > { %p4528_p2 = pnand %p4527_p1, %p4718_p5  ;;  %s4532_s26 = scalar_lea.vmem %s4531_s0, 4096 }
 0x387   : > { %p4533_p4 = scmp.lt.s32.totalorder %s6538_s30, %s4531_s0  ;;  %p4534_p7 = scmp.lt.s32.totalorder %s4532_s26, %s4526_s23 }
 0x388   : > { %p4529_p3 = pneg %p4528_p2 }
 0x389   : > { %p4535_p8 = por %p4534_p7, %p4533_p4 }
 0x38b   : > { %p4536_p9 = pnand %p4535_p8, %p4529_p3 }
 0x38d   : > { %4539 = shalt.err (!%p4536_p9)
}
 0x38e   : > { %s4540_s24 = scalar_lea.hbm %s6536_s16, 2048  ;;  %s4544_s22 = scalar_lea.hbm %s6629_s14, 4096 }
 0x38f   : > { %p4541_p10 = scmp.ne.s32.totalorder %s6536_s16, %s4540_s24  ;;  %p4545_p13 = scmp.lt.u32.totalorder %s6536_s16, %s6629_s14 }
 0x390   : > { %p4546_p0 = scmp.lt.u32.totalorder %s4544_s22, %s4540_s24  ;;  %p4548_p2 = scmp.lt.u32.totalorder %s4540_s24, %s6536_s16 }
 0x391   : > { %p4542_p11 = pnand %p4541_p10, %p4718_p5 }
 0x392   : > { %p4547_p1 = por %p4546_p0, %p4545_p13 }
 0x393   : > { %p4543_p12 = pneg %p4542_p11 }
 0x394   : > { %p4549_p3 = por %p4548_p2, %p4547_p1 }
 0x396   : > { %p4550_p4 = pnand %p4549_p3, %p4543_p12 }
 0x398   : > { %4553 = shalt.err (!%p4550_p4)
}
 0x399   : > { %4426 = dma.vmem_to_hbm [thread:$0]  (%p4718_p5), %s6538_s30, 2048, %s6536_s16, %s3656_s29, %s4597_s2, %s4597_s2, %s4598_s25  }
 0x39a PF: > { %p4437_p7 = scmp.ge.s32.totalorder %s4592_s21, 2  ;;  %s3705_s0 = sand.u32 1, %s4580_s18  }
 0x39b   : > { %s3706_s26 = scalar_lea.sflag [#allocation3], %s3705_s0 }
 0x39c   : > { %p4431_p8 = pnand %p4437_p7, %p4722_p6 }
 0x39e   : > { %4571 = dma.done.wait (!%p4431_p8), %s3706_s26, 2048  }
 0x39f   : > { %4573 = vsyncadd (!%p4431_p8), %s3706_s26, 4294965248  ;;  %s3715_s28 = scalar_lea.sflag [#allocation5], %s3705_s0 }
 0x3a0   : > { %4575 = dma.done.wait (!%p4431_p8), %s3715_s28, 2048  }
 0x3a1   : > { %4577 = vsyncadd (!%p4431_p8), %s3715_s28, 4294965248  ;;  %s6792_s21 = sld [smem:[#allocation9_spill]]  ;;  %s6793_s17 = sld [smem:[#allocation8_spill]] }
 0x3a2   : > { %s6794_s20 = sld [smem:[#allocation10_spill]]  ;;  %s6795_s18 = smov %s4584_s19 }
 0x3a7   : > { %p29_p5 = scmp.ge.s32.totalorder %s6792_s21, 4   ;;  %s6796_s19 = smov %s6793_s17 }
 0x3a9   :  { %31 = sbr.rel (!%p29_p5) target bundleno = 10 (0xa), region = 143 }
 0x3b0   :  { %3720 = vsyncpa [#allocation3], 1 }
 0x3b1   :  { %3722 = vsyncpa [#allocation3 + $0x1], 1 }
 0x3b2   :  { %3723 = vsyncpa [#allocation5], 1 }
 0x3b3   :  { %3725 = vsyncpa [#allocation5 + $0x1], 1 }

</bundles_post_ra>
